<compile_context>
chip_gen: v7x
topology: tpu7x:2x2x1
jax: 0.10.0
libtpu: 0.0.40
codegen_flags: <defaults>
</compile_context>

<pallas_src>
import functools

import jax
import jax.numpy as jnp
from jax import lax
from jax.experimental import pallas as pl
from jax.experimental.pallas import tpu as pltpu

EPS = 1e-5  # PyTorch BatchNorm2d default


# ----------------------------------------------------------------------------
# Pallas kernels
# ----------------------------------------------------------------------------
def _heads_pool_kernel(x_ref, wh_ref, bh_ref, wp_ref, bp_ref, o_ref, xpad_ref):
    """Fused branch heads + pool branch for one image.

    x_ref:    (1, H, W, Cin)  UNPADDED input image (mxu dtype)
    wh_ref:   (Cin, Ch)  BN-folded 1x1 weights, columns = [b1 | b2red | b3red]
    bh_ref:   (1, Ch)    f32
    wp_ref:   (Cin, Cp)  BN-folded 1x1 weights of the pool branch
    bp_ref:   (1, Cp)    f32
    o_ref:    (1, H, W, Ch+Cp)  columns = [y1 | h2 | h3 | y4]
    xpad_ref: VMEM scratch (H+2, W+2, Cin): -inf-padded copy for the max pool.
    """
    _, h, w, cin = x_ref.shape
    ch = wh_ref.shape[1]
    cp = wp_ref.shape[1]

    x = x_ref[0]                                             # (H, W, Cin)

    # Pad with -inf inside VMEM (no padded HBM copy), pad=1 halo for the pool.
    xpad_ref[...] = jnp.full(xpad_ref.shape, -jnp.inf, dtype=xpad_ref.dtype)
    xpad_ref[1:1 + h, 1:1 + w, :] = x

    # Separable 3x3 / stride-1 max pool: row-max over dx, then col-max over dy.
    rm = jnp.maximum(xpad_ref[:, 0:w, :],
                     jnp.maximum(xpad_ref[:, 1:1 + w, :],
                                 xpad_ref[:, 2:2 + w, :]))   # (H+2, W, Cin)
    m = jnp.maximum(rm[0:h], jnp.maximum(rm[1:1 + h], rm[2:2 + h]))

    x2 = x.reshape(h * w, cin)
    m2 = m.reshape(h * w, cin)

    # Fused 1x1 heads (b1 | b2-reduce | b3-reduce) and pool-branch 1x1; f32 acc.
    yh = jnp.dot(x2, wh_ref[...], preferred_element_type=jnp.float32)
    yp = jnp.dot(m2, wp_ref[...], preferred_element_type=jnp.float32)
    yh = jnp.maximum(yh + bh_ref[...], 0.0)
    yp = jnp.maximum(yp + bp_ref[...], 0.0)
    o_ref[0, :, :, 0:ch] = yh.reshape(h, w, ch).astype(o_ref.dtype)
    o_ref[0, :, :, ch:ch + cp] = yp.reshape(h, w, cp).astype(o_ref.dtype)


def _conv5x5_kernel(x_ref, w_ref, b_ref, o_ref, xpad_ref):
    """5x5 conv (pad=2) + folded BN + ReLU for one image.

    x_ref:    (1, H, W, C)  UNPADDED activation (mxu dtype)
    w_ref:    (25, C, Cout) BN-folded weights, tap-major
    b_ref:    (1, Cout)     f32
    o_ref:    (1, H, W, Cout)
    xpad_ref: VMEM scratch (H+4, W+4, C): zero-padded copy (mxu dtype).
    """
    _, h, w, c = x_ref.shape
    cout = w_ref.shape[2]

    # Zero-pad inside VMEM (no padded HBM copy).
    xpad_ref[...] = jnp.zeros(xpad_ref.shape, dtype=xpad_ref.dtype)
    xpad_ref[2:2 + h, 2:2 + w, :] = x_ref[0]

    # 25 accumulated tap matmuls (K = C) -- no im2col patch, no lane-masked
    # scratch stores; the MXU has plenty of slack at these channel counts.
    acc = jnp.zeros((h * w, cout), jnp.float32)
    for dy in range(5):                     # static unroll: 25 taps
        for dx in range(5):
            win = xpad_ref[dy:dy + h, dx:dx + w, :].reshape(h * w, c)
            acc = acc + jnp.dot(win, w_ref[dy * 5 + dx],
                                preferred_element_type=jnp.float32)
    y = jnp.maximum(acc + b_ref[...], 0.0)
    o_ref[0] = y.reshape(h, w, cout).astype(o_ref.dtype)


# ----------------------------------------------------------------------------
# pallas_call wrappers (grid over batch; weights/biases as resident blocks)
# ----------------------------------------------------------------------------
def _cparams():
    # "parallel": v7x's two TensorCores split the per-image grid (no-op on
    # single-core v5e/v6e).  Explicit scoped-VMEM limit (safe on all gens).
    return pltpu.CompilerParams(dimension_semantics=("parallel",),
                                vmem_limit_bytes=32 * 1024 * 1024)


def heads_pool_call(x, wh, bh, wp, bp, out_dtype):
    n, h, w, cin = x.shape
    ch, cp = wh.shape[1], wp.shape[1]
    return pl.pallas_call(
        _heads_pool_kernel,
        out_shape=jax.ShapeDtypeStruct((n, h, w, ch + cp), out_dtype),
        grid=(n,),
        in_specs=[
            pl.BlockSpec((1, h, w, cin), lambda i: (i, 0, 0, 0)),
            pl.BlockSpec((cin, ch), lambda i: (0, 0)),
            pl.BlockSpec((1, ch), lambda i: (0, 0)),
            pl.BlockSpec((cin, cp), lambda i: (0, 0)),
            pl.BlockSpec((1, cp), lambda i: (0, 0)),
        ],
        out_specs=pl.BlockSpec((1, h, w, ch + cp), lambda i: (i, 0, 0, 0)),
        scratch_shapes=[pltpu.VMEM((h + 2, w + 2, cin), x.dtype)],
        compiler_params=_cparams(),
    )(x, wh, bh, wp, bp)


def conv5x5_call(x, wtaps, bias, out_dtype):
    n, h, w, c = x.shape
    cout = wtaps.shape[2]
    return pl.pallas_call(
        _conv5x5_kernel,
        out_shape=jax.ShapeDtypeStruct((n, h, w, cout), out_dtype),
        grid=(n,),
        in_specs=[
            pl.BlockSpec((1, h, w, c), lambda i: (i, 0, 0, 0)),
            pl.BlockSpec((25, c, cout), lambda i: (0, 0, 0)),
            pl.BlockSpec((1, cout), lambda i: (0, 0)),
        ],
        out_specs=pl.BlockSpec((1, h, w, cout), lambda i: (i, 0, 0, 0)),
        scratch_shapes=[pltpu.VMEM((h + 4, w + 4, c), x.dtype)],
        compiler_params=_cparams(),
    )(x, wtaps, bias)


# ----------------------------------------------------------------------------
# Host-side param folding (BN scale folded into weights) and glue
# ----------------------------------------------------------------------------
def _bn_fold(p):
    scale = p["gamma"] / jnp.sqrt(p["var"] + EPS)
    bias = p["beta"] + (p["b"] - p["mean"]) * scale
    return scale, bias


def fold_1x1(p, mxu_dtype):
    scale, bias = _bn_fold(p)
    cout, cin = p["w"].shape[:2]
    wmat = (p["w"].reshape(cout, cin) * scale[:, None]).T          # (Cin, Cout)
    return wmat.astype(mxu_dtype), bias.reshape(1, cout).astype(jnp.float32)


def fold_5x5(p, mxu_dtype):
    scale, bias = _bn_fold(p)
    cout, cin, k, _ = p["w"].shape
    wt = (p["w"] * scale[:, None, None, None]).transpose(2, 3, 1, 0)
    wt = wt.reshape(k * k, cin, cout)                              # tap-major
    return wt.astype(mxu_dtype), bias.reshape(1, cout).astype(jnp.float32)


@functools.partial(jax.jit, static_argnames=("mxu_dtype",))
def inception_forward(x_nchw, params, mxu_dtype=jnp.bfloat16):
    n, cin, h, w = x_nchw.shape
    # NHWC; activations cast ONCE to the MXU dtype (bf16 by default, incl.
    # v5e whose MXU is bf16-native).  Accumulation / epilogue stay f32.
    x = jnp.transpose(x_nchw, (0, 2, 3, 1)).astype(mxu_dtype)

    w1, b1 = fold_1x1(params["b1_c1"], mxu_dtype)
    w2r, b2r = fold_1x1(params["b2_c1"], mxu_dtype)
    w3r, b3r = fold_1x1(params["b3_c1"], mxu_dtype)
    wpool, bpool = fold_1x1(params["b4_c1"], mxu_dtype)
    wh = jnp.concatenate([w1, w2r, w3r], axis=1)
    bh = jnp.concatenate([b1, b2r, b3r], axis=1)
    n1, n2r, n3r = w1.shape[1], w2r.shape[1], w3r.shape[1]

    # Kernel 1: x streamed from HBM once for all four branch heads (fused 1x1s
    # + in-VMEM 3x3/s1 max pool + pool-branch 1x1).  Output = [y1|h2|h3|y4].
    heads = heads_pool_call(x, wh, bh, wpool, bpool, mxu_dtype)  # (N,H,W,*)

    y1 = heads[..., :n1]
    h2 = heads[..., n1:n1 + n2r]
    h3 = heads[..., n1 + n2r:n1 + n2r + n3r]
    y4 = heads[..., n1 + n2r + n3r:]

    # Branch 2: 5x5 conv (pad=2) as 25 accumulated tap matmuls.
    w22, b22 = fold_5x5(params["b2_c2"], mxu_dtype)
    y2 = conv5x5_call(h2, w22, b22, mxu_dtype)

    # Branch 3: 5x5 conv -> 5x5 conv.
    w32, b32 = fold_5x5(params["b3_c2"], mxu_dtype)
    h3b = conv5x5_call(h3, w32, b32, mxu_dtype)
    w33, b33 = fold_5x5(params["b3_c3"], mxu_dtype)
    y3 = conv5x5_call(h3b, w33, b33, mxu_dtype)

    # Final channel concat + NCHW layout (single fused XLA op; see TODO above).
    out = jnp.concatenate([y1, y2, y3, y4], axis=-1)
    return jnp.transpose(out, (0, 3, 1, 2)).astype(jnp.float32)


# ----------------------------------------------------------------------------
# Deterministic parameter init (eval-mode BN with fixed running stats)
# ----------------------------------------------------------------------------
def make_conv_bn(key, cin, cout, k):
    k1, k2, k3, k4, k5, k6 = jax.random.split(key, 6)
    return dict(
        w=jax.random.normal(k1, (cout, cin, k, k), jnp.float32) * 0.1,
        b=jax.random.normal(k2, (cout,), jnp.float32) * 0.1,
        gamma=jax.random.uniform(k3, (cout,), jnp.float32, 0.5, 1.5),
        beta=jax.random.normal(k4, (cout,), jnp.float32) * 0.1,
        mean=jax.random.normal(k5, (cout,), jnp.float32) * 0.1,
        var=jax.random.uniform(k6, (cout,), jnp.float32, 0.5, 1.5),
    )


def init_inception_params(key, in_planes, n1x1, n3x3red, n3x3,
                          n5x5red, n5x5, pool_planes):
    ks = jax.random.split(key, 8)
    return dict(
        b1_c1=make_conv_bn(ks[0], in_planes, n1x1, 1),
        b2_c1=make_conv_bn(ks[1], in_planes, n3x3red, 1),
        b2_c2=make_conv_bn(ks[2], n3x3red, n3x3, 5),
        b3_c1=make_conv_bn(ks[3], in_planes, n5x5red, 1),
        b3_c2=make_conv_bn(ks[4], n5x5red, n5x5, 5),
        b3_c3=make_conv_bn(ks[5], n5x5, n5x5, 5),
        b4_c1=make_conv_bn(ks[6], in_planes, pool_planes, 1),
    )


# ----------------------------------------------------------------------------
# Pure-JAX reference (lax conv / reduce_window) for correctness check
# ----------------------------------------------------------------------------
def _ref_conv_bn_relu(x, p, pad):
    y = lax.conv_general_dilated(
        x, p["w"], (1, 1), [(pad, pad), (pad, pad)],
        dimension_numbers=("NCHW", "OIHW", "NCHW"))
    y = y + p["b"][None, :, None, None]
    y = ((y - p["mean"][None, :, None, None])
         / jnp.sqrt(p["var"] + EPS)[None, :, None, None]
         * p["gamma"][None, :, None, None] + p["beta"][None, :, None, None])
    return jnp.maximum(y, 0.0)


def inception_reference(x, params):
    y1 = _ref_conv_bn_relu(x, params["b1_c1"], 0)
    h = _ref_conv_bn_relu(x, params["b2_c1"], 0)
    y2 = _ref_conv_bn_relu(h, params["b2_c2"], 2)
    h = _ref_conv_bn_relu(x, params["b3_c1"], 0)
    h = _ref_conv_bn_relu(h, params["b3_c2"], 2)
    y3 = _ref_conv_bn_relu(h, params["b3_c3"], 2)
    pooled = lax.reduce_window(
        x, -jnp.inf, lax.max, (1, 1, 3, 3), (1, 1, 1, 1),
        padding=((0, 0), (0, 0), (1, 1), (1, 1)))
    y4 = _ref_conv_bn_relu(pooled, params["b4_c1"], 0)
    return jnp.concatenate([y1, y2, y3, y4], axis=1)


# ----------------------------------------------------------------------------
if __name__ == "__main__":
    key = jax.random.PRNGKey(0)
    kx, kp = jax.random.split(key)

    # small shapes: batch=2, in_planes=4, spatial=16x16
    N, Cin, H, W = 2, 4, 16, 16
    n1x1, n3x3red, n3x3, n5x5red, n5x5, pool_planes = 8, 4, 8, 4, 8, 8

    x = jax.random.normal(kx, (N, Cin, H, W), jnp.float32)
    params = init_inception_params(kp, Cin, n1x1, n3x3red, n3x3,
                                   n5x5red, n5x5, pool_planes)

    ref = jax.block_until_ready(inception_reference(x, params))

    # f32 MXU path (strict check vs. XLA reference).
    out = jax.block_until_ready(
        inception_forward(x, params, mxu_dtype=jnp.float32))
    assert out.shape == (N, n1x1 + n3x3 + n5x5 + pool_planes, H, W), out.shape
    assert jnp.allclose(out, ref, atol=1e-4, rtol=1e-3), float(
        jnp.max(jnp.abs(out - ref)))

    # Default bf16 path: bf16 activations/weights through three stacked convs,
    # f32 accumulation + epilogue; loose tolerance.
    out_bf16 = jax.block_until_ready(inception_forward(x, params))
    assert jnp.allclose(out_bf16, ref, atol=1e-1, rtol=1e-1), float(
        jnp.max(jnp.abs(out_bf16 - ref)))

    print("KERNEL_OK")
</pallas_src>

<mosaic_0001>
module attributes {stable_mosaic.version = 11 : i64} {
  func.func @_heads_pool_kernel(%arg0: i32, %arg1: memref<1x16x16x4xf32, #tpu.memory_space<vmem>>, %arg2: memref<4x16xf32, #tpu.memory_space<vmem>>, %arg3: memref<1x16xf32, #tpu.memory_space<vmem>>, %arg4: memref<4x8xf32, #tpu.memory_space<vmem>>, %arg5: memref<1x8xf32, #tpu.memory_space<vmem>>, %arg6: memref<1x16x16x24xf32, #tpu.memory_space<vmem>>, %arg7: memref<18x18x4xf32, #tpu.memory_space<vmem>>) attributes {dimension_semantics = [#tpu.dimension_semantics<parallel>], iteration_bounds = array<i64: 2>, scalar_prefetch = 0 : i64, scratch_operands = 1 : i64, tpu.core_type = #tpu.core_type<tc>, window_params = [{transform_indices = @transform_0, window_bounds = array<i64: 1, 16, 16, 4>}, {pipeline_mode = #tpu.pipeline_mode<synchronous>, transform_indices = @transform_1, window_bounds = array<i64: 4, 16>}, {pipeline_mode = #tpu.pipeline_mode<synchronous>, transform_indices = @transform_2, window_bounds = array<i64: 1, 16>}, {pipeline_mode = #tpu.pipeline_mode<synchronous>, transform_indices = @transform_3, window_bounds = array<i64: 4, 8>}, {pipeline_mode = #tpu.pipeline_mode<synchronous>, transform_indices = @transform_4, window_bounds = array<i64: 1, 8>}, {transform_indices = @transform_5, window_bounds = array<i64: 1, 16, 16, 24>}]} {
    %c0 = arith.constant 0 : index
    %c0_0 = arith.constant 0 : index
    %c0_1 = arith.constant 0 : index
    %c0_2 = arith.constant 0 : index
    %0 = vector.load %arg1[%c0, %c0_0, %c0_1, %c0_2] : memref<1x16x16x4xf32, #tpu.memory_space<vmem>>, vector<1x16x16x4xf32>
    %1 = vector.shape_cast %0 : vector<1x16x16x4xf32> to vector<16x16x4xf32>
    %cst = arith.constant 0xFF800000 : f32
    %2 = vector.broadcast %cst : f32 to vector<18x18x4xf32>
    %c0_3 = arith.constant 0 : index
    %c0_4 = arith.constant 0 : index
    %c0_5 = arith.constant 0 : index
    %3 = vector.load %arg7[%c0_3, %c0_4, %c0_5] : memref<18x18x4xf32, #tpu.memory_space<vmem>>, vector<18x18x4xf32>
    tpu.vector_store %arg7[%c0_3, %c0_4, %c0_5], %2 {strides = array<i32>} : memref<18x18x4xf32, #tpu.memory_space<vmem>>, vector<18x18x4xf32>,
    %c1 = arith.constant 1 : index
    %c1_6 = arith.constant 1 : index
    %c0_7 = arith.constant 0 : index
    %4 = vector.load %arg7[%c1, %c1_6, %c0_7] : memref<18x18x4xf32, #tpu.memory_space<vmem>>, vector<16x16x4xf32>
    tpu.vector_store %arg7[%c1, %c1_6, %c0_7], %1 {strides = array<i32>} : memref<18x18x4xf32, #tpu.memory_space<vmem>>, vector<16x16x4xf32>,
    %c0_8 = arith.constant 0 : index
    %c0_9 = arith.constant 0 : index
    %c0_10 = arith.constant 0 : index
    %5 = vector.load %arg7[%c0_8, %c0_9, %c0_10] : memref<18x18x4xf32, #tpu.memory_space<vmem>>, vector<18x16x4xf32>
    %c0_11 = arith.constant 0 : index
    %c1_12 = arith.constant 1 : index
    %c0_13 = arith.constant 0 : index
    %6 = vector.load %arg7[%c0_11, %c1_12, %c0_13] : memref<18x18x4xf32, #tpu.memory_space<vmem>>, vector<18x16x4xf32>
    %c0_14 = arith.constant 0 : index
    %c2 = arith.constant 2 : index
    %c0_15 = arith.constant 0 : index
    %7 = vector.load %arg7[%c0_14, %c2, %c0_15] : memref<18x18x4xf32, #tpu.memory_space<vmem>>, vector<18x16x4xf32>
    %8 = arith.maximumf %6, %7 : vector<18x16x4xf32>
    %9 = arith.maximumf %5, %8 : vector<18x16x4xf32>
    %10 = vector.extract_strided_slice %9 {offsets = [0, 0, 0], sizes = [16, 16, 4], strides = [1, 1, 1]} : vector<18x16x4xf32> to vector<16x16x4xf32>
    %11 = vector.extract_strided_slice %9 {offsets = [1, 0, 0], sizes = [16, 16, 4], strides = [1, 1, 1]} : vector<18x16x4xf32> to vector<16x16x4xf32>
    %12 = vector.extract_strided_slice %9 {offsets = [2, 0, 0], sizes = [16, 16, 4], strides = [1, 1, 1]} : vector<18x16x4xf32> to vector<16x16x4xf32>
    %13 = arith.maximumf %11, %12 : vector<16x16x4xf32>
    %14 = arith.maximumf %10, %13 : vector<16x16x4xf32>
    %15 = vector.shape_cast %1 : vector<16x16x4xf32> to vector<256x4xf32>
    %16 = vector.shape_cast %14 : vector<16x16x4xf32> to vector<256x4xf32>
    %c0_16 = arith.constant 0 : index
    %c0_17 = arith.constant 0 : index
    %17 = vector.load %arg2[%c0_16, %c0_17] : memref<4x16xf32, #tpu.memory_space<vmem>>, vector<4x16xf32>
    %cst_18 = arith.constant dense<0.000000e+00> : vector<256x16xf32>
    %18 = tpu.matmul %15, %17, %cst_18 {dimension_numbers = #tpu.dot_dimension_numbers<[1], [0], [0], [1], [0, 0, 1, 1], [], []>} : vector<256x4xf32>, vector<4x16xf32>, vector<256x16xf32> -> vector<256x16xf32>
    %c0_19 = arith.constant 0 : index
    %c0_20 = arith.constant 0 : index
    %19 = vector.load %arg4[%c0_19, %c0_20] : memref<4x8xf32, #tpu.memory_space<vmem>>, vector<4x8xf32>
    %cst_21 = arith.constant dense<0.000000e+00> : vector<256x8xf32>
    %20 = tpu.matmul %16, %19, %cst_21 {dimension_numbers = #tpu.dot_dimension_numbers<[1], [0], [0], [1], [0, 0, 1, 1], [], []>} : vector<256x4xf32>, vector<4x8xf32>, vector<256x8xf32> -> vector<256x8xf32>
    %c0_22 = arith.constant 0 : index
    %c0_23 = arith.constant 0 : index
    %21 = vector.load %arg3[%c0_22, %c0_23] : memref<1x16xf32, #tpu.memory_space<vmem>>, vector<1x16xf32>
    %22 = vector.broadcast %21 : vector<1x16xf32> to vector<256x16xf32>
    %23 = arith.addf %18, %22 : vector<256x16xf32>
    %cst_24 = arith.constant 0.000000e+00 : f32
    %24 = vector.broadcast %cst_24 : f32 to vector<256x16xf32>
    %25 = arith.maximumf %23, %24 : vector<256x16xf32>
    %c0_25 = arith.constant 0 : index
    %c0_26 = arith.constant 0 : index
    %26 = vector.load %arg5[%c0_25, %c0_26] : memref<1x8xf32, #tpu.memory_space<vmem>>, vector<1x8xf32>
    %27 = vector.broadcast %26 : vector<1x8xf32> to vector<256x8xf32>
    %28 = arith.addf %20, %27 : vector<256x8xf32>
    %cst_27 = arith.constant 0.000000e+00 : f32
    %29 = vector.broadcast %cst_27 : f32 to vector<256x8xf32>
    %30 = arith.maximumf %28, %29 : vector<256x8xf32>
    %31 = vector.shape_cast %25 : vector<256x16xf32> to vector<16x16x16xf32>
    %c0_28 = arith.constant 0 : index
    %c0_29 = arith.constant 0 : index
    %c0_30 = arith.constant 0 : index
    %c0_31 = arith.constant 0 : index
    %32 = vector.load %arg6[%c0_28, %c0_29, %c0_30, %c0_31] : memref<1x16x16x24xf32, #tpu.memory_space<vmem>>, vector<1x16x16x16xf32>
    %33 = vector.shape_cast %32 : vector<1x16x16x16xf32> to vector<16x16x16xf32>
    %34 = vector.shape_cast %31 : vector<16x16x16xf32> to vector<1x16x16x16xf32>
    tpu.vector_store %arg6[%c0_28, %c0_29, %c0_30, %c0_31], %34 {strides = array<i32>} : memref<1x16x16x24xf32, #tpu.memory_space<vmem>>, vector<1x16x16x16xf32>,
    %35 = vector.shape_cast %30 : vector<256x8xf32> to vector<16x16x8xf32>
    %c0_32 = arith.constant 0 : index
    %c0_33 = arith.constant 0 : index
    %c0_34 = arith.constant 0 : index
    %c16 = arith.constant 16 : index
    %36 = vector.load %arg6[%c0_32, %c0_33, %c0_34, %c16] : memref<1x16x16x24xf32, #tpu.memory_space<vmem>>, vector<1x16x16x8xf32>
    %37 = vector.shape_cast %36 : vector<1x16x16x8xf32> to vector<16x16x8xf32>
    %38 = vector.shape_cast %35 : vector<16x16x8xf32> to vector<1x16x16x8xf32>
    tpu.vector_store %arg6[%c0_32, %c0_33, %c0_34, %c16], %38 {strides = array<i32>} : memref<1x16x16x24xf32, #tpu.memory_space<vmem>>, vector<1x16x16x8xf32>,
    return
  }
  func.func @transform_0(%arg0: i32) -> (i32, i32, i32, i32) {
    %c0_i32 = arith.constant 0 : i32
    %c0_i32_0 = arith.constant 0 : i32
    %c0_i32_1 = arith.constant 0 : i32
    %c0_i32_2 = arith.constant 0 : i32
    return %arg0, %c0_i32, %c0_i32_0, %c0_i32_1 : i32, i32, i32, i32
  }
  func.func @transform_1(%arg0: i32) -> (i32, i32) {
    %c0_i32 = arith.constant 0 : i32
    %c0_i32_0 = arith.constant 0 : i32
    %c0_i32_1 = arith.constant 0 : i32
    return %c0_i32, %c0_i32_0 : i32, i32
  }
  func.func @transform_2(%arg0: i32) -> (i32, i32) {
    %c0_i32 = arith.constant 0 : i32
    %c0_i32_0 = arith.constant 0 : i32
    %c0_i32_1 = arith.constant 0 : i32
    return %c0_i32, %c0_i32_0 : i32, i32
  }
  func.func @transform_3(%arg0: i32) -> (i32, i32) {
    %c0_i32 = arith.constant 0 : i32
    %c0_i32_0 = arith.constant 0 : i32
    %c0_i32_1 = arith.constant 0 : i32
    return %c0_i32, %c0_i32_0 : i32, i32
  }
  func.func @transform_4(%arg0: i32) -> (i32, i32) {
    %c0_i32 = arith.constant 0 : i32
    %c0_i32_0 = arith.constant 0 : i32
    %c0_i32_1 = arith.constant 0 : i32
    return %c0_i32, %c0_i32_0 : i32, i32
  }
  func.func @transform_5(%arg0: i32) -> (i32, i32, i32, i32) {
    %c0_i32 = arith.constant 0 : i32
    %c0_i32_0 = arith.constant 0 : i32
    %c0_i32_1 = arith.constant 0 : i32
    %c0_i32_2 = arith.constant 0 : i32
    return %arg0, %c0_i32, %c0_i32_0, %c0_i32_1 : i32, i32, i32, i32
  }
}

module attributes {stable_mosaic.version = 11 : i64} {
  func.func @_conv5x5_kernel(%arg0: i32, %arg1: memref<1x16x16x4xf32, #tpu.memory_space<vmem>>, %arg2: memref<25x4x8xf32, #tpu.memory_space<vmem>>, %arg3: memref<1x8xf32, #tpu.memory_space<vmem>>, %arg4: memref<1x16x16x8xf32, #tpu.memory_space<vmem>>, %arg5: memref<20x20x4xf32, #tpu.memory_space<vmem>>) attributes {dimension_semantics = [#tpu.dimension_semantics<parallel>], iteration_bounds = array<i64: 2>, scalar_prefetch = 0 : i64, scratch_operands = 1 : i64, tpu.core_type = #tpu.core_type<tc>, window_params = [{transform_indices = @transform_0, window_bounds = array<i64: 1, 16, 16, 4>}, {pipeline_mode = #tpu.pipeline_mode<synchronous>, transform_indices = @transform_1, window_bounds = array<i64: 25, 4, 8>}, {pipeline_mode = #tpu.pipeline_mode<synchronous>, transform_indices = @transform_2, window_bounds = array<i64: 1, 8>}, {transform_indices = @transform_3, window_bounds = array<i64: 1, 16, 16, 8>}]} {
    %cst = arith.constant 0.000000e+00 : f32
    %0 = vector.broadcast %cst : f32 to vector<20x20x4xf32>
    %c0 = arith.constant 0 : index
    %c0_0 = arith.constant 0 : index
    %c0_1 = arith.constant 0 : index
    %1 = vector.load %arg5[%c0, %c0_0, %c0_1] : memref<20x20x4xf32, #tpu.memory_space<vmem>>, vector<20x20x4xf32>
    tpu.vector_store %arg5[%c0, %c0_0, %c0_1], %0 {strides = array<i32>} : memref<20x20x4xf32, #tpu.memory_space<vmem>>, vector<20x20x4xf32>,
    %c0_2 = arith.constant 0 : index
    %c0_3 = arith.constant 0 : index
    %c0_4 = arith.constant 0 : index
    %c0_5 = arith.constant 0 : index
    %2 = vector.load %arg1[%c0_2, %c0_3, %c0_4, %c0_5] : memref<1x16x16x4xf32, #tpu.memory_space<vmem>>, vector<1x16x16x4xf32>
    %3 = vector.shape_cast %2 : vector<1x16x16x4xf32> to vector<16x16x4xf32>
    %c2 = arith.constant 2 : index
    %c2_6 = arith.constant 2 : index
    %c0_7 = arith.constant 0 : index
    %4 = vector.load %arg5[%c2, %c2_6, %c0_7] : memref<20x20x4xf32, #tpu.memory_space<vmem>>, vector<16x16x4xf32>
    tpu.vector_store %arg5[%c2, %c2_6, %c0_7], %3 {strides = array<i32>} : memref<20x20x4xf32, #tpu.memory_space<vmem>>, vector<16x16x4xf32>,
    %cst_8 = arith.constant 0.000000e+00 : f32
    %5 = vector.broadcast %cst_8 : f32 to vector<256x8xf32>
    %c0_9 = arith.constant 0 : index
    %c0_10 = arith.constant 0 : index
    %c0_11 = arith.constant 0 : index
    %6 = vector.load %arg5[%c0_9, %c0_10, %c0_11] : memref<20x20x4xf32, #tpu.memory_space<vmem>>, vector<16x16x4xf32>
    %7 = vector.shape_cast %6 : vector<16x16x4xf32> to vector<256x4xf32>
    %c0_12 = arith.constant 0 : index
    %c0_13 = arith.constant 0 : index
    %c0_14 = arith.constant 0 : index
    %8 = vector.load %arg2[%c0_12, %c0_13, %c0_14] : memref<25x4x8xf32, #tpu.memory_space<vmem>>, vector<1x4x8xf32>
    %9 = vector.shape_cast %8 : vector<1x4x8xf32> to vector<4x8xf32>
    %cst_15 = arith.constant dense<0.000000e+00> : vector<256x8xf32>
    %10 = tpu.matmul %7, %9, %cst_15 {dimension_numbers = #tpu.dot_dimension_numbers<[1], [0], [0], [1], [0, 0, 1, 1], [], []>} : vector<256x4xf32>, vector<4x8xf32>, vector<256x8xf32> -> vector<256x8xf32>
    %11 = arith.addf %5, %10 : vector<256x8xf32>
    %c0_16 = arith.constant 0 : index
    %c1 = arith.constant 1 : index
    %c0_17 = arith.constant 0 : index
    %12 = vector.load %arg5[%c0_16, %c1, %c0_17] : memref<20x20x4xf32, #tpu.memory_space<vmem>>, vector<16x16x4xf32>
    %13 = vector.shape_cast %12 : vector<16x16x4xf32> to vector<256x4xf32>
    %c1_18 = arith.constant 1 : index
    %c0_19 = arith.constant 0 : index
    %c0_20 = arith.constant 0 : index
    %14 = vector.load %arg2[%c1_18, %c0_19, %c0_20] : memref<25x4x8xf32, #tpu.memory_space<vmem>>, vector<1x4x8xf32>
    %15 = vector.shape_cast %14 : vector<1x4x8xf32> to vector<4x8xf32>
    %cst_21 = arith.constant dense<0.000000e+00> : vector<256x8xf32>
    %16 = tpu.matmul %13, %15, %cst_21 {dimension_numbers = #tpu.dot_dimension_numbers<[1], [0], [0], [1], [0, 0, 1, 1], [], []>} : vector<256x4xf32>, vector<4x8xf32>, vector<256x8xf32> -> vector<256x8xf32>
    %17 = arith.addf %11, %16 : vector<256x8xf32>
    %c0_22 = arith.constant 0 : index
    %c2_23 = arith.constant 2 : index
    %c0_24 = arith.constant 0 : index
    %18 = vector.load %arg5[%c0_22, %c2_23, %c0_24] : memref<20x20x4xf32, #tpu.memory_space<vmem>>, vector<16x16x4xf32>
    %19 = vector.shape_cast %18 : vector<16x16x4xf32> to vector<256x4xf32>
    %c2_25 = arith.constant 2 : index
    %c0_26 = arith.constant 0 : index
    %c0_27 = arith.constant 0 : index
    %20 = vector.load %arg2[%c2_25, %c0_26, %c0_27] : memref<25x4x8xf32, #tpu.memory_space<vmem>>, vector<1x4x8xf32>
    %21 = vector.shape_cast %20 : vector<1x4x8xf32> to vector<4x8xf32>
    %cst_28 = arith.constant dense<0.000000e+00> : vector<256x8xf32>
    %22 = tpu.matmul %19, %21, %cst_28 {dimension_numbers = #tpu.dot_dimension_numbers<[1], [0], [0], [1], [0, 0, 1, 1], [], []>} : vector<256x4xf32>, vector<4x8xf32>, vector<256x8xf32> -> vector<256x8xf32>
    %23 = arith.addf %17, %22 : vector<256x8xf32>
    %c0_29 = arith.constant 0 : index
    %c3 = arith.constant 3 : index
    %c0_30 = arith.constant 0 : index
    %24 = vector.load %arg5[%c0_29, %c3, %c0_30] : memref<20x20x4xf32, #tpu.memory_space<vmem>>, vector<16x16x4xf32>
    %25 = vector.shape_cast %24 : vector<16x16x4xf32> to vector<256x4xf32>
    %c3_31 = arith.constant 3 : index
    %c0_32 = arith.constant 0 : index
    %c0_33 = arith.constant 0 : index
    %26 = vector.load %arg2[%c3_31, %c0_32, %c0_33] : memref<25x4x8xf32, #tpu.memory_space<vmem>>, vector<1x4x8xf32>
    %27 = vector.shape_cast %26 : vector<1x4x8xf32> to vector<4x8xf32>
    %cst_34 = arith.constant dense<0.000000e+00> : vector<256x8xf32>
    %28 = tpu.matmul %25, %27, %cst_34 {dimension_numbers = #tpu.dot_dimension_numbers<[1], [0], [0], [1], [0, 0, 1, 1], [], []>} : vector<256x4xf32>, vector<4x8xf32>, vector<256x8xf32> -> vector<256x8xf32>
    %29 = arith.addf %23, %28 : vector<256x8xf32>
    %c0_35 = arith.constant 0 : index
    %c4 = arith.constant 4 : index
    %c0_36 = arith.constant 0 : index
    %30 = vector.load %arg5[%c0_35, %c4, %c0_36] : memref<20x20x4xf32, #tpu.memory_space<vmem>>, vector<16x16x4xf32>
    %31 = vector.shape_cast %30 : vector<16x16x4xf32> to vector<256x4xf32>
    %c4_37 = arith.constant 4 : index
    %c0_38 = arith.constant 0 : index
    %c0_39 = arith.constant 0 : index
    %32 = vector.load %arg2[%c4_37, %c0_38, %c0_39] : memref<25x4x8xf32, #tpu.memory_space<vmem>>, vector<1x4x8xf32>
    %33 = vector.shape_cast %32 : vector<1x4x8xf32> to vector<4x8xf32>
    %cst_40 = arith.constant dense<0.000000e+00> : vector<256x8xf32>
    %34 = tpu.matmul %31, %33, %cst_40 {dimension_numbers = #tpu.dot_dimension_numbers<[1], [0], [0], [1], [0, 0, 1, 1], [], []>} : vector<256x4xf32>, vector<4x8xf32>, vector<256x8xf32> -> vector<256x8xf32>
    %35 = arith.addf %29, %34 : vector<256x8xf32>
    %c1_41 = arith.constant 1 : index
    %c0_42 = arith.constant 0 : index
    %c0_43 = arith.constant 0 : index
    %36 = vector.load %arg5[%c1_41, %c0_42, %c0_43] : memref<20x20x4xf32, #tpu.memory_space<vmem>>, vector<16x16x4xf32>
    %37 = vector.shape_cast %36 : vector<16x16x4xf32> to vector<256x4xf32>
    %c5 = arith.constant 5 : index
    %c0_44 = arith.constant 0 : index
    %c0_45 = arith.constant 0 : index
    %38 = vector.load %arg2[%c5, %c0_44, %c0_45] : memref<25x4x8xf32, #tpu.memory_space<vmem>>, vector<1x4x8xf32>
    %39 = vector.shape_cast %38 : vector<1x4x8xf32> to vector<4x8xf32>
    %cst_46 = arith.constant dense<0.000000e+00> : vector<256x8xf32>
    %40 = tpu.matmul %37, %39, %cst_46 {dimension_numbers = #tpu.dot_dimension_numbers<[1], [0], [0], [1], [0, 0, 1, 1], [], []>} : vector<256x4xf32>, vector<4x8xf32>, vector<256x8xf32> -> vector<256x8xf32>
    %41 = arith.addf %35, %40 : vector<256x8xf32>
    %c1_47 = arith.constant 1 : index
    %c1_48 = arith.constant 1 : index
    %c0_49 = arith.constant 0 : index
    %42 = vector.load %arg5[%c1_47, %c1_48, %c0_49] : memref<20x20x4xf32, #tpu.memory_space<vmem>>, vector<16x16x4xf32>
    %43 = vector.shape_cast %42 : vector<16x16x4xf32> to vector<256x4xf32>
    %c6 = arith.constant 6 : index
    %c0_50 = arith.constant 0 : index
    %c0_51 = arith.constant 0 : index
    %44 = vector.load %arg2[%c6, %c0_50, %c0_51] : memref<25x4x8xf32, #tpu.memory_space<vmem>>, vector<1x4x8xf32>
    %45 = vector.shape_cast %44 : vector<1x4x8xf32> to vector<4x8xf32>
    %cst_52 = arith.constant dense<0.000000e+00> : vector<256x8xf32>
    %46 = tpu.matmul %43, %45, %cst_52 {dimension_numbers = #tpu.dot_dimension_numbers<[1], [0], [0], [1], [0, 0, 1, 1], [], []>} : vector<256x4xf32>, vector<4x8xf32>, vector<256x8xf32> -> vector<256x8xf32>
    %47 = arith.addf %41, %46 : vector<256x8xf32>
    %c1_53 = arith.constant 1 : index
    %c2_54 = arith.constant 2 : index
    %c0_55 = arith.constant 0 : index
    %48 = vector.load %arg5[%c1_53, %c2_54, %c0_55] : memref<20x20x4xf32, #tpu.memory_space<vmem>>, vector<16x16x4xf32>
    %49 = vector.shape_cast %48 : vector<16x16x4xf32> to vector<256x4xf32>
    %c7 = arith.constant 7 : index
    %c0_56 = arith.constant 0 : index
    %c0_57 = arith.constant 0 : index
    %50 = vector.load %arg2[%c7, %c0_56, %c0_57] : memref<25x4x8xf32, #tpu.memory_space<vmem>>, vector<1x4x8xf32>
    %51 = vector.shape_cast %50 : vector<1x4x8xf32> to vector<4x8xf32>
    %cst_58 = arith.constant dense<0.000000e+00> : vector<256x8xf32>
    %52 = tpu.matmul %49, %51, %cst_58 {dimension_numbers = #tpu.dot_dimension_numbers<[1], [0], [0], [1], [0, 0, 1, 1], [], []>} : vector<256x4xf32>, vector<4x8xf32>, vector<256x8xf32> -> vector<256x8xf32>
    %53 = arith.addf %47, %52 : vector<256x8xf32>
    %c1_59 = arith.constant 1 : index
    %c3_60 = arith.constant 3 : index
    %c0_61 = arith.constant 0 : index
    %54 = vector.load %arg5[%c1_59, %c3_60, %c0_61] : memref<20x20x4xf32, #tpu.memory_space<vmem>>, vector<16x16x4xf32>
    %55 = vector.shape_cast %54 : vector<16x16x4xf32> to vector<256x4xf32>
    %c8 = arith.constant 8 : index
    %c0_62 = arith.constant 0 : index
    %c0_63 = arith.constant 0 : index
    %56 = vector.load %arg2[%c8, %c0_62, %c0_63] : memref<25x4x8xf32, #tpu.memory_space<vmem>>, vector<1x4x8xf32>
    %57 = vector.shape_cast %56 : vector<1x4x8xf32> to vector<4x8xf32>
    %cst_64 = arith.constant dense<0.000000e+00> : vector<256x8xf32>
    %58 = tpu.matmul %55, %57, %cst_64 {dimension_numbers = #tpu.dot_dimension_numbers<[1], [0], [0], [1], [0, 0, 1, 1], [], []>} : vector<256x4xf32>, vector<4x8xf32>, vector<256x8xf32> -> vector<256x8xf32>
    %59 = arith.addf %53, %58 : vector<256x8xf32>
    %c1_65 = arith.constant 1 : index
    %c4_66 = arith.constant 4 : index
    %c0_67 = arith.constant 0 : index
    %60 = vector.load %arg5[%c1_65, %c4_66, %c0_67] : memref<20x20x4xf32, #tpu.memory_space<vmem>>, vector<16x16x4xf32>
    %61 = vector.shape_cast %60 : vector<16x16x4xf32> to vector<256x4xf32>
    %c9 = arith.constant 9 : index
    %c0_68 = arith.constant 0 : index
    %c0_69 = arith.constant 0 : index
    %62 = vector.load %arg2[%c9, %c0_68, %c0_69] : memref<25x4x8xf32, #tpu.memory_space<vmem>>, vector<1x4x8xf32>
    %63 = vector.shape_cast %62 : vector<1x4x8xf32> to vector<4x8xf32>
    %cst_70 = arith.constant dense<0.000000e+00> : vector<256x8xf32>
    %64 = tpu.matmul %61, %63, %cst_70 {dimension_numbers = #tpu.dot_dimension_numbers<[1], [0], [0], [1], [0, 0, 1, 1], [], []>} : vector<256x4xf32>, vector<4x8xf32>, vector<256x8xf32> -> vector<256x8xf32>
    %65 = arith.addf %59, %64 : vector<256x8xf32>
    %c2_71 = arith.constant 2 : index
    %c0_72 = arith.constant 0 : index
    %c0_73 = arith.constant 0 : index
    %66 = vector.load %arg5[%c2_71, %c0_72, %c0_73] : memref<20x20x4xf32, #tpu.memory_space<vmem>>, vector<16x16x4xf32>
    %67 = vector.shape_cast %66 : vector<16x16x4xf32> to vector<256x4xf32>
    %c10 = arith.constant 10 : index
    %c0_74 = arith.constant 0 : index
    %c0_75 = arith.constant 0 : index
    %68 = vector.load %arg2[%c10, %c0_74, %c0_75] : memref<25x4x8xf32, #tpu.memory_space<vmem>>, vector<1x4x8xf32>
    %69 = vector.shape_cast %68 : vector<1x4x8xf32> to vector<4x8xf32>
    %cst_76 = arith.constant dense<0.000000e+00> : vector<256x8xf32>
    %70 = tpu.matmul %67, %69, %cst_76 {dimension_numbers = #tpu.dot_dimension_numbers<[1], [0], [0], [1], [0, 0, 1, 1], [], []>} : vector<256x4xf32>, vector<4x8xf32>, vector<256x8xf32> -> vector<256x8xf32>
    %71 = arith.addf %65, %70 : vector<256x8xf32>
    %c2_77 = arith.constant 2 : index
    %c1_78 = arith.constant 1 : index
    %c0_79 = arith.constant 0 : index
    %72 = vector.load %arg5[%c2_77, %c1_78, %c0_79] : memref<20x20x4xf32, #tpu.memory_space<vmem>>, vector<16x16x4xf32>
    %73 = vector.shape_cast %72 : vector<16x16x4xf32> to vector<256x4xf32>
    %c11 = arith.constant 11 : index
    %c0_80 = arith.constant 0 : index
    %c0_81 = arith.constant 0 : index
    %74 = vector.load %arg2[%c11, %c0_80, %c0_81] : memref<25x4x8xf32, #tpu.memory_space<vmem>>, vector<1x4x8xf32>
    %75 = vector.shape_cast %74 : vector<1x4x8xf32> to vector<4x8xf32>
    %cst_82 = arith.constant dense<0.000000e+00> : vector<256x8xf32>
    %76 = tpu.matmul %73, %75, %cst_82 {dimension_numbers = #tpu.dot_dimension_numbers<[1], [0], [0], [1], [0, 0, 1, 1], [], []>} : vector<256x4xf32>, vector<4x8xf32>, vector<256x8xf32> -> vector<256x8xf32>
    %77 = arith.addf %71, %76 : vector<256x8xf32>
    %c2_83 = arith.constant 2 : index
    %c2_84 = arith.constant 2 : index
    %c0_85 = arith.constant 0 : index
    %78 = vector.load %arg5[%c2_83, %c2_84, %c0_85] : memref<20x20x4xf32, #tpu.memory_space<vmem>>, vector<16x16x4xf32>
    %79 = vector.shape_cast %78 : vector<16x16x4xf32> to vector<256x4xf32>
    %c12 = arith.constant 12 : index
    %c0_86 = arith.constant 0 : index
    %c0_87 = arith.constant 0 : index
    %80 = vector.load %arg2[%c12, %c0_86, %c0_87] : memref<25x4x8xf32, #tpu.memory_space<vmem>>, vector<1x4x8xf32>
    %81 = vector.shape_cast %80 : vector<1x4x8xf32> to vector<4x8xf32>
    %cst_88 = arith.constant dense<0.000000e+00> : vector<256x8xf32>
    %82 = tpu.matmul %79, %81, %cst_88 {dimension_numbers = #tpu.dot_dimension_numbers<[1], [0], [0], [1], [0, 0, 1, 1], [], []>} : vector<256x4xf32>, vector<4x8xf32>, vector<256x8xf32> -> vector<256x8xf32>
    %83 = arith.addf %77, %82 : vector<256x8xf32>
    %c2_89 = arith.constant 2 : index
    %c3_90 = arith.constant 3 : index
    %c0_91 = arith.constant 0 : index
    %84 = vector.load %arg5[%c2_89, %c3_90, %c0_91] : memref<20x20x4xf32, #tpu.memory_space<vmem>>, vector<16x16x4xf32>
    %85 = vector.shape_cast %84 : vector<16x16x4xf32> to vector<256x4xf32>
    %c13 = arith.constant 13 : index
    %c0_92 = arith.constant 0 : index
    %c0_93 = arith.constant 0 : index
    %86 = vector.load %arg2[%c13, %c0_92, %c0_93] : memref<25x4x8xf32, #tpu.memory_space<vmem>>, vector<1x4x8xf32>
    %87 = vector.shape_cast %86 : vector<1x4x8xf32> to vector<4x8xf32>
    %cst_94 = arith.constant dense<0.000000e+00> : vector<256x8xf32>
    %88 = tpu.matmul %85, %87, %cst_94 {dimension_numbers = #tpu.dot_dimension_numbers<[1], [0], [0], [1], [0, 0, 1, 1], [], []>} : vector<256x4xf32>, vector<4x8xf32>, vector<256x8xf32> -> vector<256x8xf32>
    %89 = arith.addf %83, %88 : vector<256x8xf32>
    %c2_95 = arith.constant 2 : index
    %c4_96 = arith.constant 4 : index
    %c0_97 = arith.constant 0 : index
    %90 = vector.load %arg5[%c2_95, %c4_96, %c0_97] : memref<20x20x4xf32, #tpu.memory_space<vmem>>, vector<16x16x4xf32>
    %91 = vector.shape_cast %90 : vector<16x16x4xf32> to vector<256x4xf32>
    %c14 = arith.constant 14 : index
    %c0_98 = arith.constant 0 : index
    %c0_99 = arith.constant 0 : index
    %92 = vector.load %arg2[%c14, %c0_98, %c0_99] : memref<25x4x8xf32, #tpu.memory_space<vmem>>, vector<1x4x8xf32>
    %93 = vector.shape_cast %92 : vector<1x4x8xf32> to vector<4x8xf32>
    %cst_100 = arith.constant dense<0.000000e+00> : vector<256x8xf32>
    %94 = tpu.matmul %91, %93, %cst_100 {dimension_numbers = #tpu.dot_dimension_numbers<[1], [0], [0], [1], [0, 0, 1, 1], [], []>} : vector<256x4xf32>, vector<4x8xf32>, vector<256x8xf32> -> vector<256x8xf32>
    %95 = arith.addf %89, %94 : vector<256x8xf32>
    %c3_101 = arith.constant 3 : index
    %c0_102 = arith.constant 0 : index
    %c0_103 = arith.constant 0 : index
    %96 = vector.load %arg5[%c3_101, %c0_102, %c0_103] : memref<20x20x4xf32, #tpu.memory_space<vmem>>, vector<16x16x4xf32>
    %97 = vector.shape_cast %96 : vector<16x16x4xf32> to vector<256x4xf32>
    %c15 = arith.constant 15 : index
    %c0_104 = arith.constant 0 : index
    %c0_105 = arith.constant 0 : index
    %98 = vector.load %arg2[%c15, %c0_104, %c0_105] : memref<25x4x8xf32, #tpu.memory_space<vmem>>, vector<1x4x8xf32>
    %99 = vector.shape_cast %98 : vector<1x4x8xf32> to vector<4x8xf32>
    %cst_106 = arith.constant dense<0.000000e+00> : vector<256x8xf32>
    %100 = tpu.matmul %97, %99, %cst_106 {dimension_numbers = #tpu.dot_dimension_numbers<[1], [0], [0], [1], [0, 0, 1, 1], [], []>} : vector<256x4xf32>, vector<4x8xf32>, vector<256x8xf32> -> vector<256x8xf32>
    %101 = arith.addf %95, %100 : vector<256x8xf32>
    %c3_107 = arith.constant 3 : index
    %c1_108 = arith.constant 1 : index
    %c0_109 = arith.constant 0 : index
    %102 = vector.load %arg5[%c3_107, %c1_108, %c0_109] : memref<20x20x4xf32, #tpu.memory_space<vmem>>, vector<16x16x4xf32>
    %103 = vector.shape_cast %102 : vector<16x16x4xf32> to vector<256x4xf32>
    %c16 = arith.constant 16 : index
    %c0_110 = arith.constant 0 : index
    %c0_111 = arith.constant 0 : index
    %104 = vector.load %arg2[%c16, %c0_110, %c0_111] : memref<25x4x8xf32, #tpu.memory_space<vmem>>, vector<1x4x8xf32>
    %105 = vector.shape_cast %104 : vector<1x4x8xf32> to vector<4x8xf32>
    %cst_112 = arith.constant dense<0.000000e+00> : vector<256x8xf32>
    %106 = tpu.matmul %103, %105, %cst_112 {dimension_numbers = #tpu.dot_dimension_numbers<[1], [0], [0], [1], [0, 0, 1, 1], [], []>} : vector<256x4xf32>, vector<4x8xf32>, vector<256x8xf32> -> vector<256x8xf32>
    %107 = arith.addf %101, %106 : vector<256x8xf32>
    %c3_113 = arith.constant 3 : index
    %c2_114 = arith.constant 2 : index
    %c0_115 = arith.constant 0 : index
    %108 = vector.load %arg5[%c3_113, %c2_114, %c0_115] : memref<20x20x4xf32, #tpu.memory_space<vmem>>, vector<16x16x4xf32>
    %109 = vector.shape_cast %108 : vector<16x16x4xf32> to vector<256x4xf32>
    %c17 = arith.constant 17 : index
    %c0_116 = arith.constant 0 : index
    %c0_117 = arith.constant 0 : index
    %110 = vector.load %arg2[%c17, %c0_116, %c0_117] : memref<25x4x8xf32, #tpu.memory_space<vmem>>, vector<1x4x8xf32>
    %111 = vector.shape_cast %110 : vector<1x4x8xf32> to vector<4x8xf32>
    %cst_118 = arith.constant dense<0.000000e+00> : vector<256x8xf32>
    %112 = tpu.matmul %109, %111, %cst_118 {dimension_numbers = #tpu.dot_dimension_numbers<[1], [0], [0], [1], [0, 0, 1, 1], [], []>} : vector<256x4xf32>, vector<4x8xf32>, vector<256x8xf32> -> vector<256x8xf32>
    %113 = arith.addf %107, %112 : vector<256x8xf32>
    %c3_119 = arith.constant 3 : index
    %c3_120 = arith.constant 3 : index
    %c0_121 = arith.constant 0 : index
    %114 = vector.load %arg5[%c3_119, %c3_120, %c0_121] : memref<20x20x4xf32, #tpu.memory_space<vmem>>, vector<16x16x4xf32>
    %115 = vector.shape_cast %114 : vector<16x16x4xf32> to vector<256x4xf32>
    %c18 = arith.constant 18 : index
    %c0_122 = arith.constant 0 : index
    %c0_123 = arith.constant 0 : index
    %116 = vector.load %arg2[%c18, %c0_122, %c0_123] : memref<25x4x8xf32, #tpu.memory_space<vmem>>, vector<1x4x8xf32>
    %117 = vector.shape_cast %116 : vector<1x4x8xf32> to vector<4x8xf32>
    %cst_124 = arith.constant dense<0.000000e+00> : vector<256x8xf32>
    %118 = tpu.matmul %115, %117, %cst_124 {dimension_numbers = #tpu.dot_dimension_numbers<[1], [0], [0], [1], [0, 0, 1, 1], [], []>} : vector<256x4xf32>, vector<4x8xf32>, vector<256x8xf32> -> vector<256x8xf32>
    %119 = arith.addf %113, %118 : vector<256x8xf32>
    %c3_125 = arith.constant 3 : index
    %c4_126 = arith.constant 4 : index
    %c0_127 = arith.constant 0 : index
    %120 = vector.load %arg5[%c3_125, %c4_126, %c0_127] : memref<20x20x4xf32, #tpu.memory_space<vmem>>, vector<16x16x4xf32>
    %121 = vector.shape_cast %120 : vector<16x16x4xf32> to vector<256x4xf32>
    %c19 = arith.constant 19 : index
    %c0_128 = arith.constant 0 : index
    %c0_129 = arith.constant 0 : index
    %122 = vector.load %arg2[%c19, %c0_128, %c0_129] : memref<25x4x8xf32, #tpu.memory_space<vmem>>, vector<1x4x8xf32>
    %123 = vector.shape_cast %122 : vector<1x4x8xf32> to vector<4x8xf32>
    %cst_130 = arith.constant dense<0.000000e+00> : vector<256x8xf32>
    %124 = tpu.matmul %121, %123, %cst_130 {dimension_numbers = #tpu.dot_dimension_numbers<[1], [0], [0], [1], [0, 0, 1, 1], [], []>} : vector<256x4xf32>, vector<4x8xf32>, vector<256x8xf32> -> vector<256x8xf32>
    %125 = arith.addf %119, %124 : vector<256x8xf32>
    %c4_131 = arith.constant 4 : index
    %c0_132 = arith.constant 0 : index
    %c0_133 = arith.constant 0 : index
    %126 = vector.load %arg5[%c4_131, %c0_132, %c0_133] : memref<20x20x4xf32, #tpu.memory_space<vmem>>, vector<16x16x4xf32>
    %127 = vector.shape_cast %126 : vector<16x16x4xf32> to vector<256x4xf32>
    %c20 = arith.constant 20 : index
    %c0_134 = arith.constant 0 : index
    %c0_135 = arith.constant 0 : index
    %128 = vector.load %arg2[%c20, %c0_134, %c0_135] : memref<25x4x8xf32, #tpu.memory_space<vmem>>, vector<1x4x8xf32>
    %129 = vector.shape_cast %128 : vector<1x4x8xf32> to vector<4x8xf32>
    %cst_136 = arith.constant dense<0.000000e+00> : vector<256x8xf32>
    %130 = tpu.matmul %127, %129, %cst_136 {dimension_numbers = #tpu.dot_dimension_numbers<[1], [0], [0], [1], [0, 0, 1, 1], [], []>} : vector<256x4xf32>, vector<4x8xf32>, vector<256x8xf32> -> vector<256x8xf32>
    %131 = arith.addf %125, %130 : vector<256x8xf32>
    %c4_137 = arith.constant 4 : index
    %c1_138 = arith.constant 1 : index
    %c0_139 = arith.constant 0 : index
    %132 = vector.load %arg5[%c4_137, %c1_138, %c0_139] : memref<20x20x4xf32, #tpu.memory_space<vmem>>, vector<16x16x4xf32>
    %133 = vector.shape_cast %132 : vector<16x16x4xf32> to vector<256x4xf32>
    %c21 = arith.constant 21 : index
    %c0_140 = arith.constant 0 : index
    %c0_141 = arith.constant 0 : index
    %134 = vector.load %arg2[%c21, %c0_140, %c0_141] : memref<25x4x8xf32, #tpu.memory_space<vmem>>, vector<1x4x8xf32>
    %135 = vector.shape_cast %134 : vector<1x4x8xf32> to vector<4x8xf32>
    %cst_142 = arith.constant dense<0.000000e+00> : vector<256x8xf32>
    %136 = tpu.matmul %133, %135, %cst_142 {dimension_numbers = #tpu.dot_dimension_numbers<[1], [0], [0], [1], [0, 0, 1, 1], [], []>} : vector<256x4xf32>, vector<4x8xf32>, vector<256x8xf32> -> vector<256x8xf32>
    %137 = arith.addf %131, %136 : vector<256x8xf32>
    %c4_143 = arith.constant 4 : index
    %c2_144 = arith.constant 2 : index
    %c0_145 = arith.constant 0 : index
    %138 = vector.load %arg5[%c4_143, %c2_144, %c0_145] : memref<20x20x4xf32, #tpu.memory_space<vmem>>, vector<16x16x4xf32>
    %139 = vector.shape_cast %138 : vector<16x16x4xf32> to vector<256x4xf32>
    %c22 = arith.constant 22 : index
    %c0_146 = arith.constant 0 : index
    %c0_147 = arith.constant 0 : index
    %140 = vector.load %arg2[%c22, %c0_146, %c0_147] : memref<25x4x8xf32, #tpu.memory_space<vmem>>, vector<1x4x8xf32>
    %141 = vector.shape_cast %140 : vector<1x4x8xf32> to vector<4x8xf32>
    %cst_148 = arith.constant dense<0.000000e+00> : vector<256x8xf32>
    %142 = tpu.matmul %139, %141, %cst_148 {dimension_numbers = #tpu.dot_dimension_numbers<[1], [0], [0], [1], [0, 0, 1, 1], [], []>} : vector<256x4xf32>, vector<4x8xf32>, vector<256x8xf32> -> vector<256x8xf32>
    %143 = arith.addf %137, %142 : vector<256x8xf32>
    %c4_149 = arith.constant 4 : index
    %c3_150 = arith.constant 3 : index
    %c0_151 = arith.constant 0 : index
    %144 = vector.load %arg5[%c4_149, %c3_150, %c0_151] : memref<20x20x4xf32, #tpu.memory_space<vmem>>, vector<16x16x4xf32>
    %145 = vector.shape_cast %144 : vector<16x16x4xf32> to vector<256x4xf32>
    %c23 = arith.constant 23 : index
    %c0_152 = arith.constant 0 : index
    %c0_153 = arith.constant 0 : index
    %146 = vector.load %arg2[%c23, %c0_152, %c0_153] : memref<25x4x8xf32, #tpu.memory_space<vmem>>, vector<1x4x8xf32>
    %147 = vector.shape_cast %146 : vector<1x4x8xf32> to vector<4x8xf32>
    %cst_154 = arith.constant dense<0.000000e+00> : vector<256x8xf32>
    %148 = tpu.matmul %145, %147, %cst_154 {dimension_numbers = #tpu.dot_dimension_numbers<[1], [0], [0], [1], [0, 0, 1, 1], [], []>} : vector<256x4xf32>, vector<4x8xf32>, vector<256x8xf32> -> vector<256x8xf32>
    %149 = arith.addf %143, %148 : vector<256x8xf32>
    %c4_155 = arith.constant 4 : index
    %c4_156 = arith.constant 4 : index
    %c0_157 = arith.constant 0 : index
    %150 = vector.load %arg5[%c4_155, %c4_156, %c0_157] : memref<20x20x4xf32, #tpu.memory_space<vmem>>, vector<16x16x4xf32>
    %151 = vector.shape_cast %150 : vector<16x16x4xf32> to vector<256x4xf32>
    %c24 = arith.constant 24 : index
    %c0_158 = arith.constant 0 : index
    %c0_159 = arith.constant 0 : index
    %152 = vector.load %arg2[%c24, %c0_158, %c0_159] : memref<25x4x8xf32, #tpu.memory_space<vmem>>, vector<1x4x8xf32>
    %153 = vector.shape_cast %152 : vector<1x4x8xf32> to vector<4x8xf32>
    %cst_160 = arith.constant dense<0.000000e+00> : vector<256x8xf32>
    %154 = tpu.matmul %151, %153, %cst_160 {dimension_numbers = #tpu.dot_dimension_numbers<[1], [0], [0], [1], [0, 0, 1, 1], [], []>} : vector<256x4xf32>, vector<4x8xf32>, vector<256x8xf32> -> vector<256x8xf32>
    %155 = arith.addf %149, %154 : vector<256x8xf32>
    %c0_161 = arith.constant 0 : index
    %c0_162 = arith.constant 0 : index
    %156 = vector.load %arg3[%c0_161, %c0_162] : memref<1x8xf32, #tpu.memory_space<vmem>>, vector<1x8xf32>
    %157 = vector.broadcast %156 : vector<1x8xf32> to vector<256x8xf32>
    %158 = arith.addf %155, %157 : vector<256x8xf32>
    %cst_163 = arith.constant 0.000000e+00 : f32
    %159 = vector.broadcast %cst_163 : f32 to vector<256x8xf32>
    %160 = arith.maximumf %158, %159 : vector<256x8xf32>
    %161 = vector.shape_cast %160 : vector<256x8xf32> to vector<16x16x8xf32>
    %c0_164 = arith.constant 0 : index
    %c0_165 = arith.constant 0 : index
    %c0_166 = arith.constant 0 : index
    %c0_167 = arith.constant 0 : index
    %162 = vector.load %arg4[%c0_164, %c0_165, %c0_166, %c0_167] : memref<1x16x16x8xf32, #tpu.memory_space<vmem>>, vector<1x16x16x8xf32>
    %163 = vector.shape_cast %162 : vector<1x16x16x8xf32> to vector<16x16x8xf32>
    %164 = vector.shape_cast %161 : vector<16x16x8xf32> to vector<1x16x16x8xf32>
    tpu.vector_store %arg4[%c0_164, %c0_165, %c0_166, %c0_167], %164 {strides = array<i32>} : memref<1x16x16x8xf32, #tpu.memory_space<vmem>>, vector<1x16x16x8xf32>,
    return
  }
  func.func @transform_0(%arg0: i32) -> (i32, i32, i32, i32) {
    %c0_i32 = arith.constant 0 : i32
    %c0_i32_0 = arith.constant 0 : i32
    %c0_i32_1 = arith.constant 0 : i32
    %c0_i32_2 = arith.constant 0 : i32
    return %arg0, %c0_i32, %c0_i32_0, %c0_i32_1 : i32, i32, i32, i32
  }
  func.func @transform_1(%arg0: i32) -> (i32, i32, i32) {
    %c0_i32 = arith.constant 0 : i32
    %c0_i32_0 = arith.constant 0 : i32
    %c0_i32_1 = arith.constant 0 : i32
    %c0_i32_2 = arith.constant 0 : i32
    return %c0_i32, %c0_i32_0, %c0_i32_1 : i32, i32, i32
  }
  func.func @transform_2(%arg0: i32) -> (i32, i32) {
    %c0_i32 = arith.constant 0 : i32
    %c0_i32_0 = arith.constant 0 : i32
    %c0_i32_1 = arith.constant 0 : i32
    return %c0_i32, %c0_i32_0 : i32, i32
  }
  func.func @transform_3(%arg0: i32) -> (i32, i32, i32, i32) {
    %c0_i32 = arith.constant 0 : i32
    %c0_i32_0 = arith.constant 0 : i32
    %c0_i32_1 = arith.constant 0 : i32
    %c0_i32_2 = arith.constant 0 : i32
    return %arg0, %c0_i32, %c0_i32_0, %c0_i32_1 : i32, i32, i32, i32
  }
}

module attributes {stable_mosaic.version = 11 : i64} {
  func.func @_conv5x5_kernel(%arg0: i32, %arg1: memref<1x16x16x8xf32, #tpu.memory_space<vmem>>, %arg2: memref<25x8x8xf32, #tpu.memory_space<vmem>>, %arg3: memref<1x8xf32, #tpu.memory_space<vmem>>, %arg4: memref<1x16x16x8xf32, #tpu.memory_space<vmem>>, %arg5: memref<20x20x8xf32, #tpu.memory_space<vmem>>) attributes {dimension_semantics = [#tpu.dimension_semantics<parallel>], iteration_bounds = array<i64: 2>, scalar_prefetch = 0 : i64, scratch_operands = 1 : i64, tpu.core_type = #tpu.core_type<tc>, window_params = [{transform_indices = @transform_0, window_bounds = array<i64: 1, 16, 16, 8>}, {pipeline_mode = #tpu.pipeline_mode<synchronous>, transform_indices = @transform_1, window_bounds = array<i64: 25, 8, 8>}, {pipeline_mode = #tpu.pipeline_mode<synchronous>, transform_indices = @transform_2, window_bounds = array<i64: 1, 8>}, {transform_indices = @transform_3, window_bounds = array<i64: 1, 16, 16, 8>}]} {
    %cst = arith.constant 0.000000e+00 : f32
    %0 = vector.broadcast %cst : f32 to vector<20x20x8xf32>
    %c0 = arith.constant 0 : index
    %c0_0 = arith.constant 0 : index
    %c0_1 = arith.constant 0 : index
    %1 = vector.load %arg5[%c0, %c0_0, %c0_1] : memref<20x20x8xf32, #tpu.memory_space<vmem>>, vector<20x20x8xf32>
    tpu.vector_store %arg5[%c0, %c0_0, %c0_1], %0 {strides = array<i32>} : memref<20x20x8xf32, #tpu.memory_space<vmem>>, vector<20x20x8xf32>,
    %c0_2 = arith.constant 0 : index
    %c0_3 = arith.constant 0 : index
    %c0_4 = arith.constant 0 : index
    %c0_5 = arith.constant 0 : index
    %2 = vector.load %arg1[%c0_2, %c0_3, %c0_4, %c0_5] : memref<1x16x16x8xf32, #tpu.memory_space<vmem>>, vector<1x16x16x8xf32>
    %3 = vector.shape_cast %2 : vector<1x16x16x8xf32> to vector<16x16x8xf32>
    %c2 = arith.constant 2 : index
    %c2_6 = arith.constant 2 : index
    %c0_7 = arith.constant 0 : index
    %4 = vector.load %arg5[%c2, %c2_6, %c0_7] : memref<20x20x8xf32, #tpu.memory_space<vmem>>, vector<16x16x8xf32>
    tpu.vector_store %arg5[%c2, %c2_6, %c0_7], %3 {strides = array<i32>} : memref<20x20x8xf32, #tpu.memory_space<vmem>>, vector<16x16x8xf32>,
    %cst_8 = arith.constant 0.000000e+00 : f32
    %5 = vector.broadcast %cst_8 : f32 to vector<256x8xf32>
    %c0_9 = arith.constant 0 : index
    %c0_10 = arith.constant 0 : index
    %c0_11 = arith.constant 0 : index
    %6 = vector.load %arg5[%c0_9, %c0_10, %c0_11] : memref<20x20x8xf32, #tpu.memory_space<vmem>>, vector<16x16x8xf32>
    %7 = vector.shape_cast %6 : vector<16x16x8xf32> to vector<256x8xf32>
    %c0_12 = arith.constant 0 : index
    %c0_13 = arith.constant 0 : index
    %c0_14 = arith.constant 0 : index
    %8 = vector.load %arg2[%c0_12, %c0_13, %c0_14] : memref<25x8x8xf32, #tpu.memory_space<vmem>>, vector<1x8x8xf32>
    %9 = vector.shape_cast %8 : vector<1x8x8xf32> to vector<8x8xf32>
    %cst_15 = arith.constant dense<0.000000e+00> : vector<256x8xf32>
    %10 = tpu.matmul %7, %9, %cst_15 {dimension_numbers = #tpu.dot_dimension_numbers<[1], [0], [0], [1], [0, 0, 1, 1], [], []>} : vector<256x8xf32>, vector<8x8xf32>, vector<256x8xf32> -> vector<256x8xf32>
    %11 = arith.addf %5, %10 : vector<256x8xf32>
    %c0_16 = arith.constant 0 : index
    %c1 = arith.constant 1 : index
    %c0_17 = arith.constant 0 : index
    %12 = vector.load %arg5[%c0_16, %c1, %c0_17] : memref<20x20x8xf32, #tpu.memory_space<vmem>>, vector<16x16x8xf32>
    %13 = vector.shape_cast %12 : vector<16x16x8xf32> to vector<256x8xf32>
    %c1_18 = arith.constant 1 : index
    %c0_19 = arith.constant 0 : index
    %c0_20 = arith.constant 0 : index
    %14 = vector.load %arg2[%c1_18, %c0_19, %c0_20] : memref<25x8x8xf32, #tpu.memory_space<vmem>>, vector<1x8x8xf32>
    %15 = vector.shape_cast %14 : vector<1x8x8xf32> to vector<8x8xf32>
    %cst_21 = arith.constant dense<0.000000e+00> : vector<256x8xf32>
    %16 = tpu.matmul %13, %15, %cst_21 {dimension_numbers = #tpu.dot_dimension_numbers<[1], [0], [0], [1], [0, 0, 1, 1], [], []>} : vector<256x8xf32>, vector<8x8xf32>, vector<256x8xf32> -> vector<256x8xf32>
    %17 = arith.addf %11, %16 : vector<256x8xf32>
    %c0_22 = arith.constant 0 : index
    %c2_23 = arith.constant 2 : index
    %c0_24 = arith.constant 0 : index
    %18 = vector.load %arg5[%c0_22, %c2_23, %c0_24] : memref<20x20x8xf32, #tpu.memory_space<vmem>>, vector<16x16x8xf32>
    %19 = vector.shape_cast %18 : vector<16x16x8xf32> to vector<256x8xf32>
    %c2_25 = arith.constant 2 : index
    %c0_26 = arith.constant 0 : index
    %c0_27 = arith.constant 0 : index
    %20 = vector.load %arg2[%c2_25, %c0_26, %c0_27] : memref<25x8x8xf32, #tpu.memory_space<vmem>>, vector<1x8x8xf32>
    %21 = vector.shape_cast %20 : vector<1x8x8xf32> to vector<8x8xf32>
    %cst_28 = arith.constant dense<0.000000e+00> : vector<256x8xf32>
    %22 = tpu.matmul %19, %21, %cst_28 {dimension_numbers = #tpu.dot_dimension_numbers<[1], [0], [0], [1], [0, 0, 1, 1], [], []>} : vector<256x8xf32>, vector<8x8xf32>, vector<256x8xf32> -> vector<256x8xf32>
    %23 = arith.addf %17, %22 : vector<256x8xf32>
    %c0_29 = arith.constant 0 : index
    %c3 = arith.constant 3 : index
    %c0_30 = arith.constant 0 : index
    %24 = vector.load %arg5[%c0_29, %c3, %c0_30] : memref<20x20x8xf32, #tpu.memory_space<vmem>>, vector<16x16x8xf32>
    %25 = vector.shape_cast %24 : vector<16x16x8xf32> to vector<256x8xf32>
    %c3_31 = arith.constant 3 : index
    %c0_32 = arith.constant 0 : index
    %c0_33 = arith.constant 0 : index
    %26 = vector.load %arg2[%c3_31, %c0_32, %c0_33] : memref<25x8x8xf32, #tpu.memory_space<vmem>>, vector<1x8x8xf32>
    %27 = vector.shape_cast %26 : vector<1x8x8xf32> to vector<8x8xf32>
    %cst_34 = arith.constant dense<0.000000e+00> : vector<256x8xf32>
    %28 = tpu.matmul %25, %27, %cst_34 {dimension_numbers = #tpu.dot_dimension_numbers<[1], [0], [0], [1], [0, 0, 1, 1], [], []>} : vector<256x8xf32>, vector<8x8xf32>, vector<256x8xf32> -> vector<256x8xf32>
    %29 = arith.addf %23, %28 : vector<256x8xf32>
    %c0_35 = arith.constant 0 : index
    %c4 = arith.constant 4 : index
    %c0_36 = arith.constant 0 : index
    %30 = vector.load %arg5[%c0_35, %c4, %c0_36] : memref<20x20x8xf32, #tpu.memory_space<vmem>>, vector<16x16x8xf32>
    %31 = vector.shape_cast %30 : vector<16x16x8xf32> to vector<256x8xf32>
    %c4_37 = arith.constant 4 : index
    %c0_38 = arith.constant 0 : index
    %c0_39 = arith.constant 0 : index
    %32 = vector.load %arg2[%c4_37, %c0_38, %c0_39] : memref<25x8x8xf32, #tpu.memory_space<vmem>>, vector<1x8x8xf32>
    %33 = vector.shape_cast %32 : vector<1x8x8xf32> to vector<8x8xf32>
    %cst_40 = arith.constant dense<0.000000e+00> : vector<256x8xf32>
    %34 = tpu.matmul %31, %33, %cst_40 {dimension_numbers = #tpu.dot_dimension_numbers<[1], [0], [0], [1], [0, 0, 1, 1], [], []>} : vector<256x8xf32>, vector<8x8xf32>, vector<256x8xf32> -> vector<256x8xf32>
    %35 = arith.addf %29, %34 : vector<256x8xf32>
    %c1_41 = arith.constant 1 : index
    %c0_42 = arith.constant 0 : index
    %c0_43 = arith.constant 0 : index
    %36 = vector.load %arg5[%c1_41, %c0_42, %c0_43] : memref<20x20x8xf32, #tpu.memory_space<vmem>>, vector<16x16x8xf32>
    %37 = vector.shape_cast %36 : vector<16x16x8xf32> to vector<256x8xf32>
    %c5 = arith.constant 5 : index
    %c0_44 = arith.constant 0 : index
    %c0_45 = arith.constant 0 : index
    %38 = vector.load %arg2[%c5, %c0_44, %c0_45] : memref<25x8x8xf32, #tpu.memory_space<vmem>>, vector<1x8x8xf32>
    %39 = vector.shape_cast %38 : vector<1x8x8xf32> to vector<8x8xf32>
    %cst_46 = arith.constant dense<0.000000e+00> : vector<256x8xf32>
    %40 = tpu.matmul %37, %39, %cst_46 {dimension_numbers = #tpu.dot_dimension_numbers<[1], [0], [0], [1], [0, 0, 1, 1], [], []>} : vector<256x8xf32>, vector<8x8xf32>, vector<256x8xf32> -> vector<256x8xf32>
    %41 = arith.addf %35, %40 : vector<256x8xf32>
    %c1_47 = arith.constant 1 : index
    %c1_48 = arith.constant 1 : index
    %c0_49 = arith.constant 0 : index
    %42 = vector.load %arg5[%c1_47, %c1_48, %c0_49] : memref<20x20x8xf32, #tpu.memory_space<vmem>>, vector<16x16x8xf32>
    %43 = vector.shape_cast %42 : vector<16x16x8xf32> to vector<256x8xf32>
    %c6 = arith.constant 6 : index
    %c0_50 = arith.constant 0 : index
    %c0_51 = arith.constant 0 : index
    %44 = vector.load %arg2[%c6, %c0_50, %c0_51] : memref<25x8x8xf32, #tpu.memory_space<vmem>>, vector<1x8x8xf32>
    %45 = vector.shape_cast %44 : vector<1x8x8xf32> to vector<8x8xf32>
    %cst_52 = arith.constant dense<0.000000e+00> : vector<256x8xf32>
    %46 = tpu.matmul %43, %45, %cst_52 {dimension_numbers = #tpu.dot_dimension_numbers<[1], [0], [0], [1], [0, 0, 1, 1], [], []>} : vector<256x8xf32>, vector<8x8xf32>, vector<256x8xf32> -> vector<256x8xf32>
    %47 = arith.addf %41, %46 : vector<256x8xf32>
    %c1_53 = arith.constant 1 : index
    %c2_54 = arith.constant 2 : index
    %c0_55 = arith.constant 0 : index
    %48 = vector.load %arg5[%c1_53, %c2_54, %c0_55] : memref<20x20x8xf32, #tpu.memory_space<vmem>>, vector<16x16x8xf32>
    %49 = vector.shape_cast %48 : vector<16x16x8xf32> to vector<256x8xf32>
    %c7 = arith.constant 7 : index
    %c0_56 = arith.constant 0 : index
    %c0_57 = arith.constant 0 : index
    %50 = vector.load %arg2[%c7, %c0_56, %c0_57] : memref<25x8x8xf32, #tpu.memory_space<vmem>>, vector<1x8x8xf32>
    %51 = vector.shape_cast %50 : vector<1x8x8xf32> to vector<8x8xf32>
    %cst_58 = arith.constant dense<0.000000e+00> : vector<256x8xf32>
    %52 = tpu.matmul %49, %51, %cst_58 {dimension_numbers = #tpu.dot_dimension_numbers<[1], [0], [0], [1], [0, 0, 1, 1], [], []>} : vector<256x8xf32>, vector<8x8xf32>, vector<256x8xf32> -> vector<256x8xf32>
    %53 = arith.addf %47, %52 : vector<256x8xf32>
    %c1_59 = arith.constant 1 : index
    %c3_60 = arith.constant 3 : index
    %c0_61 = arith.constant 0 : index
    %54 = vector.load %arg5[%c1_59, %c3_60, %c0_61] : memref<20x20x8xf32, #tpu.memory_space<vmem>>, vector<16x16x8xf32>
    %55 = vector.shape_cast %54 : vector<16x16x8xf32> to vector<256x8xf32>
    %c8 = arith.constant 8 : index
    %c0_62 = arith.constant 0 : index
    %c0_63 = arith.constant 0 : index
    %56 = vector.load %arg2[%c8, %c0_62, %c0_63] : memref<25x8x8xf32, #tpu.memory_space<vmem>>, vector<1x8x8xf32>
    %57 = vector.shape_cast %56 : vector<1x8x8xf32> to vector<8x8xf32>
    %cst_64 = arith.constant dense<0.000000e+00> : vector<256x8xf32>
    %58 = tpu.matmul %55, %57, %cst_64 {dimension_numbers = #tpu.dot_dimension_numbers<[1], [0], [0], [1], [0, 0, 1, 1], [], []>} : vector<256x8xf32>, vector<8x8xf32>, vector<256x8xf32> -> vector<256x8xf32>
    %59 = arith.addf %53, %58 : vector<256x8xf32>
    %c1_65 = arith.constant 1 : index
    %c4_66 = arith.constant 4 : index
    %c0_67 = arith.constant 0 : index
    %60 = vector.load %arg5[%c1_65, %c4_66, %c0_67] : memref<20x20x8xf32, #tpu.memory_space<vmem>>, vector<16x16x8xf32>
    %61 = vector.shape_cast %60 : vector<16x16x8xf32> to vector<256x8xf32>
    %c9 = arith.constant 9 : index
    %c0_68 = arith.constant 0 : index
    %c0_69 = arith.constant 0 : index
    %62 = vector.load %arg2[%c9, %c0_68, %c0_69] : memref<25x8x8xf32, #tpu.memory_space<vmem>>, vector<1x8x8xf32>
    %63 = vector.shape_cast %62 : vector<1x8x8xf32> to vector<8x8xf32>
    %cst_70 = arith.constant dense<0.000000e+00> : vector<256x8xf32>
    %64 = tpu.matmul %61, %63, %cst_70 {dimension_numbers = #tpu.dot_dimension_numbers<[1], [0], [0], [1], [0, 0, 1, 1], [], []>} : vector<256x8xf32>, vector<8x8xf32>, vector<256x8xf32> -> vector<256x8xf32>
    %65 = arith.addf %59, %64 : vector<256x8xf32>
    %c2_71 = arith.constant 2 : index
    %c0_72 = arith.constant 0 : index
    %c0_73 = arith.constant 0 : index
    %66 = vector.load %arg5[%c2_71, %c0_72, %c0_73] : memref<20x20x8xf32, #tpu.memory_space<vmem>>, vector<16x16x8xf32>
    %67 = vector.shape_cast %66 : vector<16x16x8xf32> to vector<256x8xf32>
    %c10 = arith.constant 10 : index
    %c0_74 = arith.constant 0 : index
    %c0_75 = arith.constant 0 : index
    %68 = vector.load %arg2[%c10, %c0_74, %c0_75] : memref<25x8x8xf32, #tpu.memory_space<vmem>>, vector<1x8x8xf32>
    %69 = vector.shape_cast %68 : vector<1x8x8xf32> to vector<8x8xf32>
    %cst_76 = arith.constant dense<0.000000e+00> : vector<256x8xf32>
    %70 = tpu.matmul %67, %69, %cst_76 {dimension_numbers = #tpu.dot_dimension_numbers<[1], [0], [0], [1], [0, 0, 1, 1], [], []>} : vector<256x8xf32>, vector<8x8xf32>, vector<256x8xf32> -> vector<256x8xf32>
    %71 = arith.addf %65, %70 : vector<256x8xf32>
    %c2_77 = arith.constant 2 : index
    %c1_78 = arith.constant 1 : index
    %c0_79 = arith.constant 0 : index
    %72 = vector.load %arg5[%c2_77, %c1_78, %c0_79] : memref<20x20x8xf32, #tpu.memory_space<vmem>>, vector<16x16x8xf32>
    %73 = vector.shape_cast %72 : vector<16x16x8xf32> to vector<256x8xf32>
    %c11 = arith.constant 11 : index
    %c0_80 = arith.constant 0 : index
    %c0_81 = arith.constant 0 : index
    %74 = vector.load %arg2[%c11, %c0_80, %c0_81] : memref<25x8x8xf32, #tpu.memory_space<vmem>>, vector<1x8x8xf32>
    %75 = vector.shape_cast %74 : vector<1x8x8xf32> to vector<8x8xf32>
    %cst_82 = arith.constant dense<0.000000e+00> : vector<256x8xf32>
    %76 = tpu.matmul %73, %75, %cst_82 {dimension_numbers = #tpu.dot_dimension_numbers<[1], [0], [0], [1], [0, 0, 1, 1], [], []>} : vector<256x8xf32>, vector<8x8xf32>, vector<256x8xf32> -> vector<256x8xf32>
    %77 = arith.addf %71, %76 : vector<256x8xf32>
    %c2_83 = arith.constant 2 : index
    %c2_84 = arith.constant 2 : index
    %c0_85 = arith.constant 0 : index
    %78 = vector.load %arg5[%c2_83, %c2_84, %c0_85] : memref<20x20x8xf32, #tpu.memory_space<vmem>>, vector<16x16x8xf32>
    %79 = vector.shape_cast %78 : vector<16x16x8xf32> to vector<256x8xf32>
    %c12 = arith.constant 12 : index
    %c0_86 = arith.constant 0 : index
    %c0_87 = arith.constant 0 : index
    %80 = vector.load %arg2[%c12, %c0_86, %c0_87] : memref<25x8x8xf32, #tpu.memory_space<vmem>>, vector<1x8x8xf32>
    %81 = vector.shape_cast %80 : vector<1x8x8xf32> to vector<8x8xf32>
    %cst_88 = arith.constant dense<0.000000e+00> : vector<256x8xf32>
    %82 = tpu.matmul %79, %81, %cst_88 {dimension_numbers = #tpu.dot_dimension_numbers<[1], [0], [0], [1], [0, 0, 1, 1], [], []>} : vector<256x8xf32>, vector<8x8xf32>, vector<256x8xf32> -> vector<256x8xf32>
    %83 = arith.addf %77, %82 : vector<256x8xf32>
    %c2_89 = arith.constant 2 : index
    %c3_90 = arith.constant 3 : index
    %c0_91 = arith.constant 0 : index
    %84 = vector.load %arg5[%c2_89, %c3_90, %c0_91] : memref<20x20x8xf32, #tpu.memory_space<vmem>>, vector<16x16x8xf32>
    %85 = vector.shape_cast %84 : vector<16x16x8xf32> to vector<256x8xf32>
    %c13 = arith.constant 13 : index
    %c0_92 = arith.constant 0 : index
    %c0_93 = arith.constant 0 : index
    %86 = vector.load %arg2[%c13, %c0_92, %c0_93] : memref<25x8x8xf32, #tpu.memory_space<vmem>>, vector<1x8x8xf32>
    %87 = vector.shape_cast %86 : vector<1x8x8xf32> to vector<8x8xf32>
    %cst_94 = arith.constant dense<0.000000e+00> : vector<256x8xf32>
    %88 = tpu.matmul %85, %87, %cst_94 {dimension_numbers = #tpu.dot_dimension_numbers<[1], [0], [0], [1], [0, 0, 1, 1], [], []>} : vector<256x8xf32>, vector<8x8xf32>, vector<256x8xf32> -> vector<256x8xf32>
    %89 = arith.addf %83, %88 : vector<256x8xf32>
    %c2_95 = arith.constant 2 : index
    %c4_96 = arith.constant 4 : index
    %c0_97 = arith.constant 0 : index
    %90 = vector.load %arg5[%c2_95, %c4_96, %c0_97] : memref<20x20x8xf32, #tpu.memory_space<vmem>>, vector<16x16x8xf32>
    %91 = vector.shape_cast %90 : vector<16x16x8xf32> to vector<256x8xf32>
    %c14 = arith.constant 14 : index
    %c0_98 = arith.constant 0 : index
    %c0_99 = arith.constant 0 : index
    %92 = vector.load %arg2[%c14, %c0_98, %c0_99] : memref<25x8x8xf32, #tpu.memory_space<vmem>>, vector<1x8x8xf32>
    %93 = vector.shape_cast %92 : vector<1x8x8xf32> to vector<8x8xf32>
    %cst_100 = arith.constant dense<0.000000e+00> : vector<256x8xf32>
    %94 = tpu.matmul %91, %93, %cst_100 {dimension_numbers = #tpu.dot_dimension_numbers<[1], [0], [0], [1], [0, 0, 1, 1], [], []>} : vector<256x8xf32>, vector<8x8xf32>, vector<256x8xf32> -> vector<256x8xf32>
    %95 = arith.addf %89, %94 : vector<256x8xf32>
    %c3_101 = arith.constant 3 : index
    %c0_102 = arith.constant 0 : index
    %c0_103 = arith.constant 0 : index
    %96 = vector.load %arg5[%c3_101, %c0_102, %c0_103] : memref<20x20x8xf32, #tpu.memory_space<vmem>>, vector<16x16x8xf32>
    %97 = vector.shape_cast %96 : vector<16x16x8xf32> to vector<256x8xf32>
    %c15 = arith.constant 15 : index
    %c0_104 = arith.constant 0 : index
    %c0_105 = arith.constant 0 : index
    %98 = vector.load %arg2[%c15, %c0_104, %c0_105] : memref<25x8x8xf32, #tpu.memory_space<vmem>>, vector<1x8x8xf32>
    %99 = vector.shape_cast %98 : vector<1x8x8xf32> to vector<8x8xf32>
    %cst_106 = arith.constant dense<0.000000e+00> : vector<256x8xf32>
    %100 = tpu.matmul %97, %99, %cst_106 {dimension_numbers = #tpu.dot_dimension_numbers<[1], [0], [0], [1], [0, 0, 1, 1], [], []>} : vector<256x8xf32>, vector<8x8xf32>, vector<256x8xf32> -> vector<256x8xf32>
    %101 = arith.addf %95, %100 : vector<256x8xf32>
    %c3_107 = arith.constant 3 : index
    %c1_108 = arith.constant 1 : index
    %c0_109 = arith.constant 0 : index
    %102 = vector.load %arg5[%c3_107, %c1_108, %c0_109] : memref<20x20x8xf32, #tpu.memory_space<vmem>>, vector<16x16x8xf32>
    %103 = vector.shape_cast %102 : vector<16x16x8xf32> to vector<256x8xf32>
    %c16 = arith.constant 16 : index
    %c0_110 = arith.constant 0 : index
    %c0_111 = arith.constant 0 : index
    %104 = vector.load %arg2[%c16, %c0_110, %c0_111] : memref<25x8x8xf32, #tpu.memory_space<vmem>>, vector<1x8x8xf32>
    %105 = vector.shape_cast %104 : vector<1x8x8xf32> to vector<8x8xf32>
    %cst_112 = arith.constant dense<0.000000e+00> : vector<256x8xf32>
    %106 = tpu.matmul %103, %105, %cst_112 {dimension_numbers = #tpu.dot_dimension_numbers<[1], [0], [0], [1], [0, 0, 1, 1], [], []>} : vector<256x8xf32>, vector<8x8xf32>, vector<256x8xf32> -> vector<256x8xf32>
    %107 = arith.addf %101, %106 : vector<256x8xf32>
    %c3_113 = arith.constant 3 : index
    %c2_114 = arith.constant 2 : index
    %c0_115 = arith.constant 0 : index
    %108 = vector.load %arg5[%c3_113, %c2_114, %c0_115] : memref<20x20x8xf32, #tpu.memory_space<vmem>>, vector<16x16x8xf32>
    %109 = vector.shape_cast %108 : vector<16x16x8xf32> to vector<256x8xf32>
    %c17 = arith.constant 17 : index
    %c0_116 = arith.constant 0 : index
    %c0_117 = arith.constant 0 : index
    %110 = vector.load %arg2[%c17, %c0_116, %c0_117] : memref<25x8x8xf32, #tpu.memory_space<vmem>>, vector<1x8x8xf32>
    %111 = vector.shape_cast %110 : vector<1x8x8xf32> to vector<8x8xf32>
    %cst_118 = arith.constant dense<0.000000e+00> : vector<256x8xf32>
    %112 = tpu.matmul %109, %111, %cst_118 {dimension_numbers = #tpu.dot_dimension_numbers<[1], [0], [0], [1], [0, 0, 1, 1], [], []>} : vector<256x8xf32>, vector<8x8xf32>, vector<256x8xf32> -> vector<256x8xf32>
    %113 = arith.addf %107, %112 : vector<256x8xf32>
    %c3_119 = arith.constant 3 : index
    %c3_120 = arith.constant 3 : index
    %c0_121 = arith.constant 0 : index
    %114 = vector.load %arg5[%c3_119, %c3_120, %c0_121] : memref<20x20x8xf32, #tpu.memory_space<vmem>>, vector<16x16x8xf32>
    %115 = vector.shape_cast %114 : vector<16x16x8xf32> to vector<256x8xf32>
    %c18 = arith.constant 18 : index
    %c0_122 = arith.constant 0 : index
    %c0_123 = arith.constant 0 : index
    %116 = vector.load %arg2[%c18, %c0_122, %c0_123] : memref<25x8x8xf32, #tpu.memory_space<vmem>>, vector<1x8x8xf32>
    %117 = vector.shape_cast %116 : vector<1x8x8xf32> to vector<8x8xf32>
    %cst_124 = arith.constant dense<0.000000e+00> : vector<256x8xf32>
    %118 = tpu.matmul %115, %117, %cst_124 {dimension_numbers = #tpu.dot_dimension_numbers<[1], [0], [0], [1], [0, 0, 1, 1], [], []>} : vector<256x8xf32>, vector<8x8xf32>, vector<256x8xf32> -> vector<256x8xf32>
    %119 = arith.addf %113, %118 : vector<256x8xf32>
    %c3_125 = arith.constant 3 : index
    %c4_126 = arith.constant 4 : index
    %c0_127 = arith.constant 0 : index
    %120 = vector.load %arg5[%c3_125, %c4_126, %c0_127] : memref<20x20x8xf32, #tpu.memory_space<vmem>>, vector<16x16x8xf32>
    %121 = vector.shape_cast %120 : vector<16x16x8xf32> to vector<256x8xf32>
    %c19 = arith.constant 19 : index
    %c0_128 = arith.constant 0 : index
    %c0_129 = arith.constant 0 : index
    %122 = vector.load %arg2[%c19, %c0_128, %c0_129] : memref<25x8x8xf32, #tpu.memory_space<vmem>>, vector<1x8x8xf32>
    %123 = vector.shape_cast %122 : vector<1x8x8xf32> to vector<8x8xf32>
    %cst_130 = arith.constant dense<0.000000e+00> : vector<256x8xf32>
    %124 = tpu.matmul %121, %123, %cst_130 {dimension_numbers = #tpu.dot_dimension_numbers<[1], [0], [0], [1], [0, 0, 1, 1], [], []>} : vector<256x8xf32>, vector<8x8xf32>, vector<256x8xf32> -> vector<256x8xf32>
    %125 = arith.addf %119, %124 : vector<256x8xf32>
    %c4_131 = arith.constant 4 : index
    %c0_132 = arith.constant 0 : index
    %c0_133 = arith.constant 0 : index
    %126 = vector.load %arg5[%c4_131, %c0_132, %c0_133] : memref<20x20x8xf32, #tpu.memory_space<vmem>>, vector<16x16x8xf32>
    %127 = vector.shape_cast %126 : vector<16x16x8xf32> to vector<256x8xf32>
    %c20 = arith.constant 20 : index
    %c0_134 = arith.constant 0 : index
    %c0_135 = arith.constant 0 : index
    %128 = vector.load %arg2[%c20, %c0_134, %c0_135] : memref<25x8x8xf32, #tpu.memory_space<vmem>>, vector<1x8x8xf32>
    %129 = vector.shape_cast %128 : vector<1x8x8xf32> to vector<8x8xf32>
    %cst_136 = arith.constant dense<0.000000e+00> : vector<256x8xf32>
    %130 = tpu.matmul %127, %129, %cst_136 {dimension_numbers = #tpu.dot_dimension_numbers<[1], [0], [0], [1], [0, 0, 1, 1], [], []>} : vector<256x8xf32>, vector<8x8xf32>, vector<256x8xf32> -> vector<256x8xf32>
    %131 = arith.addf %125, %130 : vector<256x8xf32>
    %c4_137 = arith.constant 4 : index
    %c1_138 = arith.constant 1 : index
    %c0_139 = arith.constant 0 : index
    %132 = vector.load %arg5[%c4_137, %c1_138, %c0_139] : memref<20x20x8xf32, #tpu.memory_space<vmem>>, vector<16x16x8xf32>
    %133 = vector.shape_cast %132 : vector<16x16x8xf32> to vector<256x8xf32>
    %c21 = arith.constant 21 : index
    %c0_140 = arith.constant 0 : index
    %c0_141 = arith.constant 0 : index
    %134 = vector.load %arg2[%c21, %c0_140, %c0_141] : memref<25x8x8xf32, #tpu.memory_space<vmem>>, vector<1x8x8xf32>
    %135 = vector.shape_cast %134 : vector<1x8x8xf32> to vector<8x8xf32>
    %cst_142 = arith.constant dense<0.000000e+00> : vector<256x8xf32>
    %136 = tpu.matmul %133, %135, %cst_142 {dimension_numbers = #tpu.dot_dimension_numbers<[1], [0], [0], [1], [0, 0, 1, 1], [], []>} : vector<256x8xf32>, vector<8x8xf32>, vector<256x8xf32> -> vector<256x8xf32>
    %137 = arith.addf %131, %136 : vector<256x8xf32>
    %c4_143 = arith.constant 4 : index
    %c2_144 = arith.constant 2 : index
    %c0_145 = arith.constant 0 : index
    %138 = vector.load %arg5[%c4_143, %c2_144, %c0_145] : memref<20x20x8xf32, #tpu.memory_space<vmem>>, vector<16x16x8xf32>
    %139 = vector.shape_cast %138 : vector<16x16x8xf32> to vector<256x8xf32>
    %c22 = arith.constant 22 : index
    %c0_146 = arith.constant 0 : index
    %c0_147 = arith.constant 0 : index
    %140 = vector.load %arg2[%c22, %c0_146, %c0_147] : memref<25x8x8xf32, #tpu.memory_space<vmem>>, vector<1x8x8xf32>
    %141 = vector.shape_cast %140 : vector<1x8x8xf32> to vector<8x8xf32>
    %cst_148 = arith.constant dense<0.000000e+00> : vector<256x8xf32>
    %142 = tpu.matmul %139, %141, %cst_148 {dimension_numbers = #tpu.dot_dimension_numbers<[1], [0], [0], [1], [0, 0, 1, 1], [], []>} : vector<256x8xf32>, vector<8x8xf32>, vector<256x8xf32> -> vector<256x8xf32>
    %143 = arith.addf %137, %142 : vector<256x8xf32>
    %c4_149 = arith.constant 4 : index
    %c3_150 = arith.constant 3 : index
    %c0_151 = arith.constant 0 : index
    %144 = vector.load %arg5[%c4_149, %c3_150, %c0_151] : memref<20x20x8xf32, #tpu.memory_space<vmem>>, vector<16x16x8xf32>
    %145 = vector.shape_cast %144 : vector<16x16x8xf32> to vector<256x8xf32>
    %c23 = arith.constant 23 : index
    %c0_152 = arith.constant 0 : index
    %c0_153 = arith.constant 0 : index
    %146 = vector.load %arg2[%c23, %c0_152, %c0_153] : memref<25x8x8xf32, #tpu.memory_space<vmem>>, vector<1x8x8xf32>
    %147 = vector.shape_cast %146 : vector<1x8x8xf32> to vector<8x8xf32>
    %cst_154 = arith.constant dense<0.000000e+00> : vector<256x8xf32>
    %148 = tpu.matmul %145, %147, %cst_154 {dimension_numbers = #tpu.dot_dimension_numbers<[1], [0], [0], [1], [0, 0, 1, 1], [], []>} : vector<256x8xf32>, vector<8x8xf32>, vector<256x8xf32> -> vector<256x8xf32>
    %149 = arith.addf %143, %148 : vector<256x8xf32>
    %c4_155 = arith.constant 4 : index
    %c4_156 = arith.constant 4 : index
    %c0_157 = arith.constant 0 : index
    %150 = vector.load %arg5[%c4_155, %c4_156, %c0_157] : memref<20x20x8xf32, #tpu.memory_space<vmem>>, vector<16x16x8xf32>
    %151 = vector.shape_cast %150 : vector<16x16x8xf32> to vector<256x8xf32>
    %c24 = arith.constant 24 : index
    %c0_158 = arith.constant 0 : index
    %c0_159 = arith.constant 0 : index
    %152 = vector.load %arg2[%c24, %c0_158, %c0_159] : memref<25x8x8xf32, #tpu.memory_space<vmem>>, vector<1x8x8xf32>
    %153 = vector.shape_cast %152 : vector<1x8x8xf32> to vector<8x8xf32>
    %cst_160 = arith.constant dense<0.000000e+00> : vector<256x8xf32>
    %154 = tpu.matmul %151, %153, %cst_160 {dimension_numbers = #tpu.dot_dimension_numbers<[1], [0], [0], [1], [0, 0, 1, 1], [], []>} : vector<256x8xf32>, vector<8x8xf32>, vector<256x8xf32> -> vector<256x8xf32>
    %155 = arith.addf %149, %154 : vector<256x8xf32>
    %c0_161 = arith.constant 0 : index
    %c0_162 = arith.constant 0 : index
    %156 = vector.load %arg3[%c0_161, %c0_162] : memref<1x8xf32, #tpu.memory_space<vmem>>, vector<1x8xf32>
    %157 = vector.broadcast %156 : vector<1x8xf32> to vector<256x8xf32>
    %158 = arith.addf %155, %157 : vector<256x8xf32>
    %cst_163 = arith.constant 0.000000e+00 : f32
    %159 = vector.broadcast %cst_163 : f32 to vector<256x8xf32>
    %160 = arith.maximumf %158, %159 : vector<256x8xf32>
    %161 = vector.shape_cast %160 : vector<256x8xf32> to vector<16x16x8xf32>
    %c0_164 = arith.constant 0 : index
    %c0_165 = arith.constant 0 : index
    %c0_166 = arith.constant 0 : index
    %c0_167 = arith.constant 0 : index
    %162 = vector.load %arg4[%c0_164, %c0_165, %c0_166, %c0_167] : memref<1x16x16x8xf32, #tpu.memory_space<vmem>>, vector<1x16x16x8xf32>
    %163 = vector.shape_cast %162 : vector<1x16x16x8xf32> to vector<16x16x8xf32>
    %164 = vector.shape_cast %161 : vector<16x16x8xf32> to vector<1x16x16x8xf32>
    tpu.vector_store %arg4[%c0_164, %c0_165, %c0_166, %c0_167], %164 {strides = array<i32>} : memref<1x16x16x8xf32, #tpu.memory_space<vmem>>, vector<1x16x16x8xf32>,
    return
  }
  func.func @transform_0(%arg0: i32) -> (i32, i32, i32, i32) {
    %c0_i32 = arith.constant 0 : i32
    %c0_i32_0 = arith.constant 0 : i32
    %c0_i32_1 = arith.constant 0 : i32
    %c0_i32_2 = arith.constant 0 : i32
    return %arg0, %c0_i32, %c0_i32_0, %c0_i32_1 : i32, i32, i32, i32
  }
  func.func @transform_1(%arg0: i32) -> (i32, i32, i32) {
    %c0_i32 = arith.constant 0 : i32
    %c0_i32_0 = arith.constant 0 : i32
    %c0_i32_1 = arith.constant 0 : i32
    %c0_i32_2 = arith.constant 0 : i32
    return %c0_i32, %c0_i32_0, %c0_i32_1 : i32, i32, i32
  }
  func.func @transform_2(%arg0: i32) -> (i32, i32) {
    %c0_i32 = arith.constant 0 : i32
    %c0_i32_0 = arith.constant 0 : i32
    %c0_i32_1 = arith.constant 0 : i32
    return %c0_i32, %c0_i32_0 : i32, i32
  }
  func.func @transform_3(%arg0: i32) -> (i32, i32, i32, i32) {
    %c0_i32 = arith.constant 0 : i32
    %c0_i32_0 = arith.constant 0 : i32
    %c0_i32_1 = arith.constant 0 : i32
    %c0_i32_2 = arith.constant 0 : i32
    return %arg0, %c0_i32, %c0_i32_0, %c0_i32_1 : i32, i32, i32, i32
  }
}

</mosaic_0001>

<bundles_post_ra>
// kernel: inception_forward.4
= control target key start
LH: loop header
LB: loop body
LE: loop exit
PB: predicated region body
PF: predicated region fallthrough
CT: control target
= control target key end

     0   :  { %s1865_s18 = smov 0   ;;  %s2539_s0 = inlined_call_operand.vmem [shape: f32[2,16,16,4], index: 0, kind: input, shape index: {}]   ;;  %s2540_s1 = inlined_call_operand.vmem [shape: f32[4,16], index: 1, kind: input, shape index: {}]   ;;  %s2541_s2 = inlined_call_operand.vmem [shape: f32[1,16], index: 2, kind: input, shape index: {}]   ;;  %s2542_s3 = inlined_call_operand.vmem [shape: f32[4,8], index: 3, kind: input, shape index: {}]   ;;  %s2543_s4 = inlined_call_operand.vmem [shape: f32[1,8], index: 4, kind: input, shape index: {}]   ;;  %s2544_s5 = inlined_call_operand.vmem [shape: f32[2,16,16,24], index: 5, kind: output, shape index: {}]  }
   0x1 LB: > { %s1568_s19 = sadd.s32 4294967295, %s1831_s18   ;;  %p1572_p0 = scmp.ge.s32.totalorder %s1831_s18, 1  ;;  %s1831_s18 = sphi %s1865_s18, %s15_s18  }
   0x2   : > { %p187_p1 = scmp.lt.s32.totalorder %s1831_s18, 3 }
   0x4   : > { %p188_p2 = pnand %p1572_p0, %p187_p1 }
   0x5   : > { %v591_v0 = vld [vmem:[%s2542_s3] sm:$0xf] (!%p188_p2)  ;;  %vm695_vm0 = vcmask (!%p188_p2), 1043456   ;;  %p1878_p3 = scmp.lt.s32.totalorder (!%p188_p2), %s1568_s19, 1  ;;  %vm257_vm1 = vcmask (!%p188_p2), 31744   ;;  %v1833_v1 = vmov (!%p188_p2), -inf  }
   0x6   : > { %191 = sbr.rel (%p188_p2) target bundleno = 451 (0x1c3), region = 40  ;;  %1765 = vmatprep.subr.msk.mxu1 (!%p188_p2), %vm695_vm0, %v591_v0  ;;  %258 = vst.msk [vmem:[#allocation2] sm:$0xff] (!%p188_p2), %vm257_vm1, %v1833_v1  ;;  %259 = vst.msk [vmem:[#allocation2 + $0x8] sm:$0xff] (!%p188_p2), %vm257_vm1, %v1833_v1  ;;  %vm260_vm2 = vcmask (!%p188_p2), 25600   ;;  %v590_v2 = vld [vmem:[%s2540_s1] sm:$0xf] (!%p188_p2) }
   0x7   : > { %262 = vst.msk [vmem:[#allocation2 + $0x18] sm:$0xff] (!%p188_p2), %vm257_vm1, %v1833_v1  ;;  %263 = vst.msk [vmem:[#allocation2 + $0x20] sm:$0xff] (!%p188_p2), %vm257_vm1, %v1833_v1  ;;  %1766 = vmatpush3.msk.msra.mxu1 (!%p188_p2), %vm695_vm0, %v591_v0  ;;  %1715 = vmatprep.subr.msk.mxu0 (!%p188_p2), %vm695_vm0, %v590_v2  ;;  %vm1319_vm3 = vcmask (!%p188_p2), 130048   ;;  %s1834_s11 = smov (!%p188_p2), 16   ;;  %vm1480_vm4 = vcmask (!%p188_p2), 195712  }
   0x8   : > { %265 = vst.msk [vmem:[#allocation2 + $0x30] sm:$0xff] (!%p188_p2), %vm257_vm1, %v1833_v1  ;;  %266 = vst.msk [vmem:[#allocation2 + $0x38] sm:$0xff] (!%p188_p2), %vm257_vm1, %v1833_v1  ;;  %1716 = vmatpush3.msk.msra.mxu0 (!%p188_p2), %vm695_vm0, %v590_v2 }
   0x9   : > { %268 = vst.msk [vmem:[#allocation2 + $0x48] sm:$0xff] (!%p188_p2), %vm257_vm1, %v1833_v1  ;;  %269 = vst.msk [vmem:[#allocation2 + $0x50] sm:$0xff] (!%p188_p2), %vm257_vm1, %v1833_v1 }
   0xa   : > { %271 = vst.msk [vmem:[#allocation2 + $0x60] sm:$0xff] (!%p188_p2), %vm257_vm1, %v1833_v1  ;;  %272 = vst.msk [vmem:[#allocation2 + $0x68] sm:$0xff] (!%p188_p2), %vm257_vm1, %v1833_v1 }
   0xb   : > { %274 = vst.msk [vmem:[#allocation2 + $0x78] sm:$0xff] (!%p188_p2), %vm257_vm1, %v1833_v1  ;;  %275 = vst.msk [vmem:[#allocation2 + $0x80] sm:$0xff] (!%p188_p2), %vm257_vm1, %v1833_v1 }
   0xc   : > { %277 = vst.msk [vmem:[#allocation2 + $0x90] sm:$0xff] (!%p188_p2), %vm257_vm1, %v1833_v1  ;;  %278 = vst.msk [vmem:[#allocation2 + $0x98] sm:$0xff] (!%p188_p2), %vm257_vm1, %v1833_v1 }
   0xd   : > { %280 = vst.msk [vmem:[#allocation2 + $0xa8] sm:$0xff] %vm257_vm1, %v1833_v1  ;;  %281 = vst.msk [vmem:[#allocation2 + $0xb0] sm:$0xff] %vm257_vm1, %v1833_v1  ;;  %s2547_s19 = smov (!%p1878_p3, %s1568_s19), 1  ;;  %v382_v9 = vld [vmem:[#allocation2 + $0x1] sm:$0xff] }
   0xe   : > { %283 = vst.msk [vmem:[#allocation2 + $0xc0] sm:$0xff] %vm257_vm1, %v1833_v1  ;;  %284 = vst.msk [vmem:[#allocation2 + $0xc8] sm:$0xff] %vm257_vm1, %v1833_v1  ;;  %s1647_s25 = sshll.u32 %s2547_s19, 8  ;;  %v418_v10 = vld [vmem:[#allocation2 + $0x2] sm:$0xff] }
   0xf   : > { %286 = vst.msk [vmem:[#allocation2 + $0xd8] sm:$0xff] %vm257_vm1, %v1833_v1  ;;  %287 = vst.msk [vmem:[#allocation2 + $0xe0] sm:$0xff] %vm257_vm1, %v1833_v1  ;;  %s1955_s28 = scalar_lea.vmem %s2539_s0, %s1647_s25  ;;  %v346_v19 = vld [vmem:[#allocation2] sm:$0xff]  ;;  %v454_v23 = vmax.f32 %v382_v9, %v418_v10  ;;  %v347_v30 = vld [vmem:[#allocation2 + $0x8] sm:$0xff]  ;;  %s2306_s8 = scalar_lea.vmem %s2544_s5, %s1647_s25 }
  0x10   : > { %289 = vst.msk [vmem:[#allocation2 + $0xf0] sm:$0xff] %vm257_vm1, %v1833_v1  ;;  %290 = vst.msk [vmem:[#allocation2 + $0xf8] sm:$0xff] %vm257_vm1, %v1833_v1  ;;  %v225_v3 = vld [vmem:[%s1955_s28] sm:$0xff]  ;;  %v226_v4 = vld [vmem:[%s1955_s28 + $0x8] sm:$0xff] }
  0x11   : > { %292 = vst.msk [vmem:[#allocation2 + $0x108] sm:$0xff] %vm257_vm1, %v1833_v1  ;;  %293 = vst.msk [vmem:[#allocation2 + $0x110] sm:$0xff] %vm257_vm1, %v1833_v1  ;;  %v227_v5 = vld [vmem:[%s1955_s28 + $0x10] sm:$0xff]  ;;  %v228_v6 = vld [vmem:[%s1955_s28 + $0x18] sm:$0xff]  ;;  %1717 = vmatprep.mubr.msk.f32.mxu0 %vm257_vm1, %v225_v3  ;;  %v490_v40 = vmax.f32 %v346_v19, %v454_v23 }
  0x12   : > { %295 = vst.msk [vmem:[#allocation2 + $0x120] sm:$0xff] %vm257_vm1, %v1833_v1  ;;  %296 = vst.msk [vmem:[#allocation2 + $0x128] sm:$0xff] %vm257_vm1, %v1833_v1  ;;  %v229_v7 = vld [vmem:[%s1955_s28 + $0x20] sm:$0xff]  ;;  %v230_v8 = vld [vmem:[%s1955_s28 + $0x28] sm:$0xff]  ;;  %1718 = vmatmul.mubr.msk.f32.vlgmr.msra.gmra.mrb[0].mxu0 %vm257_vm1, %v226_v4 }
  0x13   : > { %298 = vst.msk [vmem:[#allocation2 + $0x138] sm:$0xff] %vm257_vm1, %v1833_v1  ;;  %299 = vst.msk [vmem:[#allocation2 + $0x140] sm:$0xff] %vm257_vm1, %v1833_v1  ;;  %1720 = vmatprep.mubr.msk.f32.mxu0 %vm257_vm1, %v227_v5  ;;  %v231_v13 = vld [vmem:[%s1955_s28 + $0x30] sm:$0xff]  ;;  %v1974_v14 = vld [vmem:[%s1955_s28 + $0x38] sm:$0xff] }
  0x14   : > { %301 = vst.msk [vmem:[#allocation2 + $0x150] sm:$0xff] %vm257_vm1, %v1833_v1  ;;  %302 = vst.msk [vmem:[#allocation2 + $0x158] sm:$0xff] %vm257_vm1, %v1833_v1  ;;  %v1977_v15 = vld [vmem:[%s1955_s28 + $0x40] sm:$0xff]  ;;  %v1983_v16 = vld [vmem:[%s1955_s28 + $0x48] sm:$0xff] }
  0x15   : > { %304 = vst.msk [vmem:[#allocation2 + $0x168] sm:$0xff] %vm257_vm1, %v1833_v1  ;;  %305 = vst.msk [vmem:[#allocation2 + $0x170] sm:$0xff] %vm257_vm1, %v1833_v1  ;;  %v1988_v17 = vld [vmem:[%s1955_s28 + $0x50] sm:$0xff]  ;;  %v1991_v18 = vld [vmem:[%s1955_s28 + $0x58] sm:$0xff] }
  0x16   : > { %307 = vst.msk [vmem:[#allocation2 + $0x180] sm:$0xff] %vm257_vm1, %v1833_v1  ;;  %308 = vst.msk [vmem:[#allocation2 + $0x188] sm:$0xff] %vm257_vm1, %v1833_v1  ;;  %v2000_v20 = vld [vmem:[%s1955_s28 + $0x60] sm:$0xff]  ;;  %v2003_v21 = vld [vmem:[%s1955_s28 + $0x68] sm:$0xff]  ;;  %1721 = vmatmul.mubr.msk.f32.gmra.mrb[2].mxu0 %vm257_vm1, %v228_v6 }
  0x17   : > { %310 = vst.msk [vmem:[#allocation2 + $0x198] sm:$0xff] %vm257_vm1, %v1833_v1  ;;  %311 = vst.msk [vmem:[#allocation2 + $0x1a0] sm:$0xff] %vm257_vm1, %v1833_v1  ;;  %v2006_v22 = vld [vmem:[%s1955_s28 + $0x70] sm:$0xff]  ;;  %v2014_v24 = vld [vmem:[%s1955_s28 + $0x78] sm:$0xff]  ;;  %1723 = vmatprep.mubr.msk.f32.mxu0 %vm257_vm1, %v229_v7 }
  0x18   : > { %264 = vst.msk [vmem:[#allocation2 + $0x28] sm:$0x3] %vm260_vm2, %v1833_v1  ;;  %267 = vst.msk [vmem:[#allocation2 + $0x40] sm:$0x3] %vm260_vm2, %v1833_v1  ;;  %v2019_v25 = vld [vmem:[%s1955_s28 + $0x80] sm:$0xff]  ;;  %v2022_v26 = vld [vmem:[%s1955_s28 + $0x88] sm:$0xff] }
  0x19   : > { %261 = vst.msk [vmem:[#allocation2 + $0x10] sm:$0x3] %vm260_vm2, %v1833_v1  ;;  %270 = vst.msk [vmem:[#allocation2 + $0x58] sm:$0x3] %vm260_vm2, %v1833_v1 }
  0x1a   : > { %273 = vst.msk [vmem:[#allocation2 + $0x70] sm:$0x3] %vm260_vm2, %v1833_v1  ;;  %276 = vst.msk [vmem:[#allocation2 + $0x88] sm:$0x3] %vm260_vm2, %v1833_v1  ;;  %1724 = vmatmul.mubr.msk.f32.gmra.mrb[4].mxu0 %vm257_vm1, %v230_v8 }
  0x1b   : > { %279 = vst.msk [vmem:[#allocation2 + $0xa0] sm:$0x3] %vm260_vm2, %v1833_v1  ;;  %282 = vst.msk [vmem:[#allocation2 + $0xb8] sm:$0x3] %vm260_vm2, %v1833_v1  ;;  %1726 = vmatprep.mubr.msk.f32.mxu0 %vm257_vm1, %v231_v13 }
  0x1c   : > { %285 = vst.msk [vmem:[#allocation2 + $0xd0] sm:$0x3] %vm260_vm2, %v1833_v1  ;;  %288 = vst.msk [vmem:[#allocation2 + $0xe8] sm:$0x3] %vm260_vm2, %v1833_v1 }
  0x1d   : > { %291 = vst.msk [vmem:[#allocation2 + $0x100] sm:$0x3] %vm260_vm2, %v1833_v1  ;;  %294 = vst.msk [vmem:[#allocation2 + $0x118] sm:$0x3] %vm260_vm2, %v1833_v1 }
  0x1e   : > { %297 = vst.msk [vmem:[#allocation2 + $0x130] sm:$0x3] %vm260_vm2, %v1833_v1  ;;  %300 = vst.msk [vmem:[#allocation2 + $0x148] sm:$0x3] %vm260_vm2, %v1833_v1  ;;  %1727 = vmatmul.mubr.msk.f32.gmra.mrb[6].mxu0 %vm257_vm1, %v1974_v14 }
  0x1f   : > { %303 = vst.msk [vmem:[#allocation2 + $0x160] sm:$0x3] %vm260_vm2, %v1833_v1  ;;  %306 = vst.msk [vmem:[#allocation2 + $0x178] sm:$0x3] %vm260_vm2, %v1833_v1  ;;  %1729 = vmatprep.mubr.msk.f32.mxu0 %vm257_vm1, %v1977_v15 }
  0x20   : > { %309 = vst.msk [vmem:[#allocation2 + $0x190] sm:$0x3] %vm260_vm2, %v1833_v1  ;;  %312 = vst.msk [vmem:[#allocation2 + $0x1a8] sm:$0x3] %vm260_vm2, %v1833_v1  ;;  %v383_v11 = vld [vmem:[#allocation2 + $0x9] sm:$0xff] }
  0x21   : > { %314 = vst.msk [vmem:[#allocation2 + $0x19] sm:$0xff] %vm257_vm1, %v225_v3  ;;  %315 = vst.msk [vmem:[#allocation2 + $0x21] sm:$0xff] %vm257_vm1, %v226_v4  ;;  %v419_v12 = vld [vmem:[#allocation2 + $0xa] sm:$0xff] }
  0x22   : > { %316 = vst.msk [vmem:[#allocation2 + $0x31] sm:$0xff] %vm257_vm1, %v227_v5  ;;  %317 = vst.msk [vmem:[#allocation2 + $0x39] sm:$0xff] %vm257_vm1, %v228_v6  ;;  %v455_v34 = vmax.f32 %v383_v11, %v419_v12  ;;  %1730 = vmatmul.mubr.msk.f32.gmra.mrb[8].mxu0 %vm257_vm1, %v1983_v16 }
  0x23   : > { %318 = vst.msk [vmem:[#allocation2 + $0x49] sm:$0xff] %vm257_vm1, %v229_v7  ;;  %319 = vst.msk [vmem:[#allocation2 + $0x51] sm:$0xff] %vm257_vm1, %v230_v8  ;;  %1732 = vmatprep.mubr.msk.f32.mxu0 %vm257_vm1, %v1988_v17 }
  0x24   : > { %320 = vst.msk [vmem:[#allocation2 + $0x61] sm:$0xff] %vm257_vm1, %v231_v13  ;;  %321 = vst.msk [vmem:[#allocation2 + $0x69] sm:$0xff] %vm257_vm1, %v1974_v14  ;;  %v491_v51 = vmax.f32 %v347_v30, %v455_v34 }
  0x25   : > { %322 = vst.msk [vmem:[#allocation2 + $0x79] sm:$0xff] %vm257_vm1, %v1977_v15  ;;  %323 = vst.msk [vmem:[#allocation2 + $0x81] sm:$0xff] %vm257_vm1, %v1983_v16 }
  0x26   : > { %324 = vst.msk [vmem:[#allocation2 + $0x91] sm:$0xff] %vm257_vm1, %v1988_v17  ;;  %325 = vst.msk [vmem:[#allocation2 + $0x99] sm:$0xff] %vm257_vm1, %v1991_v18  ;;  %1733 = vmatmul.mubr.msk.f32.gmra.mrb[10].mxu0 %vm257_vm1, %v1991_v18 }
  0x27   : > { %326 = vst.msk [vmem:[#allocation2 + $0xa9] sm:$0xff] %vm257_vm1, %v2000_v20  ;;  %327 = vst.msk [vmem:[#allocation2 + $0xb1] sm:$0xff] %vm257_vm1, %v2003_v21  ;;  %1735 = vmatprep.mubr.msk.f32.mxu0 %vm257_vm1, %v2000_v20 }
  0x28   : > { %328 = vst.msk [vmem:[#allocation2 + $0xc1] sm:$0xff] %vm257_vm1, %v2006_v22  ;;  %v348_v27 = vld [vmem:[#allocation2 + $0x18] sm:$0xff]  ;;  %329 = vst.msk [vmem:[#allocation2 + $0xc9] sm:$0xff] %vm257_vm1, %v2014_v24  ;;  %v349_v37 = vld [vmem:[#allocation2 + $0x20] sm:$0xff] }
  0x29   : > { %v350_v28 = vld [vmem:[#allocation2 + $0x30] sm:$0xff]  ;;  %v384_v29 = vld [vmem:[#allocation2 + $0x19] sm:$0xff]  ;;  %330 = vst.msk [vmem:[#allocation2 + $0xd9] sm:$0xff] %vm257_vm1, %v2019_v25  ;;  %331 = vst.msk [vmem:[#allocation2 + $0xe1] sm:$0xff] %vm257_vm1, %v2022_v26 }
  0x2a   : > { %v386_v31 = vld [vmem:[#allocation2 + $0x31] sm:$0xff]  ;;  %v420_v32 = vld [vmem:[#allocation2 + $0x1a] sm:$0xff]  ;;  %v421_v42 = vld [vmem:[#allocation2 + $0x22] sm:$0xff]  ;;  %1736 = vmatmul.mubr.msk.f32.gmra.mrb[12].mxu0 %vm257_vm1, %v2003_v21 }
  0x2b   : > { %v422_v33 = vld [vmem:[#allocation2 + $0x32] sm:$0xff]  ;;  %v456_v35 = vmax.f32 %v384_v29, %v420_v32  ;;  %v385_v39 = vld [vmem:[#allocation2 + $0x21] sm:$0xff]  ;;  %v388_v49 = vld [vmem:[#allocation2 + $0x49] sm:$0xff]  ;;  %1738 = vmatprep.mubr.msk.f32.mxu0 %vm257_vm1, %v2006_v22 }
  0x2c   : > { %v458_v36 = vmax.f32 %v386_v31, %v422_v33  ;;  %v351_v38 = vld [vmem:[#allocation2 + $0x38] sm:$0xff]  ;;  %v457_v46 = vmax.f32 %v385_v39, %v421_v42  ;;  %v352_v48 = vld [vmem:[#allocation2 + $0x48] sm:$0xff]  ;;  %v353_v53 = vld [vmem:[#allocation2 + $0x50] sm:$0xff] }
  0x2d   : > { %v387_v41 = vld [vmem:[#allocation2 + $0x39] sm:$0xff]  ;;  %v492_v44 = vmax.f32 %v348_v27, %v456_v35  ;;  %v424_v50 = vld [vmem:[#allocation2 + $0x4a] sm:$0xff]  ;;  %v390_v61 = vld [vmem:[#allocation2 + $0x61] sm:$0xff] }
  0x2e   : > { %v423_v43 = vld [vmem:[#allocation2 + $0x3a] sm:$0xff]  ;;  %v494_v45 = vmax.f32 %v350_v28, %v458_v36  ;;  %v460_v52 = vmax.f32 %v388_v49, %v424_v50  ;;  %v389_v54 = vld [vmem:[#allocation2 + $0x51] sm:$0xff]  ;;  %v493_v57 = vmax.f32 %v349_v37, %v457_v46  ;;  %v426_v62 = vld [vmem:[#allocation2 + $0x62] sm:$0xff]  ;;  %1739 = vmatmul.mubr.msk.f32.gmra.mrb[14].mxu0 %vm257_vm1, %v2014_v24 }
  0x2f   : > { %v459_v47 = vmax.f32 %v387_v41, %v423_v43  ;;  %v425_v55 = vld [vmem:[#allocation2 + $0x52] sm:$0xff]  ;;  %v354_v60 = vld [vmem:[#allocation2 + $0x60] sm:$0xff]  ;;  %v462_v0 = vmax.f32 %v390_v61, %v426_v62  ;;  %v355_v1 = vld [vmem:[#allocation2 + $0x68] sm:$0xff]  ;;  %1741 = vmatprep.mubr.msk.f32.mxu0 %vm257_vm1, %v2019_v25 }
  0x30   : > { %v526_v56 = vmax.f32 %v492_v44, %v494_v45  ;;  %v461_v59 = vmax.f32 %v389_v54, %v425_v55  ;;  %v2035_v63 = vmax.f32 %v352_v48, %v460_v52  ;;  %v391_v2 = vld [vmem:[#allocation2 + $0x69] sm:$0xff]  ;;  %v356_v8 = vld [vmem:[#allocation2 + $0x78] sm:$0xff]  ;;  %v357_v14 = vld [vmem:[#allocation2 + $0x80] sm:$0xff] }
  0x31   : > { %v495_v58 = vmax.f32 %v351_v38, %v459_v47  ;;  %v427_v3 = vld [vmem:[#allocation2 + $0x6a] sm:$0xff]  ;;  %v392_v9 = vld [vmem:[#allocation2 + $0x79] sm:$0xff]  ;;  %v2042_v12 = vmax.f32 %v354_v60, %v462_v0  ;;  %v393_v19 = vld [vmem:[#allocation2 + $0x81] sm:$0xff] }
  0x32   : > { %v558_v4 = vmax.f32 %v490_v40, %v526_v56  ;;  %v2039_v6 = vmax.f32 %v353_v53, %v461_v59  ;;  %v463_v7 = vmax.f32 %v391_v2, %v427_v3  ;;  %v428_v10 = vld [vmem:[#allocation2 + $0x7a] sm:$0xff]  ;;  %v528_v11 = vmax.f32 %v494_v45, %v2035_v63  ;;  %v429_v23 = vld [vmem:[#allocation2 + $0x82] sm:$0xff]  ;;  %v358_v30 = vld [vmem:[#allocation2 + $0x90] sm:$0xff]  ;;  %1742 = vmatmul.mubr.msk.f32.gmra.mrb[16].mxu0 %vm257_vm1, %v2022_v26 }
  0x33   : > { %v527_v5 = vmax.f32 %v493_v57, %v495_v58  ;;  %v464_v13 = vmax.f32 %v392_v9, %v428_v10  ;;  %v465_v29 = vmax.f32 %v393_v19, %v429_v23  ;;  %v394_v31 = vld [vmem:[#allocation2 + $0x91] sm:$0xff]  ;;  %v530_v34 = vmax.f32 %v2035_v63, %v2042_v12  ;;  %v395_v37 = vld [vmem:[#allocation2 + $0x99] sm:$0xff]  ;;  %v396_v43 = vld [vmem:[#allocation2 + $0xa9] sm:$0xff] }
  0x34   : > { %1767 = vmatprep.mubr.msk.f32.mxu1 %vm257_vm1, %v558_v4  ;;  %v529_v15 = vmax.f32 %v495_v58, %v2039_v6  ;;  %v2046_v28 = vmax.f32 %v355_v1, %v463_v7  ;;  %v430_v32 = vld [vmem:[#allocation2 + $0x92] sm:$0xff]  ;;  %v560_v33 = vmax.f32 %v492_v44, %v528_v11  ;;  %v431_v38 = vld [vmem:[#allocation2 + $0x9a] sm:$0xff]  ;;  %v432_v44 = vld [vmem:[#allocation2 + $0xaa] sm:$0xff] }
  0x35   : > { %v559_v27 = vmax.f32 %v491_v51, %v527_v5  ;;  %v2050_v35 = vmax.f32 %v356_v8, %v464_v13  ;;  %v466_v36 = vmax.f32 %v394_v31, %v430_v32  ;;  %v2057_v41 = vmax.f32 %v357_v14, %v465_v29  ;;  %v359_v16 = vld [vmem:[#allocation2 + $0x98] sm:$0xff]  ;;  %v360_v52 = vld [vmem:[#allocation2 + $0xa8] sm:$0xff]  ;;  %v362_v62 = vld [vmem:[#allocation2 + $0xc0] sm:$0xff] }
  0x36   : > { %v561_v39 = vmax.f32 %v493_v57, %v529_v15  ;;  %v531_v40 = vmax.f32 %v2039_v6, %v2046_v28  ;;  %v467_v42 = vmax.f32 %v395_v37, %v431_v38  ;;  %v562_v46 = vmax.f32 %v494_v45, %v530_v34  ;;  %v397_v50 = vld [vmem:[#allocation2 + $0xb1] sm:$0xff]  ;;  %v398_v53 = vld [vmem:[#allocation2 + $0xc1] sm:$0xff]  ;;  %v399_v60 = vld [vmem:[#allocation2 + $0xc9] sm:$0xff] }
  0x37   : > { %1768 = vmatmul.mubr.msk.f32.vlgmr.msra.gmra.mrb[0].mxu1 %vm257_vm1, %v559_v27  ;;  %v532_v47 = vmax.f32 %v2042_v12, %v2050_v35  ;;  %v2062_v48 = vmax.f32 %v358_v30, %v466_v36  ;;  %v468_v49 = vmax.f32 %v396_v43, %v432_v44  ;;  %v433_v51 = vld [vmem:[#allocation2 + $0xb2] sm:$0xff]  ;;  %v434_v54 = vld [vmem:[#allocation2 + $0xc2] sm:$0xff]  ;;  %v533_v55 = vmax.f32 %v2046_v28, %v2057_v41  ;;  %v435_v61 = vld [vmem:[#allocation2 + $0xca] sm:$0xff] }
  0x38   : > { %1770 = vmatprep.mubr.msk.f32.mxu1 %vm257_vm1, %v560_v33  ;;  %v563_v45 = vmax.f32 %v495_v58, %v531_v40  ;;  %v2071_v56 = vmax.f32 %v359_v16, %v467_v42  ;;  %v361_v57 = vld [vmem:[#allocation2 + $0xb0] sm:$0xff]  ;;  %v469_v59 = vmax.f32 %v397_v50, %v433_v51  ;;  %v470_v0 = vmax.f32 %v398_v53, %v434_v54  ;;  %v400_v1 = vld [vmem:[#allocation2 + $0xd9] sm:$0xff]  ;;  %v363_v3 = vld [vmem:[#allocation2 + $0xc8] sm:$0xff] }
  0x39   : > { %v564_v17 = vmax.f32 %v2035_v63, %v532_v47  ;;  %v534_v18 = vmax.f32 %v2050_v35, %v2062_v48  ;;  %v2077_v58 = vmax.f32 %v360_v52, %v468_v49  ;;  %v436_v2 = vld [vmem:[#allocation2 + $0xda] sm:$0xff]  ;;  %v437_v5 = vld [vmem:[#allocation2 + $0xe2] sm:$0xff]  ;;  %v2080_v7 = vld [vmem:[%s1955_s28 + $0x90] sm:$0xff]  ;;  %v471_v9 = vmax.f32 %v399_v60, %v435_v61 }
  0x3a   : > { %v401_v4 = vld [vmem:[#allocation2 + $0xe1] sm:$0xff]  ;;  %v2083_v8 = vld [vmem:[%s1955_s28 + $0x98] sm:$0xff]  ;;  %332 = vst.msk [vmem:[#allocation2 + $0xf1] sm:$0xff] %vm257_vm1, %v2080_v7  ;;  %v2100_v11 = vld [vmem:[%s1955_s28 + $0xb0] sm:$0xff]  ;;  %v565_v20 = vmax.f32 %v2039_v6, %v533_v55  ;;  %v535_v14 = vmax.f32 %v2057_v41, %v2071_v56  ;;  %v2111_v19 = vmax.f32 %v361_v57, %v469_v59  ;;  %v2134_v29 = vmax.f32 %v362_v62, %v470_v0 }
  0x3b   : > { %1771 = vmatmul.mubr.msk.f32.gmra.mrb[2].mxu1 %vm257_vm1, %v561_v39  ;;  %v2086_v63 = vld [vmem:[%s1955_s28 + $0xa0] sm:$0xff]  ;;  %333 = vst.msk [vmem:[#allocation2 + $0xf9] sm:$0xff] %vm257_vm1, %v2083_v8  ;;  %v2095_v10 = vld [vmem:[%s1955_s28 + $0xa8] sm:$0xff]  ;;  %v2103_v13 = vld [vmem:[%s1955_s28 + $0xb8] sm:$0xff]  ;;  %v566_v27 = vmax.f32 %v2042_v12, %v534_v18  ;;  %v536_v15 = vmax.f32 %v2062_v48, %v2077_v58  ;;  %v472_v30 = vmax.f32 %v400_v1, %v436_v2 }
  0x3c   : > { %1773 = vmatprep.mubr.msk.f32.mxu1 %vm257_vm1, %v562_v46  ;;  %334 = vst.msk [vmem:[#allocation2 + $0x109] sm:$0xff] %vm257_vm1, %v2086_v63  ;;  %335 = vst.msk [vmem:[#allocation2 + $0x111] sm:$0xff] %vm257_vm1, %v2095_v10  ;;  %v2120_v21 = vld [vmem:[%s1955_s28 + $0xc0] sm:$0xff]  ;;  %v2123_v6 = vld [vmem:[%s1955_s28 + $0xc8] sm:$0xff]  ;;  %v2163_v36 = vmax.f32 %v363_v3, %v471_v9  ;;  %v473_v37 = vmax.f32 %v401_v4, %v437_v5  ;;  %v567_v38 = vmax.f32 %v2046_v28, %v535_v14 }
  0x3d   : > { %336 = vst.msk [vmem:[#allocation2 + $0x121] sm:$0xff] %vm257_vm1, %v2100_v11  ;;  %337 = vst.msk [vmem:[#allocation2 + $0x129] sm:$0xff] %vm257_vm1, %v2103_v13  ;;  %v2126_v23 = vld [vmem:[%s1955_s28 + $0xd0] sm:$0xff]  ;;  %v2141_v31 = vld [vmem:[%s1955_s28 + $0xd8] sm:$0xff]  ;;  %v537_v39 = vmax.f32 %v2071_v56, %v2111_v19  ;;  %v568_v42 = vmax.f32 %v2050_v35, %v536_v15  ;;  %v538_v43 = vmax.f32 %v2077_v58, %v2134_v29  ;;  %1744 = vmatprep.mubr.msk.f32.mxu0 %vm257_vm1, %v2080_v7 }
  0x3e   : > { %338 = vst.msk [vmem:[#allocation2 + $0x139] sm:$0xff] %vm257_vm1, %v2120_v21  ;;  %339 = vst.msk [vmem:[#allocation2 + $0x141] sm:$0xff] %vm257_vm1, %v2123_v6  ;;  %v2146_v22 = vld [vmem:[%s1955_s28 + $0xe0] sm:$0xff]  ;;  %v2149_v12 = vld [vmem:[%s1955_s28 + $0xe8] sm:$0xff]  ;;  %v539_v28 = vmax.f32 %v2111_v19, %v2163_v36  ;;  %1745 = vmatmul.mubr.msk.f32.gmra.mrb[18].mxu0 %vm257_vm1, %v2083_v8 }
  0x3f   : > { %1774 = vmatmul.mubr.msk.f32.gmra.mrb[4].mxu1 %vm257_vm1, %v563_v45  ;;  %340 = vst.msk [vmem:[#allocation2 + $0x151] sm:$0xff] %vm257_vm1, %v2126_v23  ;;  %v364_v32 = vld [vmem:[#allocation2 + $0xd8] sm:$0xff]  ;;  %341 = vst.msk [vmem:[#allocation2 + $0x159] sm:$0xff] %vm257_vm1, %v2141_v31  ;;  %v2158_v33 = vld [vmem:[%s1955_s28 + $0xf0] sm:$0xff]  ;;  %v569_v35 = vmax.f32 %v2057_v41, %v537_v39  ;;  %v570_v45 = vmax.f32 %v2062_v48, %v538_v43  ;;  %1747 = vmatprep.mubr.msk.f32.mxu0 %vm257_vm1, %v2086_v63 }
  0x40   : > { %1776 = vmatprep.mubr.msk.f32.mxu1 %vm257_vm1, %v564_v17  ;;  %342 = vst.msk [vmem:[#allocation2 + $0x169] sm:$0xff] %vm257_vm1, %v2146_v22  ;;  %343 = vst.msk [vmem:[#allocation2 + $0x171] sm:$0xff] %vm257_vm1, %v2149_v12  ;;  %v2161_v34 = vld [vmem:[%s1955_s28 + $0xf8] sm:$0xff]  ;;  %v365_v40 = vld [vmem:[#allocation2 + $0xe0] sm:$0xff]  ;;  %v2181_v44 = vmax.f32 %v364_v32, %v472_v30  ;;  %v571_v18 = vmax.f32 %v2071_v56, %v539_v28 }
  0x41   : > { %344 = vst.msk [vmem:[#allocation2 + $0x181] sm:$0xff] %vm257_vm1, %v2158_v33  ;;  %345 = vst.msk [vmem:[#allocation2 + $0x189] sm:$0xff] %vm257_vm1, %v2161_v34  ;;  %v366_v24 = vld [vmem:[#allocation2 + $0xf0] sm:$0xff]  ;;  %v2185_v16 = vmax.f32 %v365_v40, %v473_v37 }
  0x42   : > { %v402_v46 = vld [vmem:[#allocation2 + $0xf1] sm:$0xff]  ;;  %v403_v50 = vld [vmem:[#allocation2 + $0xf9] sm:$0xff]  ;;  %v540_v55 = vmax.f32 %v2134_v29, %v2181_v44  ;;  %1748 = vmatmul.mubr.msk.f32.gmra.mrb[20].mxu0 %vm257_vm1, %v2095_v10 }
  0x43   : > { %1777 = vmatmul.mubr.msk.f32.gmra.mrb[6].mxu1 %vm257_vm1, %v565_v20  ;;  %v438_v47 = vld [vmem:[#allocation2 + $0xf2] sm:$0xff]  ;;  %v439_v25 = vld [vmem:[#allocation2 + $0xfa] sm:$0xff]  ;;  %v404_v53 = vld [vmem:[#allocation2 + $0x109] sm:$0xff]  ;;  %v541_v62 = vmax.f32 %v2163_v36, %v2185_v16  ;;  %1750 = vmatprep.mubr.msk.f32.mxu0 %vm257_vm1, %v2100_v11 }
  0x44   : > { %1779 = vmatprep.mubr.msk.f32.mxu1 %vm257_vm1, %v566_v27  ;;  %v474_v49 = vmax.f32 %v402_v46, %v438_v47  ;;  %v367_v51 = vld [vmem:[#allocation2 + $0xf8] sm:$0xff]  ;;  %v475_v52 = vmax.f32 %v403_v50, %v439_v25  ;;  %v440_v54 = vld [vmem:[#allocation2 + $0x10a] sm:$0xff]  ;;  %v406_v61 = vld [vmem:[#allocation2 + $0x121] sm:$0xff]  ;;  %v572_v56 = vmax.f32 %v2077_v58, %v540_v55 }
  0x45   : > { %v368_v26 = vld [vmem:[#allocation2 + $0x108] sm:$0xff]  ;;  %v476_v59 = vmax.f32 %v404_v53, %v440_v54  ;;  %v405_v60 = vld [vmem:[#allocation2 + $0x111] sm:$0xff]  ;;  %v370_v8 = vld [vmem:[#allocation2 + $0x120] sm:$0xff]  ;;  %v573_v14 = vmax.f32 %v2111_v19, %v541_v62 }
  0x46   : > { %v2197_v57 = vmax.f32 %v366_v24, %v474_v49  ;;  %v441_v41 = vld [vmem:[#allocation2 + $0x112] sm:$0xff]  ;;  %v442_v17 = vld [vmem:[#allocation2 + $0x122] sm:$0xff]  ;;  %v2205_v48 = vmax.f32 %v367_v51, %v475_v52  ;;  %v443_v7 = vld [vmem:[#allocation2 + $0x12a] sm:$0xff]  ;;  %1751 = vmatmul.mubr.msk.f32.gmra.mrb[22].mxu0 %vm257_vm1, %v2103_v13 }
  0x47   : > { %1780 = vmatmul.mubr.msk.f32.gmra.mrb[8].mxu1 %vm257_vm1, %v567_v38  ;;  %v2207_v0 = vmax.f32 %v368_v26, %v476_v59  ;;  %v477_v1 = vmax.f32 %v405_v60, %v441_v41  ;;  %v369_v3 = vld [vmem:[#allocation2 + $0x110] sm:$0xff]  ;;  %v478_v4 = vmax.f32 %v406_v61, %v442_v17  ;;  %v408_v9 = vld [vmem:[#allocation2 + $0x139] sm:$0xff]  ;;  %v409_v30 = vld [vmem:[#allocation2 + $0x141] sm:$0xff]  ;;  %1753 = vmatprep.mubr.msk.f32.mxu0 %vm257_vm1, %v2120_v21 }
  0x48   : > { %1782 = vmatprep.mubr.msk.f32.mxu1 %vm257_vm1, %v568_v42  ;;  %v542_v2 = vmax.f32 %v2181_v44, %v2197_v57  ;;  %v407_v5 = vld [vmem:[#allocation2 + $0x129] sm:$0xff]  ;;  %v444_v20 = vld [vmem:[#allocation2 + $0x13a] sm:$0xff]  ;;  %v543_v58 = vmax.f32 %v2185_v16, %v2205_v48  ;;  %v410_v40 = vld [vmem:[#allocation2 + $0x151] sm:$0xff] }
  0x49   : > { %v544_v63 = vmax.f32 %v2197_v57, %v2207_v0  ;;  %v2223_v27 = vmax.f32 %v369_v3, %v477_v1  ;;  %v479_v15 = vmax.f32 %v407_v5, %v443_v7  ;;  %v445_v32 = vld [vmem:[#allocation2 + $0x142] sm:$0xff]  ;;  %v2227_v37 = vmax.f32 %v370_v8, %v478_v4  ;;  %v372_v39 = vld [vmem:[#allocation2 + $0x138] sm:$0xff] }
  0x4a   : > { %v574_v19 = vmax.f32 %v2134_v29, %v542_v2  ;;  %v371_v10 = vld [vmem:[#allocation2 + $0x128] sm:$0xff]  ;;  %v480_v38 = vmax.f32 %v408_v9, %v444_v20  ;;  %v446_v42 = vld [vmem:[#allocation2 + $0x152] sm:$0xff]  ;;  %v481_v43 = vmax.f32 %v409_v30, %v445_v32  ;;  %v575_v24 = vmax.f32 %v2163_v36, %v543_v58  ;;  %v373_v28 = vld [vmem:[#allocation2 + $0x140] sm:$0xff]  ;;  %1754 = vmatmul.mubr.msk.f32.gmra.mrb[24].mxu0 %vm257_vm1, %v2123_v6 }
  0x4b   : > { %1783 = vmatmul.mubr.msk.f32.gmra.mrb[10].mxu1 %vm257_vm1, %v569_v35  ;;  %v576_v29 = vmax.f32 %v2181_v44, %v544_v63  ;;  %v545_v46 = vmax.f32 %v2205_v48, %v2223_v27  ;;  %v2238_v47 = vmax.f32 %v371_v10, %v479_v15  ;;  %v546_v11 = vmax.f32 %v2207_v0, %v2227_v37  ;;  %v411_v50 = vld [vmem:[#allocation2 + $0x159] sm:$0xff]  ;;  %v374_v36 = vld [vmem:[#allocation2 + $0x150] sm:$0xff]  ;;  %v414_v41 = vld [vmem:[#allocation2 + $0x181] sm:$0xff] }
  0x4c   : > { %1785 = vmatprep.mubr.msk.f32.mxu1 %vm257_vm1, %v570_v45  ;;  %v2243_v49 = vmax.f32 %v372_v39, %v480_v38  ;;  %v482_v13 = vmax.f32 %v410_v40, %v446_v42  ;;  %v447_v25 = vld [vmem:[#allocation2 + $0x15a] sm:$0xff]  ;;  %v412_v44 = vld [vmem:[#allocation2 + $0x169] sm:$0xff]  ;;  %v2247_v51 = vmax.f32 %v373_v28, %v481_v43  ;;  %1756 = vmatprep.mubr.msk.f32.mxu0 %vm257_vm1, %v2126_v23  ;;  %v413_v59 = vld [vmem:[#allocation2 + $0x171] sm:$0xff] }
  0x4d   : > { %v448_v35 = vld [vmem:[#allocation2 + $0x16a] sm:$0xff]  ;;  %v577_v52 = vmax.f32 %v2185_v16, %v545_v46  ;;  %v547_v53 = vmax.f32 %v2223_v27, %v2238_v47  ;;  %v483_v54 = vmax.f32 %v411_v50, %v447_v25  ;;  %v578_v21 = vmax.f32 %v2197_v57, %v546_v11  ;;  %v375_v6 = vld [vmem:[#allocation2 + $0x158] sm:$0xff]  ;;  %v450_v61 = vld [vmem:[#allocation2 + $0x182] sm:$0xff] }
  0x4e   : > { %v548_v45 = vmax.f32 %v2227_v37, %v2243_v49  ;;  %v518_v55 = vmax.f32 %v374_v36, %v482_v13  ;;  %v484_v26 = vmax.f32 %v412_v44, %v448_v35  ;;  %v449_v60 = vld [vmem:[#allocation2 + $0x172] sm:$0xff]  ;;  %v376_v16 = vld [vmem:[#allocation2 + $0x168] sm:$0xff]  ;;  %v549_v17 = vmax.f32 %v2238_v47, %v2247_v51  ;;  %1757 = vmatmul.mubr.msk.f32.gmra.mrb[26].mxu0 %vm257_vm1, %v2141_v31  ;;  %v378_v5 = vld [vmem:[#allocation2 + $0x180] sm:$0xff] }
  0x4f   : > { %1786 = vmatmul.mubr.msk.f32.gmra.mrb[12].mxu1 %vm257_vm1, %v571_v18  ;;  %v579_v23 = vmax.f32 %v2205_v48, %v547_v53  ;;  %v519_v57 = vmax.f32 %v375_v6, %v483_v54  ;;  %v485_v18 = vmax.f32 %v413_v59, %v449_v60  ;;  %1759 = vmatprep.mubr.msk.f32.mxu0 %vm257_vm1, %v2146_v22  ;;  %v377_v2 = vld [vmem:[#allocation2 + $0x170] sm:$0xff]  ;;  %v416_v7 = vld [vmem:[#allocation2 + $0x199] sm:$0xff]  ;;  %v379_v63 = vld [vmem:[#allocation2 + $0x188] sm:$0xff] }
  0x50   : > { %1788 = vmatprep.mubr.msk.f32.mxu1 %vm257_vm1, %v572_v56  ;;  %v580_v62 = vmax.f32 %v2207_v0, %v548_v45  ;;  %v550_v1 = vmax.f32 %v2243_v49, %v518_v55  ;;  %v520_v56 = vmax.f32 %v376_v16, %v484_v26  ;;  %v486_v3 = vmax.f32 %v414_v41, %v450_v61  ;;  %v415_v4 = vld [vmem:[#allocation2 + $0x189] sm:$0xff]  ;;  %v452_v8 = vld [vmem:[#allocation2 + $0x19a] sm:$0xff] }
  0x51   : > { %v451_v31 = vld [vmem:[#allocation2 + $0x18a] sm:$0xff]  ;;  %v581_v48 = vmax.f32 %v2223_v27, %v549_v17  ;;  %v551_v22 = vmax.f32 %v2247_v51, %v519_v57  ;;  %v521_v0 = vmax.f32 %v377_v2, %v485_v18  ;;  %v488_v27 = vmax.f32 %v416_v7, %v452_v8  ;;  %v417_v15 = vld [vmem:[#allocation2 + $0x1a1] sm:$0xff]  ;;  %v2323_v59 = vld [vmem:[%s2543_s4] ss:$0 sm:$0xff] }
  0x52   : > { %1760 = vmatmul.mubr.msk.f32.gmra.mrb[28].mxu0 %vm257_vm1, %v2149_v12  ;;  %v487_v9 = vmax.f32 %v415_v4, %v451_v31  ;;  %v582_v20 = vmax.f32 %v2227_v37, %v550_v1  ;;  %v522_v58 = vmax.f32 %v378_v5, %v486_v3  ;;  %v453_v30 = vld [vmem:[#allocation2 + $0x1a2] sm:$0xff]  ;;  %v380_v12 = vld [vmem:[#allocation2 + $0x198] sm:$0xff] }
  0x53   : > { %1789 = vmatmul.mubr.msk.f32.gmra.mrb[14].mxu1 %vm257_vm1, %v573_v14  ;;  %1762 = vmatprep.mubr.msk.f32.mxu0 %vm257_vm1, %v2158_v33  ;;  %v552_v14 = vmax.f32 %v518_v55, %v520_v56  ;;  %v583_v32 = vmax.f32 %v2238_v47, %v551_v22  ;;  %v489_v10 = vmax.f32 %v417_v15, %v453_v30  ;;  %v381_v40 = vld [vmem:[#allocation2 + $0x1a0] sm:$0xff] }
  0x54   : > { %1791 = vmatprep.mubr.msk.f32.mxu1 %vm257_vm1, %v574_v19  ;;  %v553_v19 = vmax.f32 %v519_v57, %v521_v0  ;;  %v523_v33 = vmax.f32 %v379_v63, %v487_v9  ;;  %v554_v38 = vmax.f32 %v520_v56, %v522_v58  ;;  %v524_v39 = vmax.f32 %v380_v12, %v488_v27 }
  0x55   : > { %v584_v37 = vmax.f32 %v2243_v49, %v552_v14  ;;  %v2298_v49 = vld [vmem:[%s2541_s2] ss:$0 sm:$0xff] }
  0x56   : > { %1763 = vmatmul.mubr.msk.f32.gmra.mrb[30].mxu0 %vm257_vm1, %v2161_v34  ;;  %v585_v42 = vmax.f32 %v2247_v51, %v553_v19  ;;  %v555_v43 = vmax.f32 %v521_v0, %v523_v33  ;;  %v525_v34 = vmax.f32 %v381_v40, %v489_v10 }
  0x57   : > { %1792 = vmatmul.mubr.msk.f32.gmra.mrb[16].mxu1 %vm257_vm1, %v575_v24  ;;  %v586_v24 = vmax.f32 %v518_v55, %v554_v38 }
  0x58   : > { %1794 = vmatprep.mubr.msk.f32.mxu1 %vm257_vm1, %v576_v29  ;;  %v556_v29 = vmax.f32 %v522_v58, %v524_v39  ;;  %v587_v46 = vmax.f32 %v519_v57, %v555_v43  ;;  %v557_v47 = vmax.f32 %v523_v33, %v525_v34 }
  0x5a   : > { %v588_v28 = vmax.f32 %v520_v56, %v556_v29  ;;  %v589_v11 = vmax.f32 %v521_v0, %v557_v47 }
  0x5b   : > { %1795 = vmatmul.mubr.msk.f32.gmra.mrb[18].mxu1 %vm257_vm1, %v577_v52 }
  0x5c   : > { %1797 = vmatprep.mubr.msk.f32.mxu1 %vm257_vm1, %v578_v21 }
  0x5f   : > { %1798 = vmatmul.mubr.msk.f32.gmra.mrb[20].mxu1 %vm257_vm1, %v579_v23 }
  0x60   : > { %1800 = vmatprep.mubr.msk.f32.mxu1 %vm257_vm1, %v580_v62 }
  0x63   : > { %1801 = vmatmul.mubr.msk.f32.gmra.mrb[22].mxu1 %vm257_vm1, %v581_v48 }
  0x64   : > { %1803 = vmatprep.mubr.msk.f32.mxu1 %vm257_vm1, %v582_v20 }
  0x67   : > { %1804 = vmatmul.mubr.msk.f32.gmra.mrb[24].mxu1 %vm257_vm1, %v583_v32 }
  0x68   : > { %1806 = vmatprep.mubr.msk.f32.mxu1 %vm257_vm1, %v584_v37 }
  0x6b   : > { %1807 = vmatmul.mubr.msk.f32.gmra.mrb[26].mxu1 %vm257_vm1, %v585_v42 }
  0x6c   : > { %1809 = vmatprep.mubr.msk.f32.mxu1 %vm257_vm1, %v586_v24 }
  0x6f   : > { %1810 = vmatmul.mubr.msk.f32.gmra.mrb[28].mxu1 %vm257_vm1, %v587_v46 }
  0x70   : > { %1812 = vmatprep.mubr.msk.f32.mxu1 %vm257_vm1, %v588_v28 }
  0x73   : > { %1813 = vmatmul.mubr.msk.f32.gmra.mrb[30].mxu1 %vm257_vm1, %v589_v11 }
  0xe5   : > { %v1719_v13 = vpop.f32.mrb[0].mxu0 }
  0xe6   : > { %v771_v50 = vadd.f32 %v1719_v13, %v2298_v49  ;;  %v765_v25 = vpop.f32.mrb[1].mxu0 }
  0xe7   : > { %v766_v36 = vadd.f32 %v2298_v49, %v765_v25 }
  0xe8   : > { %v925_v44 = vmax.f32 %v771_v50, 0.0 }
  0xe9   : > { %v924_v35 = vmax.f32 %v766_v36, 0.0  ;;  %v1722_v51 = vpop.f32.mrb[2].mxu0 }
  0xea   : > { %1321 = vst.msk [vmem:[%s2306_s8 + $0x8] sm:$0xff] %vm1319_vm3, %v925_v44  ;;  %v781_v52 = vadd.f32 %v1722_v51, %v2298_v49  ;;  %v775_v54 = vpop.f32.mrb[3].mxu0 }
  0xeb   : > { %1320 = vst.msk [vmem:[%s2306_s8] sm:$0xff] %vm1319_vm3, %v924_v35  ;;  %v776_v21 = vadd.f32 %v2298_v49, %v775_v54 }
  0xec   : > { %v927_v53 = vmax.f32 %v781_v52, 0.0 }
  0xed   : > { %v926_v45 = vmax.f32 %v776_v21, 0.0  ;;  %v1725_v55 = vpop.f32.mrb[4].mxu0 }
  0xee   : > { %1323 = vst.msk [vmem:[%s2306_s8 + $0x18] sm:$0xff] %vm1319_vm3, %v927_v53  ;;  %v791_v6 = vadd.f32 %v1725_v55, %v2298_v49  ;;  %v785_v26 = vpop.f32.mrb[5].mxu0 }
  0xef   : > { %1322 = vst.msk [vmem:[%s2306_s8 + $0x10] sm:$0xff] %vm1319_vm3, %v926_v45  ;;  %v786_v60 = vadd.f32 %v2298_v49, %v785_v26 }
  0xf0   : > { %v929_v16 = vmax.f32 %v791_v6, 0.0 }
  0xf1   : > { %v928_v61 = vmax.f32 %v786_v60, 0.0  ;;  %v1728_v17 = vpop.f32.mrb[6].mxu0 }
  0xf2   : > { %1325 = vst.msk [vmem:[%s2306_s8 + $0x28] sm:$0xff] %vm1319_vm3, %v929_v16  ;;  %v801_v18 = vadd.f32 %v1728_v17, %v2298_v49  ;;  %v795_v62 = vpop.f32.mrb[7].mxu0 }
  0xf3   : > { %1324 = vst.msk [vmem:[%s2306_s8 + $0x20] sm:$0xff] %vm1319_vm3, %v928_v61  ;;  %v796_v1 = vadd.f32 %v2298_v49, %v795_v62 }
  0xf4   : > { %v931_v3 = vmax.f32 %v801_v18, 0.0 }
  0xf5   : > { %v930_v31 = vmax.f32 %v796_v1, 0.0  ;;  %v1731_v5 = vpop.f32.mrb[8].mxu0 }
  0xf6   : > { %1327 = vst.msk [vmem:[%s2306_s8 + $0x38] sm:$0xff] %vm1319_vm3, %v931_v3  ;;  %v811_v48 = vadd.f32 %v1731_v5, %v2298_v49  ;;  %v805_v22 = vpop.f32.mrb[9].mxu0 }
  0xf7   : > { %1326 = vst.msk [vmem:[%s2306_s8 + $0x30] sm:$0xff] %vm1319_vm3, %v930_v31  ;;  %v806_v0 = vadd.f32 %v2298_v49, %v805_v22 }
  0xf8   : > { %v933_v58 = vmax.f32 %v811_v48, 0.0 }
  0xf9   : > { %v932_v27 = vmax.f32 %v806_v0, 0.0  ;;  %v1734_v15 = vpop.f32.mrb[10].mxu0 }
  0xfa   : > { %1329 = vst.msk [vmem:[%s2306_s8 + $0x48] sm:$0xff] %vm1319_vm3, %v933_v58  ;;  %v821_v32 = vadd.f32 %v1734_v15, %v2298_v49  ;;  %v815_v19 = vpop.f32.mrb[11].mxu0 }
  0xfb   : > { %1328 = vst.msk [vmem:[%s2306_s8 + $0x40] sm:$0xff] %vm1319_vm3, %v932_v27  ;;  %v816_v10 = vadd.f32 %v2298_v49, %v815_v19 }
  0xfc   : > { %v935_v38 = vmax.f32 %v821_v32, 0.0 }
  0xfd   : > { %v934_v42 = vmax.f32 %v816_v10, 0.0  ;;  %v1737_v43 = vpop.f32.mrb[12].mxu0 }
  0xfe   : > { %1331 = vst.msk [vmem:[%s2306_s8 + $0x58] sm:$0xff] %vm1319_vm3, %v935_v38  ;;  %v831_v46 = vadd.f32 %v1737_v43, %v2298_v49  ;;  %v825_v47 = vpop.f32.mrb[13].mxu0 }
  0xff   : > { %1330 = vst.msk [vmem:[%s2306_s8 + $0x50] sm:$0xff] %vm1319_vm3, %v934_v42  ;;  %v826_v11 = vadd.f32 %v2298_v49, %v825_v47 }
 0x100   : > { %v937_v13 = vmax.f32 %v831_v46, 0.0 }
 0x101   : > { %v936_v36 = vmax.f32 %v826_v11, 0.0  ;;  %v1740_v44 = vpop.f32.mrb[14].mxu0 }
 0x102   : > { %1333 = vst.msk [vmem:[%s2306_s8 + $0x68] sm:$0xff] %vm1319_vm3, %v937_v13  ;;  %v841_v53 = vadd.f32 %v1740_v44, %v2298_v49  ;;  %v835_v54 = vpop.f32.mrb[15].mxu0 }
 0x103   : > { %1332 = vst.msk [vmem:[%s2306_s8 + $0x60] sm:$0xff] %vm1319_vm3, %v936_v36  ;;  %v836_v45 = vadd.f32 %v2298_v49, %v835_v54 }
 0x104   : > { %v939_v55 = vmax.f32 %v841_v53, 0.0 }
 0x105   : > { %v938_v60 = vmax.f32 %v836_v45, 0.0  ;;  %v1743_v16 = vpop.f32.mrb[16].mxu0 }
 0x106   : > { %1335 = vst.msk [vmem:[%s2306_s8 + $0x78] sm:$0xff] %vm1319_vm3, %v939_v55 }
 0x107   : > { %1334 = vst.msk [vmem:[%s2306_s8 + $0x70] sm:$0xff] %vm1319_vm3, %v938_v60 }
 0x10a   : > { %v1769_v41 = vpop.f32.mrb[0].mxu1 }
 0x10b   : > { %v1134_v23 = vadd.f32 %v1769_v41, %v2323_v59  ;;  %v1128_v57 = vpop.f32.mrb[1].mxu1 }
 0x10c   : > { %v1129_v2 = vadd.f32 %v2323_v59, %v1128_v57  ;;  %v845_v57 = vpop.f32.mrb[17].mxu0 }
 0x10d   : > { %v1288_v56 = vmax.f32 %v1134_v23, 0.0  ;;  %v851_v23 = vadd.f32 %v1743_v16, %v2298_v49  ;;  %v846_v62 = vadd.f32 %v2298_v49, %v845_v57 }
 0x10e   : > { %v1772_v4 = vpop.f32.mrb[2].mxu1  ;;  %v1287_v9 = vmax.f32 %v1129_v2, 0.0 }
 0x10f   : > { %v1144_v7 = vadd.f32 %v1772_v4, %v2323_v59  ;;  %1386 = vrot.lane.b32.xlu0 %v1288_v56, %s1834_s11  ;;  %v1138_v8 = vpop.f32.mrb[3].mxu1  ;;  %v941_v1 = vmax.f32 %v851_v23, 0.0  ;;  %v940_v3 = vmax.f32 %v846_v62, 0.0 }
 0x110   : > { %v1139_v14 = vadd.f32 %v2323_v59, %v1138_v8 }
 0x111   : > { %v1290_v20 = vmax.f32 %v1144_v7, 0.0  ;;  %v1746_v4 = vpop.f32.mrb[18].mxu0  ;;  %1337 = vst.msk [vmem:[%s2306_s8 + $0x88] sm:$0xff] %vm1319_vm3, %v941_v1  ;;  %1336 = vst.msk [vmem:[%s2306_s8 + $0x80] sm:$0xff] %vm1319_vm3, %v940_v3 }
 0x112   : > { %v1775_v63 = vpop.f32.mrb[4].mxu1  ;;  %v1289_v37 = vmax.f32 %v1139_v14, 0.0  ;;  %v861_v8 = vadd.f32 %v1746_v4, %v2298_v49  ;;  %v855_v48 = vpop.f32.mrb[19].mxu0 }
 0x113   : > { %1390 = vrot.lane.b32.xlu1 %v1290_v20, %s1834_s11  ;;  %1384 = vrot.lane.b32.xlu0 %v1287_v9, %s1834_s11  ;;  %v1154_v30 = vadd.f32 %v1775_v63, %v2323_v59  ;;  %v1148_v12 = vpop.f32.mrb[5].mxu1  ;;  %v856_v0 = vadd.f32 %v2298_v49, %v855_v48 }
 0x114   : > { %v1149_v33 = vadd.f32 %v2323_v59, %v1148_v12  ;;  %v943_v9 = vmax.f32 %v861_v8, 0.0 }
 0x115   : > { %v1292_v34 = vmax.f32 %v1154_v30, 0.0  ;;  %v942_v58 = vmax.f32 %v856_v0, 0.0  ;;  %v1749_v63 = vpop.f32.mrb[20].mxu0 }
 0x116   : > { %v1291_v39 = vmax.f32 %v1149_v33, 0.0  ;;  %v1778_v40 = vpop.f32.mrb[6].mxu1  ;;  %1339 = vst.msk [vmem:[%s2306_s8 + $0x98] sm:$0xff] %vm1319_vm3, %v943_v9  ;;  %v871_v12 = vadd.f32 %v1749_v63, %v2298_v49  ;;  %v865_v32 = vpop.f32.mrb[21].mxu0 }
 0x117   : > { %1388 = vrot.lane.b32.xlu1 %v1289_v37, %s1834_s11  ;;  %v1164_v24 = vadd.f32 %v1778_v40, %v2323_v59  ;;  %v1158_v29 = vpop.f32.mrb[7].mxu1  ;;  %1338 = vst.msk [vmem:[%s2306_s8 + $0x90] sm:$0xff] %vm1319_vm3, %v942_v58  ;;  %v866_v33 = vadd.f32 %v2298_v49, %v865_v32 }
 0x118   : > { %v1159_v28 = vadd.f32 %v2323_v59, %v1158_v29  ;;  %1392 = vrot.lane.b32.xlu0 %v1291_v39, %s1834_s11  ;;  %v945_v10 = vmax.f32 %v871_v12, 0.0 }
 0x119   : > { %v1294_v35 = vmax.f32 %v1164_v24, 0.0  ;;  %v944_v39 = vmax.f32 %v866_v33, 0.0  ;;  %v1752_v40 = vpop.f32.mrb[22].mxu0 }
 0x11a   : > { %v1293_v50 = vmax.f32 %v1159_v28, 0.0  ;;  %v1781_v25 = vpop.f32.mrb[8].mxu1  ;;  %1341 = vst.msk [vmem:[%s2306_s8 + $0xa8] sm:$0xff] %vm1319_vm3, %v945_v10  ;;  %v881_v24 = vadd.f32 %v1752_v40, %v2298_v49  ;;  %v875_v29 = vpop.f32.mrb[23].mxu0 }
 0x11b   : > { %1394 = vrot.lane.b32.xlu1 %v1292_v34, %s1834_s11  ;;  %v1174_v51 = vadd.f32 %v1781_v25, %v2323_v59  ;;  %v1168_v52 = vpop.f32.mrb[9].mxu1  ;;  %1340 = vst.msk [vmem:[%s2306_s8 + $0xa0] sm:$0xff] %vm1319_vm3, %v944_v39  ;;  %v876_v47 = vadd.f32 %v2298_v49, %v875_v29 }
 0x11c   : > { %v1169_v21 = vadd.f32 %v2323_v59, %v1168_v52  ;;  %1396 = vrot.lane.b32.xlu0 %v1293_v50, %s1834_s11  ;;  %v947_v28 = vmax.f32 %v881_v24, 0.0 }
 0x11d   : > { %v1296_v41 = vmax.f32 %v1174_v51, 0.0  ;;  %v946_v50 = vmax.f32 %v876_v47, 0.0  ;;  %v1755_v25 = vpop.f32.mrb[24].mxu0 }
 0x11e   : > { %v1295_v6 = vmax.f32 %v1169_v21, 0.0  ;;  %v1784_v26 = vpop.f32.mrb[10].mxu1  ;;  %1343 = vst.msk [vmem:[%s2306_s8 + $0xb8] sm:$0xff] %vm1319_vm3, %v947_v28  ;;  %v891_v51 = vadd.f32 %v1755_v25, %v2298_v49  ;;  %v885_v52 = vpop.f32.mrb[25].mxu0 }
 0x11f   : > { %1398 = vrot.lane.b32.xlu1 %v1294_v35, %s1834_s11  ;;  %v1184_v61 = vadd.f32 %v1784_v26, %v2323_v59  ;;  %v1178_v17 = vpop.f32.mrb[11].mxu1  ;;  %1342 = vst.msk [vmem:[%s2306_s8 + $0xb0] sm:$0xff] %vm1319_vm3, %v946_v50  ;;  %v886_v54 = vadd.f32 %v2298_v49, %v885_v52 }
 0x120   : > { %v1179_v18 = vadd.f32 %v2323_v59, %v1178_v17  ;;  %1400 = vrot.lane.b32.xlu0 %v1295_v6, %s1834_s11  ;;  %v949_v21 = vmax.f32 %v891_v51, 0.0 }
 0x121   : > { %v1298_v31 = vmax.f32 %v1184_v61, 0.0  ;;  %v948_v6 = vmax.f32 %v886_v54, 0.0  ;;  %v1758_v26 = vpop.f32.mrb[26].mxu0 }
 0x122   : > { %v1297_v56 = vmax.f32 %v1179_v18, 0.0  ;;  %v1787_v2 = vpop.f32.mrb[12].mxu1  ;;  %1345 = vst.msk [vmem:[%s2306_s8 + $0xc8] sm:$0xff] %vm1319_vm3, %v949_v21  ;;  %v901_v61 = vadd.f32 %v1758_v26, %v2298_v49  ;;  %v895_v17 = vpop.f32.mrb[27].mxu0 }
 0x123   : > { %1402 = vrot.lane.b32.xlu1 %v1296_v41, %s1834_s11  ;;  %v1194_v5 = vadd.f32 %v1787_v2, %v2323_v59  ;;  %v1188_v7 = vpop.f32.mrb[13].mxu1  ;;  %1344 = vst.msk [vmem:[%s2306_s8 + $0xc0] sm:$0xff] %vm1319_vm3, %v948_v6  ;;  %v896_v57 = vadd.f32 %v2298_v49, %v895_v17 }
 0x124   : > { %v1189_v22 = vadd.f32 %v2323_v59, %v1188_v7  ;;  %1404 = vrot.lane.b32.xlu0 %v1297_v56, %s1834_s11  ;;  %v951_v18 = vmax.f32 %v901_v61, 0.0 }
 0x125   : > { %v1300_v27 = vmax.f32 %v1194_v5, 0.0  ;;  %v950_v56 = vmax.f32 %v896_v57, 0.0  ;;  %v1761_v2 = vpop.f32.mrb[28].mxu0 }
 0x126   : > { %v1299_v20 = vmax.f32 %v1189_v22, 0.0  ;;  %v1790_v14 = vpop.f32.mrb[14].mxu1  ;;  %1347 = vst.msk [vmem:[%s2306_s8 + $0xd8] sm:$0xff] %vm1319_vm3, %v951_v18  ;;  %v911_v5 = vadd.f32 %v1761_v2, %v2298_v49  ;;  %v905_v7 = vpop.f32.mrb[29].mxu0 }
 0x127   : > { %1406 = vrot.lane.b32.xlu1 %v1298_v31, %s1834_s11  ;;  %v1204_v15 = vadd.f32 %v1790_v14, %v2323_v59  ;;  %v1198_v30 = vpop.f32.mrb[15].mxu1  ;;  %1346 = vst.msk [vmem:[%s2306_s8 + $0xd0] sm:$0xff] %vm1319_vm3, %v950_v56  ;;  %v906_v48 = vadd.f32 %v2298_v49, %v905_v7 }
 0x128   : > { %v1199_v19 = vadd.f32 %v2323_v59, %v1198_v30  ;;  %1408 = vrot.lane.b32.xlu0 %v1299_v20, %s1834_s11  ;;  %v953_v22 = vmax.f32 %v911_v5, 0.0 }
 0x129   : > { %v1302_v42 = vmax.f32 %v1204_v15, 0.0  ;;  %v952_v20 = vmax.f32 %v906_v48, 0.0  ;;  %v1764_v14 = vpop.f32.mrb[30].mxu0 }
 0x12a   : > { %v1301_v37 = vmax.f32 %v1199_v19, 0.0  ;;  %v1793_v38 = vpop.f32.mrb[16].mxu1  ;;  %1349 = vst.msk [vmem:[%s2306_s8 + $0xe8] sm:$0xff] %vm1319_vm3, %v953_v22  ;;  %v921_v15 = vadd.f32 %v1764_v14, %v2298_v49  ;;  %v915_v30 = vpop.f32.mrb[31].mxu0 }
 0x12b   : > { %1410 = vrot.lane.b32.xlu1 %v1300_v27, %s1834_s11  ;;  %v1214_v43 = vadd.f32 %v1793_v38, %v2323_v59  ;;  %v1208_v34 = vpop.f32.mrb[17].mxu1  ;;  %1348 = vst.msk [vmem:[%s2306_s8 + $0xe0] sm:$0xff] %vm1319_vm3, %v952_v20  ;;  %v916_v32 = vadd.f32 %v2298_v49, %v915_v30 }
 0x12c   : > { %v1209_v46 = vadd.f32 %v2323_v59, %v1208_v34  ;;  %1412 = vrot.lane.b32.xlu0 %v1301_v37, %s1834_s11  ;;  %v955_v19 = vmax.f32 %v921_v15, 0.0 }
 0x12d   : > { %v1304_v36 = vmax.f32 %v1214_v43, 0.0  ;;  %v954_v37 = vmax.f32 %v916_v32, 0.0 }
 0x12e   : > { %v1303_v11 = vmax.f32 %v1209_v46, 0.0  ;;  %v1796_v13 = vpop.f32.mrb[18].mxu1  ;;  %1351 = vst.msk [vmem:[%s2306_s8 + $0xf8] sm:$0xff] %vm1319_vm3, %v955_v19 }
 0x12f   : > { %1414 = vrot.lane.b32.xlu1 %v1302_v42, %s1834_s11  ;;  %v1224_v44 = vadd.f32 %v1796_v13, %v2323_v59  ;;  %v1218_v35 = vpop.f32.mrb[19].mxu1  ;;  %1350 = vst.msk [vmem:[%s2306_s8 + $0xf0] sm:$0xff] %vm1319_vm3, %v954_v37 }
 0x130   : > { %v1219_v53 = vadd.f32 %v2323_v59, %v1218_v35  ;;  %1416 = vrot.lane.b32.xlu0 %v1303_v11, %s1834_s11 }
 0x131   : > { %v1306_v60 = vmax.f32 %v1224_v44, 0.0 }
 0x132   : > { %v1305_v45 = vmax.f32 %v1219_v53, 0.0  ;;  %v1799_v55 = vpop.f32.mrb[20].mxu1 }
 0x133   : > { %1418 = vrot.lane.b32.xlu1 %v1304_v36, %s1834_s11  ;;  %v1234_v16 = vadd.f32 %v1799_v55, %v2323_v59  ;;  %v1228_v41 = vpop.f32.mrb[21].mxu1 }
 0x134   : > { %v1229_v23 = vadd.f32 %v2323_v59, %v1228_v41  ;;  %1420 = vrot.lane.b32.xlu0 %v1305_v45, %s1834_s11 }
 0x135   : > { %v1308_v3 = vmax.f32 %v1234_v16, 0.0 }
 0x136   : > { %v1307_v62 = vmax.f32 %v1229_v23, 0.0  ;;  %v1802_v1 = vpop.f32.mrb[22].mxu1 }
 0x137   : > { %1422 = vrot.lane.b32.xlu1 %v1306_v60, %s1834_s11  ;;  %v1244_v4 = vadd.f32 %v1802_v1, %v2323_v59  ;;  %v1238_v31 = vpop.f32.mrb[23].mxu1 }
 0x138   : > { %v1239_v8 = vadd.f32 %v2323_v59, %v1238_v31  ;;  %1424 = vrot.lane.b32.xlu0 %v1307_v62, %s1834_s11 }
 0x139   : > { %v1310_v58 = vmax.f32 %v1244_v4, 0.0 }
 0x13a   : > { %v1309_v0 = vmax.f32 %v1239_v8, 0.0  ;;  %v1805_v9 = vpop.f32.mrb[24].mxu1 }
 0x13b   : > { %1426 = vrot.lane.b32.xlu1 %v1308_v3, %s1834_s11  ;;  %v1254_v63 = vadd.f32 %v1805_v9, %v2323_v59  ;;  %v1248_v27 = vpop.f32.mrb[25].mxu1 }
 0x13c   : > { %v1249_v12 = vadd.f32 %v2323_v59, %v1248_v27  ;;  %1428 = vrot.lane.b32.xlu0 %v1309_v0, %s1834_s11 }
 0x13d   : > { %v1312_v38 = vmax.f32 %v1254_v63, 0.0 }
 0x13e   : > { %v1311_v33 = vmax.f32 %v1249_v12, 0.0  ;;  %v1808_v10 = vpop.f32.mrb[26].mxu1 }
 0x13f   : > { %1430 = vrot.lane.b32.xlu1 %v1310_v58, %s1834_s11  ;;  %v1264_v39 = vadd.f32 %v1808_v10, %v2323_v59  ;;  %v1258_v40 = vpop.f32.mrb[27].mxu1 }
 0x140   : > { %v1259_v42 = vadd.f32 %v2323_v59, %v1258_v40  ;;  %1432 = vrot.lane.b32.xlu0 %v1311_v33, %s1834_s11 }
 0x141   : > { %v1314_v34 = vmax.f32 %v1264_v39, 0.0 }
 0x142   : > { %v1313_v43 = vmax.f32 %v1259_v42, 0.0  ;;  %v1811_v49 = vpop.f32.mrb[28].mxu1 }
 0x143   : > { %1434 = vrot.lane.b32.xlu1 %v1312_v38, %s1834_s11  ;;  %v1274_v24 = vadd.f32 %v1811_v49, %v2323_v59  ;;  %v1268_v29 = vpop.f32.mrb[29].mxu1 }
 0x144   : > { %v1269_v46 = vadd.f32 %v2323_v59, %v1268_v29  ;;  %1436 = vrot.lane.b32.xlu0 %v1313_v43, %s1834_s11 }
 0x145   : > { %v1316_v11 = vmax.f32 %v1274_v24, 0.0 }
 0x146   : > { %v1315_v47 = vmax.f32 %v1269_v46, 0.0  ;;  %v1814_v28 = vpop.f32.mrb[30].mxu1 }
 0x147   : > { %1438 = vrot.lane.b32.xlu1 %v1314_v34, %s1834_s11  ;;  %v1284_v13 = vadd.f32 %v1814_v28, %v2323_v59  ;;  %v1278_v50 = vpop.f32.mrb[31].mxu1 }
 0x148   : > { %v1279_v25 = vadd.f32 %v2323_v59, %v1278_v50  ;;  %1440 = vrot.lane.b32.xlu0 %v1315_v47, %s1834_s11 }
 0x149   : > { %v1318_v44 = vmax.f32 %v1284_v13, 0.0 }
 0x14a   : > { %v1317_v36 = vmax.f32 %v1279_v25, 0.0 }
 0x14b   : > { %1442 = vrot.lane.b32.xlu1 %v1316_v11, %s1834_s11 }
 0x14c   : > { %1444 = vrot.lane.b32.xlu0 %v1317_v36, %s1834_s11 }
 0x14f   : > { %1446 = vrot.lane.b32.xlu1 %v1318_v44, %s1834_s11 }
 0x181   : > { %v1387_v35 = vpop.permute.xlu0 %1386 }
 0x182   : > { %1482 = vst.msk [vmem:[%s2306_s8 + $0x8] sm:$0xff] %vm1480_vm4, %v1387_v35 }
 0x185   : > { %v1391_v59 = vpop.permute.xlu1 %1390  ;;  %v1385_v51 = vpop.permute.xlu0 %1384 }
 0x186   : > { %1484 = vst.msk [vmem:[%s2306_s8 + $0x18] sm:$0xff] %vm1480_vm4, %v1391_v59  ;;  %1481 = vst.msk [vmem:[%s2306_s8] sm:$0xff] %vm1480_vm4, %v1385_v51 }
 0x189   : > { %v1389_v52 = vpop.permute.xlu1 %1388 }
 0x18a   : > { %1483 = vst.msk [vmem:[%s2306_s8 + $0x10] sm:$0xff] %vm1480_vm4, %v1389_v52  ;;  %v1393_v53 = vpop.permute.xlu0 %1392 }
 0x18b   : > { %1485 = vst.msk [vmem:[%s2306_s8 + $0x20] sm:$0xff] %vm1480_vm4, %v1393_v53 }
 0x18d   : > { %v1395_v54 = vpop.permute.xlu1 %1394 }
 0x18e   : > { %1486 = vst.msk [vmem:[%s2306_s8 + $0x28] sm:$0xff] %vm1480_vm4, %v1395_v54  ;;  %v1397_v21 = vpop.permute.xlu0 %1396 }
 0x18f   : > { %1487 = vst.msk [vmem:[%s2306_s8 + $0x30] sm:$0xff] %vm1480_vm4, %v1397_v21 }
 0x191   : > { %v1399_v45 = vpop.permute.xlu1 %1398 }
 0x192   : > { %1488 = vst.msk [vmem:[%s2306_s8 + $0x38] sm:$0xff] %vm1480_vm4, %v1399_v45  ;;  %v1401_v55 = vpop.permute.xlu0 %1400 }
 0x193   : > { %1489 = vst.msk [vmem:[%s2306_s8 + $0x40] sm:$0xff] %vm1480_vm4, %v1401_v55 }
 0x195   : > { %v1403_v6 = vpop.permute.xlu1 %1402 }
 0x196   : > { %1490 = vst.msk [vmem:[%s2306_s8 + $0x48] sm:$0xff] %vm1480_vm4, %v1403_v6  ;;  %v1405_v26 = vpop.permute.xlu0 %1404 }
 0x197   : > { %1491 = vst.msk [vmem:[%s2306_s8 + $0x50] sm:$0xff] %vm1480_vm4, %v1405_v26 }
 0x199   : > { %v1407_v60 = vpop.permute.xlu1 %1406 }
 0x19a   : > { %1492 = vst.msk [vmem:[%s2306_s8 + $0x58] sm:$0xff] %vm1480_vm4, %v1407_v60  ;;  %v1409_v16 = vpop.permute.xlu0 %1408 }
 0x19b   : > { %1493 = vst.msk [vmem:[%s2306_s8 + $0x60] sm:$0xff] %vm1480_vm4, %v1409_v16 }
 0x19d   : > { %v1411_v41 = vpop.permute.xlu1 %1410 }
 0x19e   : > { %1494 = vst.msk [vmem:[%s2306_s8 + $0x68] sm:$0xff] %vm1480_vm4, %v1411_v41  ;;  %v1413_v61 = vpop.permute.xlu0 %1412 }
 0x19f   : > { %1495 = vst.msk [vmem:[%s2306_s8 + $0x70] sm:$0xff] %vm1480_vm4, %v1413_v61 }
 0x1a1   : > { %v1415_v17 = vpop.permute.xlu1 %1414 }
 0x1a2   : > { %1496 = vst.msk [vmem:[%s2306_s8 + $0x78] sm:$0xff] %vm1480_vm4, %v1415_v17  ;;  %v1417_v23 = vpop.permute.xlu0 %1416 }
 0x1a3   : > { %1497 = vst.msk [vmem:[%s2306_s8 + $0x80] sm:$0xff] %vm1480_vm4, %v1417_v23 }
 0x1a5   : > { %v1419_v57 = vpop.permute.xlu1 %1418 }
 0x1a6   : > { %1498 = vst.msk [vmem:[%s2306_s8 + $0x88] sm:$0xff] %vm1480_vm4, %v1419_v57  ;;  %v1421_v18 = vpop.permute.xlu0 %1420 }
 0x1a7   : > { %1499 = vst.msk [vmem:[%s2306_s8 + $0x90] sm:$0xff] %vm1480_vm4, %v1421_v18 }
 0x1a9   : > { %v1423_v62 = vpop.permute.xlu1 %1422 }
 0x1aa   : > { %1500 = vst.msk [vmem:[%s2306_s8 + $0x98] sm:$0xff] %vm1480_vm4, %v1423_v62  ;;  %v1425_v1 = vpop.permute.xlu0 %1424 }
 0x1ab   : > { %1501 = vst.msk [vmem:[%s2306_s8 + $0xa0] sm:$0xff] %vm1480_vm4, %v1425_v1 }
 0x1ad   : > { %v1427_v56 = vpop.permute.xlu1 %1426 }
 0x1ae   : > { %1502 = vst.msk [vmem:[%s2306_s8 + $0xa8] sm:$0xff] %vm1480_vm4, %v1427_v56  ;;  %v1429_v2 = vpop.permute.xlu0 %1428 }
 0x1af   : > { %1503 = vst.msk [vmem:[%s2306_s8 + $0xb0] sm:$0xff] %vm1480_vm4, %v1429_v2 }
 0x1b1   : > { %v1431_v3 = vpop.permute.xlu1 %1430 }
 0x1b2   : > { %1504 = vst.msk [vmem:[%s2306_s8 + $0xb8] sm:$0xff] %vm1480_vm4, %v1431_v3  ;;  %v1433_v4 = vpop.permute.xlu0 %1432 }
 0x1b3   : > { %1505 = vst.msk [vmem:[%s2306_s8 + $0xc0] sm:$0xff] %vm1480_vm4, %v1433_v4 }
 0x1b5   : > { %v1435_v31 = vpop.permute.xlu1 %1434 }
 0x1b6   : > { %1506 = vst.msk [vmem:[%s2306_s8 + $0xc8] sm:$0xff] %vm1480_vm4, %v1435_v31  ;;  %v1437_v5 = vpop.permute.xlu0 %1436 }
 0x1b7   : > { %1507 = vst.msk [vmem:[%s2306_s8 + $0xd0] sm:$0xff] %vm1480_vm4, %v1437_v5 }
 0x1b9   : > { %v1439_v7 = vpop.permute.xlu1 %1438 }
 0x1ba   : > { %1508 = vst.msk [vmem:[%s2306_s8 + $0xd8] sm:$0xff] %vm1480_vm4, %v1439_v7  ;;  %v1441_v8 = vpop.permute.xlu0 %1440 }
 0x1bb   : > { %1509 = vst.msk [vmem:[%s2306_s8 + $0xe0] sm:$0xff] %vm1480_vm4, %v1441_v8 }
 0x1bd   : > { %v1443_v48 = vpop.permute.xlu1 %1442 }
 0x1be   : > { %1510 = vst.msk [vmem:[%s2306_s8 + $0xe8] sm:$0xff] %vm1480_vm4, %v1443_v48  ;;  %v1445_v22 = vpop.permute.xlu0 %1444 }
 0x1bf   : > { %1511 = vst.msk [vmem:[%s2306_s8 + $0xf0] sm:$0xff] %vm1480_vm4, %v1445_v22 }
 0x1c1   : > { %v1447_v0 = vpop.permute.xlu1 %1446 }
 0x1c2   : > { %1512 = vst.msk [vmem:[%s2306_s8 + $0xf8] sm:$0xff] %vm1480_vm4, %v1447_v0 }
 0x1c3 PF: > { %s15_s18 = sadd.s32 1, %s1831_s18  }
 0x1c4   : > { %p12_p4 = scmp.ge.s32.totalorder %s15_s18, 4  }
 0x1c6   :  { %14 = sbr.rel (!%p12_p4) target bundleno = 1 (0x1), region = 71 }

// kernel: inception_forward.5
= control target key start
LH: loop header
LB: loop body
LE: loop exit
PB: predicated region body
PF: predicated region fallthrough
CT: control target
= control target key end

     0   :  { %s13893_s12 = smov 0   ;;  %s16324_s0 = inlined_call_operand.vmem [shape: f32[2,16,16,4], index: 0, kind: input, shape index: {}]   ;;  %s16325_s1 = inlined_call_operand.vmem [shape: f32[25,4,8], index: 1, kind: input, shape index: {}]   ;;  %s16326_s2 = inlined_call_operand.vmem [shape: f32[1,8], index: 2, kind: input, shape index: {}]   ;;  %s16327_s3 = inlined_call_operand.vmem [shape: f32[2,16,16,8], index: 3, kind: output, shape index: {}]  }
   0x1 LB: > { %s10146_s13 = sadd.s32 4294967295, %s13870_s12   ;;  %p10150_p0 = scmp.ge.s32.totalorder %s13870_s12, 1  ;;  %s13870_s12 = sphi %s13893_s12, %s13_s12  }
   0x2   : > { %p137_p1 = scmp.lt.s32.totalorder %s13870_s12, 3 }
   0x4   : > { %p138_p2 = pnand %p10150_p0, %p137_p1 }
   0x6   : > { %141 = sbr.rel (%p138_p2) target bundleno = 1069 (0x42d), region = 32 }
   0xd   : > { %v13904_v0 = vld [vmem:[%s16325_s1 + $0x4] sm:$0xf]  ;;  %vm461_vm0 = vcmask 1043456   ;;  %vm171_vm1 = vcmask 31744   ;;  %vm174_vm2 = vcmask 27648   ;;  %v13872_v1 = vmov 0.0  }
   0xe   : > { %11834 = vmatprep.subr.msk.mxu1 %vm461_vm0, %v13904_v0  ;;  %172 = vst.msk [vmem:[#allocation2] sm:$0xff] %vm171_vm1, %v13872_v1  ;;  %173 = vst.msk [vmem:[#allocation2 + $0x8] sm:$0xff] %vm171_vm1, %v13872_v1  ;;  %v10562_v2 = vld [vmem:[%s16325_s1 + $0x30] sm:$0xf]  ;;  %v330_v3 = vld [vmem:[%s16325_s1] sm:$0xf] }
   0xf   : > { %176 = vst.msk [vmem:[#allocation2 + $0x18] sm:$0xff] %vm171_vm1, %v13872_v1  ;;  %177 = vst.msk [vmem:[#allocation2 + $0x20] sm:$0xff] %vm171_vm1, %v13872_v1  ;;  %p161_p3 = scmp.lt.s32.totalorder %s10146_s13, 1  ;;  %11835 = vmatpush3.msk.msra.mxu1 %vm461_vm0, %v13904_v0  ;;  %12434 = vmatprep.subr.msk.mxu0 %vm461_vm0, %v10562_v2  ;;  %v13982_v4 = vld [vmem:[%s16325_s1 + $0x34] sm:$0xf]  ;;  %vm10058_vm3 = vcmask 64512  }
  0x10   : > { %179 = vst.msk [vmem:[#allocation2 + $0x30] sm:$0xff] %vm171_vm1, %v13872_v1  ;;  %180 = vst.msk [vmem:[#allocation2 + $0x38] sm:$0xff] %vm171_vm1, %v13872_v1  ;;  %12435 = vmatpush3.msk.msra.mxu0 %vm461_vm0, %v10562_v2  ;;  %11884 = vmatprep.subr.msk.mxu1 %vm461_vm0, %v330_v3  ;;  %v14006_v8 = vld [vmem:[%s16325_s1 + $0x8] sm:$0xf]  ;;  %v14068_v36 = vld [vmem:[%s16325_s1 + $0x38] sm:$0xf] }
  0x11   : > { %182 = vst.msk [vmem:[#allocation2 + $0x48] sm:$0xff] %vm171_vm1, %v13872_v1  ;;  %183 = vst.msk [vmem:[#allocation2 + $0x50] sm:$0xff] %vm171_vm1, %v13872_v1  ;;  %s16653_s13 = smov (!%p161_p3, %s10146_s13), 1  ;;  %12484 = vmatprep.subr.msk.mxu0 %vm461_vm0, %v13982_v4 }
  0x12   : > { %185 = vst.msk [vmem:[#allocation2 + $0x60] sm:$0xff] %vm171_vm1, %v13872_v1  ;;  %186 = vst.msk [vmem:[#allocation2 + $0x68] sm:$0xff] %vm171_vm1, %v13872_v1  ;;  %s11007_s22 = sshll.u32 %s16653_s13, 8 }
  0x13   : > { %188 = vst.msk [vmem:[#allocation2 + $0x78] sm:$0xff] %vm171_vm1, %v13872_v1  ;;  %189 = vst.msk [vmem:[#allocation2 + $0x80] sm:$0xff] %vm171_vm1, %v13872_v1  ;;  %s13998_s25 = scalar_lea.vmem %s16324_s0, %s11007_s22  ;;  %s16220_s26 = scalar_lea.vmem %s16327_s3, %s11007_s22 }
  0x14   : > { %191 = vst.msk [vmem:[#allocation2 + $0x90] sm:$0xff] %vm171_vm1, %v13872_v1  ;;  %192 = vst.msk [vmem:[#allocation2 + $0x98] sm:$0xff] %vm171_vm1, %v13872_v1  ;;  %v233_v5 = vld [vmem:[%s13998_s25] sm:$0xff]  ;;  %v234_v6 = vld [vmem:[%s13998_s25 + $0x8] sm:$0xff] }
  0x15   : > { %194 = vst.msk [vmem:[#allocation2 + $0xa8] sm:$0xff] %vm171_vm1, %v13872_v1  ;;  %195 = vst.msk [vmem:[#allocation2 + $0xb0] sm:$0xff] %vm171_vm1, %v13872_v1  ;;  %v235_v7 = vld [vmem:[%s13998_s25 + $0x10] sm:$0xff]  ;;  %v331_v9 = vld [vmem:[#allocation2 + $0x1] sm:$0xff] }
  0x16   : > { %197 = vst.msk [vmem:[#allocation2 + $0xc0] sm:$0xff] %vm171_vm1, %v13872_v1  ;;  %198 = vst.msk [vmem:[#allocation2 + $0xc8] sm:$0xff] %vm171_vm1, %v13872_v1  ;;  %v333_v11 = vld [vmem:[#allocation2 + $0x19] sm:$0xff]  ;;  %11836 = vmatprep.mubr.msk.f32.mxu1 %vm171_vm1, %v331_v9  ;;  %v238_v15 = vld [vmem:[%s13998_s25 + $0x28] sm:$0xff] }
  0x17   : > { %200 = vst.msk [vmem:[#allocation2 + $0xd8] sm:$0xff] %vm171_vm1, %v13872_v1  ;;  %201 = vst.msk [vmem:[#allocation2 + $0xe0] sm:$0xff] %vm171_vm1, %v13872_v1  ;;  %v236_v13 = vld [vmem:[%s13998_s25 + $0x18] sm:$0xff]  ;;  %v237_v14 = vld [vmem:[%s13998_s25 + $0x20] sm:$0xff] }
  0x18   : > { %203 = vst.msk [vmem:[#allocation2 + $0xf0] sm:$0xff] %vm171_vm1, %v13872_v1  ;;  %204 = vst.msk [vmem:[#allocation2 + $0xf8] sm:$0xff] %vm171_vm1, %v13872_v1  ;;  %v239_v16 = vld [vmem:[%s13998_s25 + $0x30] sm:$0xff]  ;;  %v240_v17 = vld [vmem:[%s13998_s25 + $0x38] sm:$0xff] }
  0x19   : > { %206 = vst.msk [vmem:[#allocation2 + $0x108] sm:$0xff] %vm171_vm1, %v13872_v1  ;;  %207 = vst.msk [vmem:[#allocation2 + $0x110] sm:$0xff] %vm171_vm1, %v13872_v1  ;;  %v241_v18 = vld [vmem:[%s13998_s25 + $0x40] sm:$0xff]  ;;  %v242_v19 = vld [vmem:[%s13998_s25 + $0x48] sm:$0xff] }
  0x1a   : > { %209 = vst.msk [vmem:[#allocation2 + $0x120] sm:$0xff] %vm171_vm1, %v13872_v1  ;;  %210 = vst.msk [vmem:[#allocation2 + $0x128] sm:$0xff] %vm171_vm1, %v13872_v1  ;;  %v243_v20 = vld [vmem:[%s13998_s25 + $0x50] sm:$0xff]  ;;  %v244_v21 = vld [vmem:[%s13998_s25 + $0x58] sm:$0xff] }
  0x1b   : > { %212 = vst.msk [vmem:[#allocation2 + $0x138] sm:$0xff] %vm171_vm1, %v13872_v1  ;;  %213 = vst.msk [vmem:[#allocation2 + $0x140] sm:$0xff] %vm171_vm1, %v13872_v1  ;;  %v245_v22 = vld [vmem:[%s13998_s25 + $0x60] sm:$0xff]  ;;  %v246_v23 = vld [vmem:[%s13998_s25 + $0x68] sm:$0xff] }
  0x1c   : > { %215 = vst.msk [vmem:[#allocation2 + $0x150] sm:$0xff] %vm171_vm1, %v13872_v1  ;;  %216 = vst.msk [vmem:[#allocation2 + $0x158] sm:$0xff] %vm171_vm1, %v13872_v1  ;;  %v247_v24 = vld [vmem:[%s13998_s25 + $0x70] sm:$0xff]  ;;  %v248_v25 = vld [vmem:[%s13998_s25 + $0x78] sm:$0xff] }
  0x1d   : > { %218 = vst.msk [vmem:[#allocation2 + $0x168] sm:$0xff] %vm171_vm1, %v13872_v1  ;;  %219 = vst.msk [vmem:[#allocation2 + $0x170] sm:$0xff] %vm171_vm1, %v13872_v1  ;;  %v249_v26 = vld [vmem:[%s13998_s25 + $0x80] sm:$0xff]  ;;  %v250_v27 = vld [vmem:[%s13998_s25 + $0x88] sm:$0xff] }
  0x1e   : > { %221 = vst.msk [vmem:[#allocation2 + $0x180] sm:$0xff] %vm171_vm1, %v13872_v1  ;;  %222 = vst.msk [vmem:[#allocation2 + $0x188] sm:$0xff] %vm171_vm1, %v13872_v1  ;;  %v251_v28 = vld [vmem:[%s13998_s25 + $0x90] sm:$0xff]  ;;  %v252_v29 = vld [vmem:[%s13998_s25 + $0x98] sm:$0xff] }
  0x1f   : > { %224 = vst.msk [vmem:[#allocation2 + $0x198] sm:$0xff] %vm171_vm1, %v13872_v1  ;;  %225 = vst.msk [vmem:[#allocation2 + $0x1a0] sm:$0xff] %vm171_vm1, %v13872_v1  ;;  %v253_v49 = vld [vmem:[%s13998_s25 + $0xa0] sm:$0xff]  ;;  %v254_v50 = vld [vmem:[%s13998_s25 + $0xa8] sm:$0xff] }
  0x20   : > { %227 = vst.msk [vmem:[#allocation2 + $0x1b0] sm:$0xff] %vm171_vm1, %v13872_v1  ;;  %228 = vst.msk [vmem:[#allocation2 + $0x1b8] sm:$0xff] %vm171_vm1, %v13872_v1  ;;  %v255_v52 = vld [vmem:[%s13998_s25 + $0xb0] sm:$0xff]  ;;  %v256_v53 = vld [vmem:[%s13998_s25 + $0xb8] sm:$0xff] }
  0x21   : > { %230 = vst.msk [vmem:[#allocation2 + $0x1c8] sm:$0xff] %vm171_vm1, %v13872_v1  ;;  %231 = vst.msk [vmem:[#allocation2 + $0x1d0] sm:$0xff] %vm171_vm1, %v13872_v1  ;;  %v257_v56 = vld [vmem:[%s13998_s25 + $0xc0] sm:$0xff]  ;;  %v258_v58 = vld [vmem:[%s13998_s25 + $0xc8] sm:$0xff] }
  0x22   : > { %175 = vst.msk [vmem:[#allocation2 + $0x10] sm:$0xf] %vm174_vm2, %v13872_v1  ;;  %178 = vst.msk [vmem:[#allocation2 + $0x28] sm:$0xf] %vm174_vm2, %v13872_v1  ;;  %v259_v59 = vld [vmem:[%s13998_s25 + $0xd0] sm:$0xff]  ;;  %v260_v60 = vld [vmem:[%s13998_s25 + $0xd8] sm:$0xff] }
  0x23   : > { %181 = vst.msk [vmem:[#allocation2 + $0x40] sm:$0xf] %vm174_vm2, %v13872_v1  ;;  %184 = vst.msk [vmem:[#allocation2 + $0x58] sm:$0xf] %vm174_vm2, %v13872_v1 }
  0x24   : > { %187 = vst.msk [vmem:[#allocation2 + $0x70] sm:$0xf] %vm174_vm2, %v13872_v1  ;;  %190 = vst.msk [vmem:[#allocation2 + $0x88] sm:$0xf] %vm174_vm2, %v13872_v1 }
  0x25   : > { %193 = vst.msk [vmem:[#allocation2 + $0xa0] sm:$0xf] %vm174_vm2, %v13872_v1  ;;  %196 = vst.msk [vmem:[#allocation2 + $0xb8] sm:$0xf] %vm174_vm2, %v13872_v1 }
  0x26   : > { %199 = vst.msk [vmem:[#allocation2 + $0xd0] sm:$0xf] %vm174_vm2, %v13872_v1  ;;  %202 = vst.msk [vmem:[#allocation2 + $0xe8] sm:$0xf] %vm174_vm2, %v13872_v1 }
  0x27   : > { %205 = vst.msk [vmem:[#allocation2 + $0x100] sm:$0xf] %vm174_vm2, %v13872_v1  ;;  %208 = vst.msk [vmem:[#allocation2 + $0x118] sm:$0xf] %vm174_vm2, %v13872_v1 }
  0x28   : > { %211 = vst.msk [vmem:[#allocation2 + $0x130] sm:$0xf] %vm174_vm2, %v13872_v1  ;;  %214 = vst.msk [vmem:[#allocation2 + $0x148] sm:$0xf] %vm174_vm2, %v13872_v1 }
  0x29   : > { %217 = vst.msk [vmem:[#allocation2 + $0x160] sm:$0xf] %vm174_vm2, %v13872_v1  ;;  %220 = vst.msk [vmem:[#allocation2 + $0x178] sm:$0xf] %vm174_vm2, %v13872_v1  ;;  %v332_v10 = vld [vmem:[#allocation2 + $0x9] sm:$0xff]  ;;  %v334_v12 = vld [vmem:[#allocation2 + $0x21] sm:$0xff] }
  0x2a   : > { %223 = vst.msk [vmem:[#allocation2 + $0x190] sm:$0xf] %vm174_vm2, %v13872_v1  ;;  %226 = vst.msk [vmem:[#allocation2 + $0x1a8] sm:$0xf] %vm174_vm2, %v13872_v1  ;;  %11837 = vmatmul.mubr.msk.f32.vlgmr.msra.gmra.mrb[0].mxu1 %vm171_vm1, %v332_v10 }
  0x2b   : > { %229 = vst.msk [vmem:[#allocation2 + $0x1c0] sm:$0xf] %vm174_vm2, %v13872_v1  ;;  %232 = vst.msk [vmem:[#allocation2 + $0x1d8] sm:$0xf] %vm174_vm2, %v13872_v1  ;;  %11839 = vmatprep.mubr.msk.f32.mxu1 %vm171_vm1, %v333_v11  ;;  %11885 = vmatpush3.msk.msra.mxu1 %vm461_vm0, %v330_v3 }
  0x2c   : > { %266 = vst.msk [vmem:[#allocation2 + $0x32] sm:$0xff] %vm171_vm1, %v233_v5  ;;  %267 = vst.msk [vmem:[#allocation2 + $0x3a] sm:$0xff] %vm171_vm1, %v234_v6  ;;  %11934 = vmatprep.subr.msk.mxu1 %vm461_vm0, %v14006_v8 }
  0x2d   : > { %268 = vst.msk [vmem:[#allocation2 + $0x4a] sm:$0xff] %vm171_vm1, %v235_v7  ;;  %269 = vst.msk [vmem:[#allocation2 + $0x52] sm:$0xff] %vm171_vm1, %v236_v13  ;;  %v261_v13 = vld [vmem:[%s13998_s25 + $0xe0] sm:$0xff] }
  0x2e   : > { %270 = vst.msk [vmem:[#allocation2 + $0x62] sm:$0xff] %vm171_vm1, %v237_v14  ;;  %271 = vst.msk [vmem:[#allocation2 + $0x6a] sm:$0xff] %vm171_vm1, %v238_v15  ;;  %11840 = vmatmul.mubr.msk.f32.gmra.mrb[2].mxu1 %vm171_vm1, %v334_v12  ;;  %v262_v14 = vld [vmem:[%s13998_s25 + $0xe8] sm:$0xff] }
  0x2f   : > { %272 = vst.msk [vmem:[#allocation2 + $0x7a] sm:$0xff] %vm171_vm1, %v239_v16  ;;  %273 = vst.msk [vmem:[#allocation2 + $0x82] sm:$0xff] %vm171_vm1, %v240_v17  ;;  %v263_v16 = vld [vmem:[%s13998_s25 + $0xf0] sm:$0xff]  ;;  %v264_v17 = vld [vmem:[%s13998_s25 + $0xf8] sm:$0xff] }
  0x30   : > { %274 = vst.msk [vmem:[#allocation2 + $0x92] sm:$0xff] %vm171_vm1, %v241_v18  ;;  %275 = vst.msk [vmem:[#allocation2 + $0x9a] sm:$0xff] %vm171_vm1, %v242_v19  ;;  %v14228_v18 = vld [vmem:[%s16325_s1 + $0x3c] sm:$0xf] }
  0x31   : > { %276 = vst.msk [vmem:[#allocation2 + $0xaa] sm:$0xff] %vm171_vm1, %v243_v20  ;;  %277 = vst.msk [vmem:[#allocation2 + $0xb2] sm:$0xff] %vm171_vm1, %v244_v21 }
  0x32   : > { %278 = vst.msk [vmem:[#allocation2 + $0xc2] sm:$0xff] %vm171_vm1, %v245_v22  ;;  %279 = vst.msk [vmem:[#allocation2 + $0xca] sm:$0xff] %vm171_vm1, %v246_v23 }
  0x33   : > { %280 = vst.msk [vmem:[#allocation2 + $0xda] sm:$0xff] %vm171_vm1, %v247_v24  ;;  %281 = vst.msk [vmem:[#allocation2 + $0xe2] sm:$0xff] %vm171_vm1, %v248_v25  ;;  %v14049_v30 = vld [vmem:[#allocation2 + $0x32] sm:$0xff]  ;;  %v14051_v31 = vld [vmem:[#allocation2 + $0x3a] sm:$0xff] }
  0x34   : > { %282 = vst.msk [vmem:[#allocation2 + $0xf2] sm:$0xff] %vm171_vm1, %v249_v26  ;;  %v335_v32 = vld [vmem:[#allocation2 + $0x31] sm:$0xff]  ;;  %283 = vst.msk [vmem:[#allocation2 + $0xfa] sm:$0xff] %vm171_vm1, %v250_v27  ;;  %12436 = vmatprep.mubr.msk.f32.mxu0 %vm171_vm1, %v14049_v30  ;;  %v336_v33 = vld [vmem:[#allocation2 + $0x39] sm:$0xff] }
  0x35   : > { %284 = vst.msk [vmem:[#allocation2 + $0x10a] sm:$0xff] %vm171_vm1, %v251_v28  ;;  %285 = vst.msk [vmem:[#allocation2 + $0x112] sm:$0xff] %vm171_vm1, %v252_v29  ;;  %11842 = vmatprep.mubr.msk.f32.mxu1 %vm171_vm1, %v335_v32  ;;  %v14059_v34 = vld [vmem:[#allocation2 + $0x4a] sm:$0xff]  ;;  %12437 = vmatmul.mubr.msk.f32.vlgmr.msra.gmra.mrb[0].mxu0 %vm171_vm1, %v14051_v31  ;;  %v14073_v37 = vld [vmem:[#allocation2 + $0x52] sm:$0xff] }
  0x36   : > { %v14061_v35 = vld [vmem:[#allocation2 + $0x49] sm:$0xff]  ;;  %12485 = vmatpush3.msk.msra.mxu0 %vm461_vm0, %v13982_v4  ;;  %11843 = vmatmul.mubr.msk.f32.gmra.mrb[4].mxu1 %vm171_vm1, %v336_v33  ;;  %v14079_v38 = vld [vmem:[#allocation2 + $0x51] sm:$0xff]  ;;  %v14083_v40 = vld [vmem:[#allocation2 + $0x61] sm:$0xff]  ;;  %286 = vst.msk [vmem:[#allocation2 + $0x122] sm:$0xff] %vm171_vm1, %v253_v49 }
  0x37   : > { %16436 = vst [vmem:[#allocation3_spill] sm:$0xff] %v14061_v35  ;;  %12439 = vmatprep.mubr.msk.f32.mxu0 %vm171_vm1, %v14059_v34  ;;  %11845 = vmatprep.mubr.msk.f32.mxu1 %vm171_vm1, %v14061_v35  ;;  %16437 = vst [vmem:[#allocation4_spill] sm:$0xff] %v14079_v38  ;;  %v14081_v39 = vld [vmem:[#allocation2 + $0x62] sm:$0xff]  ;;  %v14093_v41 = vld [vmem:[#allocation2 + $0x6a] sm:$0xff] }
  0x38   : > { %16438 = vst [vmem:[#allocation5_spill] sm:$0xff] %v14083_v40  ;;  %12534 = vmatprep.subr.msk.mxu0 %vm461_vm0, %v14068_v36  ;;  %v14097_v42 = vld [vmem:[#allocation2 + $0x69] sm:$0xff]  ;;  %v14099_v43 = vld [vmem:[#allocation2 + $0x7a] sm:$0xff]  ;;  %v14115_v47 = vld [vmem:[#allocation2 + $0x92] sm:$0xff] }
  0x39   : > { %12440 = vmatmul.mubr.msk.f32.gmra.mrb[2].mxu0 %vm171_vm1, %v14073_v37  ;;  %16439 = vst [vmem:[#allocation6_spill] sm:$0xff] %v14097_v42  ;;  %v14101_v44 = vld [vmem:[#allocation2 + $0x79] sm:$0xff]  ;;  %v14109_v45 = vld [vmem:[#allocation2 + $0x82] sm:$0xff]  ;;  %v14117_v48 = vld [vmem:[#allocation2 + $0x91] sm:$0xff] }
  0x3a   : > { %11846 = vmatmul.mubr.msk.f32.gmra.mrb[6].mxu1 %vm171_vm1, %v14079_v38  ;;  %12442 = vmatprep.mubr.msk.f32.mxu0 %vm171_vm1, %v14081_v39  ;;  %16440 = vst [vmem:[#allocation7_spill] sm:$0xff] %v14101_v44  ;;  %v14113_v46 = vld [vmem:[#allocation2 + $0x81] sm:$0xff]  ;;  %16442 = vst [vmem:[#allocation9_spill] sm:$0xff] %v14117_v48  ;;  %v14135_v54 = vld [vmem:[#allocation2 + $0x99] sm:$0xff] }
  0x3b   : > { %11848 = vmatprep.mubr.msk.f32.mxu1 %vm171_vm1, %v14083_v40  ;;  %16441 = vst [vmem:[#allocation8_spill] sm:$0xff] %v14113_v46  ;;  %v14127_v51 = vld [vmem:[#allocation2 + $0x9a] sm:$0xff]  ;;  %287 = vst.msk [vmem:[#allocation2 + $0x12a] sm:$0xff] %vm171_vm1, %v254_v50  ;;  %v14137_v55 = vld [vmem:[#allocation2 + $0xaa] sm:$0xff] }
  0x3c   : > { %16443 = vst [vmem:[#allocation10_spill] sm:$0xff] %v14135_v54  ;;  %288 = vst.msk [vmem:[#allocation2 + $0x13a] sm:$0xff] %vm171_vm1, %v255_v52  ;;  %v14142_v57 = vld [vmem:[#allocation2 + $0xa9] sm:$0xff]  ;;  %v14155_v61 = vld [vmem:[#allocation2 + $0xb2] sm:$0xff] }
  0x3d   : > { %12443 = vmatmul.mubr.msk.f32.gmra.mrb[4].mxu0 %vm171_vm1, %v14093_v41  ;;  %289 = vst.msk [vmem:[#allocation2 + $0x142] sm:$0xff] %vm171_vm1, %v256_v53  ;;  %16444 = vst [vmem:[#allocation11_spill] sm:$0xff] %v14142_v57  ;;  %v14161_v62 = vld [vmem:[#allocation2 + $0xb1] sm:$0xff]  ;;  %v14163_v63 = vld [vmem:[#allocation2 + $0xc2] sm:$0xff] }
  0x3e   : > { %11849 = vmatmul.mubr.msk.f32.gmra.mrb[8].mxu1 %vm171_vm1, %v14097_v42  ;;  %12445 = vmatprep.mubr.msk.f32.mxu0 %vm171_vm1, %v14099_v43  ;;  %290 = vst.msk [vmem:[#allocation2 + $0x152] sm:$0xff] %vm171_vm1, %v257_v56  ;;  %291 = vst.msk [vmem:[#allocation2 + $0x15a] sm:$0xff] %vm171_vm1, %v258_v58  ;;  %v14165_v0 = vld [vmem:[#allocation2 + $0xc1] sm:$0xff]  ;;  %v14173_v1 = vld [vmem:[#allocation2 + $0xca] sm:$0xff] }
  0x3f   : > { %11851 = vmatprep.mubr.msk.f32.mxu1 %vm171_vm1, %v14101_v44  ;;  %292 = vst.msk [vmem:[#allocation2 + $0x16a] sm:$0xff] %vm171_vm1, %v259_v59  ;;  %293 = vst.msk [vmem:[#allocation2 + $0x172] sm:$0xff] %vm171_vm1, %v260_v60  ;;  %v14177_v2 = vld [vmem:[#allocation2 + $0xc9] sm:$0xff]  ;;  %v14179_v3 = vld [vmem:[#allocation2 + $0xda] sm:$0xff] }
  0x40   : > { %16445 = vst [vmem:[#allocation12_spill] sm:$0xff] %v14161_v62  ;;  %16446 = vst [vmem:[#allocation13_spill] sm:$0xff] %v14165_v0  ;;  %v14181_v4 = vld [vmem:[#allocation2 + $0xd9] sm:$0xff]  ;;  %v14189_v5 = vld [vmem:[#allocation2 + $0xe2] sm:$0xff] }
  0x41   : > { %12446 = vmatmul.mubr.msk.f32.gmra.mrb[6].mxu0 %vm171_vm1, %v14109_v45  ;;  %16447 = vst [vmem:[#allocation14_spill] sm:$0xff] %v14177_v2  ;;  %16448 = vst [vmem:[#allocation15_spill] sm:$0xff] %v14181_v4  ;;  %v14193_v6 = vld [vmem:[#allocation2 + $0xe1] sm:$0xff]  ;;  %v14195_v7 = vld [vmem:[#allocation2 + $0x33] sm:$0xff] }
  0x42   : > { %11852 = vmatmul.mubr.msk.f32.gmra.mrb[10].mxu1 %vm171_vm1, %v14113_v46  ;;  %12448 = vmatprep.mubr.msk.f32.mxu0 %vm171_vm1, %v14115_v47  ;;  %16449 = vst [vmem:[#allocation16_spill] sm:$0xff] %v14193_v6  ;;  %v14197_v9 = vld [vmem:[#allocation2 + $0xf1] sm:$0xff]  ;;  %v14205_v10 = vld [vmem:[#allocation2 + $0x3b] sm:$0xff]  ;;  %v14215_v15 = vld [vmem:[#allocation2 + $0x109] sm:$0xff] }
  0x43   : > { %11854 = vmatprep.mubr.msk.f32.mxu1 %vm171_vm1, %v14117_v48  ;;  %16450 = vst [vmem:[#allocation17_spill] sm:$0xff] %v14197_v9  ;;  %v14207_v11 = vld [vmem:[#allocation2 + $0xf9] sm:$0xff]  ;;  %v14211_v12 = vld [vmem:[#allocation2 + $0x4b] sm:$0xff]  ;;  %16452 = vst [vmem:[#allocation19_spill] sm:$0xff] %v14215_v15 }
  0x44   : > { %16451 = vst [vmem:[#allocation18_spill] sm:$0xff] %v14207_v11  ;;  %294 = vst.msk [vmem:[#allocation2 + $0x182] sm:$0xff] %vm171_vm1, %v261_v13  ;;  %v14234_v19 = vld [vmem:[#allocation2 + $0x53] sm:$0xff]  ;;  %v14242_v21 = vld [vmem:[#allocation2 + $0x63] sm:$0xff] }
  0x45   : > { %12449 = vmatmul.mubr.msk.f32.gmra.mrb[8].mxu0 %vm171_vm1, %v14127_v51  ;;  %295 = vst.msk [vmem:[#allocation2 + $0x18a] sm:$0xff] %vm171_vm1, %v262_v14  ;;  %296 = vst.msk [vmem:[#allocation2 + $0x19a] sm:$0xff] %vm171_vm1, %v263_v16  ;;  %v14240_v20 = vld [vmem:[#allocation2 + $0x111] sm:$0xff]  ;;  %v14244_v22 = vld [vmem:[#allocation2 + $0x121] sm:$0xff] }
  0x46   : > { %11855 = vmatmul.mubr.msk.f32.gmra.mrb[12].mxu1 %vm171_vm1, %v14135_v54  ;;  %12451 = vmatprep.mubr.msk.f32.mxu0 %vm171_vm1, %v14137_v55  ;;  %297 = vst.msk [vmem:[#allocation2 + $0x1a2] sm:$0xff] %vm171_vm1, %v264_v17  ;;  %16453 = vst [vmem:[#allocation20_spill] sm:$0xff] %v14240_v20  ;;  %v14254_v23 = vld [vmem:[#allocation2 + $0x6b] sm:$0xff]  ;;  %v14260_v25 = vld [vmem:[#allocation2 + $0x7b] sm:$0xff] }
  0x47   : > { %11857 = vmatprep.mubr.msk.f32.mxu1 %vm171_vm1, %v14142_v57  ;;  %16454 = vst [vmem:[#allocation21_spill] sm:$0xff] %v14244_v22  ;;  %v14258_v24 = vld [vmem:[#allocation2 + $0x129] sm:$0xff]  ;;  %v14262_v26 = vld [vmem:[#allocation2 + $0x139] sm:$0xff]  ;;  %v14274_v28 = vld [vmem:[#allocation2 + $0x141] sm:$0xff] }
  0x48   : > { %16455 = vst [vmem:[#allocation22_spill] sm:$0xff] %v14258_v24  ;;  %16456 = vst [vmem:[#allocation23_spill] sm:$0xff] %v14262_v26  ;;  %v14270_v27 = vld [vmem:[#allocation2 + $0x83] sm:$0xff]  ;;  %v14276_v29 = vld [vmem:[#allocation2 + $0x93] sm:$0xff] }
  0x49   : > { %12452 = vmatmul.mubr.msk.f32.gmra.mrb[10].mxu0 %vm171_vm1, %v14155_v61  ;;  %16457 = vst [vmem:[#allocation24_spill] sm:$0xff] %v14274_v28  ;;  %v14278_v32 = vld [vmem:[#allocation2 + $0x151] sm:$0xff]  ;;  %v14286_v33 = vld [vmem:[#allocation2 + $0x9b] sm:$0xff]  ;;  %v14294_v50 = vld [vmem:[#allocation2 + $0x169] sm:$0xff] }
  0x4a   : > { %11858 = vmatmul.mubr.msk.f32.gmra.mrb[14].mxu1 %vm171_vm1, %v14161_v62  ;;  %12454 = vmatprep.mubr.msk.f32.mxu0 %vm171_vm1, %v14163_v63  ;;  %16458 = vst [vmem:[#allocation25_spill] sm:$0xff] %v14278_v32  ;;  %v14292_v49 = vld [vmem:[#allocation2 + $0xab] sm:$0xff]  ;;  %16460 = vst [vmem:[#allocation27_spill] sm:$0xff] %v14294_v50  ;;  %v14302_v52 = vld [vmem:[#allocation2 + $0xb3] sm:$0xff] }
  0x4b   : > { %11860 = vmatprep.mubr.msk.f32.mxu1 %vm171_vm1, %v14165_v0  ;;  %v14306_v53 = vld [vmem:[#allocation2 + $0x171] sm:$0xff]  ;;  %v14308_v56 = vld [vmem:[#allocation2 + $0xc3] sm:$0xff]  ;;  %v14319_v13 = vld [vmem:[#allocation2 + $0xdb] sm:$0xff] }
  0x4c   : > { %16461 = vst [vmem:[#allocation28_spill] sm:$0xff] %v14306_v53  ;;  %16462 = vst [vmem:[#allocation29_spill] sm:$0xff] %v14308_v56  ;;  %v298_v58 = vld [vmem:[#allocation2] sm:$0xff]  ;;  %v14316_v59 = vld [vmem:[#allocation2 + $0xcb] sm:$0xff] }
  0x4d   : > { %12455 = vmatmul.mubr.msk.f32.gmra.mrb[12].mxu0 %vm171_vm1, %v14173_v1  ;;  %16463 = vst [vmem:[#allocation30_spill] sm:$0xff] %v14316_v59  ;;  %v299_v60 = vld [vmem:[#allocation2 + $0x8] sm:$0xff]  ;;  %16464 = vst [vmem:[#allocation31_spill] sm:$0xff] %v14319_v13  ;;  %v300_v14 = vld [vmem:[#allocation2 + $0x18] sm:$0xff] }
  0x4e   : > { %11861 = vmatmul.mubr.msk.f32.gmra.mrb[16].mxu1 %vm171_vm1, %v14177_v2  ;;  %12457 = vmatprep.mubr.msk.f32.mxu0 %vm171_vm1, %v14179_v3  ;;  %v14326_v16 = vld [vmem:[%s16325_s1 + $0xc] sm:$0xf]  ;;  %v14331_v17 = vld [vmem:[#allocation2 + $0xe3] sm:$0xff]  ;;  %v14421_v62 = vld [vmem:[#allocation2 + $0x173] sm:$0xff] }
  0x4f   : > { %11863 = vmatprep.mubr.msk.f32.mxu1 %vm171_vm1, %v14181_v4  ;;  %16465 = vst [vmem:[#allocation32_spill] sm:$0xff] %v14331_v17  ;;  %v14409_v4 = vld [vmem:[#allocation2 + $0x98] sm:$0xff]  ;;  %v14411_v2 = vld [vmem:[#allocation2 + $0x16b] sm:$0xff]  ;;  %16477 = vst [vmem:[#allocation44_spill] sm:$0xff] %v14421_v62 }
  0x50   : > { %16476 = vst [vmem:[#allocation43_spill] sm:$0xff] %v14411_v2  ;;  %v14413_v0 = vld [vmem:[#allocation2 + $0xa8] sm:$0xff]  ;;  %v5335_v54 = vld [vmem:[#allocation2 + $0x19b] sm:$0xff] }
  0x51   : > { %12458 = vmatmul.mubr.msk.f32.gmra.mrb[14].mxu0 %vm171_vm1, %v14189_v5  ;;  %v5333_v57 = vld [vmem:[#allocation2 + $0x183] sm:$0xff]  ;;  %v14448_v48 = vld [vmem:[#allocation2 + $0x34] sm:$0xff]  ;;  %v14463_v46 = vld [vmem:[#allocation2 + $0x4c] sm:$0xff] }
  0x52   : > { %11864 = vmatmul.mubr.msk.f32.gmra.mrb[18].mxu1 %vm171_vm1, %v14193_v6  ;;  %12486 = vmatprep.mubr.msk.f32.mxu0 %vm171_vm1, %v14195_v7  ;;  %v14405_v6 = vld [vmem:[#allocation2 + $0x15b] sm:$0xff]  ;;  %16478 = vst [vmem:[#allocation45_spill] sm:$0xff] %v14448_v48  ;;  %16480 = vst [vmem:[#allocation47_spill] sm:$0xff] %v14463_v46  ;;  %v14486_v44 = vld [vmem:[#allocation2 + $0x64] sm:$0xff] }
  0x53   : > { %11866 = vmatprep.mubr.msk.f32.mxu1 %vm171_vm1, %v14197_v9  ;;  %v14397_v9 = vld [vmem:[#allocation2 + $0x90] sm:$0xff]  ;;  %16475 = vst [vmem:[#allocation42_spill] sm:$0xff] %v14405_v6  ;;  %16482 = vst [vmem:[#allocation49_spill] sm:$0xff] %v14486_v44  ;;  %v14504_v42 = vld [vmem:[#allocation2 + $0x7c] sm:$0xff] }
  0x54   : > { %16484 = vst [vmem:[#allocation51_spill] sm:$0xff] %v14504_v42  ;;  %v14520_v40 = vld [vmem:[#allocation2 + $0x94] sm:$0xff]  ;;  %v14536_v38 = vld [vmem:[#allocation2 + $0xac] sm:$0xff]  ;;  %v14552_v35 = vld [vmem:[#allocation2 + $0xc4] sm:$0xff] }
  0x55   : > { %12487 = vmatmul.mubr.msk.f32.vlgmr.msra.gmra.mrb[0].mxu0 %vm171_vm1, %v14205_v10  ;;  %16486 = vst [vmem:[#allocation53_spill] sm:$0xff] %v14520_v40  ;;  %16488 = vst [vmem:[#allocation55_spill] sm:$0xff] %v14536_v38 }
  0x56   : > { %12535 = vmatpush3.msk.msra.mxu0 %vm461_vm0, %v14068_v36  ;;  %11867 = vmatmul.mubr.msk.f32.gmra.mrb[20].mxu1 %vm171_vm1, %v14207_v11  ;;  %v14290_v36 = vld [vmem:[#allocation2 + $0x159] sm:$0xff]  ;;  %16490 = vst [vmem:[#allocation57_spill] sm:$0xff] %v14552_v35 }
  0x57   : > { %12489 = vmatprep.mubr.msk.f32.mxu0 %vm171_vm1, %v14211_v12  ;;  %11869 = vmatprep.mubr.msk.f32.mxu1 %vm171_vm1, %v14215_v15  ;;  %16459 = vst [vmem:[#allocation26_spill] sm:$0xff] %v14290_v36  ;;  %v14393_v15 = vld [vmem:[#allocation2 + $0x80] sm:$0xff]  ;;  %v14395_v11 = vld [vmem:[#allocation2 + $0x153] sm:$0xff] }
  0x58   : > { %12584 = vmatprep.subr.msk.mxu0 %vm461_vm0, %v14228_v18  ;;  %16474 = vst [vmem:[#allocation41_spill] sm:$0xff] %v14395_v11 }
  0x59   : > { %12490 = vmatmul.mubr.msk.f32.gmra.mrb[2].mxu0 %vm171_vm1, %v14234_v19 }
  0x5a   : > { %11870 = vmatmul.mubr.msk.f32.gmra.mrb[22].mxu1 %vm171_vm1, %v14240_v20  ;;  %12492 = vmatprep.mubr.msk.f32.mxu0 %vm171_vm1, %v14242_v21  ;;  %v14389_v20 = vld [vmem:[#allocation2 + $0x143] sm:$0xff] }
  0x5b   : > { %11872 = vmatprep.mubr.msk.f32.mxu1 %vm171_vm1, %v14244_v22  ;;  %v14381_v22 = vld [vmem:[#allocation2 + $0x78] sm:$0xff]  ;;  %16473 = vst [vmem:[#allocation40_spill] sm:$0xff] %v14389_v20 }
  0x5d   : > { %12493 = vmatmul.mubr.msk.f32.gmra.mrb[4].mxu0 %vm171_vm1, %v14254_v23 }
  0x5e   : > { %11873 = vmatmul.mubr.msk.f32.gmra.mrb[24].mxu1 %vm171_vm1, %v14258_v24  ;;  %12495 = vmatprep.mubr.msk.f32.mxu0 %vm171_vm1, %v14260_v25  ;;  %v14379_v24 = vld [vmem:[#allocation2 + $0x13b] sm:$0xff] }
  0x5f   : > { %11875 = vmatprep.mubr.msk.f32.mxu1 %vm171_vm1, %v14262_v26  ;;  %v14377_v26 = vld [vmem:[#allocation2 + $0x68] sm:$0xff]  ;;  %16472 = vst [vmem:[#allocation39_spill] sm:$0xff] %v14379_v24 }
  0x61   : > { %12496 = vmatmul.mubr.msk.f32.gmra.mrb[6].mxu0 %vm171_vm1, %v14270_v27 }
  0x62   : > { %11876 = vmatmul.mubr.msk.f32.gmra.mrb[26].mxu1 %vm171_vm1, %v14274_v28  ;;  %12498 = vmatprep.mubr.msk.f32.mxu0 %vm171_vm1, %v14276_v29  ;;  %v14365_v28 = vld [vmem:[#allocation2 + $0x60] sm:$0xff] }
  0x63   : > { %11878 = vmatprep.mubr.msk.f32.mxu1 %vm171_vm1, %v14278_v32  ;;  %v14361_v32 = vld [vmem:[#allocation2 + $0x50] sm:$0xff] }
  0x65   : > { %12499 = vmatmul.mubr.msk.f32.gmra.mrb[8].mxu0 %vm171_vm1, %v14286_v33 }
  0x66   : > { %11879 = vmatmul.mubr.msk.f32.gmra.mrb[28].mxu1 %vm171_vm1, %v14290_v36  ;;  %12501 = vmatprep.mubr.msk.f32.mxu0 %vm171_vm1, %v14292_v49  ;;  %v14348_v36 = vld [vmem:[#allocation2 + $0x10b] sm:$0xff] }
  0x67   : > { %11881 = vmatprep.mubr.msk.f32.mxu1 %vm171_vm1, %v14294_v50  ;;  %v302_v50 = vld [vmem:[#allocation2 + $0x30] sm:$0xff]  ;;  %16468 = vst [vmem:[#allocation35_spill] sm:$0xff] %v14348_v36 }
  0x69   : > { %12502 = vmatmul.mubr.msk.f32.gmra.mrb[10].mxu0 %vm171_vm1, %v14302_v52 }
  0x6a   : > { %11882 = vmatmul.mubr.msk.f32.gmra.mrb[30].mxu1 %vm171_vm1, %v14306_v53  ;;  %12504 = vmatprep.mubr.msk.f32.mxu0 %vm171_vm1, %v14308_v56  ;;  %v14334_v53 = vld [vmem:[#allocation2 + $0xf3] sm:$0xff] }
  0x6b   : > { %11886 = vmatprep.mubr.msk.f32.mxu1 %vm171_vm1, %v298_v58  ;;  %v301_v58 = vld [vmem:[#allocation2 + $0x20] sm:$0xff]  ;;  %16466 = vst [vmem:[#allocation33_spill] sm:$0xff] %v14334_v53  ;;  %v14578_v56 = vld [vmem:[#allocation2 + $0xf4] sm:$0xff] }
  0x6d   : > { %12505 = vmatmul.mubr.msk.f32.gmra.mrb[12].mxu0 %vm171_vm1, %v14316_v59  ;;  %v1016_v59 = vld [vmem:[#allocation2 + $0x1a] sm:$0xff] }
  0x6e   : > { %11887 = vmatmul.mubr.msk.f32.vlgmr.msra.gmra.mrb[0].mxu1 %vm171_vm1, %v299_v60  ;;  %12507 = vmatprep.mubr.msk.f32.mxu0 %vm171_vm1, %v14319_v13  ;;  %v14345_v60 = vld [vmem:[#allocation2 + $0xfb] sm:$0xff] }
  0x6f   : > { %11889 = vmatprep.mubr.msk.f32.mxu1 %vm171_vm1, %v300_v14  ;;  %11935 = vmatpush3.msk.msra.mxu1 %vm461_vm0, %v14006_v8  ;;  %16467 = vst [vmem:[#allocation34_spill] sm:$0xff] %v14345_v60  ;;  %v303_v14 = vld [vmem:[#allocation2 + $0x38] sm:$0xff]  ;;  %v14350_v8 = vld [vmem:[#allocation2 + $0x48] sm:$0xff] }
  0x70   : > { %11984 = vmatprep.subr.msk.mxu1 %vm461_vm0, %v14326_v16  ;;  %v14563_v13 = vld [vmem:[#allocation2 + $0xdc] sm:$0xff] }
  0x71   : > { %12508 = vmatmul.mubr.msk.f32.gmra.mrb[14].mxu0 %vm171_vm1, %v14331_v17  ;;  %v1014_v17 = vld [vmem:[#allocation2 + $0x2] sm:$0xff] }
  0x72   : > { %11890 = vmatmul.mubr.msk.f32.gmra.mrb[2].mxu1 %vm171_vm1, %v301_v58  ;;  %12510 = vmatprep.mubr.msk.f32.mxu0 %vm171_vm1, %v14334_v53  ;;  %v14357_v58 = vld [vmem:[#allocation2 + $0x113] sm:$0xff]  ;;  %v14538_v53 = vld [vmem:[#allocation2 + $0x168] sm:$0xff] }
  0x73   : > { %11892 = vmatprep.mubr.msk.f32.mxu1 %vm171_vm1, %v302_v50  ;;  %16469 = vst [vmem:[#allocation36_spill] sm:$0xff] %v14357_v58  ;;  %v14363_v50 = vld [vmem:[#allocation2 + $0x123] sm:$0xff] }
  0x74   : > { %16470 = vst [vmem:[#allocation37_spill] sm:$0xff] %v14363_v50 }
  0x75   : > { %12511 = vmatmul.mubr.msk.f32.gmra.mrb[16].mxu0 %vm171_vm1, %v14345_v60  ;;  %v14522_v60 = vld [vmem:[#allocation2 + $0x150] sm:$0xff] }
  0x76   : > { %11893 = vmatmul.mubr.msk.f32.gmra.mrb[4].mxu1 %vm171_vm1, %v303_v14  ;;  %12513 = vmatprep.mubr.msk.f32.mxu0 %vm171_vm1, %v14348_v36  ;;  %v14373_v14 = vld [vmem:[#allocation2 + $0x12b] sm:$0xff]  ;;  %v14506_v36 = vld [vmem:[#allocation2 + $0x138] sm:$0xff] }
  0x77   : > { %11895 = vmatprep.mubr.msk.f32.mxu1 %vm171_vm1, %v14350_v8  ;;  %16471 = vst [vmem:[#allocation38_spill] sm:$0xff] %v14373_v14 }
  0x79   : > { %12514 = vmatmul.mubr.msk.f32.gmra.mrb[18].mxu0 %vm171_vm1, %v14357_v58  ;;  %v14488_v58 = vld [vmem:[#allocation2 + $0x120] sm:$0xff] }
  0x7a   : > { %11896 = vmatmul.mubr.msk.f32.gmra.mrb[6].mxu1 %vm171_vm1, %v14361_v32  ;;  %12516 = vmatprep.mubr.msk.f32.mxu0 %vm171_vm1, %v14363_v50  ;;  %v14465_v50 = vld [vmem:[#allocation2 + $0x108] sm:$0xff] }
  0x7b   : > { %11898 = vmatprep.mubr.msk.f32.mxu1 %vm171_vm1, %v14365_v28 }
  0x7d   : > { %12517 = vmatmul.mubr.msk.f32.gmra.mrb[20].mxu0 %vm171_vm1, %v14373_v14  ;;  %v14450_v14 = vld [vmem:[#allocation2 + $0xf0] sm:$0xff] }
  0x7e   : > { %11899 = vmatmul.mubr.msk.f32.gmra.mrb[8].mxu1 %vm171_vm1, %v14377_v26  ;;  %12519 = vmatprep.mubr.msk.f32.mxu0 %vm171_vm1, %v14379_v24  ;;  %v14438_v24 = vld [vmem:[#allocation2 + $0xd8] sm:$0xff] }
  0x7f   : > { %11901 = vmatprep.mubr.msk.f32.mxu1 %vm171_vm1, %v14381_v22 }
  0x81   : > { %12520 = vmatmul.mubr.msk.f32.gmra.mrb[22].mxu0 %vm171_vm1, %v14389_v20  ;;  %v14427_v20 = vld [vmem:[#allocation2 + $0xc0] sm:$0xff] }
  0x82   : > { %11902 = vmatmul.mubr.msk.f32.gmra.mrb[10].mxu1 %vm171_vm1, %v14393_v15  ;;  %12522 = vmatprep.mubr.msk.f32.mxu0 %vm171_vm1, %v14395_v11  ;;  %v14425_v11 = vld [vmem:[#allocation2 + $0xb0] sm:$0xff] }
  0x83   : > { %11904 = vmatprep.mubr.msk.f32.mxu1 %vm171_vm1, %v14397_v9 }
  0x85   : > { %12523 = vmatmul.mubr.msk.f32.gmra.mrb[24].mxu0 %vm171_vm1, %v14405_v6  ;;  %v5334_v6 = vld [vmem:[#allocation2 + $0x18b] sm:$0xff] }
  0x86   : > { %11905 = vmatmul.mubr.msk.f32.gmra.mrb[12].mxu1 %vm171_vm1, %v14409_v4  ;;  %12525 = vmatprep.mubr.msk.f32.mxu0 %vm171_vm1, %v14411_v2  ;;  %v14436_v2 = vld [vmem:[#allocation2 + $0xc8] sm:$0xff] }
  0x87   : > { %11907 = vmatprep.mubr.msk.f32.mxu1 %vm171_vm1, %v14413_v0 }
  0x89   : > { %12526 = vmatmul.mubr.msk.f32.gmra.mrb[26].mxu0 %vm171_vm1, %v14421_v62  ;;  %v5336_v62 = vld [vmem:[#allocation2 + $0x1a3] sm:$0xff] }
  0x8a   : > { %11908 = vmatmul.mubr.msk.f32.gmra.mrb[14].mxu1 %vm171_vm1, %v14425_v11  ;;  %12528 = vmatprep.mubr.msk.f32.mxu0 %vm171_vm1, %v5333_v57  ;;  %v14446_v57 = vld [vmem:[#allocation2 + $0xe0] sm:$0xff] }
  0x8b   : > { %11910 = vmatprep.mubr.msk.f32.mxu1 %vm171_vm1, %v14427_v20 }
  0x8d   : > { %12529 = vmatmul.mubr.msk.f32.gmra.mrb[28].mxu0 %vm171_vm1, %v5334_v6  ;;  %v14457_v6 = vld [vmem:[#allocation2 + $0x3c] sm:$0xff] }
  0x8e   : > { %11911 = vmatmul.mubr.msk.f32.gmra.mrb[16].mxu1 %vm171_vm1, %v14436_v2  ;;  %12531 = vmatprep.mubr.msk.f32.mxu0 %vm171_vm1, %v5335_v54  ;;  %16479 = vst [vmem:[#allocation46_spill] sm:$0xff] %v14457_v6  ;;  %v14461_v54 = vld [vmem:[#allocation2 + $0xf8] sm:$0xff] }
  0x8f   : > { %11913 = vmatprep.mubr.msk.f32.mxu1 %vm171_vm1, %v14438_v24 }
  0x91   : > { %12532 = vmatmul.mubr.msk.f32.gmra.mrb[30].mxu0 %vm171_vm1, %v5336_v62  ;;  %v14472_v62 = vld [vmem:[%s16325_s1 + $0x40] sm:$0xf] }
  0x92   : > { %11914 = vmatmul.mubr.msk.f32.gmra.mrb[18].mxu1 %vm171_vm1, %v14446_v57  ;;  %12536 = vmatprep.mubr.msk.f32.mxu0 %vm171_vm1, %v14448_v48  ;;  %v14478_v48 = vld [vmem:[#allocation2 + $0x54] sm:$0xff] }
  0x93   : > { %11916 = vmatprep.mubr.msk.f32.mxu1 %vm171_vm1, %v14450_v14  ;;  %16481 = vst [vmem:[#allocation48_spill] sm:$0xff] %v14478_v48 }
  0x95   : > { %12537 = vmatmul.mubr.msk.f32.vlgmr.msra.gmra.mrb[0].mxu0 %vm171_vm1, %v14457_v6  ;;  %v14484_v6 = vld [vmem:[#allocation2 + $0x110] sm:$0xff] }
  0x96   : > { %12585 = vmatpush3.msk.msra.mxu0 %vm461_vm0, %v14228_v18  ;;  %11917 = vmatmul.mubr.msk.f32.gmra.mrb[20].mxu1 %vm171_vm1, %v14461_v54  ;;  %v14498_v18 = vld [vmem:[#allocation2 + $0x6c] sm:$0xff] }
  0x97   : > { %12539 = vmatprep.mubr.msk.f32.mxu0 %vm171_vm1, %v14463_v46  ;;  %11919 = vmatprep.mubr.msk.f32.mxu1 %vm171_vm1, %v14465_v50  ;;  %16483 = vst [vmem:[#allocation50_spill] sm:$0xff] %v14498_v18  ;;  %v14502_v46 = vld [vmem:[#allocation2 + $0x128] sm:$0xff] }
  0x98   : > { %12634 = vmatprep.subr.msk.mxu0 %vm461_vm0, %v14472_v62 }
  0x99   : > { %12540 = vmatmul.mubr.msk.f32.gmra.mrb[2].mxu0 %vm171_vm1, %v14478_v48  ;;  %v14518_v48 = vld [vmem:[#allocation2 + $0x140] sm:$0xff] }
  0x9a   : > { %11920 = vmatmul.mubr.msk.f32.gmra.mrb[22].mxu1 %vm171_vm1, %v14484_v6  ;;  %12542 = vmatprep.mubr.msk.f32.mxu0 %vm171_vm1, %v14486_v44  ;;  %v14514_v44 = vld [vmem:[#allocation2 + $0x84] sm:$0xff] }
  0x9b   : > { %11922 = vmatprep.mubr.msk.f32.mxu1 %vm171_vm1, %v14488_v58  ;;  %16485 = vst [vmem:[#allocation52_spill] sm:$0xff] %v14514_v44 }
  0x9d   : > { %12543 = vmatmul.mubr.msk.f32.gmra.mrb[4].mxu0 %vm171_vm1, %v14498_v18  ;;  %v14534_v18 = vld [vmem:[#allocation2 + $0x158] sm:$0xff] }
  0x9e   : > { %11923 = vmatmul.mubr.msk.f32.gmra.mrb[24].mxu1 %vm171_vm1, %v14502_v46  ;;  %12545 = vmatprep.mubr.msk.f32.mxu0 %vm171_vm1, %v14504_v42  ;;  %v14530_v42 = vld [vmem:[#allocation2 + $0x9c] sm:$0xff] }
  0x9f   : > { %11925 = vmatprep.mubr.msk.f32.mxu1 %vm171_vm1, %v14506_v36  ;;  %16487 = vst [vmem:[#allocation54_spill] sm:$0xff] %v14530_v42 }
  0xa1   : > { %12546 = vmatmul.mubr.msk.f32.gmra.mrb[6].mxu0 %vm171_vm1, %v14514_v44  ;;  %v14550_v44 = vld [vmem:[#allocation2 + $0x170] sm:$0xff] }
  0xa2   : > { %11926 = vmatmul.mubr.msk.f32.gmra.mrb[26].mxu1 %vm171_vm1, %v14518_v48  ;;  %12548 = vmatprep.mubr.msk.f32.mxu0 %vm171_vm1, %v14520_v40  ;;  %v14546_v40 = vld [vmem:[#allocation2 + $0xb4] sm:$0xff] }
  0xa3   : > { %11928 = vmatprep.mubr.msk.f32.mxu1 %vm171_vm1, %v14522_v60  ;;  %16489 = vst [vmem:[#allocation56_spill] sm:$0xff] %v14546_v40 }
  0xa5   : > { %12549 = vmatmul.mubr.msk.f32.gmra.mrb[8].mxu0 %vm171_vm1, %v14530_v42  ;;  %v1015_v42 = vld [vmem:[#allocation2 + $0xa] sm:$0xff] }
  0xa6   : > { %11929 = vmatmul.mubr.msk.f32.gmra.mrb[28].mxu1 %vm171_vm1, %v14534_v18  ;;  %12551 = vmatprep.mubr.msk.f32.mxu0 %vm171_vm1, %v14536_v38  ;;  %v14560_v38 = vld [vmem:[#allocation2 + $0xcc] sm:$0xff] }
  0xa7   : > { %11931 = vmatprep.mubr.msk.f32.mxu1 %vm171_vm1, %v14538_v53 }
  0xa9   : > { %12552 = vmatmul.mubr.msk.f32.gmra.mrb[10].mxu0 %vm171_vm1, %v14546_v40  ;;  %v14570_v40 = vld [vmem:[%s16325_s1 + $0x10] sm:$0xf] }
  0xaa   : > { %11932 = vmatmul.mubr.msk.f32.gmra.mrb[30].mxu1 %vm171_vm1, %v14550_v44  ;;  %12554 = vmatprep.mubr.msk.f32.mxu0 %vm171_vm1, %v14552_v35  ;;  %v14575_v35 = vld [vmem:[#allocation2 + $0xe4] sm:$0xff] }
  0xab   : > { %11936 = vmatprep.mubr.msk.f32.mxu1 %vm171_vm1, %v1014_v17  ;;  %v1017_v17 = vld [vmem:[#allocation2 + $0x22] sm:$0xff] }
  0xad   : > { %12555 = vmatmul.mubr.msk.f32.gmra.mrb[12].mxu0 %vm171_vm1, %v14560_v38 }
  0xae   : > { %11937 = vmatmul.mubr.msk.f32.vlgmr.msra.gmra.mrb[0].mxu1 %vm171_vm1, %v1015_v42  ;;  %12557 = vmatprep.mubr.msk.f32.mxu0 %vm171_vm1, %v14563_v13  ;;  %v14589_v42 = vld [vmem:[#allocation2 + $0xfc] sm:$0xff] }
  0xaf   : > { %11939 = vmatprep.mubr.msk.f32.mxu1 %vm171_vm1, %v1016_v59  ;;  %11985 = vmatpush3.msk.msra.mxu1 %vm461_vm0, %v14326_v16  ;;  %v14593_v59 = vld [vmem:[#allocation2 + $0x10c] sm:$0xff]  ;;  %v14601_v16 = vld [vmem:[#allocation2 + $0x114] sm:$0xff] }
  0xb0   : > { %12034 = vmatprep.subr.msk.mxu1 %vm461_vm0, %v14570_v40 }
  0xb1   : > { %12558 = vmatmul.mubr.msk.f32.gmra.mrb[14].mxu0 %vm171_vm1, %v14575_v35 }
  0xb2   : > { %11940 = vmatmul.mubr.msk.f32.gmra.mrb[2].mxu1 %vm171_vm1, %v1017_v17  ;;  %12560 = vmatprep.mubr.msk.f32.mxu0 %vm171_vm1, %v14578_v56  ;;  %v14605_v17 = vld [vmem:[#allocation2 + $0x124] sm:$0xff] }
  0xb3   : > { %11942 = vmatprep.mubr.msk.f32.mxu1 %vm171_vm1, %v14049_v30  ;;  %v14613_v30 = vld [vmem:[#allocation2 + $0x12c] sm:$0xff] }
  0xb5   : > { %12561 = vmatmul.mubr.msk.f32.gmra.mrb[16].mxu0 %vm171_vm1, %v14589_v42 }
  0xb6   : > { %11943 = vmatmul.mubr.msk.f32.gmra.mrb[4].mxu1 %vm171_vm1, %v14051_v31  ;;  %12563 = vmatprep.mubr.msk.f32.mxu0 %vm171_vm1, %v14593_v59  ;;  %v14617_v31 = vld [vmem:[#allocation2 + $0x13c] sm:$0xff] }
  0xb7   : > { %11945 = vmatprep.mubr.msk.f32.mxu1 %vm171_vm1, %v14059_v34  ;;  %v14625_v34 = vld [vmem:[#allocation2 + $0x144] sm:$0xff] }
  0xb9   : > { %12564 = vmatmul.mubr.msk.f32.gmra.mrb[18].mxu0 %vm171_vm1, %v14601_v16 }
  0xba   : > { %11946 = vmatmul.mubr.msk.f32.gmra.mrb[6].mxu1 %vm171_vm1, %v14073_v37  ;;  %12566 = vmatprep.mubr.msk.f32.mxu0 %vm171_vm1, %v14605_v17  ;;  %v14629_v37 = vld [vmem:[#allocation2 + $0x154] sm:$0xff] }
  0xbb   : > { %11948 = vmatprep.mubr.msk.f32.mxu1 %vm171_vm1, %v14081_v39  ;;  %v14637_v39 = vld [vmem:[#allocation2 + $0x15c] sm:$0xff] }
  0xbd   : > { %12567 = vmatmul.mubr.msk.f32.gmra.mrb[20].mxu0 %vm171_vm1, %v14613_v30 }
  0xbe   : > { %11949 = vmatmul.mubr.msk.f32.gmra.mrb[8].mxu1 %vm171_vm1, %v14093_v41  ;;  %12569 = vmatprep.mubr.msk.f32.mxu0 %vm171_vm1, %v14617_v31  ;;  %v14641_v41 = vld [vmem:[#allocation2 + $0x16c] sm:$0xff] }
  0xbf   : > { %11951 = vmatprep.mubr.msk.f32.mxu1 %vm171_vm1, %v14099_v43  ;;  %v14649_v43 = vld [vmem:[#allocation2 + $0x174] sm:$0xff] }
  0xc0   : > { %16491 = vst [vmem:[#allocation58_spill] sm:$0xff] %v14649_v43 }
  0xc1   : > { %12570 = vmatmul.mubr.msk.f32.gmra.mrb[22].mxu0 %vm171_vm1, %v14625_v34 }
  0xc2   : > { %11952 = vmatmul.mubr.msk.f32.gmra.mrb[10].mxu1 %vm171_vm1, %v14109_v45  ;;  %12572 = vmatprep.mubr.msk.f32.mxu0 %vm171_vm1, %v14629_v37  ;;  %v5723_v45 = vld [vmem:[#allocation2 + $0x184] sm:$0xff] }
  0xc3   : > { %11954 = vmatprep.mubr.msk.f32.mxu1 %vm171_vm1, %v14115_v47  ;;  %v5724_v47 = vld [vmem:[#allocation2 + $0x18c] sm:$0xff] }
  0xc5   : > { %12573 = vmatmul.mubr.msk.f32.gmra.mrb[24].mxu0 %vm171_vm1, %v14637_v39 }
  0xc6   : > { %11955 = vmatmul.mubr.msk.f32.gmra.mrb[12].mxu1 %vm171_vm1, %v14127_v51  ;;  %12575 = vmatprep.mubr.msk.f32.mxu0 %vm171_vm1, %v14641_v41  ;;  %v5725_v51 = vld [vmem:[#allocation2 + $0x19c] sm:$0xff] }
  0xc7   : > { %11957 = vmatprep.mubr.msk.f32.mxu1 %vm171_vm1, %v14137_v55  ;;  %v5726_v55 = vld [vmem:[#allocation2 + $0x1a4] sm:$0xff] }
  0xc9   : > { %12576 = vmatmul.mubr.msk.f32.gmra.mrb[26].mxu0 %vm171_vm1, %v14649_v43  ;;  %v14666_v43 = vld [vmem:[#allocation2 + $0xf2] sm:$0xff] }
  0xca   : > { %11958 = vmatmul.mubr.msk.f32.gmra.mrb[14].mxu1 %vm171_vm1, %v14155_v61  ;;  %12578 = vmatprep.mubr.msk.f32.mxu0 %vm171_vm1, %v5723_v45  ;;  %v14675_v61 = vld [vmem:[#allocation2 + $0xfa] sm:$0xff]  ;;  %v16513_v45 = vld [vmem:[#allocation41_spill] sm:$0xff] }
  0xcb   : > { %11960 = vmatprep.mubr.msk.f32.mxu1 %vm171_vm1, %v14163_v63  ;;  %v14677_v63 = vld [vmem:[#allocation2 + $0x10a] sm:$0xff] }
  0xcd   : > { %12579 = vmatmul.mubr.msk.f32.gmra.mrb[28].mxu0 %vm171_vm1, %v5724_v47  ;;  %v16514_v47 = vld [vmem:[#allocation12_spill] sm:$0xff] }
  0xce   : > { %11961 = vmatmul.mubr.msk.f32.gmra.mrb[16].mxu1 %vm171_vm1, %v14173_v1  ;;  %12581 = vmatprep.mubr.msk.f32.mxu0 %vm171_vm1, %v5725_v51  ;;  %v14684_v1 = vld [vmem:[%s16325_s1 + $0x44] sm:$0xf]  ;;  %v16515_v51 = vld [vmem:[#allocation42_spill] sm:$0xff] }
  0xcf   : > { %11963 = vmatprep.mubr.msk.f32.mxu1 %vm171_vm1, %v14179_v3  ;;  %v14694_v3 = vld [vmem:[#allocation2 + $0x112] sm:$0xff] }
  0xd1   : > { %12582 = vmatmul.mubr.msk.f32.gmra.mrb[30].mxu0 %vm171_vm1, %v5726_v55  ;;  %v16516_v55 = vld [vmem:[#allocation13_spill] sm:$0xff] }
  0xd2   : > { %11964 = vmatmul.mubr.msk.f32.gmra.mrb[18].mxu1 %vm171_vm1, %v14189_v5  ;;  %12586 = vmatprep.mubr.msk.f32.mxu0 %vm171_vm1, %v14350_v8  ;;  %v14696_v5 = vld [vmem:[#allocation2 + $0x122] sm:$0xff] }
  0xd3   : > { %11966 = vmatprep.mubr.msk.f32.mxu1 %vm171_vm1, %v14666_v43  ;;  %v1406_v8 = vld [vmem:[#allocation2 + $0x1b] sm:$0xff] }
  0xd5   : > { %12587 = vmatmul.mubr.msk.f32.vlgmr.msra.gmra.mrb[0].mxu0 %vm171_vm1, %v14361_v32  ;;  %v14710_v32 = vld [vmem:[#allocation2 + $0x13a] sm:$0xff] }
  0xd6   : > { %12635 = vmatpush3.msk.msra.mxu0 %vm461_vm0, %v14472_v62  ;;  %11967 = vmatmul.mubr.msk.f32.gmra.mrb[20].mxu1 %vm171_vm1, %v14675_v61  ;;  %v16511_v62 = vld [vmem:[#allocation40_spill] sm:$0xff] }
  0xd7   : > { %12589 = vmatprep.mubr.msk.f32.mxu0 %vm171_vm1, %v14365_v28  ;;  %11969 = vmatprep.mubr.msk.f32.mxu1 %vm171_vm1, %v14677_v63  ;;  %v14708_v28 = vld [vmem:[#allocation2 + $0x12a] sm:$0xff] }
  0xd8   : > { %12684 = vmatprep.subr.msk.mxu0 %vm461_vm0, %v14684_v1 }
  0xd9   : > { %12590 = vmatmul.mubr.msk.f32.gmra.mrb[2].mxu0 %vm171_vm1, %v14377_v26  ;;  %v14722_v26 = vld [vmem:[#allocation2 + $0x152] sm:$0xff] }
  0xda   : > { %11970 = vmatmul.mubr.msk.f32.gmra.mrb[22].mxu1 %vm171_vm1, %v14694_v3  ;;  %12592 = vmatprep.mubr.msk.f32.mxu0 %vm171_vm1, %v14381_v22  ;;  %v14720_v22 = vld [vmem:[#allocation2 + $0x142] sm:$0xff] }
  0xdb   : > { %11972 = vmatprep.mubr.msk.f32.mxu1 %vm171_vm1, %v14696_v5 }
  0xdd   : > { %12593 = vmatmul.mubr.msk.f32.gmra.mrb[4].mxu0 %vm171_vm1, %v14393_v15  ;;  %v14734_v15 = vld [vmem:[#allocation2 + $0x16a] sm:$0xff] }
  0xde   : > { %11973 = vmatmul.mubr.msk.f32.gmra.mrb[24].mxu1 %vm171_vm1, %v14708_v28  ;;  %12595 = vmatprep.mubr.msk.f32.mxu0 %vm171_vm1, %v14397_v9  ;;  %v14732_v9 = vld [vmem:[#allocation2 + $0x15a] sm:$0xff] }
  0xdf   : > { %11975 = vmatprep.mubr.msk.f32.mxu1 %vm171_vm1, %v14710_v32 }
  0xe1   : > { %12596 = vmatmul.mubr.msk.f32.gmra.mrb[6].mxu0 %vm171_vm1, %v14409_v4  ;;  %v1404_v4 = vld [vmem:[#allocation2 + $0x3] sm:$0xff] }
  0xe2   : > { %11976 = vmatmul.mubr.msk.f32.gmra.mrb[26].mxu1 %vm171_vm1, %v14720_v22  ;;  %12598 = vmatprep.mubr.msk.f32.mxu0 %vm171_vm1, %v14413_v0  ;;  %v14744_v0 = vld [vmem:[#allocation2 + $0x172] sm:$0xff] }
  0xe3   : > { %11978 = vmatprep.mubr.msk.f32.mxu1 %vm171_vm1, %v14722_v26 }
  0xe5   : > { %12599 = vmatmul.mubr.msk.f32.gmra.mrb[8].mxu0 %vm171_vm1, %v14425_v11  ;;  %v1405_v11 = vld [vmem:[#allocation2 + $0xb] sm:$0xff] }
  0xe6   : > { %11979 = vmatmul.mubr.msk.f32.gmra.mrb[28].mxu1 %vm171_vm1, %v14732_v9  ;;  %12601 = vmatprep.mubr.msk.f32.mxu0 %vm171_vm1, %v14427_v20  ;;  %v14758_v20 = vld [vmem:[%s16325_s1 + $0x14] sm:$0xf] }
  0xe7   : > { %11981 = vmatprep.mubr.msk.f32.mxu1 %vm171_vm1, %v14734_v15 }
  0xe9   : > { %12602 = vmatmul.mubr.msk.f32.gmra.mrb[10].mxu0 %vm171_vm1, %v14436_v2  ;;  %v1407_v2 = vld [vmem:[#allocation2 + $0x23] sm:$0xff] }
  0xea   : > { %11982 = vmatmul.mubr.msk.f32.gmra.mrb[30].mxu1 %vm171_vm1, %v14744_v0  ;;  %12604 = vmatprep.mubr.msk.f32.mxu0 %vm171_vm1, %v14438_v24  ;;  %v16496_v24 = vld [vmem:[#allocation3_spill] sm:$0xff] }
  0xeb   : > { %11986 = vmatprep.mubr.msk.f32.mxu1 %vm171_vm1, %v1404_v4  ;;  %v1794_v4 = vld [vmem:[#allocation2 + $0x4] sm:$0xff] }
  0xed   : > { %12605 = vmatmul.mubr.msk.f32.gmra.mrb[12].mxu0 %vm171_vm1, %v14446_v57  ;;  %v16508_v57 = vld [vmem:[#allocation9_spill] sm:$0xff] }
  0xee   : > { %11987 = vmatmul.mubr.msk.f32.vlgmr.msra.gmra.mrb[0].mxu1 %vm171_vm1, %v1405_v11  ;;  %12607 = vmatprep.mubr.msk.f32.mxu0 %vm171_vm1, %v14450_v14  ;;  %v16507_v14 = vld [vmem:[#allocation38_spill] sm:$0xff] }
  0xef   : > { %11989 = vmatprep.mubr.msk.f32.mxu1 %vm171_vm1, %v1406_v8  ;;  %12035 = vmatpush3.msk.msra.mxu1 %vm461_vm0, %v14570_v40  ;;  %v14807_v40 = vld [vmem:[#allocation2 + $0x180] sm:$0xff]  ;;  %v16518_v11 = vld [vmem:[#allocation14_spill] sm:$0xff]  ;;  %v16519_v8 = vld [vmem:[#allocation44_spill] sm:$0xff] }
  0xf0   : > { %12084 = vmatprep.subr.msk.mxu1 %vm461_vm0, %v14758_v20 }
  0xf1   : > { %12608 = vmatmul.mubr.msk.f32.gmra.mrb[14].mxu0 %vm171_vm1, %v14461_v54  ;;  %v16510_v54 = vld [vmem:[#allocation10_spill] sm:$0xff] }
  0xf2   : > { %11990 = vmatmul.mubr.msk.f32.gmra.mrb[2].mxu1 %vm171_vm1, %v1407_v2  ;;  %12610 = vmatprep.mubr.msk.f32.mxu0 %vm171_vm1, %v14465_v50  ;;  %v16506_v50 = vld [vmem:[#allocation8_spill] sm:$0xff]  ;;  %v16520_v2 = vld [vmem:[#allocation15_spill] sm:$0xff] }
  0xf3   : > { %11992 = vmatprep.mubr.msk.f32.mxu1 %vm171_vm1, %v14195_v7  ;;  %v16492_v7 = vld [vmem:[#allocation29_spill] sm:$0xff] }
  0xf5   : > { %12611 = vmatmul.mubr.msk.f32.gmra.mrb[16].mxu0 %vm171_vm1, %v14484_v6  ;;  %v16509_v6 = vld [vmem:[#allocation39_spill] sm:$0xff] }
  0xf6   : > { %11993 = vmatmul.mubr.msk.f32.gmra.mrb[4].mxu1 %vm171_vm1, %v14205_v10  ;;  %12613 = vmatprep.mubr.msk.f32.mxu0 %vm171_vm1, %v14488_v58  ;;  %v6116_v10 = vld [vmem:[#allocation2 + $0x1b0] sm:$0xff] }
  0xf7   : > { %11995 = vmatprep.mubr.msk.f32.mxu1 %vm171_vm1, %v14211_v12  ;;  %v16493_v12 = vld [vmem:[#allocation30_spill] sm:$0xff]  ;;  %v16505_v58 = vld [vmem:[#allocation37_spill] sm:$0xff] }
  0xf9   : > { %12614 = vmatmul.mubr.msk.f32.gmra.mrb[18].mxu0 %vm171_vm1, %v14502_v46  ;;  %v14815_v46 = vld [vmem:[#allocation2 + $0x188] sm:$0xff] }
  0xfa   : > { %11996 = vmatmul.mubr.msk.f32.gmra.mrb[6].mxu1 %vm171_vm1, %v14234_v19  ;;  %12616 = vmatprep.mubr.msk.f32.mxu0 %vm171_vm1, %v14506_v36  ;;  %v6117_v19 = vld [vmem:[#allocation2 + $0x1b8] sm:$0xff]  ;;  %v16500_v36 = vld [vmem:[#allocation5_spill] sm:$0xff] }
  0xfb   : > { %11998 = vmatprep.mubr.msk.f32.mxu1 %vm171_vm1, %v14242_v21  ;;  %v16494_v21 = vld [vmem:[#allocation31_spill] sm:$0xff] }
  0xfd   : > { %12617 = vmatmul.mubr.msk.f32.gmra.mrb[20].mxu0 %vm171_vm1, %v14518_v48  ;;  %v6114_v48 = vld [vmem:[#allocation2 + $0x198] sm:$0xff] }
  0xfe   : > { %11999 = vmatmul.mubr.msk.f32.gmra.mrb[8].mxu1 %vm171_vm1, %v14254_v23  ;;  %12619 = vmatprep.mubr.msk.f32.mxu0 %vm171_vm1, %v14522_v60  ;;  %v16495_v23 = vld [vmem:[#allocation32_spill] sm:$0xff]  ;;  %v16504_v60 = vld [vmem:[#allocation7_spill] sm:$0xff] }
  0xff   : > { %12001 = vmatprep.mubr.msk.f32.mxu1 %vm171_vm1, %v14260_v25  ;;  %v16497_v25 = vld [vmem:[#allocation33_spill] sm:$0xff] }
 0x101   : > { %12620 = vmatmul.mubr.msk.f32.gmra.mrb[22].mxu0 %vm171_vm1, %v14534_v18  ;;  %v16512_v18 = vld [vmem:[#allocation11_spill] sm:$0xff] }
 0x102   : > { %12002 = vmatmul.mubr.msk.f32.gmra.mrb[10].mxu1 %vm171_vm1, %v14270_v27  ;;  %12622 = vmatprep.mubr.msk.f32.mxu0 %vm171_vm1, %v14538_v53  ;;  %v16498_v27 = vld [vmem:[#allocation4_spill] sm:$0xff] }
 0x103   : > { %12004 = vmatprep.mubr.msk.f32.mxu1 %vm171_vm1, %v14276_v29  ;;  %v14844_v29 = vld [vmem:[%s16325_s1 + $0x48] sm:$0xf] }
 0x104   : > { %v16503_v53 = vld [vmem:[#allocation36_spill] sm:$0xff] }
 0x105   : > { %12623 = vmatmul.mubr.msk.f32.gmra.mrb[24].mxu0 %vm171_vm1, %v14550_v44  ;;  %v6115_v44 = vld [vmem:[#allocation2 + $0x1a0] sm:$0xff] }
 0x106   : > { %12005 = vmatmul.mubr.msk.f32.gmra.mrb[12].mxu1 %vm171_vm1, %v14286_v33  ;;  %12625 = vmatprep.mubr.msk.f32.mxu0 %vm171_vm1, %v14807_v40  ;;  %v16499_v33 = vld [vmem:[#allocation34_spill] sm:$0xff] }
 0x107   : > { %12007 = vmatprep.mubr.msk.f32.mxu1 %vm171_vm1, %v14292_v49  ;;  %v16501_v49 = vld [vmem:[#allocation35_spill] sm:$0xff] }
 0x109   : > { %12626 = vmatmul.mubr.msk.f32.gmra.mrb[26].mxu0 %vm171_vm1, %v14815_v46 }
 0x10a   : > { %12008 = vmatmul.mubr.msk.f32.gmra.mrb[14].mxu1 %vm171_vm1, %v14302_v52  ;;  %12628 = vmatprep.mubr.msk.f32.mxu0 %vm171_vm1, %v6114_v48  ;;  %v16502_v52 = vld [vmem:[#allocation6_spill] sm:$0xff]  ;;  %v1795_v48 = vld [vmem:[#allocation2 + $0xc] sm:$0xff] }
 0x10b   : > { %12010 = vmatprep.mubr.msk.f32.mxu1 %vm171_vm1, %v16492_v7  ;;  %v16521_v7 = vld [vmem:[#allocation16_spill] sm:$0xff] }
 0x10d   : > { %12629 = vmatmul.mubr.msk.f32.gmra.mrb[28].mxu0 %vm171_vm1, %v6115_v44  ;;  %v1796_v44 = vld [vmem:[#allocation2 + $0x1c] sm:$0xff] }
 0x10e   : > { %12011 = vmatmul.mubr.msk.f32.gmra.mrb[16].mxu1 %vm171_vm1, %v16493_v12  ;;  %12631 = vmatprep.mubr.msk.f32.mxu0 %vm171_vm1, %v6116_v10  ;;  %v14900_v10 = vld [vmem:[%s16325_s1 + $0x18] sm:$0xf]  ;;  %v16522_v12 = vld [vmem:[#allocation17_spill] sm:$0xff] }
 0x10f   : > { %12013 = vmatprep.mubr.msk.f32.mxu1 %vm171_vm1, %v16494_v21  ;;  %v16523_v21 = vld [vmem:[#allocation18_spill] sm:$0xff] }
 0x111   : > { %12632 = vmatmul.mubr.msk.f32.gmra.mrb[30].mxu0 %vm171_vm1, %v6117_v19  ;;  %v1797_v19 = vld [vmem:[#allocation2 + $0x24] sm:$0xff] }
 0x112   : > { %12014 = vmatmul.mubr.msk.f32.gmra.mrb[18].mxu1 %vm171_vm1, %v16495_v23  ;;  %12636 = vmatprep.mubr.msk.f32.mxu0 %vm171_vm1, %v16496_v24  ;;  %v16524_v23 = vld [vmem:[#allocation19_spill] sm:$0xff]  ;;  %v16525_v24 = vld [vmem:[#allocation45_spill] sm:$0xff] }
 0x113   : > { %12016 = vmatprep.mubr.msk.f32.mxu1 %vm171_vm1, %v16497_v25  ;;  %v16526_v25 = vld [vmem:[#allocation20_spill] sm:$0xff] }
 0x115   : > { %12637 = vmatmul.mubr.msk.f32.vlgmr.msra.gmra.mrb[0].mxu0 %vm171_vm1, %v16498_v27  ;;  %v16527_v27 = vld [vmem:[#allocation46_spill] sm:$0xff] }
 0x116   : > { %12685 = vmatpush3.msk.msra.mxu0 %vm461_vm0, %v14684_v1  ;;  %12017 = vmatmul.mubr.msk.f32.gmra.mrb[20].mxu1 %vm171_vm1, %v16499_v33  ;;  %v16517_v1 = vld [vmem:[#allocation43_spill] sm:$0xff] }
 0x117   : > { %12639 = vmatprep.mubr.msk.f32.mxu0 %vm171_vm1, %v16500_v36  ;;  %12019 = vmatprep.mubr.msk.f32.mxu1 %vm171_vm1, %v16501_v49  ;;  %v16529_v33 = vld [vmem:[#allocation47_spill] sm:$0xff]  ;;  %v16530_v36 = vld [vmem:[#allocation22_spill] sm:$0xff]  ;;  %v16531_v49 = vld [vmem:[#allocation48_spill] sm:$0xff] }
 0x118   : > { %12734 = vmatprep.subr.msk.mxu0 %vm461_vm0, %v14844_v29 }
 0x119   : > { %12640 = vmatmul.mubr.msk.f32.gmra.mrb[2].mxu0 %vm171_vm1, %v16502_v52  ;;  %v16532_v52 = vld [vmem:[#allocation23_spill] sm:$0xff] }
 0x11a   : > { %12020 = vmatmul.mubr.msk.f32.gmra.mrb[22].mxu1 %vm171_vm1, %v16503_v53  ;;  %12642 = vmatprep.mubr.msk.f32.mxu0 %vm171_vm1, %v16504_v60  ;;  %v16533_v53 = vld [vmem:[#allocation49_spill] sm:$0xff]  ;;  %v16534_v60 = vld [vmem:[#allocation24_spill] sm:$0xff] }
 0x11b   : > { %12022 = vmatprep.mubr.msk.f32.mxu1 %vm171_vm1, %v16505_v58  ;;  %v16535_v58 = vld [vmem:[#allocation50_spill] sm:$0xff] }
 0x11d   : > { %12643 = vmatmul.mubr.msk.f32.gmra.mrb[4].mxu0 %vm171_vm1, %v16506_v50  ;;  %v16536_v50 = vld [vmem:[#allocation25_spill] sm:$0xff] }
 0x11e   : > { %12023 = vmatmul.mubr.msk.f32.gmra.mrb[24].mxu1 %vm171_vm1, %v16507_v14  ;;  %12645 = vmatprep.mubr.msk.f32.mxu0 %vm171_vm1, %v16508_v57  ;;  %v16537_v14 = vld [vmem:[#allocation51_spill] sm:$0xff]  ;;  %v16538_v57 = vld [vmem:[#allocation26_spill] sm:$0xff] }
 0x11f   : > { %12025 = vmatprep.mubr.msk.f32.mxu1 %vm171_vm1, %v16509_v6  ;;  %v16539_v6 = vld [vmem:[#allocation52_spill] sm:$0xff] }
 0x121   : > { %12646 = vmatmul.mubr.msk.f32.gmra.mrb[6].mxu0 %vm171_vm1, %v16510_v54  ;;  %v16540_v54 = vld [vmem:[#allocation27_spill] sm:$0xff] }
 0x122   : > { %12026 = vmatmul.mubr.msk.f32.gmra.mrb[26].mxu1 %vm171_vm1, %v16511_v62  ;;  %12648 = vmatprep.mubr.msk.f32.mxu0 %vm171_vm1, %v16512_v18  ;;  %v16541_v62 = vld [vmem:[#allocation53_spill] sm:$0xff]  ;;  %v14949_v18 = vld [vmem:[#allocation2 + $0x181] sm:$0xff] }
 0x123   : > { %12028 = vmatprep.mubr.msk.f32.mxu1 %vm171_vm1, %v16513_v45  ;;  %v16542_v45 = vld [vmem:[#allocation28_spill] sm:$0xff] }
 0x125   : > { %12649 = vmatmul.mubr.msk.f32.gmra.mrb[8].mxu0 %vm171_vm1, %v16514_v47  ;;  %v16543_v47 = vld [vmem:[#allocation54_spill] sm:$0xff] }
 0x126   : > { %12029 = vmatmul.mubr.msk.f32.gmra.mrb[28].mxu1 %vm171_vm1, %v16515_v51  ;;  %12651 = vmatprep.mubr.msk.f32.mxu0 %vm171_vm1, %v16516_v55  ;;  %v14957_v51 = vld [vmem:[#allocation2 + $0x189] sm:$0xff]  ;;  %v16544_v55 = vld [vmem:[#allocation55_spill] sm:$0xff] }
 0x127   : > { %12031 = vmatprep.mubr.msk.f32.mxu1 %vm171_vm1, %v16517_v1  ;;  %v6504_v1 = vld [vmem:[#allocation2 + $0x199] sm:$0xff] }
 0x129   : > { %12652 = vmatmul.mubr.msk.f32.gmra.mrb[10].mxu0 %vm171_vm1, %v16518_v11  ;;  %v6505_v11 = vld [vmem:[#allocation2 + $0x1a1] sm:$0xff] }
 0x12a   : > { %12032 = vmatmul.mubr.msk.f32.gmra.mrb[30].mxu1 %vm171_vm1, %v16519_v8  ;;  %12654 = vmatprep.mubr.msk.f32.mxu0 %vm171_vm1, %v16520_v2  ;;  %v16546_v8 = vld [vmem:[#allocation57_spill] sm:$0xff] }
 0x12b   : > { %12036 = vmatprep.mubr.msk.f32.mxu1 %vm171_vm1, %v1794_v4  ;;  %v16545_v4 = vld [vmem:[#allocation56_spill] sm:$0xff]  ;;  %v6506_v2 = vld [vmem:[#allocation2 + $0x1b1] sm:$0xff] }
 0x12d   : > { %12655 = vmatmul.mubr.msk.f32.gmra.mrb[12].mxu0 %vm171_vm1, %v16521_v7  ;;  %v14981_v7 = vld [vmem:[#allocation2 + $0x52] sm:$0xff] }
 0x12e   : > { %12037 = vmatmul.mubr.msk.f32.vlgmr.msra.gmra.mrb[0].mxu1 %vm171_vm1, %v1795_v48  ;;  %12657 = vmatprep.mubr.msk.f32.mxu0 %vm171_vm1, %v16522_v12  ;;  %v6507_v48 = vld [vmem:[#allocation2 + $0x1b9] sm:$0xff] }
 0x12f   : > { %12039 = vmatprep.mubr.msk.f32.mxu1 %vm171_vm1, %v1796_v44  ;;  %12085 = vmatpush3.msk.msra.mxu1 %vm461_vm0, %v14758_v20  ;;  %v16528_v20 = vld [vmem:[#allocation21_spill] sm:$0xff]  ;;  %v2185_v12 = vld [vmem:[#allocation2 + $0x18] sm:$0xff] }
 0x130   : > { %12134 = vmatprep.subr.msk.mxu1 %vm461_vm0, %v14900_v10  ;;  %v14974_v44 = vld [vmem:[#allocation2 + $0x4a] sm:$0xff] }
 0x131   : > { %12658 = vmatmul.mubr.msk.f32.gmra.mrb[14].mxu0 %vm171_vm1, %v16523_v21  ;;  %v2187_v21 = vld [vmem:[#allocation2 + $0x30] sm:$0xff] }
 0x132   : > { %12040 = vmatmul.mubr.msk.f32.gmra.mrb[2].mxu1 %vm171_vm1, %v1797_v19  ;;  %12660 = vmatprep.mubr.msk.f32.mxu0 %vm171_vm1, %v16524_v23  ;;  %v2186_v19 = vld [vmem:[#allocation2 + $0x20] sm:$0xff]  ;;  %v2188_v23 = vld [vmem:[#allocation2 + $0x38] sm:$0xff] }
 0x133   : > { %12042 = vmatprep.mubr.msk.f32.mxu1 %vm171_vm1, %v16525_v24  ;;  %v2189_v24 = vld [vmem:[#allocation2 + $0x48] sm:$0xff] }
 0x135   : > { %12661 = vmatmul.mubr.msk.f32.gmra.mrb[16].mxu0 %vm171_vm1, %v16526_v25  ;;  %v15086_v25 = vld [vmem:[#allocation2 + $0x60] sm:$0xff] }
 0x136   : > { %12043 = vmatmul.mubr.msk.f32.gmra.mrb[4].mxu1 %vm171_vm1, %v16527_v27  ;;  %12663 = vmatprep.mubr.msk.f32.mxu0 %vm171_vm1, %v16528_v20  ;;  %v6894_v27 = vld [vmem:[#allocation2 + $0x19a] sm:$0xff] }
 0x137   : > { %12045 = vmatprep.mubr.msk.f32.mxu1 %vm171_vm1, %v16529_v33  ;;  %v15149_v20 = vld [vmem:[#allocation2 + $0xd8] sm:$0xff]  ;;  %v15158_v33 = vld [vmem:[#allocation2 + $0xe0] sm:$0xff] }
 0x139   : > { %12664 = vmatmul.mubr.msk.f32.gmra.mrb[18].mxu0 %vm171_vm1, %v16530_v36  ;;  %v6896_v36 = vld [vmem:[#allocation2 + $0x1b2] sm:$0xff] }
 0x13a   : > { %12046 = vmatmul.mubr.msk.f32.gmra.mrb[6].mxu1 %vm171_vm1, %v16531_v49  ;;  %12666 = vmatprep.mubr.msk.f32.mxu0 %vm171_vm1, %v16532_v52  ;;  %v15160_v49 = vld [vmem:[#allocation2 + $0xf0] sm:$0xff]  ;;  %v6897_v52 = vld [vmem:[#allocation2 + $0x1ba] sm:$0xff] }
 0x13b   : > { %12048 = vmatprep.mubr.msk.f32.mxu1 %vm171_vm1, %v16533_v53  ;;  %v15168_v53 = vld [vmem:[#allocation2 + $0xf8] sm:$0xff] }
 0x13d   : > { %12667 = vmatmul.mubr.msk.f32.gmra.mrb[20].mxu0 %vm171_vm1, %v16534_v60  ;;  %v15170_v60 = vld [vmem:[#allocation2 + $0x4b] sm:$0xff] }
 0x13e   : > { %12049 = vmatmul.mubr.msk.f32.gmra.mrb[8].mxu1 %vm171_vm1, %v16535_v58  ;;  %12669 = vmatprep.mubr.msk.f32.mxu0 %vm171_vm1, %v16536_v50  ;;  %v15172_v58 = vld [vmem:[#allocation2 + $0x108] sm:$0xff]  ;;  %v15179_v50 = vld [vmem:[#allocation2 + $0x53] sm:$0xff] }
 0x13f   : > { %12051 = vmatprep.mubr.msk.f32.mxu1 %vm171_vm1, %v16537_v14  ;;  %v15183_v14 = vld [vmem:[#allocation2 + $0x110] sm:$0xff] }
 0x141   : > { %12670 = vmatmul.mubr.msk.f32.gmra.mrb[22].mxu0 %vm171_vm1, %v16538_v57  ;;  %v15185_v57 = vld [vmem:[#allocation2 + $0x63] sm:$0xff] }
 0x142   : > { %12052 = vmatmul.mubr.msk.f32.gmra.mrb[10].mxu1 %vm171_vm1, %v16539_v6  ;;  %12672 = vmatprep.mubr.msk.f32.mxu0 %vm171_vm1, %v16540_v54  ;;  %v15187_v6 = vld [vmem:[#allocation2 + $0x120] sm:$0xff]  ;;  %v15194_v54 = vld [vmem:[%s16325_s1 + $0x50] sm:$0xf] }
 0x143   : > { %12054 = vmatprep.mubr.msk.f32.mxu1 %vm171_vm1, %v16541_v62  ;;  %v15200_v62 = vld [vmem:[#allocation2 + $0x6b] sm:$0xff] }
 0x145   : > { %12673 = vmatmul.mubr.msk.f32.gmra.mrb[24].mxu0 %vm171_vm1, %v16542_v45  ;;  %v15206_v45 = vld [vmem:[#allocation2 + $0x128] sm:$0xff] }
 0x146   : > { %12055 = vmatmul.mubr.msk.f32.gmra.mrb[12].mxu1 %vm171_vm1, %v16543_v47  ;;  %12675 = vmatprep.mubr.msk.f32.mxu0 %vm171_vm1, %v14949_v18  ;;  %v15208_v47 = vld [vmem:[#allocation2 + $0x7b] sm:$0xff] }
 0x147   : > { %12057 = vmatprep.mubr.msk.f32.mxu1 %vm171_vm1, %v16544_v55  ;;  %v15210_v55 = vld [vmem:[#allocation2 + $0x138] sm:$0xff] }
 0x149   : > { %12676 = vmatmul.mubr.msk.f32.gmra.mrb[26].mxu0 %vm171_vm1, %v14957_v51 }
 0x14a   : > { %12058 = vmatmul.mubr.msk.f32.gmra.mrb[14].mxu1 %vm171_vm1, %v16545_v4  ;;  %12678 = vmatprep.mubr.msk.f32.mxu0 %vm171_vm1, %v6504_v1  ;;  %v15220_v1 = vld [vmem:[#allocation2 + $0x83] sm:$0xff] }
 0x14b   : > { %12060 = vmatprep.mubr.msk.f32.mxu1 %vm171_vm1, %v16546_v8  ;;  %v15224_v4 = vld [vmem:[#allocation2 + $0x140] sm:$0xff]  ;;  %v15228_v8 = vld [vmem:[#allocation2 + $0x150] sm:$0xff] }
 0x14d   : > { %12679 = vmatmul.mubr.msk.f32.gmra.mrb[28].mxu0 %vm171_vm1, %v6505_v11  ;;  %v15226_v11 = vld [vmem:[#allocation2 + $0x93] sm:$0xff] }
 0x14e   : > { %12061 = vmatmul.mubr.msk.f32.gmra.mrb[16].mxu1 %vm171_vm1, %v14560_v38  ;;  %12681 = vmatprep.mubr.msk.f32.mxu0 %vm171_vm1, %v6506_v2  ;;  %v14985_v38 = vld [vmem:[#allocation2 + $0x62] sm:$0xff] }
 0x14f   : > { %12063 = vmatprep.mubr.msk.f32.mxu1 %vm171_vm1, %v14563_v13  ;;  %v14992_v13 = vld [vmem:[%s16325_s1 + $0x4c] sm:$0xf]  ;;  %v15236_v2 = vld [vmem:[#allocation2 + $0x9b] sm:$0xff] }
 0x151   : > { %12682 = vmatmul.mubr.msk.f32.gmra.mrb[30].mxu0 %vm171_vm1, %v6507_v48  ;;  %v15240_v48 = vld [vmem:[#allocation2 + $0x158] sm:$0xff] }
 0x152   : > { %12064 = vmatmul.mubr.msk.f32.gmra.mrb[18].mxu1 %vm171_vm1, %v14575_v35  ;;  %12686 = vmatprep.mubr.msk.f32.mxu0 %vm171_vm1, %v14974_v44  ;;  %v14998_v35 = vld [vmem:[#allocation2 + $0x6a] sm:$0xff] }
 0x153   : > { %12066 = vmatprep.mubr.msk.f32.mxu1 %vm171_vm1, %v14578_v56  ;;  %v15004_v56 = vld [vmem:[#allocation2 + $0x7a] sm:$0xff] }
 0x155   : > { %12687 = vmatmul.mubr.msk.f32.vlgmr.msra.gmra.mrb[0].mxu0 %vm171_vm1, %v14981_v7 }
 0x156   : > { %12735 = vmatpush3.msk.msra.mxu0 %vm461_vm0, %v14844_v29  ;;  %12067 = vmatmul.mubr.msk.f32.gmra.mrb[20].mxu1 %vm171_vm1, %v14589_v42  ;;  %v15014_v42 = vld [vmem:[#allocation2 + $0x82] sm:$0xff]  ;;  %v15030_v29 = vld [vmem:[#allocation2 + $0xaa] sm:$0xff] }
 0x157   : > { %12689 = vmatprep.mubr.msk.f32.mxu0 %vm171_vm1, %v14985_v38  ;;  %12069 = vmatprep.mubr.msk.f32.mxu1 %vm171_vm1, %v14593_v59  ;;  %v15018_v59 = vld [vmem:[#allocation2 + $0x92] sm:$0xff] }
 0x158   : > { %12784 = vmatprep.subr.msk.mxu0 %vm461_vm0, %v14992_v13 }
 0x159   : > { %12690 = vmatmul.mubr.msk.f32.gmra.mrb[2].mxu0 %vm171_vm1, %v14998_v35 }
 0x15a   : > { %12070 = vmatmul.mubr.msk.f32.gmra.mrb[22].mxu1 %vm171_vm1, %v14601_v16  ;;  %12692 = vmatprep.mubr.msk.f32.mxu0 %vm171_vm1, %v15004_v56  ;;  %v15026_v16 = vld [vmem:[#allocation2 + $0x9a] sm:$0xff] }
 0x15b   : > { %12072 = vmatprep.mubr.msk.f32.mxu1 %vm171_vm1, %v14605_v17  ;;  %v15038_v17 = vld [vmem:[#allocation2 + $0xb2] sm:$0xff] }
 0x15d   : > { %12693 = vmatmul.mubr.msk.f32.gmra.mrb[4].mxu0 %vm171_vm1, %v15014_v42 }
 0x15e   : > { %12073 = vmatmul.mubr.msk.f32.gmra.mrb[24].mxu1 %vm171_vm1, %v14613_v30  ;;  %12695 = vmatprep.mubr.msk.f32.mxu0 %vm171_vm1, %v15018_v59  ;;  %v15042_v30 = vld [vmem:[#allocation2 + $0xc2] sm:$0xff] }
 0x15f   : > { %12075 = vmatprep.mubr.msk.f32.mxu1 %vm171_vm1, %v14617_v31  ;;  %v15050_v31 = vld [vmem:[#allocation2 + $0xca] sm:$0xff] }
 0x161   : > { %12696 = vmatmul.mubr.msk.f32.gmra.mrb[6].mxu0 %vm171_vm1, %v15026_v16 }
 0x162   : > { %12076 = vmatmul.mubr.msk.f32.gmra.mrb[26].mxu1 %vm171_vm1, %v14625_v34  ;;  %12698 = vmatprep.mubr.msk.f32.mxu0 %vm171_vm1, %v15030_v29  ;;  %v15054_v34 = vld [vmem:[#allocation2 + $0xda] sm:$0xff] }
 0x163   : > { %12078 = vmatprep.mubr.msk.f32.mxu1 %vm171_vm1, %v14629_v37  ;;  %v16547_v37 = vld [vmem:[#allocation58_spill] sm:$0xff] }
 0x165   : > { %12699 = vmatmul.mubr.msk.f32.gmra.mrb[8].mxu0 %vm171_vm1, %v15038_v17 }
 0x166   : > { %12079 = vmatmul.mubr.msk.f32.gmra.mrb[28].mxu1 %vm171_vm1, %v14637_v39  ;;  %12701 = vmatprep.mubr.msk.f32.mxu0 %vm171_vm1, %v15042_v30  ;;  %v15062_v39 = vld [vmem:[#allocation2 + $0xe2] sm:$0xff] }
 0x167   : > { %12081 = vmatprep.mubr.msk.f32.mxu1 %vm171_vm1, %v14641_v41  ;;  %v15070_v41 = vld [vmem:[%s16325_s1 + $0x1c] sm:$0xf] }
 0x169   : > { %12702 = vmatmul.mubr.msk.f32.gmra.mrb[10].mxu0 %vm171_vm1, %v15050_v31 }
 0x16a   : > { %12082 = vmatmul.mubr.msk.f32.gmra.mrb[30].mxu1 %vm171_vm1, %v16547_v37  ;;  %12704 = vmatprep.mubr.msk.f32.mxu0 %vm171_vm1, %v15054_v34  ;;  %v15252_v37 = vld [vmem:[#allocation2 + $0xb3] sm:$0xff] }
 0x16b   : > { %12086 = vmatprep.mubr.msk.f32.mxu1 %vm171_vm1, %v2185_v12  ;;  %v15244_v12 = vld [vmem:[#allocation2 + $0x168] sm:$0xff] }
 0x16d   : > { %12705 = vmatmul.mubr.msk.f32.gmra.mrb[12].mxu0 %vm171_vm1, %v15062_v39 }
 0x16e   : > { %12087 = vmatmul.mubr.msk.f32.vlgmr.msra.gmra.mrb[0].mxu1 %vm171_vm1, %v2186_v19  ;;  %12707 = vmatprep.mubr.msk.f32.mxu0 %vm171_vm1, %v14666_v43  ;;  %v2190_v43 = vld [vmem:[#allocation2 + $0x50] sm:$0xff] }
 0x16f   : > { %12089 = vmatprep.mubr.msk.f32.mxu1 %vm171_vm1, %v2187_v21  ;;  %12135 = vmatpush3.msk.msra.mxu1 %vm461_vm0, %v14900_v10  ;;  %v15097_v10 = vld [vmem:[#allocation2 + $0x78] sm:$0xff]  ;;  %v15256_v19 = vld [vmem:[#allocation2 + $0x170] sm:$0xff]  ;;  %v15258_v21 = vld [vmem:[#allocation2 + $0xc3] sm:$0xff] }
 0x170   : > { %12184 = vmatprep.subr.msk.mxu1 %vm461_vm0, %v15070_v41 }
 0x171   : > { %12708 = vmatmul.mubr.msk.f32.gmra.mrb[14].mxu0 %vm171_vm1, %v14675_v61  ;;  %v15095_v61 = vld [vmem:[#allocation2 + $0x68] sm:$0xff] }
 0x172   : > { %12090 = vmatmul.mubr.msk.f32.gmra.mrb[2].mxu1 %vm171_vm1, %v2188_v23  ;;  %12710 = vmatprep.mubr.msk.f32.mxu0 %vm171_vm1, %v14677_v63  ;;  %v15107_v63 = vld [vmem:[#allocation2 + $0x80] sm:$0xff]  ;;  %v15266_v23 = vld [vmem:[#allocation2 + $0xcb] sm:$0xff] }
 0x173   : > { %12092 = vmatprep.mubr.msk.f32.mxu1 %vm171_vm1, %v2189_v24  ;;  %v15270_v24 = vld [vmem:[#allocation2 + $0xdb] sm:$0xff] }
 0x174   : > { %16548 = vst [vmem:[#allocation29_spill] sm:$0xff] %v15270_v24 }
 0x175   : > { %12711 = vmatmul.mubr.msk.f32.gmra.mrb[16].mxu0 %vm171_vm1, %v14694_v3  ;;  %v15109_v3 = vld [vmem:[#allocation2 + $0x90] sm:$0xff] }
 0x176   : > { %12093 = vmatmul.mubr.msk.f32.gmra.mrb[4].mxu1 %vm171_vm1, %v2190_v43  ;;  %12713 = vmatprep.mubr.msk.f32.mxu0 %vm171_vm1, %v14696_v5  ;;  %v15119_v5 = vld [vmem:[#allocation2 + $0x98] sm:$0xff] }
 0x177   : > { %12095 = vmatprep.mubr.msk.f32.mxu1 %vm171_vm1, %v15086_v25  ;;  %v2575_v43 = vld [vmem:[#allocation2 + $0x19] sm:$0xff] }
 0x179   : > { %12714 = vmatmul.mubr.msk.f32.gmra.mrb[18].mxu0 %vm171_vm1, %v14708_v28  ;;  %v15121_v28 = vld [vmem:[#allocation2 + $0xa8] sm:$0xff] }
 0x17a   : > { %12096 = vmatmul.mubr.msk.f32.gmra.mrb[6].mxu1 %vm171_vm1, %v15095_v61  ;;  %12716 = vmatprep.mubr.msk.f32.mxu0 %vm171_vm1, %v14710_v32  ;;  %v15131_v32 = vld [vmem:[#allocation2 + $0xb0] sm:$0xff] }
 0x17b   : > { %12098 = vmatprep.mubr.msk.f32.mxu1 %vm171_vm1, %v15097_v10 }
 0x17d   : > { %12717 = vmatmul.mubr.msk.f32.gmra.mrb[20].mxu0 %vm171_vm1, %v14720_v22  ;;  %v15133_v22 = vld [vmem:[#allocation2 + $0x182] sm:$0xff] }
 0x17e   : > { %12099 = vmatmul.mubr.msk.f32.gmra.mrb[8].mxu1 %vm171_vm1, %v15107_v63  ;;  %12719 = vmatprep.mubr.msk.f32.mxu0 %vm171_vm1, %v14722_v26  ;;  %v15135_v26 = vld [vmem:[#allocation2 + $0xc0] sm:$0xff] }
 0x17f   : > { %12101 = vmatprep.mubr.msk.f32.mxu1 %vm171_vm1, %v15109_v3 }
 0x181   : > { %12720 = vmatmul.mubr.msk.f32.gmra.mrb[22].mxu0 %vm171_vm1, %v14732_v9  ;;  %v15143_v9 = vld [vmem:[#allocation2 + $0x18a] sm:$0xff] }
 0x182   : > { %12102 = vmatmul.mubr.msk.f32.gmra.mrb[10].mxu1 %vm171_vm1, %v15119_v5  ;;  %12722 = vmatprep.mubr.msk.f32.mxu0 %vm171_vm1, %v14734_v15  ;;  %v15147_v15 = vld [vmem:[#allocation2 + $0xc8] sm:$0xff] }
 0x183   : > { %12104 = vmatprep.mubr.msk.f32.mxu1 %vm171_vm1, %v15121_v28 }
 0x185   : > { %12723 = vmatmul.mubr.msk.f32.gmra.mrb[24].mxu0 %vm171_vm1, %v14744_v0  ;;  %v6895_v0 = vld [vmem:[#allocation2 + $0x1a2] sm:$0xff] }
 0x186   : > { %12105 = vmatmul.mubr.msk.f32.gmra.mrb[12].mxu1 %vm171_vm1, %v15131_v32  ;;  %12725 = vmatprep.mubr.msk.f32.mxu0 %vm171_vm1, %v15133_v22 }
 0x187   : > { %12107 = vmatprep.mubr.msk.f32.mxu1 %vm171_vm1, %v15135_v26 }
 0x189   : > { %12726 = vmatmul.mubr.msk.f32.gmra.mrb[26].mxu0 %vm171_vm1, %v15143_v9 }
 0x18a   : > { %12108 = vmatmul.mubr.msk.f32.gmra.mrb[14].mxu1 %vm171_vm1, %v15147_v15  ;;  %12728 = vmatprep.mubr.msk.f32.mxu0 %vm171_vm1, %v6894_v27  ;;  %v15278_v27 = vld [vmem:[#allocation2 + $0xe3] sm:$0xff] }
 0x18b   : > { %12110 = vmatprep.mubr.msk.f32.mxu1 %vm171_vm1, %v15149_v20  ;;  %16549 = vst [vmem:[#allocation30_spill] sm:$0xff] %v15278_v27 }
 0x18d   : > { %12729 = vmatmul.mubr.msk.f32.gmra.mrb[28].mxu0 %vm171_vm1, %v6895_v0  ;;  %v2576_v0 = vld [vmem:[#allocation2 + $0x21] sm:$0xff] }
 0x18e   : > { %12111 = vmatmul.mubr.msk.f32.gmra.mrb[16].mxu1 %vm171_vm1, %v15158_v33  ;;  %12731 = vmatprep.mubr.msk.f32.mxu0 %vm171_vm1, %v6896_v36  ;;  %v15281_v36 = vld [vmem:[#allocation2 + $0xf3] sm:$0xff] }
 0x18f   : > { %12113 = vmatprep.mubr.msk.f32.mxu1 %vm171_vm1, %v15160_v49  ;;  %16550 = vst [vmem:[#allocation31_spill] sm:$0xff] %v15281_v36 }
 0x191   : > { %12732 = vmatmul.mubr.msk.f32.gmra.mrb[30].mxu0 %vm171_vm1, %v6897_v52  ;;  %v15288_v52 = vld [vmem:[%s16325_s1 + $0x20] sm:$0xf] }
 0x192   : > { %12114 = vmatmul.mubr.msk.f32.gmra.mrb[18].mxu1 %vm171_vm1, %v15168_v53  ;;  %12736 = vmatprep.mubr.msk.f32.mxu0 %vm171_vm1, %v15170_v60 }
 0x193   : > { %12116 = vmatprep.mubr.msk.f32.mxu1 %vm171_vm1, %v15172_v58 }
 0x195   : > { %12737 = vmatmul.mubr.msk.f32.vlgmr.msra.gmra.mrb[0].mxu0 %vm171_vm1, %v15179_v50 }
 0x196   : > { %12785 = vmatpush3.msk.msra.mxu0 %vm461_vm0, %v14992_v13  ;;  %12117 = vmatmul.mubr.msk.f32.gmra.mrb[20].mxu1 %vm171_vm1, %v15183_v14  ;;  %v15242_v13 = vld [vmem:[#allocation2 + $0xab] sm:$0xff] }
 0x197   : > { %12739 = vmatprep.mubr.msk.f32.mxu0 %vm171_vm1, %v15185_v57  ;;  %12119 = vmatprep.mubr.msk.f32.mxu1 %vm171_vm1, %v15187_v6 }
 0x198   : > { %12834 = vmatprep.subr.msk.mxu0 %vm461_vm0, %v15194_v54 }
 0x199   : > { %12740 = vmatmul.mubr.msk.f32.gmra.mrb[2].mxu0 %vm171_vm1, %v15200_v62 }
 0x19a   : > { %12120 = vmatmul.mubr.msk.f32.gmra.mrb[22].mxu1 %vm171_vm1, %v15206_v45  ;;  %12742 = vmatprep.mubr.msk.f32.mxu0 %vm171_vm1, %v15208_v47 }
 0x19b   : > { %12122 = vmatprep.mubr.msk.f32.mxu1 %vm171_vm1, %v15210_v55 }
 0x19d   : > { %12743 = vmatmul.mubr.msk.f32.gmra.mrb[4].mxu0 %vm171_vm1, %v15220_v1 }
 0x19e   : > { %12123 = vmatmul.mubr.msk.f32.gmra.mrb[24].mxu1 %vm171_vm1, %v15224_v4  ;;  %12745 = vmatprep.mubr.msk.f32.mxu0 %vm171_vm1, %v15226_v11 }
 0x19f   : > { %12125 = vmatprep.mubr.msk.f32.mxu1 %vm171_vm1, %v15228_v8 }
 0x1a1   : > { %12746 = vmatmul.mubr.msk.f32.gmra.mrb[6].mxu0 %vm171_vm1, %v15236_v2 }
 0x1a2   : > { %12126 = vmatmul.mubr.msk.f32.gmra.mrb[26].mxu1 %vm171_vm1, %v15240_v48  ;;  %12748 = vmatprep.mubr.msk.f32.mxu0 %vm171_vm1, %v15242_v13 }
 0x1a3   : > { %12128 = vmatprep.mubr.msk.f32.mxu1 %vm171_vm1, %v15244_v12 }
 0x1a5   : > { %12749 = vmatmul.mubr.msk.f32.gmra.mrb[8].mxu0 %vm171_vm1, %v15252_v37 }
 0x1a6   : > { %12129 = vmatmul.mubr.msk.f32.gmra.mrb[28].mxu1 %vm171_vm1, %v15256_v19  ;;  %12751 = vmatprep.mubr.msk.f32.mxu0 %vm171_vm1, %v15258_v21 }
 0x1a7   : > { %12131 = vmatprep.mubr.msk.f32.mxu1 %vm171_vm1, %v14807_v40  ;;  %v2577_v40 = vld [vmem:[#allocation2 + $0x31] sm:$0xff] }
 0x1a9   : > { %12752 = vmatmul.mubr.msk.f32.gmra.mrb[10].mxu0 %vm171_vm1, %v15266_v23 }
 0x1aa   : > { %12132 = vmatmul.mubr.msk.f32.gmra.mrb[30].mxu1 %vm171_vm1, %v14815_v46  ;;  %12754 = vmatprep.mubr.msk.f32.mxu0 %vm171_vm1, %v15270_v24  ;;  %v15293_v46 = vld [vmem:[#allocation2 + $0xfb] sm:$0xff]  ;;  %v15296_v24 = vld [vmem:[#allocation2 + $0x10b] sm:$0xff] }
 0x1ab   : > { %12136 = vmatprep.mubr.msk.f32.mxu1 %vm171_vm1, %v2575_v43  ;;  %16551 = vst [vmem:[#allocation32_spill] sm:$0xff] %v15293_v46  ;;  %v2578_v43 = vld [vmem:[#allocation2 + $0x39] sm:$0xff]  ;;  %16552 = vst [vmem:[#allocation3_spill] sm:$0xff] %v15296_v24 }
 0x1ad   : > { %12755 = vmatmul.mubr.msk.f32.gmra.mrb[12].mxu0 %vm171_vm1, %v15278_v27  ;;  %v2579_v27 = vld [vmem:[#allocation2 + $0x49] sm:$0xff] }
 0x1ae   : > { %12137 = vmatmul.mubr.msk.f32.vlgmr.msra.gmra.mrb[0].mxu1 %vm171_vm1, %v2576_v0  ;;  %12757 = vmatprep.mubr.msk.f32.mxu0 %vm171_vm1, %v15281_v36  ;;  %v15307_v0 = vld [vmem:[#allocation2 + $0x113] sm:$0xff]  ;;  %v15310_v36 = vld [vmem:[#allocation2 + $0x123] sm:$0xff] }
 0x1af   : > { %12139 = vmatprep.mubr.msk.f32.mxu1 %vm171_vm1, %v2577_v40  ;;  %12185 = vmatpush3.msk.msra.mxu1 %vm461_vm0, %v15070_v41  ;;  %16553 = vst [vmem:[#allocation33_spill] sm:$0xff] %v15307_v0  ;;  %v2580_v40 = vld [vmem:[#allocation2 + $0x51] sm:$0xff]  ;;  %16554 = vst [vmem:[#allocation4_spill] sm:$0xff] %v15310_v36  ;;  %v15312_v41 = vld [vmem:[#allocation2 + $0x61] sm:$0xff] }
 0x1b0   : > { %12234 = vmatprep.subr.msk.mxu1 %vm461_vm0, %v15288_v52  ;;  %16555 = vst [vmem:[#allocation34_spill] sm:$0xff] %v15312_v41 }
 0x1b1   : > { %12758 = vmatmul.mubr.msk.f32.gmra.mrb[14].mxu0 %vm171_vm1, %v15293_v46  ;;  %v15327_v46 = vld [vmem:[#allocation2 + $0x79] sm:$0xff] }
 0x1b2   : > { %12140 = vmatmul.mubr.msk.f32.gmra.mrb[2].mxu1 %vm171_vm1, %v2578_v43  ;;  %12760 = vmatprep.mubr.msk.f32.mxu0 %vm171_vm1, %v15296_v24  ;;  %v15319_v43 = vld [vmem:[#allocation2 + $0x12b] sm:$0xff]  ;;  %16559 = vst [vmem:[#allocation36_spill] sm:$0xff] %v15327_v46 }
 0x1b3   : > { %12142 = vmatprep.mubr.msk.f32.mxu1 %vm171_vm1, %v2579_v27  ;;  %16556 = vst [vmem:[#allocation5_spill] sm:$0xff] %v15319_v43  ;;  %v15323_v24 = vld [vmem:[#allocation2 + $0x69] sm:$0xff]  ;;  %v15325_v27 = vld [vmem:[#allocation2 + $0x13b] sm:$0xff] }
 0x1b4   : > { %16557 = vst [vmem:[#allocation35_spill] sm:$0xff] %v15323_v24  ;;  %16558 = vst [vmem:[#allocation6_spill] sm:$0xff] %v15325_v27 }
 0x1b5   : > { %12761 = vmatmul.mubr.msk.f32.gmra.mrb[16].mxu0 %vm171_vm1, %v15307_v0  ;;  %v15341_v0 = vld [vmem:[#allocation2 + $0x153] sm:$0xff] }
 0x1b6   : > { %12143 = vmatmul.mubr.msk.f32.gmra.mrb[4].mxu1 %vm171_vm1, %v2580_v40  ;;  %12763 = vmatprep.mubr.msk.f32.mxu0 %vm171_vm1, %v15310_v36  ;;  %v15335_v40 = vld [vmem:[#allocation2 + $0x143] sm:$0xff]  ;;  %16562 = vst [vmem:[#allocation8_spill] sm:$0xff] %v15341_v0 }
 0x1b7   : > { %12145 = vmatprep.mubr.msk.f32.mxu1 %vm171_vm1, %v15312_v41  ;;  %16560 = vst [vmem:[#allocation7_spill] sm:$0xff] %v15335_v40  ;;  %v15339_v36 = vld [vmem:[#allocation2 + $0x81] sm:$0xff]  ;;  %v15343_v41 = vld [vmem:[#allocation2 + $0x91] sm:$0xff] }
 0x1b8   : > { %16561 = vst [vmem:[#allocation37_spill] sm:$0xff] %v15339_v36  ;;  %16563 = vst [vmem:[#allocation38_spill] sm:$0xff] %v15343_v41 }
 0x1b9   : > { %12764 = vmatmul.mubr.msk.f32.gmra.mrb[18].mxu0 %vm171_vm1, %v15319_v43  ;;  %v15355_v43 = vld [vmem:[#allocation2 + $0x99] sm:$0xff] }
 0x1ba   : > { %12146 = vmatmul.mubr.msk.f32.gmra.mrb[6].mxu1 %vm171_vm1, %v15323_v24  ;;  %12766 = vmatprep.mubr.msk.f32.mxu0 %vm171_vm1, %v15325_v27  ;;  %v15351_v27 = vld [vmem:[#allocation2 + $0x15b] sm:$0xff]  ;;  %16565 = vst [vmem:[#allocation39_spill] sm:$0xff] %v15355_v43  ;;  %v15359_v24 = vld [vmem:[#allocation2 + $0xa9] sm:$0xff] }
 0x1bb   : > { %12148 = vmatprep.mubr.msk.f32.mxu1 %vm171_vm1, %v15327_v46  ;;  %16564 = vst [vmem:[#allocation9_spill] sm:$0xff] %v15351_v27  ;;  %v15357_v46 = vld [vmem:[#allocation2 + $0x16b] sm:$0xff]  ;;  %16567 = vst [vmem:[#allocation40_spill] sm:$0xff] %v15359_v24 }
 0x1bc   : > { %16566 = vst [vmem:[#allocation10_spill] sm:$0xff] %v15357_v46 }
 0x1bd   : > { %12767 = vmatmul.mubr.msk.f32.gmra.mrb[20].mxu0 %vm171_vm1, %v15335_v40  ;;  %v15371_v40 = vld [vmem:[#allocation2 + $0xb1] sm:$0xff] }
 0x1be   : > { %12149 = vmatmul.mubr.msk.f32.gmra.mrb[8].mxu1 %vm171_vm1, %v15339_v36  ;;  %12769 = vmatprep.mubr.msk.f32.mxu0 %vm171_vm1, %v15341_v0  ;;  %v15367_v0 = vld [vmem:[#allocation2 + $0x173] sm:$0xff]  ;;  %16569 = vst [vmem:[#allocation41_spill] sm:$0xff] %v15371_v40  ;;  %v15375_v36 = vld [vmem:[#allocation2 + $0xc1] sm:$0xff] }
 0x1bf   : > { %12151 = vmatprep.mubr.msk.f32.mxu1 %vm171_vm1, %v15343_v41  ;;  %16568 = vst [vmem:[#allocation11_spill] sm:$0xff] %v15367_v0  ;;  %v15373_v41 = vld [vmem:[#allocation2 + $0x183] sm:$0xff]  ;;  %16571 = vst [vmem:[#allocation42_spill] sm:$0xff] %v15375_v36 }
 0x1c0   : > { %16570 = vst [vmem:[#allocation12_spill] sm:$0xff] %v15373_v41 }
 0x1c1   : > { %12770 = vmatmul.mubr.msk.f32.gmra.mrb[22].mxu0 %vm171_vm1, %v15351_v27  ;;  %v15387_v27 = vld [vmem:[#allocation2 + $0xc9] sm:$0xff] }
 0x1c2   : > { %12152 = vmatmul.mubr.msk.f32.gmra.mrb[10].mxu1 %vm171_vm1, %v15355_v43  ;;  %12772 = vmatprep.mubr.msk.f32.mxu0 %vm171_vm1, %v15357_v46  ;;  %v15383_v46 = vld [vmem:[#allocation2 + $0x18b] sm:$0xff]  ;;  %16573 = vst [vmem:[#allocation43_spill] sm:$0xff] %v15387_v27  ;;  %v15389_v43 = vld [vmem:[#allocation2 + $0xd9] sm:$0xff] }
 0x1c3   : > { %12154 = vmatprep.mubr.msk.f32.mxu1 %vm171_vm1, %v15359_v24  ;;  %16572 = vst [vmem:[#allocation13_spill] sm:$0xff] %v15383_v46  ;;  %v7284_v24 = vld [vmem:[#allocation2 + $0x19b] sm:$0xff]  ;;  %16574 = vst [vmem:[#allocation14_spill] sm:$0xff] %v15389_v43 }
 0x1c5   : > { %12773 = vmatmul.mubr.msk.f32.gmra.mrb[24].mxu0 %vm171_vm1, %v15367_v0  ;;  %v7285_v0 = vld [vmem:[#allocation2 + $0x1a3] sm:$0xff] }
 0x1c6   : > { %12155 = vmatmul.mubr.msk.f32.gmra.mrb[12].mxu1 %vm171_vm1, %v15371_v40  ;;  %12775 = vmatprep.mubr.msk.f32.mxu0 %vm171_vm1, %v15373_v41  ;;  %v15398_v41 = vld [vmem:[#allocation2 + $0xe1] sm:$0xff]  ;;  %v15400_v40 = vld [vmem:[#allocation2 + $0xf1] sm:$0xff] }
 0x1c7   : > { %12157 = vmatprep.mubr.msk.f32.mxu1 %vm171_vm1, %v15375_v36  ;;  %16575 = vst [vmem:[#allocation44_spill] sm:$0xff] %v15398_v41  ;;  %v7286_v36 = vld [vmem:[#allocation2 + $0x1b3] sm:$0xff]  ;;  %16576 = vst [vmem:[#allocation15_spill] sm:$0xff] %v15400_v40 }
 0x1c9   : > { %12776 = vmatmul.mubr.msk.f32.gmra.mrb[26].mxu0 %vm171_vm1, %v15383_v46  ;;  %v7287_v46 = vld [vmem:[#allocation2 + $0x1bb] sm:$0xff] }
 0x1ca   : > { %12158 = vmatmul.mubr.msk.f32.gmra.mrb[14].mxu1 %vm171_vm1, %v15387_v27  ;;  %12778 = vmatprep.mubr.msk.f32.mxu0 %vm171_vm1, %v7284_v24  ;;  %v15408_v24 = vld [vmem:[#allocation2 + $0xf9] sm:$0xff]  ;;  %v15410_v27 = vld [vmem:[#allocation2 + $0x4c] sm:$0xff] }
 0x1cb   : > { %12160 = vmatprep.mubr.msk.f32.mxu1 %vm171_vm1, %v15389_v43  ;;  %16577 = vst [vmem:[#allocation16_spill] sm:$0xff] %v15408_v24  ;;  %16578 = vst [vmem:[#allocation17_spill] sm:$0xff] %v15410_v27  ;;  %v15412_v43 = vld [vmem:[#allocation2 + $0x109] sm:$0xff] }
 0x1cc   : > { %16579 = vst [vmem:[#allocation18_spill] sm:$0xff] %v15412_v43 }
 0x1cd   : > { %12779 = vmatmul.mubr.msk.f32.gmra.mrb[28].mxu0 %vm171_vm1, %v7285_v0  ;;  %v15419_v0 = vld [vmem:[#allocation2 + $0x54] sm:$0xff] }
 0x1ce   : > { %12161 = vmatmul.mubr.msk.f32.gmra.mrb[16].mxu1 %vm171_vm1, %v15398_v41  ;;  %12781 = vmatprep.mubr.msk.f32.mxu0 %vm171_vm1, %v7286_v36  ;;  %16580 = vst [vmem:[#allocation19_spill] sm:$0xff] %v15419_v0  ;;  %v15423_v36 = vld [vmem:[#allocation2 + $0x111] sm:$0xff]  ;;  %v15427_v41 = vld [vmem:[#allocation2 + $0x121] sm:$0xff] }
 0x1cf   : > { %12163 = vmatprep.mubr.msk.f32.mxu1 %vm171_vm1, %v15400_v40  ;;  %16581 = vst [vmem:[#allocation45_spill] sm:$0xff] %v15423_v36  ;;  %v15425_v40 = vld [vmem:[#allocation2 + $0x64] sm:$0xff]  ;;  %16583 = vst [vmem:[#allocation46_spill] sm:$0xff] %v15427_v41 }
 0x1d0   : > { %16582 = vst [vmem:[#allocation20_spill] sm:$0xff] %v15425_v40 }
 0x1d1   : > { %12782 = vmatmul.mubr.msk.f32.gmra.mrb[30].mxu0 %vm171_vm1, %v7287_v46  ;;  %v15434_v46 = vld [vmem:[%s16325_s1 + $0x54] sm:$0xf] }
 0x1d2   : > { %12164 = vmatmul.mubr.msk.f32.gmra.mrb[18].mxu1 %vm171_vm1, %v15408_v24  ;;  %12786 = vmatprep.mubr.msk.f32.mxu0 %vm171_vm1, %v15410_v27  ;;  %v15440_v27 = vld [vmem:[#allocation2 + $0x6c] sm:$0xff]  ;;  %v15450_v24 = vld [vmem:[#allocation2 + $0x139] sm:$0xff] }
 0x1d3   : > { %12166 = vmatprep.mubr.msk.f32.mxu1 %vm171_vm1, %v15412_v43  ;;  %16584 = vst [vmem:[#allocation21_spill] sm:$0xff] %v15440_v27  ;;  %v15448_v43 = vld [vmem:[#allocation2 + $0x7c] sm:$0xff]  ;;  %16587 = vst [vmem:[#allocation48_spill] sm:$0xff] %v15450_v24 }
 0x1d4   : > { %16586 = vst [vmem:[#allocation22_spill] sm:$0xff] %v15448_v43 }
 0x1d5   : > { %12787 = vmatmul.mubr.msk.f32.vlgmr.msra.gmra.mrb[0].mxu0 %vm171_vm1, %v15419_v0  ;;  %v15446_v0 = vld [vmem:[#allocation2 + $0x129] sm:$0xff] }
 0x1d6   : > { %12835 = vmatpush3.msk.msra.mxu0 %vm461_vm0, %v15194_v54  ;;  %12167 = vmatmul.mubr.msk.f32.gmra.mrb[20].mxu1 %vm171_vm1, %v15423_v36  ;;  %16585 = vst [vmem:[#allocation47_spill] sm:$0xff] %v15446_v0  ;;  %v15460_v54 = vld [vmem:[#allocation2 + $0x84] sm:$0xff]  ;;  %v15468_v36 = vld [vmem:[#allocation2 + $0x151] sm:$0xff] }
 0x1d7   : > { %12789 = vmatprep.mubr.msk.f32.mxu0 %vm171_vm1, %v15425_v40  ;;  %12169 = vmatprep.mubr.msk.f32.mxu1 %vm171_vm1, %v15427_v41  ;;  %16588 = vst [vmem:[#allocation23_spill] sm:$0xff] %v15460_v54  ;;  %v15464_v40 = vld [vmem:[#allocation2 + $0x141] sm:$0xff]  ;;  %v15466_v41 = vld [vmem:[#allocation2 + $0x94] sm:$0xff]  ;;  %16590 = vst [vmem:[#allocation24_spill] sm:$0xff] %v15468_v36 }
 0x1d8   : > { %12884 = vmatprep.subr.msk.mxu0 %vm461_vm0, %v15434_v46  ;;  %16589 = vst [vmem:[#allocation49_spill] sm:$0xff] %v15466_v41 }
 0x1d9   : > { %12790 = vmatmul.mubr.msk.f32.gmra.mrb[2].mxu0 %vm171_vm1, %v15440_v27  ;;  %v15480_v27 = vld [vmem:[#allocation2 + $0x159] sm:$0xff] }
 0x1da   : > { %12170 = vmatmul.mubr.msk.f32.gmra.mrb[22].mxu1 %vm171_vm1, %v15446_v0  ;;  %12792 = vmatprep.mubr.msk.f32.mxu0 %vm171_vm1, %v15448_v43  ;;  %v15476_v43 = vld [vmem:[#allocation2 + $0x9c] sm:$0xff]  ;;  %v15484_v0 = vld [vmem:[#allocation2 + $0x169] sm:$0xff] }
 0x1db   : > { %12172 = vmatprep.mubr.msk.f32.mxu1 %vm171_vm1, %v15450_v24  ;;  %16591 = vst [vmem:[#allocation50_spill] sm:$0xff] %v15476_v43  ;;  %v15482_v24 = vld [vmem:[#allocation2 + $0xac] sm:$0xff]  ;;  %16593 = vst [vmem:[#allocation51_spill] sm:$0xff] %v15484_v0 }
 0x1dc   : > { %16592 = vst [vmem:[#allocation25_spill] sm:$0xff] %v15482_v24 }
 0x1dd   : > { %12793 = vmatmul.mubr.msk.f32.gmra.mrb[4].mxu0 %vm171_vm1, %v15460_v54  ;;  %v15496_v54 = vld [vmem:[#allocation2 + $0x171] sm:$0xff] }
 0x1de   : > { %12173 = vmatmul.mubr.msk.f32.gmra.mrb[24].mxu1 %vm171_vm1, %v15464_v40  ;;  %12795 = vmatprep.mubr.msk.f32.mxu0 %vm171_vm1, %v15466_v41  ;;  %v15492_v41 = vld [vmem:[#allocation2 + $0xb4] sm:$0xff]  ;;  %16595 = vst [vmem:[#allocation52_spill] sm:$0xff] %v15496_v54 }
 0x1df   : > { %12175 = vmatprep.mubr.msk.f32.mxu1 %vm171_vm1, %v15468_v36  ;;  %16594 = vst [vmem:[#allocation26_spill] sm:$0xff] %v15492_v41  ;;  %v15498_v36 = vld [vmem:[#allocation2 + $0xc4] sm:$0xff] }
 0x1e0   : > { %16596 = vst [vmem:[#allocation27_spill] sm:$0xff] %v15498_v36 }
 0x1e1   : > { %12796 = vmatmul.mubr.msk.f32.gmra.mrb[6].mxu0 %vm171_vm1, %v15476_v43  ;;  %v15506_v43 = vld [vmem:[#allocation2 + $0xcc] sm:$0xff] }
 0x1e2   : > { %12176 = vmatmul.mubr.msk.f32.gmra.mrb[26].mxu1 %vm171_vm1, %v15480_v27  ;;  %12798 = vmatprep.mubr.msk.f32.mxu0 %vm171_vm1, %v15482_v24  ;;  %16597 = vst [vmem:[#allocation53_spill] sm:$0xff] %v15506_v43  ;;  %v15510_v24 = vld [vmem:[#allocation2 + $0xdc] sm:$0xff] }
 0x1e3   : > { %12178 = vmatprep.mubr.msk.f32.mxu1 %vm171_vm1, %v15484_v0  ;;  %16598 = vst [vmem:[#allocation28_spill] sm:$0xff] %v15510_v24  ;;  %v2965_v0 = vld [vmem:[#allocation2 + $0x1a] sm:$0xff] }
 0x1e5   : > { %12799 = vmatmul.mubr.msk.f32.gmra.mrb[8].mxu0 %vm171_vm1, %v15492_v41  ;;  %v15518_v41 = vld [vmem:[#allocation2 + $0xe4] sm:$0xff] }
 0x1e6   : > { %12179 = vmatmul.mubr.msk.f32.gmra.mrb[28].mxu1 %vm171_vm1, %v15496_v54  ;;  %12801 = vmatprep.mubr.msk.f32.mxu0 %vm171_vm1, %v15498_v36  ;;  %v2966_v36 = vld [vmem:[#allocation2 + $0x22] sm:$0xff]  ;;  %v15521_v54 = vld [vmem:[#allocation2 + $0xf4] sm:$0xff] }
 0x1e7   : > { %12181 = vmatprep.mubr.msk.f32.mxu1 %vm171_vm1, %v14949_v18  ;;  %v2967_v18 = vld [vmem:[#allocation2 + $0x32] sm:$0xff] }
 0x1e9   : > { %12802 = vmatmul.mubr.msk.f32.gmra.mrb[10].mxu0 %vm171_vm1, %v15506_v43  ;;  %v15528_v43 = vld [vmem:[%s16325_s1 + $0x24] sm:$0xf] }
 0x1ea   : > { %12182 = vmatmul.mubr.msk.f32.gmra.mrb[30].mxu1 %vm171_vm1, %v14957_v51  ;;  %12804 = vmatprep.mubr.msk.f32.mxu0 %vm171_vm1, %v15510_v24  ;;  %v15533_v51 = vld [vmem:[#allocation2 + $0xfc] sm:$0xff]  ;;  %v15536_v24 = vld [vmem:[#allocation2 + $0x10c] sm:$0xff] }
 0x1eb   : > { %12186 = vmatprep.mubr.msk.f32.mxu1 %vm171_vm1, %v2965_v0  ;;  %v2968_v0 = vld [vmem:[#allocation2 + $0x3a] sm:$0xff] }
 0x1ed   : > { %12805 = vmatmul.mubr.msk.f32.gmra.mrb[12].mxu0 %vm171_vm1, %v15518_v41 }
 0x1ee   : > { %12187 = vmatmul.mubr.msk.f32.vlgmr.msra.gmra.mrb[0].mxu1 %vm171_vm1, %v2966_v36  ;;  %12807 = vmatprep.mubr.msk.f32.mxu0 %vm171_vm1, %v15521_v54  ;;  %v15547_v36 = vld [vmem:[#allocation2 + $0x114] sm:$0xff] }
 0x1ef   : > { %12189 = vmatprep.mubr.msk.f32.mxu1 %vm171_vm1, %v2967_v18  ;;  %12235 = vmatpush3.msk.msra.mxu1 %vm461_vm0, %v15288_v52  ;;  %v15551_v18 = vld [vmem:[#allocation2 + $0x124] sm:$0xff]  ;;  %v15559_v52 = vld [vmem:[#allocation2 + $0x12c] sm:$0xff] }
 0x1f0   : > { %12284 = vmatprep.subr.msk.mxu1 %vm461_vm0, %v15528_v43 }
 0x1f1   : > { %12808 = vmatmul.mubr.msk.f32.gmra.mrb[14].mxu0 %vm171_vm1, %v15533_v51 }
 0x1f2   : > { %12190 = vmatmul.mubr.msk.f32.gmra.mrb[2].mxu1 %vm171_vm1, %v2968_v0  ;;  %12810 = vmatprep.mubr.msk.f32.mxu0 %vm171_vm1, %v15536_v24  ;;  %v15563_v0 = vld [vmem:[#allocation2 + $0x13c] sm:$0xff] }
 0x1f3   : > { %12192 = vmatprep.mubr.msk.f32.mxu1 %vm171_vm1, %v14974_v44  ;;  %v15571_v44 = vld [vmem:[#allocation2 + $0x144] sm:$0xff] }
 0x1f5   : > { %12811 = vmatmul.mubr.msk.f32.gmra.mrb[16].mxu0 %vm171_vm1, %v15547_v36 }
 0x1f6   : > { %12193 = vmatmul.mubr.msk.f32.gmra.mrb[4].mxu1 %vm171_vm1, %v14981_v7  ;;  %12813 = vmatprep.mubr.msk.f32.mxu0 %vm171_vm1, %v15551_v18  ;;  %v15575_v7 = vld [vmem:[#allocation2 + $0x154] sm:$0xff] }
 0x1f7   : > { %12195 = vmatprep.mubr.msk.f32.mxu1 %vm171_vm1, %v14985_v38  ;;  %v15583_v38 = vld [vmem:[#allocation2 + $0x15c] sm:$0xff] }
 0x1f9   : > { %12814 = vmatmul.mubr.msk.f32.gmra.mrb[18].mxu0 %vm171_vm1, %v15559_v52 }
 0x1fa   : > { %12196 = vmatmul.mubr.msk.f32.gmra.mrb[6].mxu1 %vm171_vm1, %v14998_v35  ;;  %12816 = vmatprep.mubr.msk.f32.mxu0 %vm171_vm1, %v15563_v0  ;;  %v15587_v35 = vld [vmem:[#allocation2 + $0x16c] sm:$0xff] }
 0x1fb   : > { %12198 = vmatprep.mubr.msk.f32.mxu1 %vm171_vm1, %v15004_v56  ;;  %v15595_v56 = vld [vmem:[#allocation2 + $0x174] sm:$0xff] }
 0x1fd   : > { %12817 = vmatmul.mubr.msk.f32.gmra.mrb[20].mxu0 %vm171_vm1, %v15571_v44 }
 0x1fe   : > { %12199 = vmatmul.mubr.msk.f32.gmra.mrb[8].mxu1 %vm171_vm1, %v15014_v42  ;;  %12819 = vmatprep.mubr.msk.f32.mxu0 %vm171_vm1, %v15575_v7  ;;  %v15599_v42 = vld [vmem:[#allocation2 + $0x184] sm:$0xff] }
 0x1ff   : > { %12201 = vmatprep.mubr.msk.f32.mxu1 %vm171_vm1, %v15018_v59  ;;  %16599 = vst [vmem:[#allocation54_spill] sm:$0xff] %v15599_v42  ;;  %v15607_v59 = vld [vmem:[#allocation2 + $0x18c] sm:$0xff] }
 0x201   : > { %12820 = vmatmul.mubr.msk.f32.gmra.mrb[22].mxu0 %vm171_vm1, %v15583_v38 }
 0x202   : > { %12202 = vmatmul.mubr.msk.f32.gmra.mrb[10].mxu1 %vm171_vm1, %v15026_v16  ;;  %12822 = vmatprep.mubr.msk.f32.mxu0 %vm171_vm1, %v15587_v35  ;;  %v7674_v16 = vld [vmem:[#allocation2 + $0x19c] sm:$0xff] }
 0x203   : > { %12204 = vmatprep.mubr.msk.f32.mxu1 %vm171_vm1, %v15030_v29  ;;  %v7675_v29 = vld [vmem:[#allocation2 + $0x1a4] sm:$0xff] }
 0x205   : > { %12823 = vmatmul.mubr.msk.f32.gmra.mrb[24].mxu0 %vm171_vm1, %v15595_v56 }
 0x206   : > { %12205 = vmatmul.mubr.msk.f32.gmra.mrb[12].mxu1 %vm171_vm1, %v15038_v17  ;;  %12825 = vmatprep.mubr.msk.f32.mxu0 %vm171_vm1, %v15599_v42  ;;  %v7676_v17 = vld [vmem:[#allocation2 + $0x1b4] sm:$0xff] }
 0x207   : > { %12207 = vmatprep.mubr.msk.f32.mxu1 %vm171_vm1, %v15042_v30  ;;  %v15618_v42 = vld [vmem:[#allocation2 + $0xf2] sm:$0xff]  ;;  %v7677_v30 = vld [vmem:[#allocation2 + $0x1bc] sm:$0xff] }
 0x209   : > { %12826 = vmatmul.mubr.msk.f32.gmra.mrb[26].mxu0 %vm171_vm1, %v15607_v59 }
 0x20a   : > { %12208 = vmatmul.mubr.msk.f32.gmra.mrb[14].mxu1 %vm171_vm1, %v15050_v31  ;;  %12828 = vmatprep.mubr.msk.f32.mxu0 %vm171_vm1, %v7674_v16  ;;  %v15626_v31 = vld [vmem:[#allocation2 + $0xfa] sm:$0xff]  ;;  %v15628_v16 = vld [vmem:[#allocation2 + $0x10a] sm:$0xff] }
 0x20b   : > { %12210 = vmatprep.mubr.msk.f32.mxu1 %vm171_vm1, %v15054_v34  ;;  %v15637_v34 = vld [vmem:[#allocation2 + $0x112] sm:$0xff] }
 0x20d   : > { %12829 = vmatmul.mubr.msk.f32.gmra.mrb[28].mxu0 %vm171_vm1, %v7675_v29  ;;  %v15646_v29 = vld [vmem:[%s16325_s1 + $0x58] sm:$0xf] }
 0x20e   : > { %12211 = vmatmul.mubr.msk.f32.gmra.mrb[16].mxu1 %vm171_vm1, %v15062_v39  ;;  %12831 = vmatprep.mubr.msk.f32.mxu0 %vm171_vm1, %v7676_v17  ;;  %v15639_v39 = vld [vmem:[#allocation2 + $0x122] sm:$0xff]  ;;  %v16619_v17 = vld [vmem:[#allocation9_spill] sm:$0xff] }
 0x20f   : > { %12213 = vmatprep.mubr.msk.f32.mxu1 %vm171_vm1, %v15618_v42 }
 0x211   : > { %12832 = vmatmul.mubr.msk.f32.gmra.mrb[30].mxu0 %vm171_vm1, %v7677_v30  ;;  %v16620_v30 = vld [vmem:[#allocation42_spill] sm:$0xff] }
 0x212   : > { %12214 = vmatmul.mubr.msk.f32.gmra.mrb[18].mxu1 %vm171_vm1, %v15626_v31  ;;  %12836 = vmatprep.mubr.msk.f32.mxu0 %vm171_vm1, %v15086_v25  ;;  %v15656_v25 = vld [vmem:[#allocation2 + $0x12a] sm:$0xff] }
 0x213   : > { %12216 = vmatprep.mubr.msk.f32.mxu1 %vm171_vm1, %v15628_v16 }
 0x215   : > { %12837 = vmatmul.mubr.msk.f32.vlgmr.msra.gmra.mrb[0].mxu0 %vm171_vm1, %v15095_v61  ;;  %v15658_v61 = vld [vmem:[#allocation2 + $0x13a] sm:$0xff] }
 0x216   : > { %12885 = vmatpush3.msk.msra.mxu0 %vm461_vm0, %v15434_v46  ;;  %12217 = vmatmul.mubr.msk.f32.gmra.mrb[20].mxu1 %vm171_vm1, %v15637_v34  ;;  %v15672_v46 = vld [vmem:[#allocation2 + $0x152] sm:$0xff] }
 0x217   : > { %12839 = vmatprep.mubr.msk.f32.mxu0 %vm171_vm1, %v15097_v10  ;;  %12219 = vmatprep.mubr.msk.f32.mxu1 %vm171_vm1, %v15639_v39  ;;  %v15670_v10 = vld [vmem:[#allocation2 + $0x142] sm:$0xff] }
 0x218   : > { %12934 = vmatprep.subr.msk.mxu0 %vm461_vm0, %v15646_v29 }
 0x219   : > { %12840 = vmatmul.mubr.msk.f32.gmra.mrb[2].mxu0 %vm171_vm1, %v15107_v63  ;;  %v15682_v63 = vld [vmem:[#allocation2 + $0x15a] sm:$0xff] }
 0x21a   : > { %12220 = vmatmul.mubr.msk.f32.gmra.mrb[22].mxu1 %vm171_vm1, %v15656_v25  ;;  %12842 = vmatprep.mubr.msk.f32.mxu0 %vm171_vm1, %v15109_v3  ;;  %v15684_v3 = vld [vmem:[#allocation2 + $0x16a] sm:$0xff] }
 0x21b   : > { %12222 = vmatprep.mubr.msk.f32.mxu1 %vm171_vm1, %v15658_v61 }
 0x21d   : > { %12843 = vmatmul.mubr.msk.f32.gmra.mrb[4].mxu0 %vm171_vm1, %v15119_v5  ;;  %v15694_v5 = vld [vmem:[#allocation2 + $0x172] sm:$0xff] }
 0x21e   : > { %12223 = vmatmul.mubr.msk.f32.gmra.mrb[24].mxu1 %vm171_vm1, %v15670_v10  ;;  %12845 = vmatprep.mubr.msk.f32.mxu0 %vm171_vm1, %v15121_v28  ;;  %v3355_v28 = vld [vmem:[#allocation2 + $0x1b] sm:$0xff] }
 0x21f   : > { %12225 = vmatprep.mubr.msk.f32.mxu1 %vm171_vm1, %v15672_v46 }
 0x221   : > { %12846 = vmatmul.mubr.msk.f32.gmra.mrb[6].mxu0 %vm171_vm1, %v15131_v32  ;;  %v3356_v32 = vld [vmem:[#allocation2 + $0x23] sm:$0xff] }
 0x222   : > { %12226 = vmatmul.mubr.msk.f32.gmra.mrb[26].mxu1 %vm171_vm1, %v15682_v63  ;;  %12848 = vmatprep.mubr.msk.f32.mxu0 %vm171_vm1, %v15135_v26  ;;  %v3357_v26 = vld [vmem:[#allocation2 + $0x33] sm:$0xff] }
 0x223   : > { %12228 = vmatprep.mubr.msk.f32.mxu1 %vm171_vm1, %v15684_v3 }
 0x225   : > { %12849 = vmatmul.mubr.msk.f32.gmra.mrb[8].mxu0 %vm171_vm1, %v15147_v15  ;;  %v15757_v15 = vld [vmem:[#allocation2 + $0x180] sm:$0xff] }
 0x226   : > { %12229 = vmatmul.mubr.msk.f32.gmra.mrb[28].mxu1 %vm171_vm1, %v15694_v5  ;;  %12851 = vmatprep.mubr.msk.f32.mxu0 %vm171_vm1, %v15149_v20  ;;  %v15765_v20 = vld [vmem:[#allocation2 + $0x188] sm:$0xff] }
 0x227   : > { %12231 = vmatprep.mubr.msk.f32.mxu1 %vm171_vm1, %v15133_v22  ;;  %v15716_v22 = vld [vmem:[%s16325_s1 + $0x28] sm:$0xf] }
 0x229   : > { %12852 = vmatmul.mubr.msk.f32.gmra.mrb[10].mxu0 %vm171_vm1, %v15158_v33  ;;  %v15769_v33 = vld [vmem:[#allocation2 + $0x198] sm:$0xff] }
 0x22a   : > { %12232 = vmatmul.mubr.msk.f32.gmra.mrb[30].mxu1 %vm171_vm1, %v15143_v9  ;;  %12854 = vmatprep.mubr.msk.f32.mxu0 %vm171_vm1, %v15160_v49  ;;  %v3358_v9 = vld [vmem:[#allocation2 + $0x3b] sm:$0xff] }
 0x22b   : > { %12236 = vmatprep.mubr.msk.f32.mxu1 %vm171_vm1, %v3355_v28  ;;  %v15777_v49 = vld [vmem:[#allocation2 + $0x1a0] sm:$0xff] }
 0x22c   : > { %v16622_v28 = vld [vmem:[#allocation43_spill] sm:$0xff] }
 0x22d   : > { %12855 = vmatmul.mubr.msk.f32.gmra.mrb[12].mxu0 %vm171_vm1, %v15168_v53  ;;  %v8065_v53 = vld [vmem:[#allocation2 + $0x1b0] sm:$0xff] }
 0x22e   : > { %12237 = vmatmul.mubr.msk.f32.vlgmr.msra.gmra.mrb[0].mxu1 %vm171_vm1, %v3356_v32  ;;  %12857 = vmatprep.mubr.msk.f32.mxu0 %vm171_vm1, %v15172_v58  ;;  %v16600_v58 = vld [vmem:[#allocation29_spill] sm:$0xff]  ;;  %v16623_v32 = vld [vmem:[#allocation11_spill] sm:$0xff] }
 0x22f   : > { %12239 = vmatprep.mubr.msk.f32.mxu1 %vm171_vm1, %v3357_v26  ;;  %12285 = vmatpush3.msk.msra.mxu1 %vm461_vm0, %v15528_v43  ;;  %v16618_v43 = vld [vmem:[#allocation41_spill] sm:$0xff]  ;;  %v16624_v26 = vld [vmem:[#allocation14_spill] sm:$0xff] }
 0x230   : > { %12334 = vmatprep.subr.msk.mxu1 %vm461_vm0, %v15716_v22 }
 0x231   : > { %12858 = vmatmul.mubr.msk.f32.gmra.mrb[14].mxu0 %vm171_vm1, %v15183_v14  ;;  %v16601_v14 = vld [vmem:[#allocation30_spill] sm:$0xff] }
 0x232   : > { %12240 = vmatmul.mubr.msk.f32.gmra.mrb[2].mxu1 %vm171_vm1, %v3358_v9  ;;  %12860 = vmatprep.mubr.msk.f32.mxu0 %vm171_vm1, %v15187_v6  ;;  %v16602_v6 = vld [vmem:[#allocation31_spill] sm:$0xff]  ;;  %v16625_v9 = vld [vmem:[#allocation12_spill] sm:$0xff] }
 0x233   : > { %12242 = vmatprep.mubr.msk.f32.mxu1 %vm171_vm1, %v15170_v60  ;;  %v8066_v60 = vld [vmem:[#allocation2 + $0x1b8] sm:$0xff] }
 0x235   : > { %12861 = vmatmul.mubr.msk.f32.gmra.mrb[16].mxu0 %vm171_vm1, %v15206_v45  ;;  %v16604_v45 = vld [vmem:[#allocation34_spill] sm:$0xff] }
 0x236   : > { %12243 = vmatmul.mubr.msk.f32.gmra.mrb[4].mxu1 %vm171_vm1, %v15179_v50  ;;  %12863 = vmatprep.mubr.msk.f32.mxu0 %vm171_vm1, %v15210_v55  ;;  %v8067_v50 = vld [vmem:[#allocation2 + $0x1c8] sm:$0xff]  ;;  %v16606_v55 = vld [vmem:[#allocation35_spill] sm:$0xff] }
 0x237   : > { %12245 = vmatprep.mubr.msk.f32.mxu1 %vm171_vm1, %v15185_v57  ;;  %v8068_v57 = vld [vmem:[#allocation2 + $0x1d0] sm:$0xff] }
 0x239   : > { %12864 = vmatmul.mubr.msk.f32.gmra.mrb[18].mxu0 %vm171_vm1, %v15224_v4  ;;  %v16607_v4 = vld [vmem:[#allocation33_spill] sm:$0xff] }
 0x23a   : > { %12246 = vmatmul.mubr.msk.f32.gmra.mrb[6].mxu1 %vm171_vm1, %v15200_v62  ;;  %12866 = vmatprep.mubr.msk.f32.mxu0 %vm171_vm1, %v15228_v8  ;;  %v16603_v62 = vld [vmem:[#allocation32_spill] sm:$0xff] }
 0x23b   : > { %12248 = vmatprep.mubr.msk.f32.mxu1 %vm171_vm1, %v15208_v47  ;;  %v16605_v47 = vld [vmem:[#allocation3_spill] sm:$0xff]  ;;  %v16609_v8 = vld [vmem:[#allocation4_spill] sm:$0xff] }
 0x23d   : > { %12867 = vmatmul.mubr.msk.f32.gmra.mrb[20].mxu0 %vm171_vm1, %v15240_v48  ;;  %v16611_v48 = vld [vmem:[#allocation5_spill] sm:$0xff] }
 0x23e   : > { %12249 = vmatmul.mubr.msk.f32.gmra.mrb[8].mxu1 %vm171_vm1, %v15220_v1  ;;  %12869 = vmatprep.mubr.msk.f32.mxu0 %vm171_vm1, %v15244_v12  ;;  %v15806_v1 = vld [vmem:[%s16325_s1 + $0x5c] sm:$0xf] }
 0x23f   : > { %12251 = vmatprep.mubr.msk.f32.mxu1 %vm171_vm1, %v15226_v11  ;;  %v16608_v11 = vld [vmem:[#allocation36_spill] sm:$0xff]  ;;  %v16613_v12 = vld [vmem:[#allocation6_spill] sm:$0xff] }
 0x241   : > { %12870 = vmatmul.mubr.msk.f32.gmra.mrb[22].mxu0 %vm171_vm1, %v15256_v19  ;;  %v16615_v19 = vld [vmem:[#allocation7_spill] sm:$0xff] }
 0x242   : > { %12252 = vmatmul.mubr.msk.f32.gmra.mrb[10].mxu1 %vm171_vm1, %v15236_v2  ;;  %12872 = vmatprep.mubr.msk.f32.mxu0 %vm171_vm1, %v15757_v15  ;;  %v16610_v2 = vld [vmem:[#allocation37_spill] sm:$0xff] }
 0x243   : > { %12254 = vmatprep.mubr.msk.f32.mxu1 %vm171_vm1, %v15242_v13  ;;  %v16612_v13 = vld [vmem:[#allocation38_spill] sm:$0xff] }
 0x245   : > { %12873 = vmatmul.mubr.msk.f32.gmra.mrb[24].mxu0 %vm171_vm1, %v15765_v20 }
 0x246   : > { %12255 = vmatmul.mubr.msk.f32.gmra.mrb[12].mxu1 %vm171_vm1, %v15252_v37  ;;  %12875 = vmatprep.mubr.msk.f32.mxu0 %vm171_vm1, %v15769_v33  ;;  %v16614_v37 = vld [vmem:[#allocation39_spill] sm:$0xff] }
 0x247   : > { %12257 = vmatprep.mubr.msk.f32.mxu1 %vm171_vm1, %v15258_v21  ;;  %v16616_v21 = vld [vmem:[#allocation40_spill] sm:$0xff] }
 0x249   : > { %12876 = vmatmul.mubr.msk.f32.gmra.mrb[26].mxu0 %vm171_vm1, %v15777_v49 }
 0x24a   : > { %12258 = vmatmul.mubr.msk.f32.gmra.mrb[14].mxu1 %vm171_vm1, %v15266_v23  ;;  %12878 = vmatprep.mubr.msk.f32.mxu0 %vm171_vm1, %v8065_v53  ;;  %v16617_v23 = vld [vmem:[#allocation8_spill] sm:$0xff]  ;;  %v3745_v53 = vld [vmem:[#allocation2 + $0x1c] sm:$0xff] }
 0x24b   : > { %12260 = vmatprep.mubr.msk.f32.mxu1 %vm171_vm1, %v16600_v58  ;;  %v16627_v58 = vld [vmem:[#allocation13_spill] sm:$0xff] }
 0x24d   : > { %12879 = vmatmul.mubr.msk.f32.gmra.mrb[28].mxu0 %vm171_vm1, %v8066_v60  ;;  %v16626_v60 = vld [vmem:[#allocation44_spill] sm:$0xff] }
 0x24e   : > { %12261 = vmatmul.mubr.msk.f32.gmra.mrb[16].mxu1 %vm171_vm1, %v16601_v14  ;;  %12881 = vmatprep.mubr.msk.f32.mxu0 %vm171_vm1, %v8067_v50  ;;  %v16628_v50 = vld [vmem:[#allocation15_spill] sm:$0xff] }
 0x24f   : > { %12263 = vmatprep.mubr.msk.f32.mxu1 %vm171_vm1, %v16602_v6  ;;  %v3746_v14 = vld [vmem:[#allocation2 + $0x24] sm:$0xff] }
 0x250   : > { %v16629_v6 = vld [vmem:[#allocation16_spill] sm:$0xff] }
 0x251   : > { %12882 = vmatmul.mubr.msk.f32.gmra.mrb[30].mxu0 %vm171_vm1, %v8068_v57  ;;  %v3747_v57 = vld [vmem:[#allocation2 + $0x34] sm:$0xff] }
 0x252   : > { %12264 = vmatmul.mubr.msk.f32.gmra.mrb[18].mxu1 %vm171_vm1, %v16603_v62  ;;  %12886 = vmatprep.mubr.msk.f32.mxu0 %vm171_vm1, %v16604_v45  ;;  %v15862_v62 = vld [vmem:[%s16325_s1 + $0x2c] sm:$0xf]  ;;  %v16630_v45 = vld [vmem:[#allocation18_spill] sm:$0xff] }
 0x253   : > { %12266 = vmatprep.mubr.msk.f32.mxu1 %vm171_vm1, %v16605_v47  ;;  %v3748_v47 = vld [vmem:[#allocation2 + $0x3c] sm:$0xff] }
 0x255   : > { %12887 = vmatmul.mubr.msk.f32.vlgmr.msra.gmra.mrb[0].mxu0 %vm171_vm1, %v16606_v55  ;;  %v16631_v55 = vld [vmem:[#allocation45_spill] sm:$0xff] }
 0x256   : > { %12935 = vmatpush3.msk.msra.mxu0 %vm461_vm0, %v15646_v29  ;;  %12267 = vmatmul.mubr.msk.f32.gmra.mrb[20].mxu1 %vm171_vm1, %v16607_v4  ;;  %v16621_v29 = vld [vmem:[#allocation10_spill] sm:$0xff] }
 0x257   : > { %12889 = vmatprep.mubr.msk.f32.mxu0 %vm171_vm1, %v16608_v11  ;;  %12269 = vmatprep.mubr.msk.f32.mxu1 %vm171_vm1, %v16609_v8  ;;  %v16632_v4 = vld [vmem:[#allocation46_spill] sm:$0xff]  ;;  %v16633_v11 = vld [vmem:[#allocation17_spill] sm:$0xff]  ;;  %v16634_v8 = vld [vmem:[#allocation47_spill] sm:$0xff] }
 0x258   : > { %12984 = vmatprep.subr.msk.mxu0 %vm461_vm0, %v15806_v1 }
 0x259   : > { %12890 = vmatmul.mubr.msk.f32.gmra.mrb[2].mxu0 %vm171_vm1, %v16610_v2  ;;  %v16635_v2 = vld [vmem:[#allocation19_spill] sm:$0xff] }
 0x25a   : > { %12270 = vmatmul.mubr.msk.f32.gmra.mrb[22].mxu1 %vm171_vm1, %v16611_v48  ;;  %12892 = vmatprep.mubr.msk.f32.mxu0 %vm171_vm1, %v16612_v13  ;;  %v16637_v48 = vld [vmem:[#allocation20_spill] sm:$0xff]  ;;  %v16638_v13 = vld [vmem:[#allocation21_spill] sm:$0xff] }
 0x25b   : > { %12272 = vmatprep.mubr.msk.f32.mxu1 %vm171_vm1, %v16613_v12  ;;  %v16639_v12 = vld [vmem:[#allocation24_spill] sm:$0xff] }
 0x25d   : > { %12893 = vmatmul.mubr.msk.f32.gmra.mrb[4].mxu0 %vm171_vm1, %v16614_v37  ;;  %v16640_v37 = vld [vmem:[#allocation22_spill] sm:$0xff] }
 0x25e   : > { %12273 = vmatmul.mubr.msk.f32.gmra.mrb[24].mxu1 %vm171_vm1, %v16615_v19  ;;  %12895 = vmatprep.mubr.msk.f32.mxu0 %vm171_vm1, %v16616_v21  ;;  %v16641_v19 = vld [vmem:[#allocation23_spill] sm:$0xff] }
 0x25f   : > { %12275 = vmatprep.mubr.msk.f32.mxu1 %vm171_vm1, %v16617_v23  ;;  %v16642_v21 = vld [vmem:[#allocation51_spill] sm:$0xff]  ;;  %v16643_v23 = vld [vmem:[#allocation49_spill] sm:$0xff] }
 0x261   : > { %12896 = vmatmul.mubr.msk.f32.gmra.mrb[6].mxu0 %vm171_vm1, %v16618_v43  ;;  %v16644_v43 = vld [vmem:[#allocation52_spill] sm:$0xff] }
 0x262   : > { %12276 = vmatmul.mubr.msk.f32.gmra.mrb[26].mxu1 %vm171_vm1, %v16619_v17  ;;  %12898 = vmatprep.mubr.msk.f32.mxu0 %vm171_vm1, %v16620_v30  ;;  %v16645_v17 = vld [vmem:[#allocation50_spill] sm:$0xff]  ;;  %v16646_v30 = vld [vmem:[#allocation25_spill] sm:$0xff] }
 0x263   : > { %12278 = vmatprep.mubr.msk.f32.mxu1 %vm171_vm1, %v16621_v29  ;;  %v15915_v29 = vld [vmem:[#allocation2 + $0x199] sm:$0xff] }
 0x265   : > { %12899 = vmatmul.mubr.msk.f32.gmra.mrb[8].mxu0 %vm171_vm1, %v16622_v28  ;;  %v16647_v28 = vld [vmem:[#allocation26_spill] sm:$0xff] }
 0x266   : > { %12279 = vmatmul.mubr.msk.f32.gmra.mrb[28].mxu1 %vm171_vm1, %v16623_v32  ;;  %12901 = vmatprep.mubr.msk.f32.mxu0 %vm171_vm1, %v16624_v26  ;;  %v15923_v32 = vld [vmem:[#allocation2 + $0x1a1] sm:$0xff] }
 0x267   : > { %12281 = vmatprep.mubr.msk.f32.mxu1 %vm171_vm1, %v16625_v9  ;;  %v16648_v26 = vld [vmem:[#allocation27_spill] sm:$0xff]  ;;  %v8455_v9 = vld [vmem:[#allocation2 + $0x1b1] sm:$0xff] }
 0x269   : > { %12902 = vmatmul.mubr.msk.f32.gmra.mrb[10].mxu0 %vm171_vm1, %v16626_v60  ;;  %v8456_v60 = vld [vmem:[#allocation2 + $0x1b9] sm:$0xff] }
 0x26a   : > { %12282 = vmatmul.mubr.msk.f32.gmra.mrb[30].mxu1 %vm171_vm1, %v16627_v58  ;;  %12904 = vmatprep.mubr.msk.f32.mxu0 %vm171_vm1, %v16628_v50  ;;  %v16650_v58 = vld [vmem:[#allocation28_spill] sm:$0xff] }
 0x26b   : > { %12286 = vmatprep.mubr.msk.f32.mxu1 %vm171_vm1, %v3745_v53  ;;  %v16649_v53 = vld [vmem:[#allocation53_spill] sm:$0xff] }
 0x26c   : > { %v8457_v50 = vld [vmem:[#allocation2 + $0x1c9] sm:$0xff] }
 0x26d   : > { %12905 = vmatmul.mubr.msk.f32.gmra.mrb[12].mxu0 %vm171_vm1, %v16629_v6  ;;  %v8818_v6 = vld [vmem:[#allocation2 + $0x6a] sm:$0xff] }
 0x26e   : > { %12287 = vmatmul.mubr.msk.f32.vlgmr.msra.gmra.mrb[0].mxu1 %vm171_vm1, %v3746_v14  ;;  %12907 = vmatprep.mubr.msk.f32.mxu0 %vm171_vm1, %v16630_v45  ;;  %v8458_v14 = vld [vmem:[#allocation2 + $0x1d1] sm:$0xff]  ;;  %v8819_v45 = vld [vmem:[#allocation2 + $0x7a] sm:$0xff] }
 0x26f   : > { %12289 = vmatprep.mubr.msk.f32.mxu1 %vm171_vm1, %v3747_v57  ;;  %12335 = vmatpush3.msk.msra.mxu1 %vm461_vm0, %v15716_v22  ;;  %v16636_v22 = vld [vmem:[#allocation48_spill] sm:$0xff] }
 0x270   : > { %12384 = vmatprep.subr.msk.mxu1 %vm461_vm0, %v15862_v62  ;;  %v8817_v57 = vld [vmem:[#allocation2 + $0x62] sm:$0xff] }
 0x271   : > { %12908 = vmatmul.mubr.msk.f32.gmra.mrb[14].mxu0 %vm171_vm1, %v16631_v55  ;;  %v4147_v55 = vld [vmem:[#allocation2 + $0xc0] sm:$0xff] }
 0x272   : > { %12290 = vmatmul.mubr.msk.f32.gmra.mrb[2].mxu1 %vm171_vm1, %v3748_v47  ;;  %12910 = vmatprep.mubr.msk.f32.mxu0 %vm171_vm1, %v16632_v4  ;;  %v4135_v47 = vld [vmem:[#allocation2 + $0x30] sm:$0xff]  ;;  %v4149_v4 = vld [vmem:[#allocation2 + $0xd8] sm:$0xff] }
 0x273   : > { %12292 = vmatprep.mubr.msk.f32.mxu1 %vm171_vm1, %v16633_v11  ;;  %v4150_v11 = vld [vmem:[#allocation2 + $0xe0] sm:$0xff] }
 0x275   : > { %12911 = vmatmul.mubr.msk.f32.gmra.mrb[16].mxu0 %vm171_vm1, %v16634_v8  ;;  %v8845_v8 = vld [vmem:[#allocation2 + $0x1b2] sm:$0xff] }
 0x276   : > { %12293 = vmatmul.mubr.msk.f32.gmra.mrb[4].mxu1 %vm171_vm1, %v16635_v2  ;;  %12913 = vmatprep.mubr.msk.f32.mxu0 %vm171_vm1, %v16636_v22  ;;  %v4151_v2 = vld [vmem:[#allocation2 + $0xf0] sm:$0xff]  ;;  %v8846_v22 = vld [vmem:[#allocation2 + $0x1ba] sm:$0xff] }
 0x277   : > { %12295 = vmatprep.mubr.msk.f32.mxu1 %vm171_vm1, %v16637_v48  ;;  %v4152_v48 = vld [vmem:[#allocation2 + $0xf8] sm:$0xff] }
 0x279   : > { %12914 = vmatmul.mubr.msk.f32.gmra.mrb[18].mxu0 %vm171_vm1, %v15464_v40  ;;  %v15903_v40 = vld [vmem:[#allocation2 + $0x181] sm:$0xff] }
 0x27a   : > { %12296 = vmatmul.mubr.msk.f32.gmra.mrb[6].mxu1 %vm171_vm1, %v16638_v13  ;;  %12916 = vmatprep.mubr.msk.f32.mxu0 %vm171_vm1, %v16639_v12  ;;  %v8847_v13 = vld [vmem:[#allocation2 + $0x1ca] sm:$0xff] }
 0x27b   : > { %12298 = vmatprep.mubr.msk.f32.mxu1 %vm171_vm1, %v16640_v37  ;;  %v4153_v12 = vld [vmem:[#allocation2 + $0x108] sm:$0xff]  ;;  %v8848_v37 = vld [vmem:[#allocation2 + $0x1d2] sm:$0xff] }
 0x27d   : > { %12917 = vmatmul.mubr.msk.f32.gmra.mrb[20].mxu0 %vm171_vm1, %v15480_v27  ;;  %v15911_v27 = vld [vmem:[#allocation2 + $0x189] sm:$0xff] }
 0x27e   : > { %12299 = vmatmul.mubr.msk.f32.gmra.mrb[8].mxu1 %vm171_vm1, %v16641_v19  ;;  %12919 = vmatprep.mubr.msk.f32.mxu0 %vm171_vm1, %v16642_v21  ;;  %v4154_v19 = vld [vmem:[#allocation2 + $0x110] sm:$0xff]  ;;  %v9207_v21 = vld [vmem:[#allocation2 + $0x63] sm:$0xff] }
 0x27f   : > { %12301 = vmatprep.mubr.msk.f32.mxu1 %vm171_vm1, %v16643_v23  ;;  %v4155_v23 = vld [vmem:[#allocation2 + $0x120] sm:$0xff] }
 0x281   : > { %12920 = vmatmul.mubr.msk.f32.gmra.mrb[22].mxu0 %vm171_vm1, %v16644_v43  ;;  %v9208_v43 = vld [vmem:[#allocation2 + $0x6b] sm:$0xff] }
 0x282   : > { %12302 = vmatmul.mubr.msk.f32.gmra.mrb[10].mxu1 %vm171_vm1, %v16645_v17  ;;  %12922 = vmatprep.mubr.msk.f32.mxu0 %vm171_vm1, %v15903_v40  ;;  %v4156_v17 = vld [vmem:[#allocation2 + $0x128] sm:$0xff] }
 0x283   : > { %12304 = vmatprep.mubr.msk.f32.mxu1 %vm171_vm1, %v16646_v30  ;;  %v9209_v30 = vld [vmem:[#allocation2 + $0x7b] sm:$0xff] }
 0x285   : > { %12923 = vmatmul.mubr.msk.f32.gmra.mrb[24].mxu0 %vm171_vm1, %v15911_v27 }
 0x286   : > { %12305 = vmatmul.mubr.msk.f32.gmra.mrb[12].mxu1 %vm171_vm1, %v16647_v28  ;;  %12925 = vmatprep.mubr.msk.f32.mxu0 %vm171_vm1, %v15915_v29  ;;  %v4157_v28 = vld [vmem:[#allocation2 + $0x138] sm:$0xff] }
 0x287   : > { %12307 = vmatprep.mubr.msk.f32.mxu1 %vm171_vm1, %v16648_v26  ;;  %v9210_v26 = vld [vmem:[#allocation2 + $0x83] sm:$0xff] }
 0x289   : > { %12926 = vmatmul.mubr.msk.f32.gmra.mrb[26].mxu0 %vm171_vm1, %v15923_v32 }
 0x28a   : > { %12308 = vmatmul.mubr.msk.f32.gmra.mrb[14].mxu1 %vm171_vm1, %v16649_v53  ;;  %12928 = vmatprep.mubr.msk.f32.mxu0 %vm171_vm1, %v8455_v9  ;;  %v4158_v9 = vld [vmem:[#allocation2 + $0x140] sm:$0xff]  ;;  %v9211_v53 = vld [vmem:[#allocation2 + $0x93] sm:$0xff] }
 0x28b   : > { %12310 = vmatprep.mubr.msk.f32.mxu1 %vm171_vm1, %v16650_v58  ;;  %v9212_v58 = vld [vmem:[#allocation2 + $0x9b] sm:$0xff] }
 0x28d   : > { %12929 = vmatmul.mubr.msk.f32.gmra.mrb[28].mxu0 %vm171_vm1, %v8456_v60  ;;  %v4159_v60 = vld [vmem:[#allocation2 + $0x150] sm:$0xff] }
 0x28e   : > { %12311 = vmatmul.mubr.msk.f32.gmra.mrb[16].mxu1 %vm171_vm1, %v15518_v41  ;;  %12931 = vmatprep.mubr.msk.f32.mxu0 %vm171_vm1, %v8457_v50  ;;  %v15950_v41 = vld [vmem:[%s16325_s1 + $0x60] sm:$0xf]  ;;  %v4160_v50 = vld [vmem:[#allocation2 + $0x158] sm:$0xff] }
 0x28f   : > { %12313 = vmatprep.mubr.msk.f32.mxu1 %vm171_vm1, %v15521_v54  ;;  %v8820_v54 = vld [vmem:[#allocation2 + $0x82] sm:$0xff] }
 0x291   : > { %12932 = vmatmul.mubr.msk.f32.gmra.mrb[30].mxu0 %vm171_vm1, %v8458_v14  ;;  %v9213_v14 = vld [vmem:[#allocation2 + $0xab] sm:$0xff] }
 0x292   : > { %12314 = vmatmul.mubr.msk.f32.gmra.mrb[18].mxu1 %vm171_vm1, %v15533_v51  ;;  %12936 = vmatprep.mubr.msk.f32.mxu0 %vm171_vm1, %v8817_v57  ;;  %v8822_v51 = vld [vmem:[#allocation2 + $0x9a] sm:$0xff]  ;;  %v4161_v57 = vld [vmem:[#allocation2 + $0x168] sm:$0xff] }
 0x293   : > { %12316 = vmatprep.mubr.msk.f32.mxu1 %vm171_vm1, %v15536_v24  ;;  %v8821_v24 = vld [vmem:[#allocation2 + $0x92] sm:$0xff] }
 0x295   : > { %12937 = vmatmul.mubr.msk.f32.vlgmr.msra.gmra.mrb[0].mxu0 %vm171_vm1, %v8818_v6  ;;  %v9214_v6 = vld [vmem:[#allocation2 + $0xb3] sm:$0xff] }
 0x296   : > { %12985 = vmatpush3.msk.msra.mxu0 %vm461_vm0, %v15806_v1  ;;  %12317 = vmatmul.mubr.msk.f32.gmra.mrb[20].mxu1 %vm171_vm1, %v15547_v36  ;;  %v8823_v36 = vld [vmem:[#allocation2 + $0xaa] sm:$0xff]  ;;  %v8825_v1 = vld [vmem:[#allocation2 + $0xc2] sm:$0xff] }
 0x297   : > { %12939 = vmatprep.mubr.msk.f32.mxu0 %vm171_vm1, %v8819_v45  ;;  %12319 = vmatprep.mubr.msk.f32.mxu1 %vm171_vm1, %v15551_v18  ;;  %v8824_v18 = vld [vmem:[#allocation2 + $0xb2] sm:$0xff] }
 0x298   : > { %13034 = vmatprep.subr.msk.mxu0 %vm461_vm0, %v15950_v41  ;;  %v4162_v45 = vld [vmem:[#allocation2 + $0x170] sm:$0xff] }
 0x299   : > { %12940 = vmatmul.mubr.msk.f32.gmra.mrb[2].mxu0 %vm171_vm1, %v8820_v54  ;;  %v9216_v54 = vld [vmem:[#allocation2 + $0xcb] sm:$0xff] }
 0x29a   : > { %12320 = vmatmul.mubr.msk.f32.gmra.mrb[22].mxu1 %vm171_vm1, %v15559_v52  ;;  %12942 = vmatprep.mubr.msk.f32.mxu0 %vm171_vm1, %v8821_v24  ;;  %v8826_v52 = vld [vmem:[#allocation2 + $0xca] sm:$0xff]  ;;  %v9217_v24 = vld [vmem:[#allocation2 + $0xdb] sm:$0xff] }
 0x29b   : > { %12322 = vmatprep.mubr.msk.f32.mxu1 %vm171_vm1, %v15563_v0  ;;  %v8827_v0 = vld [vmem:[#allocation2 + $0xda] sm:$0xff] }
 0x29d   : > { %12943 = vmatmul.mubr.msk.f32.gmra.mrb[4].mxu0 %vm171_vm1, %v8822_v51  ;;  %v9218_v51 = vld [vmem:[#allocation2 + $0xe3] sm:$0xff] }
 0x29e   : > { %12323 = vmatmul.mubr.msk.f32.gmra.mrb[24].mxu1 %vm171_vm1, %v15571_v44  ;;  %12945 = vmatprep.mubr.msk.f32.mxu0 %vm171_vm1, %v8823_v36  ;;  %v8828_v44 = vld [vmem:[#allocation2 + $0xe2] sm:$0xff]  ;;  %v9219_v36 = vld [vmem:[#allocation2 + $0xf3] sm:$0xff] }
 0x29f   : > { %12325 = vmatprep.mubr.msk.f32.mxu1 %vm171_vm1, %v15575_v7  ;;  %v16651_v7 = vld [vmem:[#allocation54_spill] sm:$0xff] }
 0x2a1   : > { %12946 = vmatmul.mubr.msk.f32.gmra.mrb[6].mxu0 %vm171_vm1, %v8824_v18  ;;  %v4525_v18 = vld [vmem:[#allocation2 + $0x31] sm:$0xff] }
 0x2a2   : > { %12326 = vmatmul.mubr.msk.f32.gmra.mrb[26].mxu1 %vm171_vm1, %v15583_v38  ;;  %12948 = vmatprep.mubr.msk.f32.mxu0 %vm171_vm1, %v8825_v1  ;;  %v4136_v38 = vld [vmem:[#allocation2 + $0x38] sm:$0xff] }
 0x2a3   : > { %12328 = vmatprep.mubr.msk.f32.mxu1 %vm171_vm1, %v15587_v35  ;;  %v4137_v35 = vld [vmem:[#allocation2 + $0x48] sm:$0xff]  ;;  %v4526_v1 = vld [vmem:[#allocation2 + $0x39] sm:$0xff] }
 0x2a5   : > { %12949 = vmatmul.mubr.msk.f32.gmra.mrb[8].mxu0 %vm171_vm1, %v8826_v52  ;;  %v4527_v52 = vld [vmem:[#allocation2 + $0x49] sm:$0xff] }
 0x2a6   : > { %12329 = vmatmul.mubr.msk.f32.gmra.mrb[28].mxu1 %vm171_vm1, %v15595_v56  ;;  %12951 = vmatprep.mubr.msk.f32.mxu0 %vm171_vm1, %v8827_v0  ;;  %v4138_v56 = vld [vmem:[#allocation2 + $0x50] sm:$0xff] }
 0x2a7   : > { %12331 = vmatprep.mubr.msk.f32.mxu1 %vm171_vm1, %v16651_v7  ;;  %v4528_v0 = vld [vmem:[#allocation2 + $0x51] sm:$0xff] }
 0x2a8   : > { %v9224_v7 = vld [vmem:[#allocation2 + $0x12b] sm:$0xff] }
 0x2a9   : > { %12952 = vmatmul.mubr.msk.f32.gmra.mrb[10].mxu0 %vm171_vm1, %v8828_v44  ;;  %v9223_v44 = vld [vmem:[#allocation2 + $0x123] sm:$0xff] }
 0x2aa   : > { %12332 = vmatmul.mubr.msk.f32.gmra.mrb[30].mxu1 %vm171_vm1, %v15607_v59  ;;  %12954 = vmatprep.mubr.msk.f32.mxu0 %vm171_vm1, %v15618_v42  ;;  %v4139_v59 = vld [vmem:[#allocation2 + $0x60] sm:$0xff]  ;;  %v16002_v42 = vld [vmem:[%s16325_s1 + $0x30] sm:$0xf] }
 0x2ab   : > { %12336 = vmatprep.mubr.msk.f32.mxu1 %vm171_vm1, %v4135_v47  ;;  %v4530_v47 = vld [vmem:[#allocation2 + $0x69] sm:$0xff] }
 0x2ad   : > { %12955 = vmatmul.mubr.msk.f32.gmra.mrb[12].mxu0 %vm171_vm1, %v15626_v31  ;;  %v4140_v31 = vld [vmem:[#allocation2 + $0x68] sm:$0xff] }
 0x2ae   : > { %12337 = vmatmul.mubr.msk.f32.vlgmr.msra.gmra.mrb[0].mxu1 %vm171_vm1, %v4136_v38  ;;  %12957 = vmatprep.mubr.msk.f32.mxu0 %vm171_vm1, %v15628_v16  ;;  %v4141_v16 = vld [vmem:[#allocation2 + $0x78] sm:$0xff] }
 0x2af   : > { %12339 = vmatprep.mubr.msk.f32.mxu1 %vm171_vm1, %v4137_v35  ;;  %12385 = vmatpush3.msk.msra.mxu1 %vm461_vm0, %v15862_v62  ;;  %v4143_v62 = vld [vmem:[#allocation2 + $0x90] sm:$0xff]  ;;  %v9225_v38 = vld [vmem:[#allocation2 + $0x13b] sm:$0xff] }
 0x2b0   : > { %13084 = vmatprep.subr.msk.mxu1 %vm461_vm0, %v16002_v42  ;;  %v4531_v35 = vld [vmem:[#allocation2 + $0x79] sm:$0xff] }
 0x2b1   : > { %12958 = vmatmul.mubr.msk.f32.gmra.mrb[14].mxu0 %vm171_vm1, %v15637_v34  ;;  %v4142_v34 = vld [vmem:[#allocation2 + $0x80] sm:$0xff] }
 0x2b2   : > { %12340 = vmatmul.mubr.msk.f32.gmra.mrb[2].mxu1 %vm171_vm1, %v4138_v56  ;;  %12960 = vmatprep.mubr.msk.f32.mxu0 %vm171_vm1, %v15639_v39  ;;  %v4144_v39 = vld [vmem:[#allocation2 + $0x98] sm:$0xff]  ;;  %v9226_v56 = vld [vmem:[#allocation2 + $0x143] sm:$0xff] }
 0x2b3   : > { %12342 = vmatprep.mubr.msk.f32.mxu1 %vm171_vm1, %v4139_v59  ;;  %v4532_v59 = vld [vmem:[#allocation2 + $0x81] sm:$0xff] }
 0x2b5   : > { %12961 = vmatmul.mubr.msk.f32.gmra.mrb[16].mxu0 %vm171_vm1, %v15656_v25  ;;  %v4145_v25 = vld [vmem:[#allocation2 + $0xa8] sm:$0xff] }
 0x2b6   : > { %12343 = vmatmul.mubr.msk.f32.gmra.mrb[4].mxu1 %vm171_vm1, %v4140_v31  ;;  %12963 = vmatprep.mubr.msk.f32.mxu0 %vm171_vm1, %v15658_v61  ;;  %v4146_v61 = vld [vmem:[#allocation2 + $0xb0] sm:$0xff] }
 0x2b7   : > { %12345 = vmatprep.mubr.msk.f32.mxu1 %vm171_vm1, %v4141_v16  ;;  %v4533_v31 = vld [vmem:[#allocation2 + $0x91] sm:$0xff]  ;;  %v9228_v16 = vld [vmem:[#allocation2 + $0x15b] sm:$0xff] }
 0x2b9   : > { %12964 = vmatmul.mubr.msk.f32.gmra.mrb[18].mxu0 %vm171_vm1, %v15670_v10  ;;  %v16030_v10 = vld [vmem:[#allocation2 + $0x182] sm:$0xff] }
 0x2ba   : > { %12346 = vmatmul.mubr.msk.f32.gmra.mrb[6].mxu1 %vm171_vm1, %v4142_v34  ;;  %12966 = vmatprep.mubr.msk.f32.mxu0 %vm171_vm1, %v15672_v46  ;;  %v16037_v46 = vld [vmem:[#allocation2 + $0x18a] sm:$0xff]  ;;  %v4534_v34 = vld [vmem:[#allocation2 + $0x99] sm:$0xff] }
 0x2bb   : > { %12348 = vmatprep.mubr.msk.f32.mxu1 %vm171_vm1, %v4143_v62  ;;  %v9229_v62 = vld [vmem:[#allocation2 + $0x16b] sm:$0xff] }
 0x2bd   : > { %12967 = vmatmul.mubr.msk.f32.gmra.mrb[20].mxu0 %vm171_vm1, %v15682_v63  ;;  %v4148_v63 = vld [vmem:[#allocation2 + $0xc8] sm:$0xff] }
 0x2be   : > { %12349 = vmatmul.mubr.msk.f32.gmra.mrb[8].mxu1 %vm171_vm1, %v4144_v39  ;;  %12969 = vmatprep.mubr.msk.f32.mxu0 %vm171_vm1, %v15684_v3  ;;  %v16040_v3 = vld [vmem:[#allocation2 + $0x19a] sm:$0xff]  ;;  %v4535_v39 = vld [vmem:[#allocation2 + $0xa9] sm:$0xff] }
 0x2bf   : > { %12351 = vmatprep.mubr.msk.f32.mxu1 %vm171_vm1, %v4145_v25  ;;  %v9230_v25 = vld [vmem:[#allocation2 + $0x173] sm:$0xff] }
 0x2c1   : > { %12970 = vmatmul.mubr.msk.f32.gmra.mrb[22].mxu0 %vm171_vm1, %v15694_v5  ;;  %v16047_v5 = vld [vmem:[#allocation2 + $0x1a2] sm:$0xff] }
 0x2c2   : > { %12352 = vmatmul.mubr.msk.f32.gmra.mrb[10].mxu1 %vm171_vm1, %v4146_v61  ;;  %12972 = vmatprep.mubr.msk.f32.mxu0 %vm171_vm1, %v16030_v10  ;;  %v4536_v61 = vld [vmem:[#allocation2 + $0xb1] sm:$0xff] }
 0x2c3   : > { %12354 = vmatprep.mubr.msk.f32.mxu1 %vm171_vm1, %v4147_v55  ;;  %v9231_v55 = vld [vmem:[#allocation2 + $0x183] sm:$0xff] }
 0x2c5   : > { %12973 = vmatmul.mubr.msk.f32.gmra.mrb[24].mxu0 %vm171_vm1, %v16037_v46 }
 0x2c6   : > { %12355 = vmatmul.mubr.msk.f32.gmra.mrb[12].mxu1 %vm171_vm1, %v4148_v63  ;;  %12975 = vmatprep.mubr.msk.f32.mxu0 %vm171_vm1, %v16040_v3  ;;  %v4537_v63 = vld [vmem:[#allocation2 + $0xc1] sm:$0xff] }
 0x2c7   : > { %12357 = vmatprep.mubr.msk.f32.mxu1 %vm171_vm1, %v4149_v4  ;;  %v9232_v4 = vld [vmem:[#allocation2 + $0x18b] sm:$0xff] }
 0x2c9   : > { %12976 = vmatmul.mubr.msk.f32.gmra.mrb[26].mxu0 %vm171_vm1, %v16047_v5 }
 0x2ca   : > { %12358 = vmatmul.mubr.msk.f32.gmra.mrb[14].mxu1 %vm171_vm1, %v4150_v11  ;;  %12978 = vmatprep.mubr.msk.f32.mxu0 %vm171_vm1, %v8845_v8  ;;  %v4538_v11 = vld [vmem:[#allocation2 + $0xc9] sm:$0xff]  ;;  %v9233_v8 = vld [vmem:[#allocation2 + $0x19b] sm:$0xff] }
 0x2cb   : > { %12360 = vmatprep.mubr.msk.f32.mxu1 %vm171_vm1, %v4151_v2  ;;  %v4539_v2 = vld [vmem:[#allocation2 + $0xd9] sm:$0xff] }
 0x2cd   : > { %12979 = vmatmul.mubr.msk.f32.gmra.mrb[28].mxu0 %vm171_vm1, %v8846_v22  ;;  %v9234_v22 = vld [vmem:[#allocation2 + $0x1a3] sm:$0xff] }
 0x2ce   : > { %12361 = vmatmul.mubr.msk.f32.gmra.mrb[16].mxu1 %vm171_vm1, %v4152_v48  ;;  %12981 = vmatprep.mubr.msk.f32.mxu0 %vm171_vm1, %v8847_v13  ;;  %v4540_v48 = vld [vmem:[#allocation2 + $0xe1] sm:$0xff]  ;;  %v9235_v13 = vld [vmem:[#allocation2 + $0x1b3] sm:$0xff] }
 0x2cf   : > { %12363 = vmatprep.mubr.msk.f32.mxu1 %vm171_vm1, %v4153_v12  ;;  %v4541_v12 = vld [vmem:[#allocation2 + $0xf1] sm:$0xff] }
 0x2d1   : > { %12982 = vmatmul.mubr.msk.f32.gmra.mrb[30].mxu0 %vm171_vm1, %v8848_v37  ;;  %v9236_v37 = vld [vmem:[#allocation2 + $0x1bb] sm:$0xff] }
 0x2d2   : > { %12364 = vmatmul.mubr.msk.f32.gmra.mrb[18].mxu1 %vm171_vm1, %v4154_v19  ;;  %12986 = vmatprep.mubr.msk.f32.mxu0 %vm171_vm1, %v9207_v21  ;;  %v4542_v19 = vld [vmem:[#allocation2 + $0xf9] sm:$0xff]  ;;  %v9237_v21 = vld [vmem:[#allocation2 + $0x1cb] sm:$0xff] }
 0x2d3   : > { %12366 = vmatprep.mubr.msk.f32.mxu1 %vm171_vm1, %v4155_v23  ;;  %v4543_v23 = vld [vmem:[#allocation2 + $0x109] sm:$0xff] }
 0x2d5   : > { %12987 = vmatmul.mubr.msk.f32.vlgmr.msra.gmra.mrb[0].mxu0 %vm171_vm1, %v9208_v43  ;;  %v9238_v43 = vld [vmem:[#allocation2 + $0x1d3] sm:$0xff] }
 0x2d6   : > { %13035 = vmatpush3.msk.msra.mxu0 %vm461_vm0, %v15950_v41  ;;  %12367 = vmatmul.mubr.msk.f32.gmra.mrb[20].mxu1 %vm171_vm1, %v4156_v17  ;;  %v9215_v41 = vld [vmem:[#allocation2 + $0xc3] sm:$0xff]  ;;  %v4544_v17 = vld [vmem:[#allocation2 + $0x111] sm:$0xff] }
 0x2d7   : > { %12989 = vmatprep.mubr.msk.f32.mxu0 %vm171_vm1, %v9209_v30  ;;  %12369 = vmatprep.mubr.msk.f32.mxu1 %vm171_vm1, %v4157_v28  ;;  %v9597_v30 = vld [vmem:[#allocation2 + $0x64] sm:$0xff] }
 0x2d8   : > { %v4545_v28 = vld [vmem:[#allocation2 + $0x121] sm:$0xff] }
 0x2d9   : > { %12990 = vmatmul.mubr.msk.f32.gmra.mrb[2].mxu0 %vm171_vm1, %v9210_v26  ;;  %v9598_v26 = vld [vmem:[#allocation2 + $0x6c] sm:$0xff] }
 0x2da   : > { %12370 = vmatmul.mubr.msk.f32.gmra.mrb[22].mxu1 %vm171_vm1, %v4158_v9  ;;  %12992 = vmatprep.mubr.msk.f32.mxu0 %vm171_vm1, %v9211_v53  ;;  %v4546_v9 = vld [vmem:[#allocation2 + $0x129] sm:$0xff]  ;;  %v9599_v53 = vld [vmem:[#allocation2 + $0x7c] sm:$0xff] }
 0x2db   : > { %12372 = vmatprep.mubr.msk.f32.mxu1 %vm171_vm1, %v4159_v60  ;;  %v4547_v60 = vld [vmem:[#allocation2 + $0x139] sm:$0xff] }
 0x2dd   : > { %12993 = vmatmul.mubr.msk.f32.gmra.mrb[4].mxu0 %vm171_vm1, %v9212_v58  ;;  %v9600_v58 = vld [vmem:[#allocation2 + $0x84] sm:$0xff] }
 0x2de   : > { %12373 = vmatmul.mubr.msk.f32.gmra.mrb[24].mxu1 %vm171_vm1, %v4160_v50  ;;  %12995 = vmatprep.mubr.msk.f32.mxu0 %vm171_vm1, %v9213_v14  ;;  %v4548_v50 = vld [vmem:[#allocation2 + $0x141] sm:$0xff]  ;;  %v9601_v14 = vld [vmem:[#allocation2 + $0x94] sm:$0xff] }
 0x2df   : > { %12375 = vmatprep.mubr.msk.f32.mxu1 %vm171_vm1, %v4161_v57  ;;  %v4549_v57 = vld [vmem:[#allocation2 + $0x151] sm:$0xff] }
 0x2e1   : > { %12996 = vmatmul.mubr.msk.f32.gmra.mrb[6].mxu0 %vm171_vm1, %v9214_v6  ;;  %v9602_v6 = vld [vmem:[#allocation2 + $0x9c] sm:$0xff] }
 0x2e2   : > { %12376 = vmatmul.mubr.msk.f32.gmra.mrb[26].mxu1 %vm171_vm1, %v4162_v45  ;;  %12998 = vmatprep.mubr.msk.f32.mxu0 %vm171_vm1, %v9215_v41  ;;  %v4550_v45 = vld [vmem:[#allocation2 + $0x159] sm:$0xff]  ;;  %v9603_v41 = vld [vmem:[#allocation2 + $0xac] sm:$0xff] }
 0x2e3   : > { %12378 = vmatprep.mubr.msk.f32.mxu1 %vm171_vm1, %v15757_v15  ;;  %v9220_v15 = vld [vmem:[#allocation2 + $0xfb] sm:$0xff] }
 0x2e5   : > { %12999 = vmatmul.mubr.msk.f32.gmra.mrb[8].mxu0 %vm171_vm1, %v9216_v54  ;;  %v4551_v54 = vld [vmem:[#allocation2 + $0x169] sm:$0xff] }
 0x2e6   : > { %12379 = vmatmul.mubr.msk.f32.gmra.mrb[28].mxu1 %vm171_vm1, %v15765_v20  ;;  %13001 = vmatprep.mubr.msk.f32.mxu0 %vm171_vm1, %v9217_v24  ;;  %v9221_v20 = vld [vmem:[#allocation2 + $0x10b] sm:$0xff]  ;;  %v9604_v24 = vld [vmem:[#allocation2 + $0xb4] sm:$0xff] }
 0x2e7   : > { %12381 = vmatprep.mubr.msk.f32.mxu1 %vm171_vm1, %v15769_v33  ;;  %v9222_v33 = vld [vmem:[#allocation2 + $0x113] sm:$0xff] }
 0x2e9   : > { %13002 = vmatmul.mubr.msk.f32.gmra.mrb[10].mxu0 %vm171_vm1, %v9218_v51  ;;  %v4552_v51 = vld [vmem:[#allocation2 + $0x171] sm:$0xff] }
 0x2ea   : > { %12382 = vmatmul.mubr.msk.f32.gmra.mrb[30].mxu1 %vm171_vm1, %v15777_v49  ;;  %13004 = vmatprep.mubr.msk.f32.mxu0 %vm171_vm1, %v9219_v36  ;;  %v4529_v49 = vld [vmem:[#allocation2 + $0x61] sm:$0xff] }
 0x2eb   : > { %12386 = vmatprep.mubr.msk.f32.mxu1 %vm171_vm1, %v4525_v18  ;;  %v9605_v36 = vld [vmem:[#allocation2 + $0xc4] sm:$0xff]  ;;  %v9606_v18 = vld [vmem:[#allocation2 + $0xcc] sm:$0xff] }
 0x2ed   : > { %13005 = vmatmul.mubr.msk.f32.gmra.mrb[12].mxu0 %vm171_vm1, %v9220_v15  ;;  %v9607_v15 = vld [vmem:[#allocation2 + $0xdc] sm:$0xff] }
 0x2ee   : > { %12387 = vmatmul.mubr.msk.f32.vlgmr.msra.gmra.mrb[0].mxu1 %vm171_vm1, %v4526_v1  ;;  %13007 = vmatprep.mubr.msk.f32.mxu0 %vm171_vm1, %v9221_v20  ;;  %v9608_v1 = vld [vmem:[#allocation2 + $0xe4] sm:$0xff]  ;;  %v9609_v20 = vld [vmem:[#allocation2 + $0xf4] sm:$0xff] }
 0x2ef   : > { %12389 = vmatprep.mubr.msk.f32.mxu1 %vm171_vm1, %v4527_v52  ;;  %13085 = vmatpush3.msk.msra.mxu1 %vm461_vm0, %v16002_v42  ;;  %v9227_v42 = vld [vmem:[#allocation2 + $0x153] sm:$0xff] }
 0x2f0   : > { %v4931_v52 = vld [vmem:[#allocation2 + $0xf2] sm:$0xff] }
 0x2f1   : > { %13008 = vmatmul.mubr.msk.f32.gmra.mrb[14].mxu0 %vm171_vm1, %v9222_v33  ;;  %v4932_v33 = vld [vmem:[#allocation2 + $0xfa] sm:$0xff] }
 0x2f2   : > { %12390 = vmatmul.mubr.msk.f32.gmra.mrb[2].mxu1 %vm171_vm1, %v4528_v0  ;;  %13010 = vmatprep.mubr.msk.f32.mxu0 %vm171_vm1, %v9223_v44  ;;  %v4933_v0 = vld [vmem:[#allocation2 + $0x10a] sm:$0xff]  ;;  %v4934_v44 = vld [vmem:[#allocation2 + $0x112] sm:$0xff] }
 0x2f3   : > { %12392 = vmatprep.mubr.msk.f32.mxu1 %vm171_vm1, %v4529_v49  ;;  %v9613_v49 = vld [vmem:[#allocation2 + $0x124] sm:$0xff] }
 0x2f5   : > { %13011 = vmatmul.mubr.msk.f32.gmra.mrb[16].mxu0 %vm171_vm1, %v9224_v7  ;;  %v9614_v7 = vld [vmem:[#allocation2 + $0x12c] sm:$0xff] }
 0x2f6   : > { %12393 = vmatmul.mubr.msk.f32.gmra.mrb[4].mxu1 %vm171_vm1, %v4530_v47  ;;  %13013 = vmatprep.mubr.msk.f32.mxu0 %vm171_vm1, %v9225_v38  ;;  %v4936_v47 = vld [vmem:[#allocation2 + $0x12a] sm:$0xff]  ;;  %v9615_v38 = vld [vmem:[#allocation2 + $0x13c] sm:$0xff] }
 0x2f7   : > { %12395 = vmatprep.mubr.msk.f32.mxu1 %vm171_vm1, %v4531_v35  ;;  %v4937_v35 = vld [vmem:[#allocation2 + $0x13a] sm:$0xff] }
 0x2f9   : > { %13014 = vmatmul.mubr.msk.f32.gmra.mrb[18].mxu0 %vm171_vm1, %v9226_v56  ;;  %v9616_v56 = vld [vmem:[#allocation2 + $0x144] sm:$0xff] }
 0x2fa   : > { %12396 = vmatmul.mubr.msk.f32.gmra.mrb[6].mxu1 %vm171_vm1, %v4532_v59  ;;  %13016 = vmatprep.mubr.msk.f32.mxu0 %vm171_vm1, %v9227_v42  ;;  %v4938_v59 = vld [vmem:[#allocation2 + $0x142] sm:$0xff]  ;;  %v9617_v42 = vld [vmem:[#allocation2 + $0x154] sm:$0xff] }
 0x2fb   : > { %12398 = vmatprep.mubr.msk.f32.mxu1 %vm171_vm1, %v4533_v31  ;;  %v4939_v31 = vld [vmem:[#allocation2 + $0x152] sm:$0xff] }
 0x2fd   : > { %13017 = vmatmul.mubr.msk.f32.gmra.mrb[20].mxu0 %vm171_vm1, %v9228_v16  ;;  %v9618_v16 = vld [vmem:[#allocation2 + $0x15c] sm:$0xff] }
 0x2fe   : > { %12399 = vmatmul.mubr.msk.f32.gmra.mrb[8].mxu1 %vm171_vm1, %v4534_v34  ;;  %13019 = vmatprep.mubr.msk.f32.mxu0 %vm171_vm1, %v9229_v62  ;;  %v4940_v34 = vld [vmem:[#allocation2 + $0x15a] sm:$0xff]  ;;  %v9619_v62 = vld [vmem:[#allocation2 + $0x16c] sm:$0xff] }
 0x2ff   : > { %12401 = vmatprep.mubr.msk.f32.mxu1 %vm171_vm1, %v4535_v39  ;;  %v4941_v39 = vld [vmem:[#allocation2 + $0x16a] sm:$0xff] }
 0x301   : > { %13020 = vmatmul.mubr.msk.f32.gmra.mrb[22].mxu0 %vm171_vm1, %v9230_v25  ;;  %v9620_v25 = vld [vmem:[#allocation2 + $0x174] sm:$0xff] }
 0x302   : > { %12402 = vmatmul.mubr.msk.f32.gmra.mrb[10].mxu1 %vm171_vm1, %v4536_v61  ;;  %13022 = vmatprep.mubr.msk.f32.mxu0 %vm171_vm1, %v9231_v55  ;;  %v4942_v61 = vld [vmem:[#allocation2 + $0x172] sm:$0xff]  ;;  %v9621_v55 = vld [vmem:[#allocation2 + $0x184] sm:$0xff] }
 0x303   : > { %12404 = vmatprep.mubr.msk.f32.mxu1 %vm171_vm1, %v4537_v63  ;;  %v9622_v63 = vld [vmem:[#allocation2 + $0x18c] sm:$0xff] }
 0x305   : > { %13023 = vmatmul.mubr.msk.f32.gmra.mrb[24].mxu0 %vm171_vm1, %v9232_v4  ;;  %v9623_v4 = vld [vmem:[#allocation2 + $0x19c] sm:$0xff] }
 0x306   : > { %12405 = vmatmul.mubr.msk.f32.gmra.mrb[12].mxu1 %vm171_vm1, %v4538_v11  ;;  %13025 = vmatprep.mubr.msk.f32.mxu0 %vm171_vm1, %v9233_v8  ;;  %v9624_v11 = vld [vmem:[#allocation2 + $0x1a4] sm:$0xff]  ;;  %v9625_v8 = vld [vmem:[#allocation2 + $0x1b4] sm:$0xff] }
 0x307   : > { %12407 = vmatprep.mubr.msk.f32.mxu1 %vm171_vm1, %v4539_v2  ;;  %v9627_v2 = vld [vmem:[#allocation2 + $0x1cc] sm:$0xff] }
 0x309   : > { %13026 = vmatmul.mubr.msk.f32.gmra.mrb[26].mxu0 %vm171_vm1, %v9234_v22 }
 0x30a   : > { %12408 = vmatmul.mubr.msk.f32.gmra.mrb[14].mxu1 %vm171_vm1, %v4540_v48  ;;  %13028 = vmatprep.mubr.msk.f32.mxu0 %vm171_vm1, %v9235_v13 }
 0x30b   : > { %12410 = vmatprep.mubr.msk.f32.mxu1 %vm171_vm1, %v4541_v12 }
 0x30d   : > { %13029 = vmatmul.mubr.msk.f32.gmra.mrb[28].mxu0 %vm171_vm1, %v9236_v37 }
 0x30e   : > { %12411 = vmatmul.mubr.msk.f32.gmra.mrb[16].mxu1 %vm171_vm1, %v4542_v19  ;;  %13031 = vmatprep.mubr.msk.f32.mxu0 %vm171_vm1, %v9237_v21 }
 0x30f   : > { %12413 = vmatprep.mubr.msk.f32.mxu1 %vm171_vm1, %v4543_v23 }
 0x311   : > { %13032 = vmatmul.mubr.msk.f32.gmra.mrb[30].mxu0 %vm171_vm1, %v9238_v43 }
 0x312   : > { %12414 = vmatmul.mubr.msk.f32.gmra.mrb[18].mxu1 %vm171_vm1, %v4544_v17  ;;  %13036 = vmatprep.mubr.msk.f32.mxu0 %vm171_vm1, %v9597_v30 }
 0x313   : > { %12416 = vmatprep.mubr.msk.f32.mxu1 %vm171_vm1, %v4545_v28 }
 0x315   : > { %13037 = vmatmul.mubr.msk.f32.vlgmr.msra.gmra.mrb[0].mxu0 %vm171_vm1, %v9598_v26 }
 0x316   : > { %12417 = vmatmul.mubr.msk.f32.gmra.mrb[20].mxu1 %vm171_vm1, %v4546_v9  ;;  %13039 = vmatprep.mubr.msk.f32.mxu0 %vm171_vm1, %v9599_v53 }
 0x317   : > { %12419 = vmatprep.mubr.msk.f32.mxu1 %vm171_vm1, %v4547_v60  ;;  %v16212_v60 = vld [vmem:[%s16326_s2] ss:$0 sm:$0xff] }
 0x319   : > { %13040 = vmatmul.mubr.msk.f32.gmra.mrb[2].mxu0 %vm171_vm1, %v9600_v58 }
 0x31a   : > { %12420 = vmatmul.mubr.msk.f32.gmra.mrb[22].mxu1 %vm171_vm1, %v4548_v50  ;;  %13042 = vmatprep.mubr.msk.f32.mxu0 %vm171_vm1, %v9601_v14 }
 0x31b   : > { %12422 = vmatprep.mubr.msk.f32.mxu1 %vm171_vm1, %v4549_v57 }
 0x31d   : > { %13043 = vmatmul.mubr.msk.f32.gmra.mrb[4].mxu0 %vm171_vm1, %v9602_v6 }
 0x31e   : > { %12423 = vmatmul.mubr.msk.f32.gmra.mrb[24].mxu1 %vm171_vm1, %v4550_v45  ;;  %13045 = vmatprep.mubr.msk.f32.mxu0 %vm171_vm1, %v9603_v41 }
 0x31f   : > { %12425 = vmatprep.mubr.msk.f32.mxu1 %vm171_vm1, %v4551_v54 }
 0x321   : > { %13046 = vmatmul.mubr.msk.f32.gmra.mrb[6].mxu0 %vm171_vm1, %v9604_v24 }
 0x322   : > { %12426 = vmatmul.mubr.msk.f32.gmra.mrb[26].mxu1 %vm171_vm1, %v4552_v51  ;;  %13048 = vmatprep.mubr.msk.f32.mxu0 %vm171_vm1, %v9605_v36 }
 0x323   : > { %12428 = vmatprep.mubr.msk.f32.mxu1 %vm171_vm1, %v15903_v40  ;;  %v9610_v40 = vld [vmem:[#allocation2 + $0xfc] sm:$0xff] }
 0x325   : > { %13049 = vmatmul.mubr.msk.f32.gmra.mrb[8].mxu0 %vm171_vm1, %v9606_v18 }
 0x326   : > { %12429 = vmatmul.mubr.msk.f32.gmra.mrb[28].mxu1 %vm171_vm1, %v15911_v27  ;;  %13051 = vmatprep.mubr.msk.f32.mxu0 %vm171_vm1, %v9607_v15  ;;  %v9611_v27 = vld [vmem:[#allocation2 + $0x10c] sm:$0xff] }
 0x327   : > { %12431 = vmatprep.mubr.msk.f32.mxu1 %vm171_vm1, %v15915_v29  ;;  %v9612_v29 = vld [vmem:[#allocation2 + $0x114] sm:$0xff] }
 0x329   : > { %13052 = vmatmul.mubr.msk.f32.gmra.mrb[10].mxu0 %vm171_vm1, %v9608_v1 }
 0x32a   : > { %12432 = vmatmul.mubr.msk.f32.gmra.mrb[30].mxu1 %vm171_vm1, %v15923_v32  ;;  %13054 = vmatprep.mubr.msk.f32.mxu0 %vm171_vm1, %v9609_v20  ;;  %v4935_v32 = vld [vmem:[#allocation2 + $0x122] sm:$0xff] }
 0x32b   : > { %12460 = vmatprep.mubr.msk.f32.mxu1 %vm171_vm1, %v4931_v52 }
 0x32d   : > { %13055 = vmatmul.mubr.msk.f32.gmra.mrb[12].mxu0 %vm171_vm1, %v9610_v40 }
 0x32e   : > { %12461 = vmatmul.mubr.msk.f32.vlgmr.msra.gmra.mrb[16].mxu1 %vm171_vm1, %v4932_v33  ;;  %13057 = vmatprep.mubr.msk.f32.mxu0 %vm171_vm1, %v9611_v27 }
 0x32f   : > { %12463 = vmatprep.mubr.msk.f32.mxu1 %vm171_vm1, %v4933_v0 }
 0x331   : > { %13058 = vmatmul.mubr.msk.f32.gmra.mrb[14].mxu0 %vm171_vm1, %v9612_v29 }
 0x332   : > { %12464 = vmatmul.mubr.msk.f32.gmra.mrb[18].mxu1 %vm171_vm1, %v4934_v44  ;;  %13060 = vmatprep.mubr.msk.f32.mxu0 %vm171_vm1, %v9613_v49 }
 0x333   : > { %12466 = vmatprep.mubr.msk.f32.mxu1 %vm171_vm1, %v4935_v32 }
 0x335   : > { %13061 = vmatmul.mubr.msk.f32.gmra.mrb[16].mxu0 %vm171_vm1, %v9614_v7 }
 0x336   : > { %12467 = vmatmul.mubr.msk.f32.gmra.mrb[20].mxu1 %vm171_vm1, %v4936_v47  ;;  %13063 = vmatprep.mubr.msk.f32.mxu0 %vm171_vm1, %v9615_v38 }
 0x337   : > { %12469 = vmatprep.mubr.msk.f32.mxu1 %vm171_vm1, %v4937_v35 }
 0x339   : > { %13064 = vmatmul.mubr.msk.f32.gmra.mrb[18].mxu0 %vm171_vm1, %v9616_v56 }
 0x33a   : > { %12470 = vmatmul.mubr.msk.f32.gmra.mrb[22].mxu1 %vm171_vm1, %v4938_v59  ;;  %13066 = vmatprep.mubr.msk.f32.mxu0 %vm171_vm1, %v9617_v42 }
 0x33b   : > { %12472 = vmatprep.mubr.msk.f32.mxu1 %vm171_vm1, %v4939_v31 }
 0x33d   : > { %13067 = vmatmul.mubr.msk.f32.gmra.mrb[20].mxu0 %vm171_vm1, %v9618_v16 }
 0x33e   : > { %12473 = vmatmul.mubr.msk.f32.gmra.mrb[24].mxu1 %vm171_vm1, %v4940_v34  ;;  %13069 = vmatprep.mubr.msk.f32.mxu0 %vm171_vm1, %v9619_v62 }
 0x33f   : > { %12475 = vmatprep.mubr.msk.f32.mxu1 %vm171_vm1, %v4941_v39 }
 0x341   : > { %13070 = vmatmul.mubr.msk.f32.gmra.mrb[22].mxu0 %vm171_vm1, %v9620_v25 }
 0x342   : > { %12476 = vmatmul.mubr.msk.f32.gmra.mrb[26].mxu1 %vm171_vm1, %v4942_v61  ;;  %13072 = vmatprep.mubr.msk.f32.mxu0 %vm171_vm1, %v9621_v55 }
 0x343   : > { %12478 = vmatprep.mubr.msk.f32.mxu1 %vm171_vm1, %v16030_v10  ;;  %v9626_v10 = vld [vmem:[#allocation2 + $0x1bc] sm:$0xff] }
 0x345   : > { %13073 = vmatmul.mubr.msk.f32.gmra.mrb[24].mxu0 %vm171_vm1, %v9622_v63 }
 0x346   : > { %12479 = vmatmul.mubr.msk.f32.gmra.mrb[28].mxu1 %vm171_vm1, %v16037_v46  ;;  %13075 = vmatprep.mubr.msk.f32.mxu0 %vm171_vm1, %v9623_v4  ;;  %v9628_v46 = vld [vmem:[#allocation2 + $0x1d4] sm:$0xff] }
 0x347   : > { %12481 = vmatprep.mubr.msk.f32.mxu1 %vm171_vm1, %v16040_v3 }
 0x349   : > { %13076 = vmatmul.mubr.msk.f32.gmra.mrb[26].mxu0 %vm171_vm1, %v9624_v11 }
 0x34a   : > { %12482 = vmatmul.mubr.msk.f32.gmra.mrb[30].mxu1 %vm171_vm1, %v16047_v5  ;;  %13078 = vmatprep.mubr.msk.f32.mxu0 %vm171_vm1, %v9625_v8 }
 0x34d   : > { %13079 = vmatmul.mubr.msk.f32.gmra.mrb[28].mxu0 %vm171_vm1, %v9626_v10 }
 0x34e   : > { %13081 = vmatprep.mubr.msk.f32.mxu0 %vm171_vm1, %v9627_v2 }
 0x351   : > { %13082 = vmatmul.mubr.msk.f32.gmra.mrb[30].mxu0 %vm171_vm1, %v9628_v46 }
 0x3c1   : > { %v12388_v22 = vpop.f32.mrb[0].mxu1 }
 0x3c2   : > { %v4724_v48 = vpop.f32.mrb[1].mxu1 }
 0x3c5   : > { %v12391_v3 = vpop.f32.mrb[2].mxu1 }
 0x3c6   : > { %v4734_v13 = vpop.f32.mrb[3].mxu1 }
 0x3c9   : > { %v12394_v12 = vpop.f32.mrb[4].mxu1 }
 0x3ca   : > { %v4744_v37 = vpop.f32.mrb[5].mxu1 }
 0x3cd   : > { %v12397_v19 = vpop.f32.mrb[6].mxu1 }
 0x3ce   : > { %v4754_v5 = vpop.f32.mrb[7].mxu1 }
 0x3d1   : > { %v12400_v21 = vpop.f32.mrb[8].mxu1 }
 0x3d2   : > { %v4764_v23 = vpop.f32.mrb[9].mxu1 }
 0x3d5   : > { %v12403_v43 = vpop.f32.mrb[10].mxu1 }
 0x3d6   : > { %v4774_v17 = vpop.f32.mrb[11].mxu1 }
 0x3d9   : > { %v16201_v30 = vpop.f32.mrb[12].mxu1 }
 0x3da   : > { %v16203_v28 = vpop.f32.mrb[13].mxu1 }
 0x3dd   : > { %v16205_v26 = vpop.f32.mrb[14].mxu1 }
 0x3de   : > { %v16207_v9 = vpop.f32.mrb[15].mxu1 }
 0x3e8   : > { %v13038_v53 = vpop.f32.mrb[0].mxu0 }
 0x3e9   : > { %v13086_v58 = vadd.f32 %v13038_v53, %v12388_v22  ;;  %v9796_v50 = vpop.f32.mrb[1].mxu0 }
 0x3ea   : > { %v13087_v14 = vadd.f32 %v9796_v50, %v4724_v48 }
 0x3eb   : > { %v9995_v57 = vadd.f32 %v13086_v58, %v16212_v60 }
 0x3ec   : > { %v9994_v6 = vadd.f32 %v13087_v14, %v16212_v60  ;;  %v13041_v45 = vpop.f32.mrb[2].mxu0 }
 0x3ed   : > { %v10027_v41 = vmax.f32 %v9995_v57, 0.0  ;;  %v13088_v54 = vadd.f32 %v13041_v45, %v12391_v3  ;;  %v9806_v24 = vpop.f32.mrb[3].mxu0 }
 0x3ee   : > { %v10026_v51 = vmax.f32 %v9994_v6, 0.0  ;;  %v13089_v36 = vadd.f32 %v9806_v24, %v4734_v13 }
 0x3ef   : > { %10060 = vst.msk [vmem:[%s16220_s26 + $0x8] sm:$0xff] %vm10058_vm3, %v10027_v41  ;;  %v9997_v18 = vadd.f32 %v13088_v54, %v16212_v60 }
 0x3f0   : > { %10059 = vst.msk [vmem:[%s16220_s26] sm:$0xff] %vm10058_vm3, %v10026_v51  ;;  %v9996_v15 = vadd.f32 %v13089_v36, %v16212_v60  ;;  %v13044_v1 = vpop.f32.mrb[4].mxu0 }
 0x3f1   : > { %v10029_v20 = vmax.f32 %v9997_v18, 0.0  ;;  %v13090_v52 = vadd.f32 %v13044_v1, %v12394_v12  ;;  %v9816_v40 = vpop.f32.mrb[5].mxu0 }
 0x3f2   : > { %v10028_v33 = vmax.f32 %v9996_v15, 0.0  ;;  %v13091_v27 = vadd.f32 %v9816_v40, %v4744_v37 }
 0x3f3   : > { %10062 = vst.msk [vmem:[%s16220_s26 + $0x18] sm:$0xff] %vm10058_vm3, %v10029_v20  ;;  %v9999_v0 = vadd.f32 %v13090_v52, %v16212_v60 }
 0x3f4   : > { %10061 = vst.msk [vmem:[%s16220_s26 + $0x10] sm:$0xff] %vm10058_vm3, %v10028_v33  ;;  %v9998_v29 = vadd.f32 %v13091_v27, %v16212_v60  ;;  %v13047_v44 = vpop.f32.mrb[6].mxu0 }
 0x3f5   : > { %v10031_v49 = vmax.f32 %v9999_v0, 0.0  ;;  %v13092_v32 = vadd.f32 %v13047_v44, %v12397_v19  ;;  %v9826_v7 = vpop.f32.mrb[7].mxu0 }
 0x3f6   : > { %v10030_v47 = vmax.f32 %v9998_v29, 0.0  ;;  %v13093_v38 = vadd.f32 %v9826_v7, %v4754_v5 }
 0x3f7   : > { %10064 = vst.msk [vmem:[%s16220_s26 + $0x28] sm:$0xff] %vm10058_vm3, %v10031_v49  ;;  %v10001_v35 = vadd.f32 %v13092_v32, %v16212_v60 }
 0x3f8   : > { %10063 = vst.msk [vmem:[%s16220_s26 + $0x20] sm:$0xff] %vm10058_vm3, %v10030_v47  ;;  %v10000_v56 = vadd.f32 %v13093_v38, %v16212_v60  ;;  %v13050_v59 = vpop.f32.mrb[8].mxu0 }
 0x3f9   : > { %v10033_v42 = vmax.f32 %v10001_v35, 0.0  ;;  %v13094_v31 = vadd.f32 %v13050_v59, %v12400_v21  ;;  %v9836_v16 = vpop.f32.mrb[9].mxu0 }
 0x3fa   : > { %v10032_v34 = vmax.f32 %v10000_v56, 0.0  ;;  %v13095_v62 = vadd.f32 %v9836_v16, %v4764_v23 }
 0x3fb   : > { %10066 = vst.msk [vmem:[%s16220_s26 + $0x38] sm:$0xff] %vm10058_vm3, %v10033_v42  ;;  %v10003_v39 = vadd.f32 %v13094_v31, %v16212_v60 }
 0x3fc   : > { %10065 = vst.msk [vmem:[%s16220_s26 + $0x30] sm:$0xff] %vm10058_vm3, %v10032_v34  ;;  %v10002_v25 = vadd.f32 %v13095_v62, %v16212_v60  ;;  %v13053_v61 = vpop.f32.mrb[10].mxu0 }
 0x3fd   : > { %v10035_v55 = vmax.f32 %v10003_v39, 0.0  ;;  %v13096_v63 = vadd.f32 %v13053_v61, %v12403_v43  ;;  %v9846_v4 = vpop.f32.mrb[11].mxu0 }
 0x3fe   : > { %v10034_v11 = vmax.f32 %v10002_v25, 0.0  ;;  %v13097_v8 = vadd.f32 %v9846_v4, %v4774_v17 }
 0x3ff   : > { %10068 = vst.msk [vmem:[%s16220_s26 + $0x48] sm:$0xff] %vm10058_vm3, %v10035_v55  ;;  %v10005_v10 = vadd.f32 %v13096_v63, %v16212_v60 }
 0x400   : > { %10067 = vst.msk [vmem:[%s16220_s26 + $0x40] sm:$0xff] %vm10058_vm3, %v10034_v11  ;;  %v10004_v2 = vadd.f32 %v13097_v8, %v16212_v60  ;;  %v13056_v46 = vpop.f32.mrb[12].mxu0 }
 0x401   : > { %v10037_v22 = vmax.f32 %v10005_v10, 0.0  ;;  %v13098_v48 = vadd.f32 %v13056_v46, %v16201_v30  ;;  %v9856_v3 = vpop.f32.mrb[13].mxu0  ;;  %v12462_v13 = vpop.f32.mrb[16].mxu1 }
 0x402   : > { %v10036_v12 = vmax.f32 %v10004_v2, 0.0  ;;  %v13099_v37 = vadd.f32 %v9856_v3, %v16203_v28  ;;  %v5194_v19 = vpop.f32.mrb[17].mxu1 }
 0x403   : > { %10070 = vst.msk [vmem:[%s16220_s26 + $0x58] sm:$0xff] %vm10058_vm3, %v10037_v22  ;;  %v10007_v5 = vadd.f32 %v13098_v48, %v16212_v60 }
 0x404   : > { %10069 = vst.msk [vmem:[%s16220_s26 + $0x50] sm:$0xff] %vm10058_vm3, %v10036_v12  ;;  %v10006_v21 = vadd.f32 %v13099_v37, %v16212_v60  ;;  %v13059_v23 = vpop.f32.mrb[14].mxu0 }
 0x405   : > { %v10039_v43 = vmax.f32 %v10007_v5, 0.0  ;;  %v13100_v17 = vadd.f32 %v13059_v23, %v16205_v26  ;;  %v9866_v30 = vpop.f32.mrb[15].mxu0  ;;  %v12465_v53 = vpop.f32.mrb[18].mxu1 }
 0x406   : > { %v10038_v58 = vmax.f32 %v10006_v21, 0.0  ;;  %v13101_v28 = vadd.f32 %v9866_v30, %v16207_v9  ;;  %v5204_v50 = vpop.f32.mrb[19].mxu1 }
 0x407   : > { %10072 = vst.msk [vmem:[%s16220_s26 + $0x68] sm:$0xff] %vm10058_vm3, %v10039_v43  ;;  %v10009_v14 = vadd.f32 %v13100_v17, %v16212_v60 }
 0x408   : > { %10071 = vst.msk [vmem:[%s16220_s26 + $0x60] sm:$0xff] %vm10058_vm3, %v10038_v58  ;;  %v10008_v57 = vadd.f32 %v13101_v28, %v16212_v60  ;;  %v13062_v6 = vpop.f32.mrb[16].mxu0 }
 0x409   : > { %v10041_v45 = vmax.f32 %v10009_v14, 0.0  ;;  %v13102_v41 = vadd.f32 %v13062_v6, %v12462_v13  ;;  %v9876_v26 = vpop.f32.mrb[17].mxu0  ;;  %v12468_v54 = vpop.f32.mrb[20].mxu1 }
 0x40a   : > { %v10040_v24 = vmax.f32 %v10008_v57, 0.0  ;;  %v13103_v51 = vadd.f32 %v9876_v26, %v5194_v19  ;;  %v5214_v9 = vpop.f32.mrb[21].mxu1 }
 0x40b   : > { %10074 = vst.msk [vmem:[%s16220_s26 + $0x78] sm:$0xff] %vm10058_vm3, %v10041_v45  ;;  %v10011_v36 = vadd.f32 %v13102_v41, %v16212_v60 }
 0x40c   : > { %10073 = vst.msk [vmem:[%s16220_s26 + $0x70] sm:$0xff] %vm10058_vm3, %v10040_v24  ;;  %v10010_v18 = vadd.f32 %v13103_v51, %v16212_v60  ;;  %v13065_v15 = vpop.f32.mrb[18].mxu0 }
 0x40d   : > { %v10043_v1 = vmax.f32 %v10011_v36, 0.0  ;;  %v13104_v20 = vadd.f32 %v13065_v15, %v12465_v53  ;;  %v9886_v52 = vpop.f32.mrb[19].mxu0  ;;  %v12471_v40 = vpop.f32.mrb[22].mxu1 }
 0x40e   : > { %v10042_v33 = vmax.f32 %v10010_v18, 0.0  ;;  %v13105_v27 = vadd.f32 %v9886_v52, %v5204_v50  ;;  %v5224_v0 = vpop.f32.mrb[23].mxu1 }
 0x40f   : > { %10076 = vst.msk [vmem:[%s16220_s26 + $0x88] sm:$0xff] %vm10058_vm3, %v10043_v1  ;;  %v10013_v29 = vadd.f32 %v13104_v20, %v16212_v60 }
 0x410   : > { %10075 = vst.msk [vmem:[%s16220_s26 + $0x80] sm:$0xff] %vm10058_vm3, %v10042_v33  ;;  %v10012_v44 = vadd.f32 %v13105_v27, %v16212_v60  ;;  %v13068_v49 = vpop.f32.mrb[20].mxu0 }
 0x411   : > { %v10045_v32 = vmax.f32 %v10013_v29, 0.0  ;;  %v13106_v7 = vadd.f32 %v13068_v49, %v12468_v54  ;;  %v9896_v47 = vpop.f32.mrb[21].mxu0  ;;  %v12474_v38 = vpop.f32.mrb[24].mxu1 }
 0x412   : > { %v10044_v35 = vmax.f32 %v10012_v44, 0.0  ;;  %v13107_v56 = vadd.f32 %v9896_v47, %v5214_v9  ;;  %v5234_v59 = vpop.f32.mrb[25].mxu1 }
 0x413   : > { %10078 = vst.msk [vmem:[%s16220_s26 + $0x98] sm:$0xff] %vm10058_vm3, %v10045_v32  ;;  %v10015_v42 = vadd.f32 %v13106_v7, %v16212_v60 }
 0x414   : > { %10077 = vst.msk [vmem:[%s16220_s26 + $0x90] sm:$0xff] %vm10058_vm3, %v10044_v35  ;;  %v10014_v31 = vadd.f32 %v13107_v56, %v16212_v60  ;;  %v13071_v16 = vpop.f32.mrb[22].mxu0 }
 0x415   : > { %v10047_v34 = vmax.f32 %v10015_v42, 0.0  ;;  %v13108_v62 = vadd.f32 %v13071_v16, %v12471_v40  ;;  %v9906_v39 = vpop.f32.mrb[23].mxu0  ;;  %v12477_v25 = vpop.f32.mrb[26].mxu1 }
 0x416   : > { %v10046_v61 = vmax.f32 %v10014_v31, 0.0  ;;  %v13109_v55 = vadd.f32 %v9906_v39, %v5224_v0  ;;  %v5244_v63 = vpop.f32.mrb[27].mxu1 }
 0x417   : > { %10080 = vst.msk [vmem:[%s16220_s26 + $0xa8] sm:$0xff] %vm10058_vm3, %v10047_v34  ;;  %v10017_v4 = vadd.f32 %v13108_v62, %v16212_v60 }
 0x418   : > { %10079 = vst.msk [vmem:[%s16220_s26 + $0xa0] sm:$0xff] %vm10058_vm3, %v10046_v61  ;;  %v10016_v11 = vadd.f32 %v13109_v55, %v16212_v60  ;;  %v13074_v8 = vpop.f32.mrb[24].mxu0 }
 0x419   : > { %v10049_v10 = vmax.f32 %v10017_v4, 0.0  ;;  %v13110_v2 = vadd.f32 %v13074_v8, %v12474_v38  ;;  %v9916_v46 = vpop.f32.mrb[25].mxu0  ;;  %v12480_v22 = vpop.f32.mrb[28].mxu1 }
 0x41a   : > { %v10048_v48 = vmax.f32 %v10016_v11, 0.0  ;;  %v13111_v3 = vadd.f32 %v9916_v46, %v5234_v59  ;;  %v5254_v13 = vpop.f32.mrb[29].mxu1 }
 0x41b   : > { %10082 = vst.msk [vmem:[%s16220_s26 + $0xb8] sm:$0xff] %vm10058_vm3, %v10049_v10  ;;  %v10019_v12 = vadd.f32 %v13110_v2, %v16212_v60 }
 0x41c   : > { %10081 = vst.msk [vmem:[%s16220_s26 + $0xb0] sm:$0xff] %vm10058_vm3, %v10048_v48  ;;  %v10018_v37 = vadd.f32 %v13111_v3, %v16212_v60  ;;  %v13077_v19 = vpop.f32.mrb[26].mxu0 }
 0x41d   : > { %v10051_v5 = vmax.f32 %v10019_v12, 0.0  ;;  %v13112_v21 = vadd.f32 %v13077_v19, %v12477_v25  ;;  %v9926_v23 = vpop.f32.mrb[27].mxu0  ;;  %v12483_v43 = vpop.f32.mrb[30].mxu1 }
 0x41e   : > { %v10050_v17 = vmax.f32 %v10018_v37, 0.0  ;;  %v13113_v30 = vadd.f32 %v9926_v23, %v5244_v63  ;;  %v5264_v53 = vpop.f32.mrb[31].mxu1 }
 0x41f   : > { %10084 = vst.msk [vmem:[%s16220_s26 + $0xc8] sm:$0xff] %vm10058_vm3, %v10051_v5  ;;  %v10021_v58 = vadd.f32 %v13112_v21, %v16212_v60 }
 0x420   : > { %10083 = vst.msk [vmem:[%s16220_s26 + $0xc0] sm:$0xff] %vm10058_vm3, %v10050_v17  ;;  %v10020_v28 = vadd.f32 %v13113_v30, %v16212_v60  ;;  %v13080_v50 = vpop.f32.mrb[28].mxu0 }
 0x421   : > { %v10053_v14 = vmax.f32 %v10021_v58, 0.0  ;;  %v13114_v57 = vadd.f32 %v13080_v50, %v12480_v22  ;;  %v9936_v6 = vpop.f32.mrb[29].mxu0 }
 0x422   : > { %v10052_v45 = vmax.f32 %v10020_v28, 0.0  ;;  %v13115_v41 = vadd.f32 %v9936_v6, %v5254_v13 }
 0x423   : > { %10086 = vst.msk [vmem:[%s16220_s26 + $0xd8] sm:$0xff] %vm10058_vm3, %v10053_v14  ;;  %v10023_v26 = vadd.f32 %v13114_v57, %v16212_v60 }
 0x424   : > { %10085 = vst.msk [vmem:[%s16220_s26 + $0xd0] sm:$0xff] %vm10058_vm3, %v10052_v45  ;;  %v10022_v54 = vadd.f32 %v13115_v41, %v16212_v60  ;;  %v13083_v24 = vpop.f32.mrb[30].mxu0 }
 0x425   : > { %v10055_v51 = vmax.f32 %v10023_v26, 0.0  ;;  %v13116_v9 = vadd.f32 %v13083_v24, %v12483_v43  ;;  %v9946_v36 = vpop.f32.mrb[31].mxu0 }
 0x426   : > { %v10054_v18 = vmax.f32 %v10022_v54, 0.0  ;;  %v13117_v15 = vadd.f32 %v9946_v36, %v5264_v53 }
 0x427   : > { %10088 = vst.msk [vmem:[%s16220_s26 + $0xe8] sm:$0xff] %vm10058_vm3, %v10055_v51  ;;  %v10025_v1 = vadd.f32 %v13116_v9, %v16212_v60 }
 0x428   : > { %10087 = vst.msk [vmem:[%s16220_s26 + $0xe0] sm:$0xff] %vm10058_vm3, %v10054_v18  ;;  %v10024_v20 = vadd.f32 %v13117_v15, %v16212_v60 }
 0x429   : > { %v10057_v52 = vmax.f32 %v10025_v1, 0.0 }
 0x42a   : > { %v10056_v40 = vmax.f32 %v10024_v20, 0.0 }
 0x42b   : > { %10090 = vst.msk [vmem:[%s16220_s26 + $0xf8] sm:$0xff] %vm10058_vm3, %v10057_v52 }
 0x42c   : > { %10089 = vst.msk [vmem:[%s16220_s26 + $0xf0] sm:$0xff] %vm10058_vm3, %v10056_v40 }
 0x42d PF: > { %s13_s12 = sadd.s32 1, %s13870_s12  }
 0x42e   : > { %p10_p4 = scmp.ge.s32.totalorder %s13_s12, 4  }
 0x430   :  { %12 = sbr.rel (!%p10_p4) target bundleno = 1 (0x1), region = 90 }

// kernel: inception_forward.7
= control target key start
LH: loop header
LB: loop body
LE: loop exit
PB: predicated region body
PF: predicated region fallthrough
CT: control target
= control target key end

     0   :  { %s13791_s12 = smov 0   ;;  %s16178_s0 = inlined_call_operand.vmem [shape: f32[2,16,16,8], index: 0, kind: input, shape index: {}]   ;;  %s16179_s1 = inlined_call_operand.vmem [shape: f32[25,8,8], index: 1, kind: input, shape index: {}]   ;;  %s16180_s2 = inlined_call_operand.vmem [shape: f32[1,8], index: 2, kind: input, shape index: {}]   ;;  %s16181_s3 = inlined_call_operand.vmem [shape: f32[2,16,16,8], index: 3, kind: output, shape index: {}]  }
   0x1 LB: > { %s10069_s13 = sadd.s32 4294967295, %s13768_s12   ;;  %p10073_p0 = scmp.ge.s32.totalorder %s13768_s12, 1  ;;  %s13768_s12 = sphi %s13791_s12, %s13_s12  }
   0x2   : > { %p137_p1 = scmp.lt.s32.totalorder %s13768_s12, 3 }
   0x4   : > { %p138_p2 = pnand %p10073_p0, %p137_p1 }
   0x6   : > { %141 = sbr.rel (%p138_p2) target bundleno = 1069 (0x42d), region = 32 }
   0xd   : > { %v13802_v0 = vld [vmem:[%s16179_s1 + $0x8] sm:$0xff]  ;;  %vm171_vm0 = vcmask 64512   ;;  %vm174_vm1 = vcmask 60416   ;;  %v13807_v1 = vld [vmem:[%s16179_s1 + $0x60] sm:$0xff]  ;;  %v13770_v3 = vmov 0.0   ;;  %p161_p3 = scmp.lt.s32.totalorder %s10069_s13, 1 }
   0xe   : > { %v13812_v2 = vld [vmem:[%s16179_s1] sm:$0xff]  ;;  %11732 = vmatprep.subr.mxu1 %v13802_v0  ;;  %172 = vst.msk [vmem:[#allocation2] sm:$0xff] %vm171_vm0, %v13770_v3  ;;  %173 = vst.msk [vmem:[#allocation2 + $0x8] sm:$0xff] %vm171_vm0, %v13770_v3  ;;  %12332 = vmatprep.subr.mxu0 %v13807_v1  ;;  %v13881_v4 = vld [vmem:[%s16179_s1 + $0x68] sm:$0xff] }
   0xf   : > { %176 = vst.msk [vmem:[#allocation2 + $0x18] sm:$0xff] %vm171_vm0, %v13770_v3  ;;  %177 = vst.msk [vmem:[#allocation2 + $0x20] sm:$0xff] %vm171_vm0, %v13770_v3  ;;  %11733 = vmatpush3.msra.mxu1 %v13802_v0  ;;  %12333 = vmatpush3.msra.mxu0 %v13807_v1  ;;  %s16507_s13 = smov (!%p161_p3, %s10069_s13), 1  ;;  %v13905_v8 = vld [vmem:[%s16179_s1 + $0x10] sm:$0xff] }
  0x10   : > { %179 = vst.msk [vmem:[#allocation2 + $0x30] sm:$0xff] %vm171_vm0, %v13770_v3  ;;  %180 = vst.msk [vmem:[#allocation2 + $0x38] sm:$0xff] %vm171_vm0, %v13770_v3  ;;  %11782 = vmatprep.subr.mxu1 %v13812_v2  ;;  %12382 = vmatprep.subr.mxu0 %v13881_v4  ;;  %s10905_s22 = sshll.u32 %s16507_s13, 8  ;;  %v13966_v36 = vld [vmem:[%s16179_s1 + $0x70] sm:$0xff] }
  0x11   : > { %182 = vst.msk [vmem:[#allocation2 + $0x48] sm:$0xff] %vm171_vm0, %v13770_v3  ;;  %183 = vst.msk [vmem:[#allocation2 + $0x50] sm:$0xff] %vm171_vm0, %v13770_v3  ;;  %s13897_s25 = scalar_lea.vmem %s16178_s0, %s10905_s22  ;;  %s16074_s26 = scalar_lea.vmem %s16181_s3, %s10905_s22 }
  0x12   : > { %185 = vst.msk [vmem:[#allocation2 + $0x60] sm:$0xff] %vm171_vm0, %v13770_v3  ;;  %186 = vst.msk [vmem:[#allocation2 + $0x68] sm:$0xff] %vm171_vm0, %v13770_v3  ;;  %v233_v5 = vld [vmem:[%s13897_s25] sm:$0xff]  ;;  %v234_v6 = vld [vmem:[%s13897_s25 + $0x8] sm:$0xff] }
  0x13   : > { %188 = vst.msk [vmem:[#allocation2 + $0x78] sm:$0xff] %vm171_vm0, %v13770_v3  ;;  %189 = vst.msk [vmem:[#allocation2 + $0x80] sm:$0xff] %vm171_vm0, %v13770_v3  ;;  %v235_v7 = vld [vmem:[%s13897_s25 + $0x10] sm:$0xff]  ;;  %v236_v13 = vld [vmem:[%s13897_s25 + $0x18] sm:$0xff] }
  0x14   : > { %191 = vst.msk [vmem:[#allocation2 + $0x90] sm:$0xff] %vm171_vm0, %v13770_v3  ;;  %192 = vst.msk [vmem:[#allocation2 + $0x98] sm:$0xff] %vm171_vm0, %v13770_v3  ;;  %v237_v14 = vld [vmem:[%s13897_s25 + $0x20] sm:$0xff]  ;;  %v238_v15 = vld [vmem:[%s13897_s25 + $0x28] sm:$0xff] }
  0x15   : > { %194 = vst.msk [vmem:[#allocation2 + $0xa8] sm:$0xff] %vm171_vm0, %v13770_v3  ;;  %195 = vst.msk [vmem:[#allocation2 + $0xb0] sm:$0xff] %vm171_vm0, %v13770_v3  ;;  %v331_v9 = vld [vmem:[#allocation2 + $0x1] sm:$0xff]  ;;  %v239_v16 = vld [vmem:[%s13897_s25 + $0x30] sm:$0xff] }
  0x16   : > { %197 = vst.msk [vmem:[#allocation2 + $0xc0] sm:$0xff] %vm171_vm0, %v13770_v3  ;;  %198 = vst.msk [vmem:[#allocation2 + $0xc8] sm:$0xff] %vm171_vm0, %v13770_v3  ;;  %v333_v11 = vld [vmem:[#allocation2 + $0x19] sm:$0xff]  ;;  %11734 = vmatprep.mubr.msk.f32.mxu1 %vm171_vm0, %v331_v9  ;;  %v242_v19 = vld [vmem:[%s13897_s25 + $0x48] sm:$0xff] }
  0x17   : > { %200 = vst.msk [vmem:[#allocation2 + $0xd8] sm:$0xff] %vm171_vm0, %v13770_v3  ;;  %201 = vst.msk [vmem:[#allocation2 + $0xe0] sm:$0xff] %vm171_vm0, %v13770_v3  ;;  %v240_v17 = vld [vmem:[%s13897_s25 + $0x38] sm:$0xff]  ;;  %v241_v18 = vld [vmem:[%s13897_s25 + $0x40] sm:$0xff] }
  0x18   : > { %203 = vst.msk [vmem:[#allocation2 + $0xf0] sm:$0xff] %vm171_vm0, %v13770_v3  ;;  %204 = vst.msk [vmem:[#allocation2 + $0xf8] sm:$0xff] %vm171_vm0, %v13770_v3  ;;  %v243_v20 = vld [vmem:[%s13897_s25 + $0x50] sm:$0xff]  ;;  %v244_v21 = vld [vmem:[%s13897_s25 + $0x58] sm:$0xff] }
  0x19   : > { %206 = vst.msk [vmem:[#allocation2 + $0x108] sm:$0xff] %vm171_vm0, %v13770_v3  ;;  %207 = vst.msk [vmem:[#allocation2 + $0x110] sm:$0xff] %vm171_vm0, %v13770_v3  ;;  %v245_v22 = vld [vmem:[%s13897_s25 + $0x60] sm:$0xff]  ;;  %v246_v23 = vld [vmem:[%s13897_s25 + $0x68] sm:$0xff] }
  0x1a   : > { %209 = vst.msk [vmem:[#allocation2 + $0x120] sm:$0xff] %vm171_vm0, %v13770_v3  ;;  %210 = vst.msk [vmem:[#allocation2 + $0x128] sm:$0xff] %vm171_vm0, %v13770_v3  ;;  %v247_v24 = vld [vmem:[%s13897_s25 + $0x70] sm:$0xff]  ;;  %v248_v25 = vld [vmem:[%s13897_s25 + $0x78] sm:$0xff] }
  0x1b   : > { %212 = vst.msk [vmem:[#allocation2 + $0x138] sm:$0xff] %vm171_vm0, %v13770_v3  ;;  %213 = vst.msk [vmem:[#allocation2 + $0x140] sm:$0xff] %vm171_vm0, %v13770_v3  ;;  %v249_v26 = vld [vmem:[%s13897_s25 + $0x80] sm:$0xff]  ;;  %v250_v27 = vld [vmem:[%s13897_s25 + $0x88] sm:$0xff] }
  0x1c   : > { %215 = vst.msk [vmem:[#allocation2 + $0x150] sm:$0xff] %vm171_vm0, %v13770_v3  ;;  %216 = vst.msk [vmem:[#allocation2 + $0x158] sm:$0xff] %vm171_vm0, %v13770_v3  ;;  %v251_v28 = vld [vmem:[%s13897_s25 + $0x90] sm:$0xff]  ;;  %v252_v29 = vld [vmem:[%s13897_s25 + $0x98] sm:$0xff] }
  0x1d   : > { %218 = vst.msk [vmem:[#allocation2 + $0x168] sm:$0xff] %vm171_vm0, %v13770_v3  ;;  %219 = vst.msk [vmem:[#allocation2 + $0x170] sm:$0xff] %vm171_vm0, %v13770_v3  ;;  %v253_v49 = vld [vmem:[%s13897_s25 + $0xa0] sm:$0xff]  ;;  %v254_v50 = vld [vmem:[%s13897_s25 + $0xa8] sm:$0xff] }
  0x1e   : > { %221 = vst.msk [vmem:[#allocation2 + $0x180] sm:$0xff] %vm171_vm0, %v13770_v3  ;;  %222 = vst.msk [vmem:[#allocation2 + $0x188] sm:$0xff] %vm171_vm0, %v13770_v3  ;;  %v255_v52 = vld [vmem:[%s13897_s25 + $0xb0] sm:$0xff]  ;;  %v256_v53 = vld [vmem:[%s13897_s25 + $0xb8] sm:$0xff] }
  0x1f   : > { %224 = vst.msk [vmem:[#allocation2 + $0x198] sm:$0xff] %vm171_vm0, %v13770_v3  ;;  %225 = vst.msk [vmem:[#allocation2 + $0x1a0] sm:$0xff] %vm171_vm0, %v13770_v3  ;;  %v257_v56 = vld [vmem:[%s13897_s25 + $0xc0] sm:$0xff]  ;;  %v258_v58 = vld [vmem:[%s13897_s25 + $0xc8] sm:$0xff] }
  0x20   : > { %227 = vst.msk [vmem:[#allocation2 + $0x1b0] sm:$0xff] %vm171_vm0, %v13770_v3  ;;  %228 = vst.msk [vmem:[#allocation2 + $0x1b8] sm:$0xff] %vm171_vm0, %v13770_v3  ;;  %v259_v59 = vld [vmem:[%s13897_s25 + $0xd0] sm:$0xff]  ;;  %v260_v60 = vld [vmem:[%s13897_s25 + $0xd8] sm:$0xff] }
  0x21   : > { %230 = vst.msk [vmem:[#allocation2 + $0x1c8] sm:$0xff] %vm171_vm0, %v13770_v3  ;;  %231 = vst.msk [vmem:[#allocation2 + $0x1d0] sm:$0xff] %vm171_vm0, %v13770_v3 }
  0x22   : > { %175 = vst.msk [vmem:[#allocation2 + $0x10] sm:$0xf] %vm174_vm1, %v13770_v3  ;;  %178 = vst.msk [vmem:[#allocation2 + $0x28] sm:$0xf] %vm174_vm1, %v13770_v3 }
  0x23   : > { %181 = vst.msk [vmem:[#allocation2 + $0x40] sm:$0xf] %vm174_vm1, %v13770_v3  ;;  %184 = vst.msk [vmem:[#allocation2 + $0x58] sm:$0xf] %vm174_vm1, %v13770_v3 }
  0x24   : > { %187 = vst.msk [vmem:[#allocation2 + $0x70] sm:$0xf] %vm174_vm1, %v13770_v3  ;;  %190 = vst.msk [vmem:[#allocation2 + $0x88] sm:$0xf] %vm174_vm1, %v13770_v3 }
  0x25   : > { %193 = vst.msk [vmem:[#allocation2 + $0xa0] sm:$0xf] %vm174_vm1, %v13770_v3  ;;  %196 = vst.msk [vmem:[#allocation2 + $0xb8] sm:$0xf] %vm174_vm1, %v13770_v3 }
  0x26   : > { %199 = vst.msk [vmem:[#allocation2 + $0xd0] sm:$0xf] %vm174_vm1, %v13770_v3  ;;  %202 = vst.msk [vmem:[#allocation2 + $0xe8] sm:$0xf] %vm174_vm1, %v13770_v3 }
  0x27   : > { %205 = vst.msk [vmem:[#allocation2 + $0x100] sm:$0xf] %vm174_vm1, %v13770_v3  ;;  %208 = vst.msk [vmem:[#allocation2 + $0x118] sm:$0xf] %vm174_vm1, %v13770_v3 }
  0x28   : > { %211 = vst.msk [vmem:[#allocation2 + $0x130] sm:$0xf] %vm174_vm1, %v13770_v3  ;;  %214 = vst.msk [vmem:[#allocation2 + $0x148] sm:$0xf] %vm174_vm1, %v13770_v3 }
  0x29   : > { %217 = vst.msk [vmem:[#allocation2 + $0x160] sm:$0xf] %vm174_vm1, %v13770_v3  ;;  %220 = vst.msk [vmem:[#allocation2 + $0x178] sm:$0xf] %vm174_vm1, %v13770_v3  ;;  %v332_v10 = vld [vmem:[#allocation2 + $0x9] sm:$0xff]  ;;  %v334_v12 = vld [vmem:[#allocation2 + $0x21] sm:$0xff] }
  0x2a   : > { %223 = vst.msk [vmem:[#allocation2 + $0x190] sm:$0xf] %vm174_vm1, %v13770_v3  ;;  %226 = vst.msk [vmem:[#allocation2 + $0x1a8] sm:$0xf] %vm174_vm1, %v13770_v3  ;;  %11735 = vmatmul.mubr.msk.f32.vlgmr.msra.gmra.mrb[0].mxu1 %vm171_vm0, %v332_v10 }
  0x2b   : > { %229 = vst.msk [vmem:[#allocation2 + $0x1c0] sm:$0xf] %vm174_vm1, %v13770_v3  ;;  %232 = vst.msk [vmem:[#allocation2 + $0x1d8] sm:$0xf] %vm174_vm1, %v13770_v3  ;;  %11737 = vmatprep.mubr.msk.f32.mxu1 %vm171_vm0, %v333_v11  ;;  %11783 = vmatpush3.msra.mxu1 %v13812_v2 }
  0x2c   : > { %266 = vst.msk [vmem:[#allocation2 + $0x32] sm:$0xff] %vm171_vm0, %v233_v5  ;;  %267 = vst.msk [vmem:[#allocation2 + $0x3a] sm:$0xff] %vm171_vm0, %v234_v6  ;;  %11832 = vmatprep.subr.mxu1 %v13905_v8 }
  0x2d   : > { %268 = vst.msk [vmem:[#allocation2 + $0x4a] sm:$0xff] %vm171_vm0, %v235_v7  ;;  %269 = vst.msk [vmem:[#allocation2 + $0x52] sm:$0xff] %vm171_vm0, %v236_v13  ;;  %v261_v13 = vld [vmem:[%s13897_s25 + $0xe0] sm:$0xff] }
  0x2e   : > { %270 = vst.msk [vmem:[#allocation2 + $0x62] sm:$0xff] %vm171_vm0, %v237_v14  ;;  %271 = vst.msk [vmem:[#allocation2 + $0x6a] sm:$0xff] %vm171_vm0, %v238_v15  ;;  %11738 = vmatmul.mubr.msk.f32.gmra.mrb[2].mxu1 %vm171_vm0, %v334_v12  ;;  %v262_v14 = vld [vmem:[%s13897_s25 + $0xe8] sm:$0xff] }
  0x2f   : > { %272 = vst.msk [vmem:[#allocation2 + $0x7a] sm:$0xff] %vm171_vm0, %v239_v16  ;;  %273 = vst.msk [vmem:[#allocation2 + $0x82] sm:$0xff] %vm171_vm0, %v240_v17  ;;  %v263_v16 = vld [vmem:[%s13897_s25 + $0xf0] sm:$0xff]  ;;  %v264_v17 = vld [vmem:[%s13897_s25 + $0xf8] sm:$0xff] }
  0x30   : > { %274 = vst.msk [vmem:[#allocation2 + $0x92] sm:$0xff] %vm171_vm0, %v241_v18  ;;  %275 = vst.msk [vmem:[#allocation2 + $0x9a] sm:$0xff] %vm171_vm0, %v242_v19  ;;  %v14124_v18 = vld [vmem:[%s16179_s1 + $0x78] sm:$0xff] }
  0x31   : > { %276 = vst.msk [vmem:[#allocation2 + $0xaa] sm:$0xff] %vm171_vm0, %v243_v20  ;;  %277 = vst.msk [vmem:[#allocation2 + $0xb2] sm:$0xff] %vm171_vm0, %v244_v21 }
  0x32   : > { %278 = vst.msk [vmem:[#allocation2 + $0xc2] sm:$0xff] %vm171_vm0, %v245_v22  ;;  %279 = vst.msk [vmem:[#allocation2 + $0xca] sm:$0xff] %vm171_vm0, %v246_v23 }
  0x33   : > { %280 = vst.msk [vmem:[#allocation2 + $0xda] sm:$0xff] %vm171_vm0, %v247_v24  ;;  %281 = vst.msk [vmem:[#allocation2 + $0xe2] sm:$0xff] %vm171_vm0, %v248_v25  ;;  %v13947_v30 = vld [vmem:[#allocation2 + $0x32] sm:$0xff]  ;;  %v13949_v31 = vld [vmem:[#allocation2 + $0x3a] sm:$0xff] }
  0x34   : > { %282 = vst.msk [vmem:[#allocation2 + $0xf2] sm:$0xff] %vm171_vm0, %v249_v26  ;;  %v335_v32 = vld [vmem:[#allocation2 + $0x31] sm:$0xff]  ;;  %283 = vst.msk [vmem:[#allocation2 + $0xfa] sm:$0xff] %vm171_vm0, %v250_v27  ;;  %12334 = vmatprep.mubr.msk.f32.mxu0 %vm171_vm0, %v13947_v30  ;;  %v336_v33 = vld [vmem:[#allocation2 + $0x39] sm:$0xff] }
  0x35   : > { %284 = vst.msk [vmem:[#allocation2 + $0x10a] sm:$0xff] %vm171_vm0, %v251_v28  ;;  %285 = vst.msk [vmem:[#allocation2 + $0x112] sm:$0xff] %vm171_vm0, %v252_v29  ;;  %11740 = vmatprep.mubr.msk.f32.mxu1 %vm171_vm0, %v335_v32  ;;  %v13957_v34 = vld [vmem:[#allocation2 + $0x4a] sm:$0xff]  ;;  %12335 = vmatmul.mubr.msk.f32.vlgmr.msra.gmra.mrb[0].mxu0 %vm171_vm0, %v13949_v31  ;;  %v13970_v37 = vld [vmem:[#allocation2 + $0x52] sm:$0xff] }
  0x36   : > { %v13959_v35 = vld [vmem:[#allocation2 + $0x49] sm:$0xff]  ;;  %12383 = vmatpush3.msra.mxu0 %v13881_v4  ;;  %11741 = vmatmul.mubr.msk.f32.gmra.mrb[4].mxu1 %vm171_vm0, %v336_v33  ;;  %v13976_v38 = vld [vmem:[#allocation2 + $0x51] sm:$0xff]  ;;  %v13980_v40 = vld [vmem:[#allocation2 + $0x61] sm:$0xff]  ;;  %286 = vst.msk [vmem:[#allocation2 + $0x122] sm:$0xff] %vm171_vm0, %v253_v49 }
  0x37   : > { %16290 = vst [vmem:[#allocation3_spill] sm:$0xff] %v13959_v35  ;;  %12337 = vmatprep.mubr.msk.f32.mxu0 %vm171_vm0, %v13957_v34  ;;  %11743 = vmatprep.mubr.msk.f32.mxu1 %vm171_vm0, %v13959_v35  ;;  %16291 = vst [vmem:[#allocation4_spill] sm:$0xff] %v13976_v38  ;;  %v13978_v39 = vld [vmem:[#allocation2 + $0x62] sm:$0xff]  ;;  %v13989_v41 = vld [vmem:[#allocation2 + $0x6a] sm:$0xff] }
  0x38   : > { %16292 = vst [vmem:[#allocation5_spill] sm:$0xff] %v13980_v40  ;;  %12432 = vmatprep.subr.mxu0 %v13966_v36  ;;  %v13993_v42 = vld [vmem:[#allocation2 + $0x69] sm:$0xff]  ;;  %v13995_v43 = vld [vmem:[#allocation2 + $0x7a] sm:$0xff]  ;;  %v14011_v47 = vld [vmem:[#allocation2 + $0x92] sm:$0xff] }
  0x39   : > { %12338 = vmatmul.mubr.msk.f32.gmra.mrb[2].mxu0 %vm171_vm0, %v13970_v37  ;;  %16293 = vst [vmem:[#allocation6_spill] sm:$0xff] %v13993_v42  ;;  %v13997_v44 = vld [vmem:[#allocation2 + $0x79] sm:$0xff]  ;;  %v14005_v45 = vld [vmem:[#allocation2 + $0x82] sm:$0xff]  ;;  %v14013_v48 = vld [vmem:[#allocation2 + $0x91] sm:$0xff] }
  0x3a   : > { %11744 = vmatmul.mubr.msk.f32.gmra.mrb[6].mxu1 %vm171_vm0, %v13976_v38  ;;  %12340 = vmatprep.mubr.msk.f32.mxu0 %vm171_vm0, %v13978_v39  ;;  %16294 = vst [vmem:[#allocation7_spill] sm:$0xff] %v13997_v44  ;;  %v14009_v46 = vld [vmem:[#allocation2 + $0x81] sm:$0xff]  ;;  %16296 = vst [vmem:[#allocation9_spill] sm:$0xff] %v14013_v48  ;;  %v14031_v54 = vld [vmem:[#allocation2 + $0x99] sm:$0xff] }
  0x3b   : > { %11746 = vmatprep.mubr.msk.f32.mxu1 %vm171_vm0, %v13980_v40  ;;  %16295 = vst [vmem:[#allocation8_spill] sm:$0xff] %v14009_v46  ;;  %v14023_v51 = vld [vmem:[#allocation2 + $0x9a] sm:$0xff]  ;;  %287 = vst.msk [vmem:[#allocation2 + $0x12a] sm:$0xff] %vm171_vm0, %v254_v50  ;;  %v14033_v55 = vld [vmem:[#allocation2 + $0xaa] sm:$0xff] }
  0x3c   : > { %16297 = vst [vmem:[#allocation10_spill] sm:$0xff] %v14031_v54  ;;  %288 = vst.msk [vmem:[#allocation2 + $0x13a] sm:$0xff] %vm171_vm0, %v255_v52  ;;  %v14038_v57 = vld [vmem:[#allocation2 + $0xa9] sm:$0xff]  ;;  %v14051_v61 = vld [vmem:[#allocation2 + $0xb2] sm:$0xff] }
  0x3d   : > { %12341 = vmatmul.mubr.msk.f32.gmra.mrb[4].mxu0 %vm171_vm0, %v13989_v41  ;;  %289 = vst.msk [vmem:[#allocation2 + $0x142] sm:$0xff] %vm171_vm0, %v256_v53  ;;  %16298 = vst [vmem:[#allocation11_spill] sm:$0xff] %v14038_v57  ;;  %v14057_v62 = vld [vmem:[#allocation2 + $0xb1] sm:$0xff]  ;;  %v14059_v63 = vld [vmem:[#allocation2 + $0xc2] sm:$0xff] }
  0x3e   : > { %11747 = vmatmul.mubr.msk.f32.gmra.mrb[8].mxu1 %vm171_vm0, %v13993_v42  ;;  %12343 = vmatprep.mubr.msk.f32.mxu0 %vm171_vm0, %v13995_v43  ;;  %290 = vst.msk [vmem:[#allocation2 + $0x152] sm:$0xff] %vm171_vm0, %v257_v56  ;;  %291 = vst.msk [vmem:[#allocation2 + $0x15a] sm:$0xff] %vm171_vm0, %v258_v58  ;;  %v14061_v0 = vld [vmem:[#allocation2 + $0xc1] sm:$0xff]  ;;  %v14069_v1 = vld [vmem:[#allocation2 + $0xca] sm:$0xff] }
  0x3f   : > { %11749 = vmatprep.mubr.msk.f32.mxu1 %vm171_vm0, %v13997_v44  ;;  %292 = vst.msk [vmem:[#allocation2 + $0x16a] sm:$0xff] %vm171_vm0, %v259_v59  ;;  %293 = vst.msk [vmem:[#allocation2 + $0x172] sm:$0xff] %vm171_vm0, %v260_v60  ;;  %v14073_v2 = vld [vmem:[#allocation2 + $0xc9] sm:$0xff]  ;;  %v14075_v3 = vld [vmem:[#allocation2 + $0xda] sm:$0xff] }
  0x40   : > { %16299 = vst [vmem:[#allocation12_spill] sm:$0xff] %v14057_v62  ;;  %16300 = vst [vmem:[#allocation13_spill] sm:$0xff] %v14061_v0  ;;  %v14077_v4 = vld [vmem:[#allocation2 + $0xd9] sm:$0xff]  ;;  %v14085_v5 = vld [vmem:[#allocation2 + $0xe2] sm:$0xff] }
  0x41   : > { %12344 = vmatmul.mubr.msk.f32.gmra.mrb[6].mxu0 %vm171_vm0, %v14005_v45  ;;  %16301 = vst [vmem:[#allocation14_spill] sm:$0xff] %v14073_v2  ;;  %16302 = vst [vmem:[#allocation15_spill] sm:$0xff] %v14077_v4  ;;  %v14089_v6 = vld [vmem:[#allocation2 + $0xe1] sm:$0xff]  ;;  %v14091_v7 = vld [vmem:[#allocation2 + $0x33] sm:$0xff] }
  0x42   : > { %11750 = vmatmul.mubr.msk.f32.gmra.mrb[10].mxu1 %vm171_vm0, %v14009_v46  ;;  %12346 = vmatprep.mubr.msk.f32.mxu0 %vm171_vm0, %v14011_v47  ;;  %16303 = vst [vmem:[#allocation16_spill] sm:$0xff] %v14089_v6  ;;  %v14093_v9 = vld [vmem:[#allocation2 + $0xf1] sm:$0xff]  ;;  %v14101_v10 = vld [vmem:[#allocation2 + $0x3b] sm:$0xff]  ;;  %v14111_v15 = vld [vmem:[#allocation2 + $0x109] sm:$0xff] }
  0x43   : > { %11752 = vmatprep.mubr.msk.f32.mxu1 %vm171_vm0, %v14013_v48  ;;  %16304 = vst [vmem:[#allocation17_spill] sm:$0xff] %v14093_v9  ;;  %v14103_v11 = vld [vmem:[#allocation2 + $0xf9] sm:$0xff]  ;;  %v14107_v12 = vld [vmem:[#allocation2 + $0x4b] sm:$0xff]  ;;  %16306 = vst [vmem:[#allocation19_spill] sm:$0xff] %v14111_v15 }
  0x44   : > { %16305 = vst [vmem:[#allocation18_spill] sm:$0xff] %v14103_v11  ;;  %294 = vst.msk [vmem:[#allocation2 + $0x182] sm:$0xff] %vm171_vm0, %v261_v13  ;;  %v14129_v19 = vld [vmem:[#allocation2 + $0x53] sm:$0xff]  ;;  %v14137_v21 = vld [vmem:[#allocation2 + $0x63] sm:$0xff] }
  0x45   : > { %12347 = vmatmul.mubr.msk.f32.gmra.mrb[8].mxu0 %vm171_vm0, %v14023_v51  ;;  %295 = vst.msk [vmem:[#allocation2 + $0x18a] sm:$0xff] %vm171_vm0, %v262_v14  ;;  %296 = vst.msk [vmem:[#allocation2 + $0x19a] sm:$0xff] %vm171_vm0, %v263_v16  ;;  %v14135_v20 = vld [vmem:[#allocation2 + $0x111] sm:$0xff]  ;;  %v14139_v22 = vld [vmem:[#allocation2 + $0x121] sm:$0xff] }
  0x46   : > { %11753 = vmatmul.mubr.msk.f32.gmra.mrb[12].mxu1 %vm171_vm0, %v14031_v54  ;;  %12349 = vmatprep.mubr.msk.f32.mxu0 %vm171_vm0, %v14033_v55  ;;  %297 = vst.msk [vmem:[#allocation2 + $0x1a2] sm:$0xff] %vm171_vm0, %v264_v17  ;;  %16307 = vst [vmem:[#allocation20_spill] sm:$0xff] %v14135_v20  ;;  %v14148_v23 = vld [vmem:[#allocation2 + $0x6b] sm:$0xff]  ;;  %v14154_v25 = vld [vmem:[#allocation2 + $0x7b] sm:$0xff] }
  0x47   : > { %11755 = vmatprep.mubr.msk.f32.mxu1 %vm171_vm0, %v14038_v57  ;;  %16308 = vst [vmem:[#allocation21_spill] sm:$0xff] %v14139_v22  ;;  %v14152_v24 = vld [vmem:[#allocation2 + $0x129] sm:$0xff]  ;;  %v14156_v26 = vld [vmem:[#allocation2 + $0x139] sm:$0xff]  ;;  %v14168_v28 = vld [vmem:[#allocation2 + $0x141] sm:$0xff] }
  0x48   : > { %16309 = vst [vmem:[#allocation22_spill] sm:$0xff] %v14152_v24  ;;  %16310 = vst [vmem:[#allocation23_spill] sm:$0xff] %v14156_v26  ;;  %v14164_v27 = vld [vmem:[#allocation2 + $0x83] sm:$0xff]  ;;  %v14170_v29 = vld [vmem:[#allocation2 + $0x93] sm:$0xff] }
  0x49   : > { %12350 = vmatmul.mubr.msk.f32.gmra.mrb[10].mxu0 %vm171_vm0, %v14051_v61  ;;  %16311 = vst [vmem:[#allocation24_spill] sm:$0xff] %v14168_v28  ;;  %v14172_v32 = vld [vmem:[#allocation2 + $0x151] sm:$0xff]  ;;  %v14180_v33 = vld [vmem:[#allocation2 + $0x9b] sm:$0xff]  ;;  %v14188_v50 = vld [vmem:[#allocation2 + $0x169] sm:$0xff] }
  0x4a   : > { %11756 = vmatmul.mubr.msk.f32.gmra.mrb[14].mxu1 %vm171_vm0, %v14057_v62  ;;  %12352 = vmatprep.mubr.msk.f32.mxu0 %vm171_vm0, %v14059_v63  ;;  %16312 = vst [vmem:[#allocation25_spill] sm:$0xff] %v14172_v32  ;;  %v14186_v49 = vld [vmem:[#allocation2 + $0xab] sm:$0xff]  ;;  %16314 = vst [vmem:[#allocation27_spill] sm:$0xff] %v14188_v50  ;;  %v14196_v52 = vld [vmem:[#allocation2 + $0xb3] sm:$0xff] }
  0x4b   : > { %11758 = vmatprep.mubr.msk.f32.mxu1 %vm171_vm0, %v14061_v0  ;;  %v14200_v53 = vld [vmem:[#allocation2 + $0x171] sm:$0xff]  ;;  %v14202_v56 = vld [vmem:[#allocation2 + $0xc3] sm:$0xff]  ;;  %v14213_v13 = vld [vmem:[#allocation2 + $0xdb] sm:$0xff] }
  0x4c   : > { %16315 = vst [vmem:[#allocation28_spill] sm:$0xff] %v14200_v53  ;;  %16316 = vst [vmem:[#allocation29_spill] sm:$0xff] %v14202_v56  ;;  %v298_v58 = vld [vmem:[#allocation2] sm:$0xff]  ;;  %v14210_v59 = vld [vmem:[#allocation2 + $0xcb] sm:$0xff] }
  0x4d   : > { %12353 = vmatmul.mubr.msk.f32.gmra.mrb[12].mxu0 %vm171_vm0, %v14069_v1  ;;  %16317 = vst [vmem:[#allocation30_spill] sm:$0xff] %v14210_v59  ;;  %v299_v60 = vld [vmem:[#allocation2 + $0x8] sm:$0xff]  ;;  %16318 = vst [vmem:[#allocation31_spill] sm:$0xff] %v14213_v13  ;;  %v300_v14 = vld [vmem:[#allocation2 + $0x18] sm:$0xff] }
  0x4e   : > { %11759 = vmatmul.mubr.msk.f32.gmra.mrb[16].mxu1 %vm171_vm0, %v14073_v2  ;;  %12355 = vmatprep.mubr.msk.f32.mxu0 %vm171_vm0, %v14075_v3  ;;  %v14220_v16 = vld [vmem:[%s16179_s1 + $0x18] sm:$0xff]  ;;  %v14225_v17 = vld [vmem:[#allocation2 + $0xe3] sm:$0xff]  ;;  %v14303_v2 = vld [vmem:[#allocation2 + $0x16b] sm:$0xff] }
  0x4f   : > { %11761 = vmatprep.mubr.msk.f32.mxu1 %vm171_vm0, %v14077_v4  ;;  %16319 = vst [vmem:[#allocation32_spill] sm:$0xff] %v14225_v17  ;;  %v14301_v4 = vld [vmem:[#allocation2 + $0x98] sm:$0xff]  ;;  %16330 = vst [vmem:[#allocation43_spill] sm:$0xff] %v14303_v2  ;;  %v14305_v0 = vld [vmem:[#allocation2 + $0xa8] sm:$0xff] }
  0x50   : > { %v14313_v62 = vld [vmem:[#allocation2 + $0x173] sm:$0xff]  ;;  %v5293_v57 = vld [vmem:[#allocation2 + $0x183] sm:$0xff]  ;;  %v5295_v54 = vld [vmem:[#allocation2 + $0x19b] sm:$0xff] }
  0x51   : > { %12356 = vmatmul.mubr.msk.f32.gmra.mrb[14].mxu0 %vm171_vm0, %v14085_v5  ;;  %16331 = vst [vmem:[#allocation44_spill] sm:$0xff] %v14313_v62  ;;  %v14340_v48 = vld [vmem:[#allocation2 + $0x34] sm:$0xff]  ;;  %v14355_v46 = vld [vmem:[#allocation2 + $0x4c] sm:$0xff]  ;;  %v14394_v42 = vld [vmem:[#allocation2 + $0x7c] sm:$0xff] }
  0x52   : > { %11762 = vmatmul.mubr.msk.f32.gmra.mrb[18].mxu1 %vm171_vm0, %v14089_v6  ;;  %12384 = vmatprep.mubr.msk.f32.mxu0 %vm171_vm0, %v14091_v7  ;;  %v14297_v6 = vld [vmem:[#allocation2 + $0x15b] sm:$0xff]  ;;  %16332 = vst [vmem:[#allocation45_spill] sm:$0xff] %v14340_v48  ;;  %16334 = vst [vmem:[#allocation47_spill] sm:$0xff] %v14355_v46  ;;  %v14375_v44 = vld [vmem:[#allocation2 + $0x110] sm:$0xff] }
  0x53   : > { %11764 = vmatprep.mubr.msk.f32.mxu1 %vm171_vm0, %v14093_v9  ;;  %v14289_v9 = vld [vmem:[#allocation2 + $0x90] sm:$0xff]  ;;  %16329 = vst [vmem:[#allocation42_spill] sm:$0xff] %v14297_v6  ;;  %16338 = vst [vmem:[#allocation51_spill] sm:$0xff] %v14394_v42  ;;  %v14442_v35 = vld [vmem:[#allocation2 + $0xc4] sm:$0xff] }
  0x54   : > { %v14410_v40 = vld [vmem:[#allocation2 + $0x94] sm:$0xff]  ;;  %v14426_v38 = vld [vmem:[#allocation2 + $0xac] sm:$0xff]  ;;  %16344 = vst [vmem:[#allocation57_spill] sm:$0xff] %v14442_v35 }
  0x55   : > { %12385 = vmatmul.mubr.msk.f32.vlgmr.msra.gmra.mrb[0].mxu0 %vm171_vm0, %v14101_v10  ;;  %16340 = vst [vmem:[#allocation53_spill] sm:$0xff] %v14410_v40  ;;  %16342 = vst [vmem:[#allocation55_spill] sm:$0xff] %v14426_v38 }
  0x56   : > { %12433 = vmatpush3.msra.mxu0 %v13966_v36  ;;  %11765 = vmatmul.mubr.msk.f32.gmra.mrb[20].mxu1 %vm171_vm0, %v14103_v11  ;;  %v14184_v36 = vld [vmem:[#allocation2 + $0x159] sm:$0xff] }
  0x57   : > { %12387 = vmatprep.mubr.msk.f32.mxu0 %vm171_vm0, %v14107_v12  ;;  %11767 = vmatprep.mubr.msk.f32.mxu1 %vm171_vm0, %v14111_v15  ;;  %16313 = vst [vmem:[#allocation26_spill] sm:$0xff] %v14184_v36  ;;  %v14285_v15 = vld [vmem:[#allocation2 + $0x80] sm:$0xff]  ;;  %v14287_v11 = vld [vmem:[#allocation2 + $0x153] sm:$0xff] }
  0x58   : > { %12482 = vmatprep.subr.mxu0 %v14124_v18  ;;  %16328 = vst [vmem:[#allocation41_spill] sm:$0xff] %v14287_v11 }
  0x59   : > { %12388 = vmatmul.mubr.msk.f32.gmra.mrb[2].mxu0 %vm171_vm0, %v14129_v19 }
  0x5a   : > { %11768 = vmatmul.mubr.msk.f32.gmra.mrb[22].mxu1 %vm171_vm0, %v14135_v20  ;;  %12390 = vmatprep.mubr.msk.f32.mxu0 %vm171_vm0, %v14137_v21  ;;  %v14281_v20 = vld [vmem:[#allocation2 + $0x143] sm:$0xff] }
  0x5b   : > { %11770 = vmatprep.mubr.msk.f32.mxu1 %vm171_vm0, %v14139_v22  ;;  %v14273_v22 = vld [vmem:[#allocation2 + $0x78] sm:$0xff]  ;;  %16327 = vst [vmem:[#allocation40_spill] sm:$0xff] %v14281_v20 }
  0x5d   : > { %12391 = vmatmul.mubr.msk.f32.gmra.mrb[4].mxu0 %vm171_vm0, %v14148_v23 }
  0x5e   : > { %11771 = vmatmul.mubr.msk.f32.gmra.mrb[24].mxu1 %vm171_vm0, %v14152_v24  ;;  %12393 = vmatprep.mubr.msk.f32.mxu0 %vm171_vm0, %v14154_v25  ;;  %v14271_v24 = vld [vmem:[#allocation2 + $0x13b] sm:$0xff] }
  0x5f   : > { %11773 = vmatprep.mubr.msk.f32.mxu1 %vm171_vm0, %v14156_v26  ;;  %v14269_v26 = vld [vmem:[#allocation2 + $0x68] sm:$0xff]  ;;  %16326 = vst [vmem:[#allocation39_spill] sm:$0xff] %v14271_v24 }
  0x61   : > { %12394 = vmatmul.mubr.msk.f32.gmra.mrb[6].mxu0 %vm171_vm0, %v14164_v27 }
  0x62   : > { %11774 = vmatmul.mubr.msk.f32.gmra.mrb[26].mxu1 %vm171_vm0, %v14168_v28  ;;  %12396 = vmatprep.mubr.msk.f32.mxu0 %vm171_vm0, %v14170_v29  ;;  %v14257_v28 = vld [vmem:[#allocation2 + $0x60] sm:$0xff] }
  0x63   : > { %11776 = vmatprep.mubr.msk.f32.mxu1 %vm171_vm0, %v14172_v32  ;;  %v14242_v32 = vld [vmem:[#allocation2 + $0x48] sm:$0xff] }
  0x65   : > { %12397 = vmatmul.mubr.msk.f32.gmra.mrb[8].mxu0 %vm171_vm0, %v14180_v33 }
  0x66   : > { %11777 = vmatmul.mubr.msk.f32.gmra.mrb[28].mxu1 %vm171_vm0, %v14184_v36  ;;  %12399 = vmatprep.mubr.msk.f32.mxu0 %vm171_vm0, %v14186_v49  ;;  %v14240_v36 = vld [vmem:[#allocation2 + $0x10b] sm:$0xff] }
  0x67   : > { %11779 = vmatprep.mubr.msk.f32.mxu1 %vm171_vm0, %v14188_v50  ;;  %v302_v50 = vld [vmem:[#allocation2 + $0x30] sm:$0xff]  ;;  %16322 = vst [vmem:[#allocation35_spill] sm:$0xff] %v14240_v36 }
  0x69   : > { %12400 = vmatmul.mubr.msk.f32.gmra.mrb[10].mxu0 %vm171_vm0, %v14196_v52 }
  0x6a   : > { %11780 = vmatmul.mubr.msk.f32.gmra.mrb[30].mxu1 %vm171_vm0, %v14200_v53  ;;  %12402 = vmatprep.mubr.msk.f32.mxu0 %vm171_vm0, %v14202_v56  ;;  %v14228_v53 = vld [vmem:[#allocation2 + $0xf3] sm:$0xff] }
  0x6b   : > { %11784 = vmatprep.mubr.msk.f32.mxu1 %vm171_vm0, %v298_v58  ;;  %v301_v58 = vld [vmem:[#allocation2 + $0x20] sm:$0xff]  ;;  %16320 = vst [vmem:[#allocation33_spill] sm:$0xff] %v14228_v53  ;;  %v14468_v56 = vld [vmem:[#allocation2 + $0xf4] sm:$0xff] }
  0x6d   : > { %12403 = vmatmul.mubr.msk.f32.gmra.mrb[12].mxu0 %vm171_vm0, %v14210_v59  ;;  %v1009_v59 = vld [vmem:[#allocation2 + $0x1a] sm:$0xff] }
  0x6e   : > { %11785 = vmatmul.mubr.msk.f32.vlgmr.msra.gmra.mrb[0].mxu1 %vm171_vm0, %v299_v60  ;;  %12405 = vmatprep.mubr.msk.f32.mxu0 %vm171_vm0, %v14213_v13  ;;  %v14237_v60 = vld [vmem:[#allocation2 + $0xfb] sm:$0xff] }
  0x6f   : > { %11787 = vmatprep.mubr.msk.f32.mxu1 %vm171_vm0, %v300_v14  ;;  %11833 = vmatpush3.msra.mxu1 %v13905_v8  ;;  %16321 = vst [vmem:[#allocation34_spill] sm:$0xff] %v14237_v60  ;;  %v303_v14 = vld [vmem:[#allocation2 + $0x38] sm:$0xff] }
  0x70   : > { %11882 = vmatprep.subr.mxu1 %v14220_v16  ;;  %v14249_v8 = vld [vmem:[#allocation2 + $0x113] sm:$0xff]  ;;  %v14453_v13 = vld [vmem:[#allocation2 + $0xdc] sm:$0xff] }
  0x71   : > { %12406 = vmatmul.mubr.msk.f32.gmra.mrb[14].mxu0 %vm171_vm0, %v14225_v17  ;;  %16323 = vst [vmem:[#allocation36_spill] sm:$0xff] %v14249_v8  ;;  %v1007_v17 = vld [vmem:[#allocation2 + $0x2] sm:$0xff] }
  0x72   : > { %11788 = vmatmul.mubr.msk.f32.gmra.mrb[2].mxu1 %vm171_vm0, %v301_v58  ;;  %12408 = vmatprep.mubr.msk.f32.mxu0 %vm171_vm0, %v14228_v53  ;;  %v14253_v58 = vld [vmem:[#allocation2 + $0x50] sm:$0xff]  ;;  %v14428_v53 = vld [vmem:[#allocation2 + $0x168] sm:$0xff] }
  0x73   : > { %11790 = vmatprep.mubr.msk.f32.mxu1 %vm171_vm0, %v302_v50  ;;  %v14255_v50 = vld [vmem:[#allocation2 + $0x123] sm:$0xff] }
  0x74   : > { %16324 = vst [vmem:[#allocation37_spill] sm:$0xff] %v14255_v50 }
  0x75   : > { %12409 = vmatmul.mubr.msk.f32.gmra.mrb[16].mxu0 %vm171_vm0, %v14237_v60  ;;  %v14412_v60 = vld [vmem:[#allocation2 + $0x150] sm:$0xff] }
  0x76   : > { %11791 = vmatmul.mubr.msk.f32.gmra.mrb[4].mxu1 %vm171_vm0, %v303_v14  ;;  %12411 = vmatprep.mubr.msk.f32.mxu0 %vm171_vm0, %v14240_v36  ;;  %v14265_v14 = vld [vmem:[#allocation2 + $0x12b] sm:$0xff]  ;;  %v14396_v36 = vld [vmem:[#allocation2 + $0x138] sm:$0xff] }
  0x77   : > { %11793 = vmatprep.mubr.msk.f32.mxu1 %vm171_vm0, %v14242_v32  ;;  %16325 = vst [vmem:[#allocation38_spill] sm:$0xff] %v14265_v14 }
  0x79   : > { %12412 = vmatmul.mubr.msk.f32.gmra.mrb[18].mxu0 %vm171_vm0, %v14249_v8  ;;  %v14379_v8 = vld [vmem:[#allocation2 + $0x120] sm:$0xff] }
  0x7a   : > { %11794 = vmatmul.mubr.msk.f32.gmra.mrb[6].mxu1 %vm171_vm0, %v14253_v58  ;;  %12414 = vmatprep.mubr.msk.f32.mxu0 %vm171_vm0, %v14255_v50  ;;  %v14357_v50 = vld [vmem:[#allocation2 + $0x108] sm:$0xff] }
  0x7b   : > { %11796 = vmatprep.mubr.msk.f32.mxu1 %vm171_vm0, %v14257_v28 }
  0x7d   : > { %12415 = vmatmul.mubr.msk.f32.gmra.mrb[20].mxu0 %vm171_vm0, %v14265_v14  ;;  %v14342_v14 = vld [vmem:[#allocation2 + $0xf0] sm:$0xff] }
  0x7e   : > { %11797 = vmatmul.mubr.msk.f32.gmra.mrb[8].mxu1 %vm171_vm0, %v14269_v26  ;;  %12417 = vmatprep.mubr.msk.f32.mxu0 %vm171_vm0, %v14271_v24  ;;  %v14330_v24 = vld [vmem:[#allocation2 + $0xd8] sm:$0xff] }
  0x7f   : > { %11799 = vmatprep.mubr.msk.f32.mxu1 %vm171_vm0, %v14273_v22 }
  0x81   : > { %12418 = vmatmul.mubr.msk.f32.gmra.mrb[22].mxu0 %vm171_vm0, %v14281_v20  ;;  %v14319_v20 = vld [vmem:[#allocation2 + $0xc0] sm:$0xff] }
  0x82   : > { %11800 = vmatmul.mubr.msk.f32.gmra.mrb[10].mxu1 %vm171_vm0, %v14285_v15  ;;  %12420 = vmatprep.mubr.msk.f32.mxu0 %vm171_vm0, %v14287_v11  ;;  %v14317_v11 = vld [vmem:[#allocation2 + $0xb0] sm:$0xff] }
  0x83   : > { %11802 = vmatprep.mubr.msk.f32.mxu1 %vm171_vm0, %v14289_v9 }
  0x85   : > { %12421 = vmatmul.mubr.msk.f32.gmra.mrb[24].mxu0 %vm171_vm0, %v14297_v6  ;;  %v5294_v6 = vld [vmem:[#allocation2 + $0x18b] sm:$0xff] }
  0x86   : > { %11803 = vmatmul.mubr.msk.f32.gmra.mrb[12].mxu1 %vm171_vm0, %v14301_v4  ;;  %12423 = vmatprep.mubr.msk.f32.mxu0 %vm171_vm0, %v14303_v2  ;;  %v14328_v2 = vld [vmem:[#allocation2 + $0xc8] sm:$0xff] }
  0x87   : > { %11805 = vmatprep.mubr.msk.f32.mxu1 %vm171_vm0, %v14305_v0 }
  0x89   : > { %12424 = vmatmul.mubr.msk.f32.gmra.mrb[26].mxu0 %vm171_vm0, %v14313_v62  ;;  %v5296_v62 = vld [vmem:[#allocation2 + $0x1a3] sm:$0xff] }
  0x8a   : > { %11806 = vmatmul.mubr.msk.f32.gmra.mrb[14].mxu1 %vm171_vm0, %v14317_v11  ;;  %12426 = vmatprep.mubr.msk.f32.mxu0 %vm171_vm0, %v5293_v57  ;;  %v14338_v57 = vld [vmem:[#allocation2 + $0xe0] sm:$0xff] }
  0x8b   : > { %11808 = vmatprep.mubr.msk.f32.mxu1 %vm171_vm0, %v14319_v20 }
  0x8d   : > { %12427 = vmatmul.mubr.msk.f32.gmra.mrb[28].mxu0 %vm171_vm0, %v5294_v6  ;;  %v14349_v6 = vld [vmem:[#allocation2 + $0x3c] sm:$0xff] }
  0x8e   : > { %11809 = vmatmul.mubr.msk.f32.gmra.mrb[16].mxu1 %vm171_vm0, %v14328_v2  ;;  %12429 = vmatprep.mubr.msk.f32.mxu0 %vm171_vm0, %v5295_v54  ;;  %16333 = vst [vmem:[#allocation46_spill] sm:$0xff] %v14349_v6  ;;  %v14353_v54 = vld [vmem:[#allocation2 + $0xf8] sm:$0xff] }
  0x8f   : > { %11811 = vmatprep.mubr.msk.f32.mxu1 %vm171_vm0, %v14330_v24 }
  0x91   : > { %12430 = vmatmul.mubr.msk.f32.gmra.mrb[30].mxu0 %vm171_vm0, %v5296_v62  ;;  %v14364_v62 = vld [vmem:[%s16179_s1 + $0x80] sm:$0xff] }
  0x92   : > { %11812 = vmatmul.mubr.msk.f32.gmra.mrb[18].mxu1 %vm171_vm0, %v14338_v57  ;;  %12434 = vmatprep.mubr.msk.f32.mxu0 %vm171_vm0, %v14340_v48  ;;  %v14369_v48 = vld [vmem:[#allocation2 + $0x54] sm:$0xff] }
  0x93   : > { %11814 = vmatprep.mubr.msk.f32.mxu1 %vm171_vm0, %v14342_v14  ;;  %16335 = vst [vmem:[#allocation48_spill] sm:$0xff] %v14369_v48 }
  0x95   : > { %12435 = vmatmul.mubr.msk.f32.vlgmr.msra.gmra.mrb[0].mxu0 %vm171_vm0, %v14349_v6  ;;  %v14377_v6 = vld [vmem:[#allocation2 + $0x64] sm:$0xff] }
  0x96   : > { %12483 = vmatpush3.msra.mxu0 %v14124_v18  ;;  %11815 = vmatmul.mubr.msk.f32.gmra.mrb[20].mxu1 %vm171_vm0, %v14353_v54  ;;  %16336 = vst [vmem:[#allocation49_spill] sm:$0xff] %v14377_v6  ;;  %v14388_v18 = vld [vmem:[#allocation2 + $0x6c] sm:$0xff] }
  0x97   : > { %12437 = vmatprep.mubr.msk.f32.mxu0 %vm171_vm0, %v14355_v46  ;;  %11817 = vmatprep.mubr.msk.f32.mxu1 %vm171_vm0, %v14357_v50  ;;  %16337 = vst [vmem:[#allocation50_spill] sm:$0xff] %v14388_v18  ;;  %v14392_v46 = vld [vmem:[#allocation2 + $0x128] sm:$0xff] }
  0x98   : > { %12532 = vmatprep.subr.mxu0 %v14364_v62 }
  0x99   : > { %12438 = vmatmul.mubr.msk.f32.gmra.mrb[2].mxu0 %vm171_vm0, %v14369_v48  ;;  %v14408_v48 = vld [vmem:[#allocation2 + $0x140] sm:$0xff] }
  0x9a   : > { %11818 = vmatmul.mubr.msk.f32.gmra.mrb[22].mxu1 %vm171_vm0, %v14375_v44  ;;  %12440 = vmatprep.mubr.msk.f32.mxu0 %vm171_vm0, %v14377_v6  ;;  %v14404_v6 = vld [vmem:[#allocation2 + $0x84] sm:$0xff] }
  0x9b   : > { %11820 = vmatprep.mubr.msk.f32.mxu1 %vm171_vm0, %v14379_v8  ;;  %16339 = vst [vmem:[#allocation52_spill] sm:$0xff] %v14404_v6 }
  0x9d   : > { %12441 = vmatmul.mubr.msk.f32.gmra.mrb[4].mxu0 %vm171_vm0, %v14388_v18  ;;  %v14424_v18 = vld [vmem:[#allocation2 + $0x158] sm:$0xff] }
  0x9e   : > { %11821 = vmatmul.mubr.msk.f32.gmra.mrb[24].mxu1 %vm171_vm0, %v14392_v46  ;;  %12443 = vmatprep.mubr.msk.f32.mxu0 %vm171_vm0, %v14394_v42  ;;  %v14420_v42 = vld [vmem:[#allocation2 + $0x9c] sm:$0xff] }
  0x9f   : > { %11823 = vmatprep.mubr.msk.f32.mxu1 %vm171_vm0, %v14396_v36  ;;  %16341 = vst [vmem:[#allocation54_spill] sm:$0xff] %v14420_v42 }
  0xa1   : > { %12444 = vmatmul.mubr.msk.f32.gmra.mrb[6].mxu0 %vm171_vm0, %v14404_v6  ;;  %v14440_v6 = vld [vmem:[#allocation2 + $0x170] sm:$0xff] }
  0xa2   : > { %11824 = vmatmul.mubr.msk.f32.gmra.mrb[26].mxu1 %vm171_vm0, %v14408_v48  ;;  %12446 = vmatprep.mubr.msk.f32.mxu0 %vm171_vm0, %v14410_v40  ;;  %v14436_v40 = vld [vmem:[#allocation2 + $0xb4] sm:$0xff] }
  0xa3   : > { %11826 = vmatprep.mubr.msk.f32.mxu1 %vm171_vm0, %v14412_v60  ;;  %16343 = vst [vmem:[#allocation56_spill] sm:$0xff] %v14436_v40 }
  0xa5   : > { %12447 = vmatmul.mubr.msk.f32.gmra.mrb[8].mxu0 %vm171_vm0, %v14420_v42  ;;  %v1008_v42 = vld [vmem:[#allocation2 + $0xa] sm:$0xff] }
  0xa6   : > { %11827 = vmatmul.mubr.msk.f32.gmra.mrb[28].mxu1 %vm171_vm0, %v14424_v18  ;;  %12449 = vmatprep.mubr.msk.f32.mxu0 %vm171_vm0, %v14426_v38  ;;  %v14450_v38 = vld [vmem:[#allocation2 + $0xcc] sm:$0xff] }
  0xa7   : > { %11829 = vmatprep.mubr.msk.f32.mxu1 %vm171_vm0, %v14428_v53 }
  0xa9   : > { %12450 = vmatmul.mubr.msk.f32.gmra.mrb[10].mxu0 %vm171_vm0, %v14436_v40  ;;  %v14460_v40 = vld [vmem:[%s16179_s1 + $0x20] sm:$0xff] }
  0xaa   : > { %11830 = vmatmul.mubr.msk.f32.gmra.mrb[30].mxu1 %vm171_vm0, %v14440_v6  ;;  %12452 = vmatprep.mubr.msk.f32.mxu0 %vm171_vm0, %v14442_v35  ;;  %v14465_v35 = vld [vmem:[#allocation2 + $0xe4] sm:$0xff] }
  0xab   : > { %11834 = vmatprep.mubr.msk.f32.mxu1 %vm171_vm0, %v1007_v17  ;;  %v1010_v17 = vld [vmem:[#allocation2 + $0x22] sm:$0xff] }
  0xad   : > { %12453 = vmatmul.mubr.msk.f32.gmra.mrb[12].mxu0 %vm171_vm0, %v14450_v38 }
  0xae   : > { %11835 = vmatmul.mubr.msk.f32.vlgmr.msra.gmra.mrb[0].mxu1 %vm171_vm0, %v1008_v42  ;;  %12455 = vmatprep.mubr.msk.f32.mxu0 %vm171_vm0, %v14453_v13  ;;  %v14477_v42 = vld [vmem:[#allocation2 + $0xfc] sm:$0xff] }
  0xaf   : > { %11837 = vmatprep.mubr.msk.f32.mxu1 %vm171_vm0, %v1009_v59  ;;  %11883 = vmatpush3.msra.mxu1 %v14220_v16  ;;  %v14481_v59 = vld [vmem:[#allocation2 + $0x10c] sm:$0xff]  ;;  %v14489_v16 = vld [vmem:[#allocation2 + $0x114] sm:$0xff] }
  0xb0   : > { %11932 = vmatprep.subr.mxu1 %v14460_v40 }
  0xb1   : > { %12456 = vmatmul.mubr.msk.f32.gmra.mrb[14].mxu0 %vm171_vm0, %v14465_v35 }
  0xb2   : > { %11838 = vmatmul.mubr.msk.f32.gmra.mrb[2].mxu1 %vm171_vm0, %v1010_v17  ;;  %12458 = vmatprep.mubr.msk.f32.mxu0 %vm171_vm0, %v14468_v56  ;;  %v14493_v17 = vld [vmem:[#allocation2 + $0x124] sm:$0xff] }
  0xb3   : > { %11840 = vmatprep.mubr.msk.f32.mxu1 %vm171_vm0, %v13947_v30  ;;  %v14501_v30 = vld [vmem:[#allocation2 + $0x12c] sm:$0xff] }
  0xb5   : > { %12459 = vmatmul.mubr.msk.f32.gmra.mrb[16].mxu0 %vm171_vm0, %v14477_v42 }
  0xb6   : > { %11841 = vmatmul.mubr.msk.f32.gmra.mrb[4].mxu1 %vm171_vm0, %v13949_v31  ;;  %12461 = vmatprep.mubr.msk.f32.mxu0 %vm171_vm0, %v14481_v59  ;;  %v14505_v31 = vld [vmem:[#allocation2 + $0x13c] sm:$0xff] }
  0xb7   : > { %11843 = vmatprep.mubr.msk.f32.mxu1 %vm171_vm0, %v13957_v34  ;;  %v14513_v34 = vld [vmem:[#allocation2 + $0x144] sm:$0xff] }
  0xb9   : > { %12462 = vmatmul.mubr.msk.f32.gmra.mrb[18].mxu0 %vm171_vm0, %v14489_v16 }
  0xba   : > { %11844 = vmatmul.mubr.msk.f32.gmra.mrb[6].mxu1 %vm171_vm0, %v13970_v37  ;;  %12464 = vmatprep.mubr.msk.f32.mxu0 %vm171_vm0, %v14493_v17  ;;  %v14517_v37 = vld [vmem:[#allocation2 + $0x154] sm:$0xff] }
  0xbb   : > { %11846 = vmatprep.mubr.msk.f32.mxu1 %vm171_vm0, %v13978_v39  ;;  %v14525_v39 = vld [vmem:[#allocation2 + $0x15c] sm:$0xff] }
  0xbd   : > { %12465 = vmatmul.mubr.msk.f32.gmra.mrb[20].mxu0 %vm171_vm0, %v14501_v30 }
  0xbe   : > { %11847 = vmatmul.mubr.msk.f32.gmra.mrb[8].mxu1 %vm171_vm0, %v13989_v41  ;;  %12467 = vmatprep.mubr.msk.f32.mxu0 %vm171_vm0, %v14505_v31  ;;  %v14529_v41 = vld [vmem:[#allocation2 + $0x16c] sm:$0xff] }
  0xbf   : > { %11849 = vmatprep.mubr.msk.f32.mxu1 %vm171_vm0, %v13995_v43  ;;  %v14537_v43 = vld [vmem:[#allocation2 + $0x174] sm:$0xff] }
  0xc0   : > { %16345 = vst [vmem:[#allocation58_spill] sm:$0xff] %v14537_v43 }
  0xc1   : > { %12468 = vmatmul.mubr.msk.f32.gmra.mrb[22].mxu0 %vm171_vm0, %v14513_v34 }
  0xc2   : > { %11850 = vmatmul.mubr.msk.f32.gmra.mrb[10].mxu1 %vm171_vm0, %v14005_v45  ;;  %12470 = vmatprep.mubr.msk.f32.mxu0 %vm171_vm0, %v14517_v37  ;;  %v5680_v45 = vld [vmem:[#allocation2 + $0x184] sm:$0xff] }
  0xc3   : > { %11852 = vmatprep.mubr.msk.f32.mxu1 %vm171_vm0, %v14011_v47  ;;  %v5681_v47 = vld [vmem:[#allocation2 + $0x18c] sm:$0xff] }
  0xc5   : > { %12471 = vmatmul.mubr.msk.f32.gmra.mrb[24].mxu0 %vm171_vm0, %v14525_v39 }
  0xc6   : > { %11853 = vmatmul.mubr.msk.f32.gmra.mrb[12].mxu1 %vm171_vm0, %v14023_v51  ;;  %12473 = vmatprep.mubr.msk.f32.mxu0 %vm171_vm0, %v14529_v41  ;;  %v5682_v51 = vld [vmem:[#allocation2 + $0x19c] sm:$0xff] }
  0xc7   : > { %11855 = vmatprep.mubr.msk.f32.mxu1 %vm171_vm0, %v14033_v55  ;;  %v5683_v55 = vld [vmem:[#allocation2 + $0x1a4] sm:$0xff] }
  0xc9   : > { %12474 = vmatmul.mubr.msk.f32.gmra.mrb[26].mxu0 %vm171_vm0, %v14537_v43  ;;  %v14554_v43 = vld [vmem:[#allocation2 + $0xf2] sm:$0xff] }
  0xca   : > { %11856 = vmatmul.mubr.msk.f32.gmra.mrb[14].mxu1 %vm171_vm0, %v14051_v61  ;;  %12476 = vmatprep.mubr.msk.f32.mxu0 %vm171_vm0, %v5680_v45  ;;  %v14563_v61 = vld [vmem:[#allocation2 + $0xfa] sm:$0xff]  ;;  %v16367_v45 = vld [vmem:[#allocation41_spill] sm:$0xff] }
  0xcb   : > { %11858 = vmatprep.mubr.msk.f32.mxu1 %vm171_vm0, %v14059_v63  ;;  %v14565_v63 = vld [vmem:[#allocation2 + $0x10a] sm:$0xff] }
  0xcd   : > { %12477 = vmatmul.mubr.msk.f32.gmra.mrb[28].mxu0 %vm171_vm0, %v5681_v47  ;;  %v16368_v47 = vld [vmem:[#allocation12_spill] sm:$0xff] }
  0xce   : > { %11859 = vmatmul.mubr.msk.f32.gmra.mrb[16].mxu1 %vm171_vm0, %v14069_v1  ;;  %12479 = vmatprep.mubr.msk.f32.mxu0 %vm171_vm0, %v5682_v51  ;;  %v14572_v1 = vld [vmem:[%s16179_s1 + $0x88] sm:$0xff]  ;;  %v16369_v51 = vld [vmem:[#allocation42_spill] sm:$0xff] }
  0xcf   : > { %11861 = vmatprep.mubr.msk.f32.mxu1 %vm171_vm0, %v14075_v3  ;;  %v14581_v3 = vld [vmem:[#allocation2 + $0x112] sm:$0xff] }
  0xd1   : > { %12480 = vmatmul.mubr.msk.f32.gmra.mrb[30].mxu0 %vm171_vm0, %v5683_v55  ;;  %v16370_v55 = vld [vmem:[#allocation13_spill] sm:$0xff] }
  0xd2   : > { %11862 = vmatmul.mubr.msk.f32.gmra.mrb[18].mxu1 %vm171_vm0, %v14085_v5  ;;  %12484 = vmatprep.mubr.msk.f32.mxu0 %vm171_vm0, %v14242_v32  ;;  %v14583_v5 = vld [vmem:[#allocation2 + $0x122] sm:$0xff]  ;;  %v14596_v32 = vld [vmem:[#allocation2 + $0x13a] sm:$0xff] }
  0xd3   : > { %11864 = vmatprep.mubr.msk.f32.mxu1 %vm171_vm0, %v14554_v43 }
  0xd5   : > { %12485 = vmatmul.mubr.msk.f32.vlgmr.msra.gmra.mrb[0].mxu0 %vm171_vm0, %v14253_v58  ;;  %v1396_v58 = vld [vmem:[#allocation2 + $0x1b] sm:$0xff] }
  0xd6   : > { %12533 = vmatpush3.msra.mxu0 %v14364_v62  ;;  %11865 = vmatmul.mubr.msk.f32.gmra.mrb[20].mxu1 %vm171_vm0, %v14563_v61  ;;  %v16365_v62 = vld [vmem:[#allocation40_spill] sm:$0xff] }
  0xd7   : > { %12487 = vmatprep.mubr.msk.f32.mxu0 %vm171_vm0, %v14257_v28  ;;  %11867 = vmatprep.mubr.msk.f32.mxu1 %vm171_vm0, %v14565_v63  ;;  %v14594_v28 = vld [vmem:[#allocation2 + $0x12a] sm:$0xff] }
  0xd8   : > { %12582 = vmatprep.subr.mxu0 %v14572_v1 }
  0xd9   : > { %12488 = vmatmul.mubr.msk.f32.gmra.mrb[2].mxu0 %vm171_vm0, %v14269_v26  ;;  %v14608_v26 = vld [vmem:[#allocation2 + $0x152] sm:$0xff] }
  0xda   : > { %11868 = vmatmul.mubr.msk.f32.gmra.mrb[22].mxu1 %vm171_vm0, %v14581_v3  ;;  %12490 = vmatprep.mubr.msk.f32.mxu0 %vm171_vm0, %v14273_v22  ;;  %v14606_v22 = vld [vmem:[#allocation2 + $0x142] sm:$0xff] }
  0xdb   : > { %11870 = vmatprep.mubr.msk.f32.mxu1 %vm171_vm0, %v14583_v5 }
  0xdd   : > { %12491 = vmatmul.mubr.msk.f32.gmra.mrb[4].mxu0 %vm171_vm0, %v14285_v15  ;;  %v14620_v15 = vld [vmem:[#allocation2 + $0x16a] sm:$0xff] }
  0xde   : > { %11871 = vmatmul.mubr.msk.f32.gmra.mrb[24].mxu1 %vm171_vm0, %v14594_v28  ;;  %12493 = vmatprep.mubr.msk.f32.mxu0 %vm171_vm0, %v14289_v9  ;;  %v14618_v9 = vld [vmem:[#allocation2 + $0x15a] sm:$0xff] }
  0xdf   : > { %11873 = vmatprep.mubr.msk.f32.mxu1 %vm171_vm0, %v14596_v32 }
  0xe1   : > { %12494 = vmatmul.mubr.msk.f32.gmra.mrb[6].mxu0 %vm171_vm0, %v14301_v4  ;;  %v1394_v4 = vld [vmem:[#allocation2 + $0x3] sm:$0xff] }
  0xe2   : > { %11874 = vmatmul.mubr.msk.f32.gmra.mrb[26].mxu1 %vm171_vm0, %v14606_v22  ;;  %12496 = vmatprep.mubr.msk.f32.mxu0 %vm171_vm0, %v14305_v0  ;;  %v14630_v0 = vld [vmem:[#allocation2 + $0x172] sm:$0xff] }
  0xe3   : > { %11876 = vmatprep.mubr.msk.f32.mxu1 %vm171_vm0, %v14608_v26 }
  0xe5   : > { %12497 = vmatmul.mubr.msk.f32.gmra.mrb[8].mxu0 %vm171_vm0, %v14317_v11  ;;  %v1395_v11 = vld [vmem:[#allocation2 + $0xb] sm:$0xff] }
  0xe6   : > { %11877 = vmatmul.mubr.msk.f32.gmra.mrb[28].mxu1 %vm171_vm0, %v14618_v9  ;;  %12499 = vmatprep.mubr.msk.f32.mxu0 %vm171_vm0, %v14319_v20  ;;  %v14644_v20 = vld [vmem:[%s16179_s1 + $0x28] sm:$0xff] }
  0xe7   : > { %11879 = vmatprep.mubr.msk.f32.mxu1 %vm171_vm0, %v14620_v15 }
  0xe9   : > { %12500 = vmatmul.mubr.msk.f32.gmra.mrb[10].mxu0 %vm171_vm0, %v14328_v2  ;;  %v1397_v2 = vld [vmem:[#allocation2 + $0x23] sm:$0xff] }
  0xea   : > { %11880 = vmatmul.mubr.msk.f32.gmra.mrb[30].mxu1 %vm171_vm0, %v14630_v0  ;;  %12502 = vmatprep.mubr.msk.f32.mxu0 %vm171_vm0, %v14330_v24  ;;  %v16350_v24 = vld [vmem:[#allocation3_spill] sm:$0xff] }
  0xeb   : > { %11884 = vmatprep.mubr.msk.f32.mxu1 %vm171_vm0, %v1394_v4  ;;  %v1781_v4 = vld [vmem:[#allocation2 + $0x4] sm:$0xff] }
  0xed   : > { %12503 = vmatmul.mubr.msk.f32.gmra.mrb[12].mxu0 %vm171_vm0, %v14338_v57  ;;  %v16362_v57 = vld [vmem:[#allocation9_spill] sm:$0xff] }
  0xee   : > { %11885 = vmatmul.mubr.msk.f32.vlgmr.msra.gmra.mrb[0].mxu1 %vm171_vm0, %v1395_v11  ;;  %12505 = vmatprep.mubr.msk.f32.mxu0 %vm171_vm0, %v14342_v14  ;;  %v16361_v14 = vld [vmem:[#allocation38_spill] sm:$0xff] }
  0xef   : > { %11887 = vmatprep.mubr.msk.f32.mxu1 %vm171_vm0, %v1396_v58  ;;  %11933 = vmatpush3.msra.mxu1 %v14460_v40  ;;  %v14691_v40 = vld [vmem:[#allocation2 + $0x180] sm:$0xff]  ;;  %v16372_v11 = vld [vmem:[#allocation14_spill] sm:$0xff]  ;;  %v16373_v58 = vld [vmem:[#allocation44_spill] sm:$0xff] }
  0xf0   : > { %11982 = vmatprep.subr.mxu1 %v14644_v20 }
  0xf1   : > { %12506 = vmatmul.mubr.msk.f32.gmra.mrb[14].mxu0 %vm171_vm0, %v14353_v54  ;;  %v16364_v54 = vld [vmem:[#allocation10_spill] sm:$0xff] }
  0xf2   : > { %11888 = vmatmul.mubr.msk.f32.gmra.mrb[2].mxu1 %vm171_vm0, %v1397_v2  ;;  %12508 = vmatprep.mubr.msk.f32.mxu0 %vm171_vm0, %v14357_v50  ;;  %v16360_v50 = vld [vmem:[#allocation8_spill] sm:$0xff]  ;;  %v16374_v2 = vld [vmem:[#allocation15_spill] sm:$0xff] }
  0xf3   : > { %11890 = vmatprep.mubr.msk.f32.mxu1 %vm171_vm0, %v14091_v7  ;;  %v16346_v7 = vld [vmem:[#allocation29_spill] sm:$0xff] }
  0xf5   : > { %12509 = vmatmul.mubr.msk.f32.gmra.mrb[16].mxu0 %vm171_vm0, %v14375_v44  ;;  %v14699_v44 = vld [vmem:[#allocation2 + $0x188] sm:$0xff] }
  0xf6   : > { %11891 = vmatmul.mubr.msk.f32.gmra.mrb[4].mxu1 %vm171_vm0, %v14101_v10  ;;  %12511 = vmatprep.mubr.msk.f32.mxu0 %vm171_vm0, %v14379_v8  ;;  %v6070_v10 = vld [vmem:[#allocation2 + $0x1b0] sm:$0xff] }
  0xf7   : > { %11893 = vmatprep.mubr.msk.f32.mxu1 %vm171_vm0, %v14107_v12  ;;  %v16347_v12 = vld [vmem:[#allocation30_spill] sm:$0xff]  ;;  %v16359_v8 = vld [vmem:[#allocation37_spill] sm:$0xff] }
  0xf9   : > { %12512 = vmatmul.mubr.msk.f32.gmra.mrb[18].mxu0 %vm171_vm0, %v14392_v46  ;;  %v6068_v46 = vld [vmem:[#allocation2 + $0x198] sm:$0xff] }
  0xfa   : > { %11894 = vmatmul.mubr.msk.f32.gmra.mrb[6].mxu1 %vm171_vm0, %v14129_v19  ;;  %12514 = vmatprep.mubr.msk.f32.mxu0 %vm171_vm0, %v14396_v36  ;;  %v6071_v19 = vld [vmem:[#allocation2 + $0x1b8] sm:$0xff]  ;;  %v16354_v36 = vld [vmem:[#allocation5_spill] sm:$0xff] }
  0xfb   : > { %11896 = vmatprep.mubr.msk.f32.mxu1 %vm171_vm0, %v14137_v21  ;;  %v16348_v21 = vld [vmem:[#allocation31_spill] sm:$0xff] }
  0xfd   : > { %12515 = vmatmul.mubr.msk.f32.gmra.mrb[20].mxu0 %vm171_vm0, %v14408_v48  ;;  %v6069_v48 = vld [vmem:[#allocation2 + $0x1a0] sm:$0xff] }
  0xfe   : > { %11897 = vmatmul.mubr.msk.f32.gmra.mrb[8].mxu1 %vm171_vm0, %v14148_v23  ;;  %12517 = vmatprep.mubr.msk.f32.mxu0 %vm171_vm0, %v14412_v60  ;;  %v16349_v23 = vld [vmem:[#allocation32_spill] sm:$0xff]  ;;  %v16358_v60 = vld [vmem:[#allocation7_spill] sm:$0xff] }
  0xff   : > { %11899 = vmatprep.mubr.msk.f32.mxu1 %vm171_vm0, %v14154_v25  ;;  %v16351_v25 = vld [vmem:[#allocation33_spill] sm:$0xff] }
 0x101   : > { %12518 = vmatmul.mubr.msk.f32.gmra.mrb[22].mxu0 %vm171_vm0, %v14424_v18  ;;  %v16366_v18 = vld [vmem:[#allocation11_spill] sm:$0xff] }
 0x102   : > { %11900 = vmatmul.mubr.msk.f32.gmra.mrb[10].mxu1 %vm171_vm0, %v14164_v27  ;;  %12520 = vmatprep.mubr.msk.f32.mxu0 %vm171_vm0, %v14428_v53  ;;  %v16352_v27 = vld [vmem:[#allocation4_spill] sm:$0xff] }
 0x103   : > { %11902 = vmatprep.mubr.msk.f32.mxu1 %vm171_vm0, %v14170_v29  ;;  %v14728_v29 = vld [vmem:[%s16179_s1 + $0x90] sm:$0xff]  ;;  %v16357_v53 = vld [vmem:[#allocation36_spill] sm:$0xff] }
 0x105   : > { %12521 = vmatmul.mubr.msk.f32.gmra.mrb[24].mxu0 %vm171_vm0, %v14440_v6  ;;  %v16363_v6 = vld [vmem:[#allocation39_spill] sm:$0xff] }
 0x106   : > { %11903 = vmatmul.mubr.msk.f32.gmra.mrb[12].mxu1 %vm171_vm0, %v14180_v33  ;;  %12523 = vmatprep.mubr.msk.f32.mxu0 %vm171_vm0, %v14691_v40  ;;  %v16353_v33 = vld [vmem:[#allocation34_spill] sm:$0xff] }
 0x107   : > { %11905 = vmatprep.mubr.msk.f32.mxu1 %vm171_vm0, %v14186_v49  ;;  %v16355_v49 = vld [vmem:[#allocation35_spill] sm:$0xff] }
 0x109   : > { %12524 = vmatmul.mubr.msk.f32.gmra.mrb[26].mxu0 %vm171_vm0, %v14699_v44 }
 0x10a   : > { %11906 = vmatmul.mubr.msk.f32.gmra.mrb[14].mxu1 %vm171_vm0, %v14196_v52  ;;  %12526 = vmatprep.mubr.msk.f32.mxu0 %vm171_vm0, %v6068_v46  ;;  %v16356_v52 = vld [vmem:[#allocation6_spill] sm:$0xff]  ;;  %v1782_v46 = vld [vmem:[#allocation2 + $0xc] sm:$0xff] }
 0x10b   : > { %11908 = vmatprep.mubr.msk.f32.mxu1 %vm171_vm0, %v16346_v7  ;;  %v16375_v7 = vld [vmem:[#allocation16_spill] sm:$0xff] }
 0x10d   : > { %12527 = vmatmul.mubr.msk.f32.gmra.mrb[28].mxu0 %vm171_vm0, %v6069_v48  ;;  %v1783_v48 = vld [vmem:[#allocation2 + $0x1c] sm:$0xff] }
 0x10e   : > { %11909 = vmatmul.mubr.msk.f32.gmra.mrb[16].mxu1 %vm171_vm0, %v16347_v12  ;;  %12529 = vmatprep.mubr.msk.f32.mxu0 %vm171_vm0, %v6070_v10  ;;  %v14782_v10 = vld [vmem:[%s16179_s1 + $0x30] sm:$0xff] }
 0x10f   : > { %11911 = vmatprep.mubr.msk.f32.mxu1 %vm171_vm0, %v16348_v21  ;;  %v16376_v12 = vld [vmem:[#allocation17_spill] sm:$0xff]  ;;  %v16377_v21 = vld [vmem:[#allocation18_spill] sm:$0xff] }
 0x111   : > { %12530 = vmatmul.mubr.msk.f32.gmra.mrb[30].mxu0 %vm171_vm0, %v6071_v19  ;;  %v1784_v19 = vld [vmem:[#allocation2 + $0x24] sm:$0xff] }
 0x112   : > { %11912 = vmatmul.mubr.msk.f32.gmra.mrb[18].mxu1 %vm171_vm0, %v16349_v23  ;;  %12534 = vmatprep.mubr.msk.f32.mxu0 %vm171_vm0, %v16350_v24  ;;  %v16378_v23 = vld [vmem:[#allocation19_spill] sm:$0xff]  ;;  %v16379_v24 = vld [vmem:[#allocation45_spill] sm:$0xff] }
 0x113   : > { %11914 = vmatprep.mubr.msk.f32.mxu1 %vm171_vm0, %v16351_v25  ;;  %v16380_v25 = vld [vmem:[#allocation20_spill] sm:$0xff] }
 0x115   : > { %12535 = vmatmul.mubr.msk.f32.vlgmr.msra.gmra.mrb[0].mxu0 %vm171_vm0, %v16352_v27  ;;  %v16381_v27 = vld [vmem:[#allocation46_spill] sm:$0xff] }
 0x116   : > { %12583 = vmatpush3.msra.mxu0 %v14572_v1  ;;  %11915 = vmatmul.mubr.msk.f32.gmra.mrb[20].mxu1 %vm171_vm0, %v16353_v33  ;;  %v16371_v1 = vld [vmem:[#allocation43_spill] sm:$0xff] }
 0x117   : > { %12537 = vmatprep.mubr.msk.f32.mxu0 %vm171_vm0, %v16354_v36  ;;  %11917 = vmatprep.mubr.msk.f32.mxu1 %vm171_vm0, %v16355_v49  ;;  %v16383_v33 = vld [vmem:[#allocation47_spill] sm:$0xff]  ;;  %v16384_v36 = vld [vmem:[#allocation22_spill] sm:$0xff]  ;;  %v16385_v49 = vld [vmem:[#allocation48_spill] sm:$0xff] }
 0x118   : > { %12632 = vmatprep.subr.mxu0 %v14728_v29 }
 0x119   : > { %12538 = vmatmul.mubr.msk.f32.gmra.mrb[2].mxu0 %vm171_vm0, %v16356_v52  ;;  %v16386_v52 = vld [vmem:[#allocation23_spill] sm:$0xff] }
 0x11a   : > { %11918 = vmatmul.mubr.msk.f32.gmra.mrb[22].mxu1 %vm171_vm0, %v16357_v53  ;;  %12540 = vmatprep.mubr.msk.f32.mxu0 %vm171_vm0, %v16358_v60  ;;  %v16387_v53 = vld [vmem:[#allocation49_spill] sm:$0xff]  ;;  %v16388_v60 = vld [vmem:[#allocation24_spill] sm:$0xff] }
 0x11b   : > { %11920 = vmatprep.mubr.msk.f32.mxu1 %vm171_vm0, %v16359_v8  ;;  %v16389_v8 = vld [vmem:[#allocation50_spill] sm:$0xff] }
 0x11d   : > { %12541 = vmatmul.mubr.msk.f32.gmra.mrb[4].mxu0 %vm171_vm0, %v16360_v50  ;;  %v16390_v50 = vld [vmem:[#allocation25_spill] sm:$0xff] }
 0x11e   : > { %11921 = vmatmul.mubr.msk.f32.gmra.mrb[24].mxu1 %vm171_vm0, %v16361_v14  ;;  %12543 = vmatprep.mubr.msk.f32.mxu0 %vm171_vm0, %v16362_v57  ;;  %v16391_v14 = vld [vmem:[#allocation51_spill] sm:$0xff]  ;;  %v16392_v57 = vld [vmem:[#allocation26_spill] sm:$0xff] }
 0x11f   : > { %11923 = vmatprep.mubr.msk.f32.mxu1 %vm171_vm0, %v16363_v6  ;;  %v16393_v6 = vld [vmem:[#allocation52_spill] sm:$0xff] }
 0x121   : > { %12544 = vmatmul.mubr.msk.f32.gmra.mrb[6].mxu0 %vm171_vm0, %v16364_v54  ;;  %v16394_v54 = vld [vmem:[#allocation27_spill] sm:$0xff] }
 0x122   : > { %11924 = vmatmul.mubr.msk.f32.gmra.mrb[26].mxu1 %vm171_vm0, %v16365_v62  ;;  %12546 = vmatprep.mubr.msk.f32.mxu0 %vm171_vm0, %v16366_v18  ;;  %v16395_v62 = vld [vmem:[#allocation53_spill] sm:$0xff]  ;;  %v14829_v18 = vld [vmem:[#allocation2 + $0x181] sm:$0xff] }
 0x123   : > { %11926 = vmatprep.mubr.msk.f32.mxu1 %vm171_vm0, %v16367_v45  ;;  %v16396_v45 = vld [vmem:[#allocation28_spill] sm:$0xff] }
 0x125   : > { %12547 = vmatmul.mubr.msk.f32.gmra.mrb[8].mxu0 %vm171_vm0, %v16368_v47  ;;  %v16397_v47 = vld [vmem:[#allocation54_spill] sm:$0xff] }
 0x126   : > { %11927 = vmatmul.mubr.msk.f32.gmra.mrb[28].mxu1 %vm171_vm0, %v16369_v51  ;;  %12549 = vmatprep.mubr.msk.f32.mxu0 %vm171_vm0, %v16370_v55  ;;  %v14837_v51 = vld [vmem:[#allocation2 + $0x189] sm:$0xff]  ;;  %v16398_v55 = vld [vmem:[#allocation55_spill] sm:$0xff] }
 0x127   : > { %11929 = vmatprep.mubr.msk.f32.mxu1 %vm171_vm0, %v16371_v1  ;;  %v6455_v1 = vld [vmem:[#allocation2 + $0x199] sm:$0xff] }
 0x129   : > { %12550 = vmatmul.mubr.msk.f32.gmra.mrb[10].mxu0 %vm171_vm0, %v16372_v11  ;;  %v6456_v11 = vld [vmem:[#allocation2 + $0x1a1] sm:$0xff] }
 0x12a   : > { %11930 = vmatmul.mubr.msk.f32.gmra.mrb[30].mxu1 %vm171_vm0, %v16373_v58  ;;  %12552 = vmatprep.mubr.msk.f32.mxu0 %vm171_vm0, %v16374_v2  ;;  %v16400_v58 = vld [vmem:[#allocation57_spill] sm:$0xff] }
 0x12b   : > { %11934 = vmatprep.mubr.msk.f32.mxu1 %vm171_vm0, %v1781_v4  ;;  %v16399_v4 = vld [vmem:[#allocation56_spill] sm:$0xff]  ;;  %v6457_v2 = vld [vmem:[#allocation2 + $0x1b1] sm:$0xff] }
 0x12d   : > { %12553 = vmatmul.mubr.msk.f32.gmra.mrb[12].mxu0 %vm171_vm0, %v16375_v7  ;;  %v14861_v7 = vld [vmem:[#allocation2 + $0x52] sm:$0xff] }
 0x12e   : > { %11935 = vmatmul.mubr.msk.f32.vlgmr.msra.gmra.mrb[0].mxu1 %vm171_vm0, %v1782_v46  ;;  %12555 = vmatprep.mubr.msk.f32.mxu0 %vm171_vm0, %v16376_v12  ;;  %v6458_v46 = vld [vmem:[#allocation2 + $0x1b9] sm:$0xff] }
 0x12f   : > { %11937 = vmatprep.mubr.msk.f32.mxu1 %vm171_vm0, %v1783_v48  ;;  %11983 = vmatpush3.msra.mxu1 %v14644_v20  ;;  %v16382_v20 = vld [vmem:[#allocation21_spill] sm:$0xff]  ;;  %v2169_v12 = vld [vmem:[#allocation2 + $0x18] sm:$0xff] }
 0x130   : > { %12032 = vmatprep.subr.mxu1 %v14782_v10  ;;  %v14854_v48 = vld [vmem:[#allocation2 + $0x4a] sm:$0xff] }
 0x131   : > { %12556 = vmatmul.mubr.msk.f32.gmra.mrb[14].mxu0 %vm171_vm0, %v16377_v21  ;;  %v2171_v21 = vld [vmem:[#allocation2 + $0x30] sm:$0xff] }
 0x132   : > { %11938 = vmatmul.mubr.msk.f32.gmra.mrb[2].mxu1 %vm171_vm0, %v1784_v19  ;;  %12558 = vmatprep.mubr.msk.f32.mxu0 %vm171_vm0, %v16378_v23  ;;  %v2170_v19 = vld [vmem:[#allocation2 + $0x20] sm:$0xff]  ;;  %v2172_v23 = vld [vmem:[#allocation2 + $0x38] sm:$0xff] }
 0x133   : > { %11940 = vmatprep.mubr.msk.f32.mxu1 %vm171_vm0, %v16379_v24  ;;  %v2173_v24 = vld [vmem:[#allocation2 + $0x48] sm:$0xff] }
 0x135   : > { %12559 = vmatmul.mubr.msk.f32.gmra.mrb[16].mxu0 %vm171_vm0, %v16380_v25  ;;  %v2174_v25 = vld [vmem:[#allocation2 + $0x50] sm:$0xff] }
 0x136   : > { %11941 = vmatmul.mubr.msk.f32.gmra.mrb[4].mxu1 %vm171_vm0, %v16381_v27  ;;  %12561 = vmatprep.mubr.msk.f32.mxu0 %vm171_vm0, %v16382_v20  ;;  %v6842_v27 = vld [vmem:[#allocation2 + $0x19a] sm:$0xff] }
 0x137   : > { %11943 = vmatprep.mubr.msk.f32.mxu1 %vm171_vm0, %v16383_v33  ;;  %v15025_v20 = vld [vmem:[#allocation2 + $0xd8] sm:$0xff]  ;;  %v15034_v33 = vld [vmem:[#allocation2 + $0xe0] sm:$0xff] }
 0x139   : > { %12562 = vmatmul.mubr.msk.f32.gmra.mrb[18].mxu0 %vm171_vm0, %v16384_v36  ;;  %v6844_v36 = vld [vmem:[#allocation2 + $0x1b2] sm:$0xff] }
 0x13a   : > { %11944 = vmatmul.mubr.msk.f32.gmra.mrb[6].mxu1 %vm171_vm0, %v16385_v49  ;;  %12564 = vmatprep.mubr.msk.f32.mxu0 %vm171_vm0, %v16386_v52  ;;  %v15036_v49 = vld [vmem:[#allocation2 + $0xf0] sm:$0xff]  ;;  %v6845_v52 = vld [vmem:[#allocation2 + $0x1ba] sm:$0xff] }
 0x13b   : > { %11946 = vmatprep.mubr.msk.f32.mxu1 %vm171_vm0, %v16387_v53  ;;  %v15044_v53 = vld [vmem:[#allocation2 + $0xf8] sm:$0xff] }
 0x13d   : > { %12565 = vmatmul.mubr.msk.f32.gmra.mrb[20].mxu0 %vm171_vm0, %v16388_v60  ;;  %v15046_v60 = vld [vmem:[#allocation2 + $0x4b] sm:$0xff] }
 0x13e   : > { %11947 = vmatmul.mubr.msk.f32.gmra.mrb[8].mxu1 %vm171_vm0, %v16389_v8  ;;  %12567 = vmatprep.mubr.msk.f32.mxu0 %vm171_vm0, %v16390_v50  ;;  %v15048_v8 = vld [vmem:[#allocation2 + $0x108] sm:$0xff]  ;;  %v15055_v50 = vld [vmem:[#allocation2 + $0x53] sm:$0xff] }
 0x13f   : > { %11949 = vmatprep.mubr.msk.f32.mxu1 %vm171_vm0, %v16391_v14  ;;  %v15059_v14 = vld [vmem:[#allocation2 + $0x110] sm:$0xff] }
 0x141   : > { %12568 = vmatmul.mubr.msk.f32.gmra.mrb[22].mxu0 %vm171_vm0, %v16392_v57  ;;  %v15061_v57 = vld [vmem:[#allocation2 + $0x63] sm:$0xff] }
 0x142   : > { %11950 = vmatmul.mubr.msk.f32.gmra.mrb[10].mxu1 %vm171_vm0, %v16393_v6  ;;  %12570 = vmatprep.mubr.msk.f32.mxu0 %vm171_vm0, %v16394_v54  ;;  %v15063_v6 = vld [vmem:[#allocation2 + $0x120] sm:$0xff] }
 0x143   : > { %11952 = vmatprep.mubr.msk.f32.mxu1 %vm171_vm0, %v16395_v62  ;;  %v15070_v54 = vld [vmem:[%s16179_s1 + $0xa0] sm:$0xff]  ;;  %v15075_v62 = vld [vmem:[#allocation2 + $0x6b] sm:$0xff] }
 0x145   : > { %12571 = vmatmul.mubr.msk.f32.gmra.mrb[24].mxu0 %vm171_vm0, %v16396_v45  ;;  %v15081_v45 = vld [vmem:[#allocation2 + $0x128] sm:$0xff] }
 0x146   : > { %11953 = vmatmul.mubr.msk.f32.gmra.mrb[12].mxu1 %vm171_vm0, %v16397_v47  ;;  %12573 = vmatprep.mubr.msk.f32.mxu0 %vm171_vm0, %v14829_v18  ;;  %v15083_v47 = vld [vmem:[#allocation2 + $0x7b] sm:$0xff] }
 0x147   : > { %11955 = vmatprep.mubr.msk.f32.mxu1 %vm171_vm0, %v16398_v55  ;;  %v15085_v55 = vld [vmem:[#allocation2 + $0x138] sm:$0xff] }
 0x149   : > { %12574 = vmatmul.mubr.msk.f32.gmra.mrb[26].mxu0 %vm171_vm0, %v14837_v51 }
 0x14a   : > { %11956 = vmatmul.mubr.msk.f32.gmra.mrb[14].mxu1 %vm171_vm0, %v16399_v4  ;;  %12576 = vmatprep.mubr.msk.f32.mxu0 %vm171_vm0, %v6455_v1  ;;  %v15094_v1 = vld [vmem:[#allocation2 + $0x83] sm:$0xff] }
 0x14b   : > { %11958 = vmatprep.mubr.msk.f32.mxu1 %vm171_vm0, %v16400_v58  ;;  %v15098_v4 = vld [vmem:[#allocation2 + $0x140] sm:$0xff]  ;;  %v15102_v58 = vld [vmem:[#allocation2 + $0x150] sm:$0xff] }
 0x14d   : > { %12577 = vmatmul.mubr.msk.f32.gmra.mrb[28].mxu0 %vm171_vm0, %v6456_v11  ;;  %v15100_v11 = vld [vmem:[#allocation2 + $0x93] sm:$0xff] }
 0x14e   : > { %11959 = vmatmul.mubr.msk.f32.gmra.mrb[16].mxu1 %vm171_vm0, %v14450_v38  ;;  %12579 = vmatprep.mubr.msk.f32.mxu0 %vm171_vm0, %v6457_v2  ;;  %v14865_v38 = vld [vmem:[#allocation2 + $0x62] sm:$0xff] }
 0x14f   : > { %11961 = vmatprep.mubr.msk.f32.mxu1 %vm171_vm0, %v14453_v13  ;;  %v14872_v13 = vld [vmem:[%s16179_s1 + $0x98] sm:$0xff] }
 0x150   : > { %v15110_v2 = vld [vmem:[#allocation2 + $0x9b] sm:$0xff] }
 0x151   : > { %12580 = vmatmul.mubr.msk.f32.gmra.mrb[30].mxu0 %vm171_vm0, %v6458_v46  ;;  %v15114_v46 = vld [vmem:[#allocation2 + $0x158] sm:$0xff] }
 0x152   : > { %11962 = vmatmul.mubr.msk.f32.gmra.mrb[18].mxu1 %vm171_vm0, %v14465_v35  ;;  %12584 = vmatprep.mubr.msk.f32.mxu0 %vm171_vm0, %v14854_v48  ;;  %v14877_v35 = vld [vmem:[#allocation2 + $0x6a] sm:$0xff] }
 0x153   : > { %11964 = vmatprep.mubr.msk.f32.mxu1 %vm171_vm0, %v14468_v56  ;;  %v14883_v56 = vld [vmem:[#allocation2 + $0x7a] sm:$0xff] }
 0x155   : > { %12585 = vmatmul.mubr.msk.f32.vlgmr.msra.gmra.mrb[0].mxu0 %vm171_vm0, %v14861_v7 }
 0x156   : > { %12633 = vmatpush3.msra.mxu0 %v14728_v29  ;;  %11965 = vmatmul.mubr.msk.f32.gmra.mrb[20].mxu1 %vm171_vm0, %v14477_v42  ;;  %v14892_v42 = vld [vmem:[#allocation2 + $0x82] sm:$0xff]  ;;  %v14896_v29 = vld [vmem:[#allocation2 + $0x92] sm:$0xff] }
 0x157   : > { %12587 = vmatprep.mubr.msk.f32.mxu0 %vm171_vm0, %v14865_v38  ;;  %11967 = vmatprep.mubr.msk.f32.mxu1 %vm171_vm0, %v14481_v59  ;;  %v14904_v59 = vld [vmem:[#allocation2 + $0x9a] sm:$0xff] }
 0x158   : > { %12682 = vmatprep.subr.mxu0 %v14872_v13 }
 0x159   : > { %12588 = vmatmul.mubr.msk.f32.gmra.mrb[2].mxu0 %vm171_vm0, %v14877_v35 }
 0x15a   : > { %11968 = vmatmul.mubr.msk.f32.gmra.mrb[22].mxu1 %vm171_vm0, %v14489_v16  ;;  %12590 = vmatprep.mubr.msk.f32.mxu0 %vm171_vm0, %v14883_v56  ;;  %v14908_v16 = vld [vmem:[#allocation2 + $0xaa] sm:$0xff] }
 0x15b   : > { %11970 = vmatprep.mubr.msk.f32.mxu1 %vm171_vm0, %v14493_v17  ;;  %v14916_v17 = vld [vmem:[#allocation2 + $0xb2] sm:$0xff] }
 0x15d   : > { %12591 = vmatmul.mubr.msk.f32.gmra.mrb[4].mxu0 %vm171_vm0, %v14892_v42 }
 0x15e   : > { %11971 = vmatmul.mubr.msk.f32.gmra.mrb[24].mxu1 %vm171_vm0, %v14501_v30  ;;  %12593 = vmatprep.mubr.msk.f32.mxu0 %vm171_vm0, %v14896_v29  ;;  %v14920_v30 = vld [vmem:[#allocation2 + $0xc2] sm:$0xff] }
 0x15f   : > { %11973 = vmatprep.mubr.msk.f32.mxu1 %vm171_vm0, %v14505_v31  ;;  %v14928_v31 = vld [vmem:[#allocation2 + $0xca] sm:$0xff] }
 0x161   : > { %12594 = vmatmul.mubr.msk.f32.gmra.mrb[6].mxu0 %vm171_vm0, %v14904_v59 }
 0x162   : > { %11974 = vmatmul.mubr.msk.f32.gmra.mrb[26].mxu1 %vm171_vm0, %v14513_v34  ;;  %12596 = vmatprep.mubr.msk.f32.mxu0 %vm171_vm0, %v14908_v16  ;;  %v14932_v34 = vld [vmem:[#allocation2 + $0xda] sm:$0xff] }
 0x163   : > { %11976 = vmatprep.mubr.msk.f32.mxu1 %vm171_vm0, %v14517_v37  ;;  %v16401_v37 = vld [vmem:[#allocation58_spill] sm:$0xff] }
 0x165   : > { %12597 = vmatmul.mubr.msk.f32.gmra.mrb[8].mxu0 %vm171_vm0, %v14916_v17 }
 0x166   : > { %11977 = vmatmul.mubr.msk.f32.gmra.mrb[28].mxu1 %vm171_vm0, %v14525_v39  ;;  %12599 = vmatprep.mubr.msk.f32.mxu0 %vm171_vm0, %v14920_v30  ;;  %v14940_v39 = vld [vmem:[#allocation2 + $0xe2] sm:$0xff] }
 0x167   : > { %11979 = vmatprep.mubr.msk.f32.mxu1 %vm171_vm0, %v14529_v41  ;;  %v14948_v41 = vld [vmem:[%s16179_s1 + $0x38] sm:$0xff] }
 0x169   : > { %12600 = vmatmul.mubr.msk.f32.gmra.mrb[10].mxu0 %vm171_vm0, %v14928_v31 }
 0x16a   : > { %11980 = vmatmul.mubr.msk.f32.gmra.mrb[30].mxu1 %vm171_vm0, %v16401_v37  ;;  %12602 = vmatprep.mubr.msk.f32.mxu0 %vm171_vm0, %v14932_v34  ;;  %v15126_v37 = vld [vmem:[#allocation2 + $0xb3] sm:$0xff] }
 0x16b   : > { %11984 = vmatprep.mubr.msk.f32.mxu1 %vm171_vm0, %v2169_v12  ;;  %v15118_v12 = vld [vmem:[#allocation2 + $0x168] sm:$0xff] }
 0x16d   : > { %12603 = vmatmul.mubr.msk.f32.gmra.mrb[12].mxu0 %vm171_vm0, %v14940_v39 }
 0x16e   : > { %11985 = vmatmul.mubr.msk.f32.vlgmr.msra.gmra.mrb[0].mxu1 %vm171_vm0, %v2170_v19  ;;  %12605 = vmatprep.mubr.msk.f32.mxu0 %vm171_vm0, %v14554_v43  ;;  %v14962_v43 = vld [vmem:[#allocation2 + $0x60] sm:$0xff]  ;;  %v15130_v19 = vld [vmem:[#allocation2 + $0x170] sm:$0xff] }
 0x16f   : > { %11987 = vmatprep.mubr.msk.f32.mxu1 %vm171_vm0, %v2171_v21  ;;  %12033 = vmatpush3.msra.mxu1 %v14782_v10  ;;  %v14973_v10 = vld [vmem:[#allocation2 + $0x78] sm:$0xff]  ;;  %v15132_v21 = vld [vmem:[#allocation2 + $0xc3] sm:$0xff] }
 0x170   : > { %12082 = vmatprep.subr.mxu1 %v14948_v41 }
 0x171   : > { %12606 = vmatmul.mubr.msk.f32.gmra.mrb[14].mxu0 %vm171_vm0, %v14563_v61  ;;  %v14971_v61 = vld [vmem:[#allocation2 + $0x68] sm:$0xff] }
 0x172   : > { %11988 = vmatmul.mubr.msk.f32.gmra.mrb[2].mxu1 %vm171_vm0, %v2172_v23  ;;  %12608 = vmatprep.mubr.msk.f32.mxu0 %vm171_vm0, %v14565_v63  ;;  %v14983_v63 = vld [vmem:[#allocation2 + $0x80] sm:$0xff]  ;;  %v15140_v23 = vld [vmem:[#allocation2 + $0xcb] sm:$0xff] }
 0x173   : > { %11990 = vmatprep.mubr.msk.f32.mxu1 %vm171_vm0, %v2173_v24  ;;  %16402 = vst [vmem:[#allocation29_spill] sm:$0xff] %v15140_v23  ;;  %v15144_v24 = vld [vmem:[#allocation2 + $0xdb] sm:$0xff] }
 0x174   : > { %16403 = vst [vmem:[#allocation30_spill] sm:$0xff] %v15144_v24 }
 0x175   : > { %12609 = vmatmul.mubr.msk.f32.gmra.mrb[16].mxu0 %vm171_vm0, %v14581_v3  ;;  %v14985_v3 = vld [vmem:[#allocation2 + $0x90] sm:$0xff] }
 0x176   : > { %11991 = vmatmul.mubr.msk.f32.gmra.mrb[4].mxu1 %vm171_vm0, %v2174_v25  ;;  %12611 = vmatprep.mubr.msk.f32.mxu0 %vm171_vm0, %v14583_v5  ;;  %v14995_v5 = vld [vmem:[#allocation2 + $0x98] sm:$0xff] }
 0x177   : > { %11993 = vmatprep.mubr.msk.f32.mxu1 %vm171_vm0, %v14962_v43  ;;  %v2556_v25 = vld [vmem:[#allocation2 + $0x19] sm:$0xff] }
 0x179   : > { %12612 = vmatmul.mubr.msk.f32.gmra.mrb[18].mxu0 %vm171_vm0, %v14594_v28  ;;  %v14997_v28 = vld [vmem:[#allocation2 + $0xa8] sm:$0xff] }
 0x17a   : > { %11994 = vmatmul.mubr.msk.f32.gmra.mrb[6].mxu1 %vm171_vm0, %v14971_v61  ;;  %12614 = vmatprep.mubr.msk.f32.mxu0 %vm171_vm0, %v14596_v32  ;;  %v15007_v32 = vld [vmem:[#allocation2 + $0xb0] sm:$0xff] }
 0x17b   : > { %11996 = vmatprep.mubr.msk.f32.mxu1 %vm171_vm0, %v14973_v10 }
 0x17d   : > { %12615 = vmatmul.mubr.msk.f32.gmra.mrb[20].mxu0 %vm171_vm0, %v14606_v22  ;;  %v15009_v22 = vld [vmem:[#allocation2 + $0x182] sm:$0xff] }
 0x17e   : > { %11997 = vmatmul.mubr.msk.f32.gmra.mrb[8].mxu1 %vm171_vm0, %v14983_v63  ;;  %12617 = vmatprep.mubr.msk.f32.mxu0 %vm171_vm0, %v14608_v26  ;;  %v15011_v26 = vld [vmem:[#allocation2 + $0xc0] sm:$0xff] }
 0x17f   : > { %11999 = vmatprep.mubr.msk.f32.mxu1 %vm171_vm0, %v14985_v3 }
 0x181   : > { %12618 = vmatmul.mubr.msk.f32.gmra.mrb[22].mxu0 %vm171_vm0, %v14618_v9  ;;  %v15019_v9 = vld [vmem:[#allocation2 + $0x18a] sm:$0xff] }
 0x182   : > { %12000 = vmatmul.mubr.msk.f32.gmra.mrb[10].mxu1 %vm171_vm0, %v14995_v5  ;;  %12620 = vmatprep.mubr.msk.f32.mxu0 %vm171_vm0, %v14620_v15  ;;  %v15023_v15 = vld [vmem:[#allocation2 + $0xc8] sm:$0xff] }
 0x183   : > { %12002 = vmatprep.mubr.msk.f32.mxu1 %vm171_vm0, %v14997_v28 }
 0x185   : > { %12621 = vmatmul.mubr.msk.f32.gmra.mrb[24].mxu0 %vm171_vm0, %v14630_v0  ;;  %v6843_v0 = vld [vmem:[#allocation2 + $0x1a2] sm:$0xff] }
 0x186   : > { %12003 = vmatmul.mubr.msk.f32.gmra.mrb[12].mxu1 %vm171_vm0, %v15007_v32  ;;  %12623 = vmatprep.mubr.msk.f32.mxu0 %vm171_vm0, %v15009_v22 }
 0x187   : > { %12005 = vmatprep.mubr.msk.f32.mxu1 %vm171_vm0, %v15011_v26 }
 0x189   : > { %12624 = vmatmul.mubr.msk.f32.gmra.mrb[26].mxu0 %vm171_vm0, %v15019_v9 }
 0x18a   : > { %12006 = vmatmul.mubr.msk.f32.gmra.mrb[14].mxu1 %vm171_vm0, %v15023_v15  ;;  %12626 = vmatprep.mubr.msk.f32.mxu0 %vm171_vm0, %v6842_v27  ;;  %v15152_v27 = vld [vmem:[#allocation2 + $0xe3] sm:$0xff] }
 0x18b   : > { %12008 = vmatprep.mubr.msk.f32.mxu1 %vm171_vm0, %v15025_v20  ;;  %16404 = vst [vmem:[#allocation31_spill] sm:$0xff] %v15152_v27 }
 0x18d   : > { %12627 = vmatmul.mubr.msk.f32.gmra.mrb[28].mxu0 %vm171_vm0, %v6843_v0  ;;  %v2557_v0 = vld [vmem:[#allocation2 + $0x21] sm:$0xff] }
 0x18e   : > { %12009 = vmatmul.mubr.msk.f32.gmra.mrb[16].mxu1 %vm171_vm0, %v15034_v33  ;;  %12629 = vmatprep.mubr.msk.f32.mxu0 %vm171_vm0, %v6844_v36  ;;  %v15155_v36 = vld [vmem:[#allocation2 + $0xf3] sm:$0xff] }
 0x18f   : > { %12011 = vmatprep.mubr.msk.f32.mxu1 %vm171_vm0, %v15036_v49  ;;  %16405 = vst [vmem:[#allocation32_spill] sm:$0xff] %v15155_v36 }
 0x191   : > { %12630 = vmatmul.mubr.msk.f32.gmra.mrb[30].mxu0 %vm171_vm0, %v6845_v52  ;;  %v15162_v52 = vld [vmem:[%s16179_s1 + $0x40] sm:$0xff] }
 0x192   : > { %12012 = vmatmul.mubr.msk.f32.gmra.mrb[18].mxu1 %vm171_vm0, %v15044_v53  ;;  %12634 = vmatprep.mubr.msk.f32.mxu0 %vm171_vm0, %v15046_v60 }
 0x193   : > { %12014 = vmatprep.mubr.msk.f32.mxu1 %vm171_vm0, %v15048_v8 }
 0x195   : > { %12635 = vmatmul.mubr.msk.f32.vlgmr.msra.gmra.mrb[0].mxu0 %vm171_vm0, %v15055_v50 }
 0x196   : > { %12683 = vmatpush3.msra.mxu0 %v14872_v13  ;;  %12015 = vmatmul.mubr.msk.f32.gmra.mrb[20].mxu1 %vm171_vm0, %v15059_v14  ;;  %v15116_v13 = vld [vmem:[#allocation2 + $0xab] sm:$0xff] }
 0x197   : > { %12637 = vmatprep.mubr.msk.f32.mxu0 %vm171_vm0, %v15061_v57  ;;  %12017 = vmatprep.mubr.msk.f32.mxu1 %vm171_vm0, %v15063_v6 }
 0x198   : > { %12732 = vmatprep.subr.mxu0 %v15070_v54 }
 0x199   : > { %12638 = vmatmul.mubr.msk.f32.gmra.mrb[2].mxu0 %vm171_vm0, %v15075_v62 }
 0x19a   : > { %12018 = vmatmul.mubr.msk.f32.gmra.mrb[22].mxu1 %vm171_vm0, %v15081_v45  ;;  %12640 = vmatprep.mubr.msk.f32.mxu0 %vm171_vm0, %v15083_v47 }
 0x19b   : > { %12020 = vmatprep.mubr.msk.f32.mxu1 %vm171_vm0, %v15085_v55 }
 0x19d   : > { %12641 = vmatmul.mubr.msk.f32.gmra.mrb[4].mxu0 %vm171_vm0, %v15094_v1 }
 0x19e   : > { %12021 = vmatmul.mubr.msk.f32.gmra.mrb[24].mxu1 %vm171_vm0, %v15098_v4  ;;  %12643 = vmatprep.mubr.msk.f32.mxu0 %vm171_vm0, %v15100_v11 }
 0x19f   : > { %12023 = vmatprep.mubr.msk.f32.mxu1 %vm171_vm0, %v15102_v58 }
 0x1a1   : > { %12644 = vmatmul.mubr.msk.f32.gmra.mrb[6].mxu0 %vm171_vm0, %v15110_v2 }
 0x1a2   : > { %12024 = vmatmul.mubr.msk.f32.gmra.mrb[26].mxu1 %vm171_vm0, %v15114_v46  ;;  %12646 = vmatprep.mubr.msk.f32.mxu0 %vm171_vm0, %v15116_v13 }
 0x1a3   : > { %12026 = vmatprep.mubr.msk.f32.mxu1 %vm171_vm0, %v15118_v12 }
 0x1a5   : > { %12647 = vmatmul.mubr.msk.f32.gmra.mrb[8].mxu0 %vm171_vm0, %v15126_v37 }
 0x1a6   : > { %12027 = vmatmul.mubr.msk.f32.gmra.mrb[28].mxu1 %vm171_vm0, %v15130_v19  ;;  %12649 = vmatprep.mubr.msk.f32.mxu0 %vm171_vm0, %v15132_v21 }
 0x1a7   : > { %12029 = vmatprep.mubr.msk.f32.mxu1 %vm171_vm0, %v14691_v40  ;;  %v2558_v40 = vld [vmem:[#allocation2 + $0x31] sm:$0xff] }
 0x1a9   : > { %12650 = vmatmul.mubr.msk.f32.gmra.mrb[10].mxu0 %vm171_vm0, %v15140_v23  ;;  %v15184_v23 = vld [vmem:[#allocation2 + $0x61] sm:$0xff] }
 0x1aa   : > { %12030 = vmatmul.mubr.msk.f32.gmra.mrb[30].mxu1 %vm171_vm0, %v14699_v44  ;;  %12652 = vmatprep.mubr.msk.f32.mxu0 %vm171_vm0, %v15144_v24  ;;  %v15167_v44 = vld [vmem:[#allocation2 + $0xfb] sm:$0xff]  ;;  %v15170_v24 = vld [vmem:[#allocation2 + $0x10b] sm:$0xff]  ;;  %16409 = vst [vmem:[#allocation34_spill] sm:$0xff] %v15184_v23 }
 0x1ab   : > { %12034 = vmatprep.mubr.msk.f32.mxu1 %vm171_vm0, %v2556_v25  ;;  %v2559_v25 = vld [vmem:[#allocation2 + $0x39] sm:$0xff]  ;;  %16406 = vst [vmem:[#allocation3_spill] sm:$0xff] %v15170_v24 }
 0x1ad   : > { %12653 = vmatmul.mubr.msk.f32.gmra.mrb[12].mxu0 %vm171_vm0, %v15152_v27  ;;  %v2560_v27 = vld [vmem:[#allocation2 + $0x49] sm:$0xff] }
 0x1ae   : > { %12035 = vmatmul.mubr.msk.f32.vlgmr.msra.gmra.mrb[0].mxu1 %vm171_vm0, %v2557_v0  ;;  %12655 = vmatprep.mubr.msk.f32.mxu0 %vm171_vm0, %v15155_v36  ;;  %v15179_v0 = vld [vmem:[#allocation2 + $0x113] sm:$0xff]  ;;  %v15182_v36 = vld [vmem:[#allocation2 + $0x123] sm:$0xff] }
 0x1af   : > { %12037 = vmatprep.mubr.msk.f32.mxu1 %vm171_vm0, %v2558_v40  ;;  %12083 = vmatpush3.msra.mxu1 %v14948_v41  ;;  %16407 = vst [vmem:[#allocation33_spill] sm:$0xff] %v15179_v0  ;;  %v2561_v40 = vld [vmem:[#allocation2 + $0x51] sm:$0xff]  ;;  %16408 = vst [vmem:[#allocation4_spill] sm:$0xff] %v15182_v36 }
 0x1b0   : > { %12132 = vmatprep.subr.mxu1 %v15162_v52  ;;  %v15191_v41 = vld [vmem:[#allocation2 + $0x12b] sm:$0xff] }
 0x1b1   : > { %12656 = vmatmul.mubr.msk.f32.gmra.mrb[14].mxu0 %vm171_vm0, %v15167_v44  ;;  %16410 = vst [vmem:[#allocation5_spill] sm:$0xff] %v15191_v41 }
 0x1b2   : > { %12038 = vmatmul.mubr.msk.f32.gmra.mrb[2].mxu1 %vm171_vm0, %v2559_v25  ;;  %12658 = vmatprep.mubr.msk.f32.mxu0 %vm171_vm0, %v15170_v24  ;;  %v15195_v25 = vld [vmem:[#allocation2 + $0x69] sm:$0xff]  ;;  %v15199_v24 = vld [vmem:[#allocation2 + $0x79] sm:$0xff] }
 0x1b3   : > { %12040 = vmatprep.mubr.msk.f32.mxu1 %vm171_vm0, %v2560_v27  ;;  %16411 = vst [vmem:[#allocation35_spill] sm:$0xff] %v15195_v25  ;;  %v15197_v27 = vld [vmem:[#allocation2 + $0x13b] sm:$0xff]  ;;  %16413 = vst [vmem:[#allocation36_spill] sm:$0xff] %v15199_v24 }
 0x1b4   : > { %16412 = vst [vmem:[#allocation6_spill] sm:$0xff] %v15197_v27 }
 0x1b5   : > { %12659 = vmatmul.mubr.msk.f32.gmra.mrb[16].mxu0 %vm171_vm0, %v15179_v0  ;;  %v15213_v0 = vld [vmem:[#allocation2 + $0x153] sm:$0xff] }
 0x1b6   : > { %12041 = vmatmul.mubr.msk.f32.gmra.mrb[4].mxu1 %vm171_vm0, %v2561_v40  ;;  %12661 = vmatprep.mubr.msk.f32.mxu0 %vm171_vm0, %v15182_v36  ;;  %v15207_v40 = vld [vmem:[#allocation2 + $0x143] sm:$0xff]  ;;  %16416 = vst [vmem:[#allocation8_spill] sm:$0xff] %v15213_v0 }
 0x1b7   : > { %12043 = vmatprep.mubr.msk.f32.mxu1 %vm171_vm0, %v15184_v23  ;;  %16414 = vst [vmem:[#allocation7_spill] sm:$0xff] %v15207_v40  ;;  %v15211_v36 = vld [vmem:[#allocation2 + $0x81] sm:$0xff]  ;;  %v15215_v23 = vld [vmem:[#allocation2 + $0x91] sm:$0xff] }
 0x1b8   : > { %16415 = vst [vmem:[#allocation37_spill] sm:$0xff] %v15211_v36  ;;  %16417 = vst [vmem:[#allocation38_spill] sm:$0xff] %v15215_v23 }
 0x1b9   : > { %12662 = vmatmul.mubr.msk.f32.gmra.mrb[18].mxu0 %vm171_vm0, %v15191_v41  ;;  %v15227_v41 = vld [vmem:[#allocation2 + $0x99] sm:$0xff] }
 0x1ba   : > { %12044 = vmatmul.mubr.msk.f32.gmra.mrb[6].mxu1 %vm171_vm0, %v15195_v25  ;;  %12664 = vmatprep.mubr.msk.f32.mxu0 %vm171_vm0, %v15197_v27  ;;  %v15223_v27 = vld [vmem:[#allocation2 + $0x15b] sm:$0xff]  ;;  %16419 = vst [vmem:[#allocation39_spill] sm:$0xff] %v15227_v41  ;;  %v15231_v25 = vld [vmem:[#allocation2 + $0xa9] sm:$0xff] }
 0x1bb   : > { %12046 = vmatprep.mubr.msk.f32.mxu1 %vm171_vm0, %v15199_v24  ;;  %16418 = vst [vmem:[#allocation9_spill] sm:$0xff] %v15223_v27  ;;  %v15229_v24 = vld [vmem:[#allocation2 + $0x16b] sm:$0xff]  ;;  %16421 = vst [vmem:[#allocation40_spill] sm:$0xff] %v15231_v25 }
 0x1bc   : > { %16420 = vst [vmem:[#allocation10_spill] sm:$0xff] %v15229_v24 }
 0x1bd   : > { %12665 = vmatmul.mubr.msk.f32.gmra.mrb[20].mxu0 %vm171_vm0, %v15207_v40  ;;  %v15243_v40 = vld [vmem:[#allocation2 + $0xb1] sm:$0xff] }
 0x1be   : > { %12047 = vmatmul.mubr.msk.f32.gmra.mrb[8].mxu1 %vm171_vm0, %v15211_v36  ;;  %12667 = vmatprep.mubr.msk.f32.mxu0 %vm171_vm0, %v15213_v0  ;;  %v15239_v0 = vld [vmem:[#allocation2 + $0x173] sm:$0xff]  ;;  %16423 = vst [vmem:[#allocation41_spill] sm:$0xff] %v15243_v40  ;;  %v15247_v36 = vld [vmem:[#allocation2 + $0xc1] sm:$0xff] }
 0x1bf   : > { %12049 = vmatprep.mubr.msk.f32.mxu1 %vm171_vm0, %v15215_v23  ;;  %16422 = vst [vmem:[#allocation11_spill] sm:$0xff] %v15239_v0  ;;  %v15245_v23 = vld [vmem:[#allocation2 + $0x183] sm:$0xff]  ;;  %16425 = vst [vmem:[#allocation42_spill] sm:$0xff] %v15247_v36 }
 0x1c0   : > { %16424 = vst [vmem:[#allocation12_spill] sm:$0xff] %v15245_v23 }
 0x1c1   : > { %12668 = vmatmul.mubr.msk.f32.gmra.mrb[22].mxu0 %vm171_vm0, %v15223_v27  ;;  %v15259_v27 = vld [vmem:[#allocation2 + $0xc9] sm:$0xff] }
 0x1c2   : > { %12050 = vmatmul.mubr.msk.f32.gmra.mrb[10].mxu1 %vm171_vm0, %v15227_v41  ;;  %12670 = vmatprep.mubr.msk.f32.mxu0 %vm171_vm0, %v15229_v24  ;;  %v15255_v24 = vld [vmem:[#allocation2 + $0x18b] sm:$0xff]  ;;  %16427 = vst [vmem:[#allocation43_spill] sm:$0xff] %v15259_v27  ;;  %v15261_v41 = vld [vmem:[#allocation2 + $0xd9] sm:$0xff] }
 0x1c3   : > { %12052 = vmatprep.mubr.msk.f32.mxu1 %vm171_vm0, %v15231_v25  ;;  %16426 = vst [vmem:[#allocation13_spill] sm:$0xff] %v15255_v24  ;;  %v7229_v25 = vld [vmem:[#allocation2 + $0x19b] sm:$0xff]  ;;  %16428 = vst [vmem:[#allocation14_spill] sm:$0xff] %v15261_v41 }
 0x1c5   : > { %12671 = vmatmul.mubr.msk.f32.gmra.mrb[24].mxu0 %vm171_vm0, %v15239_v0  ;;  %v7230_v0 = vld [vmem:[#allocation2 + $0x1a3] sm:$0xff] }
 0x1c6   : > { %12053 = vmatmul.mubr.msk.f32.gmra.mrb[12].mxu1 %vm171_vm0, %v15243_v40  ;;  %12673 = vmatprep.mubr.msk.f32.mxu0 %vm171_vm0, %v15245_v23  ;;  %v15270_v23 = vld [vmem:[#allocation2 + $0xe1] sm:$0xff]  ;;  %v15272_v40 = vld [vmem:[#allocation2 + $0xf1] sm:$0xff] }
 0x1c7   : > { %12055 = vmatprep.mubr.msk.f32.mxu1 %vm171_vm0, %v15247_v36  ;;  %16429 = vst [vmem:[#allocation44_spill] sm:$0xff] %v15270_v23  ;;  %v7231_v36 = vld [vmem:[#allocation2 + $0x1b3] sm:$0xff]  ;;  %16430 = vst [vmem:[#allocation15_spill] sm:$0xff] %v15272_v40 }
 0x1c9   : > { %12674 = vmatmul.mubr.msk.f32.gmra.mrb[26].mxu0 %vm171_vm0, %v15255_v24  ;;  %v7232_v24 = vld [vmem:[#allocation2 + $0x1bb] sm:$0xff] }
 0x1ca   : > { %12056 = vmatmul.mubr.msk.f32.gmra.mrb[14].mxu1 %vm171_vm0, %v15259_v27  ;;  %12676 = vmatprep.mubr.msk.f32.mxu0 %vm171_vm0, %v7229_v25  ;;  %v15280_v25 = vld [vmem:[#allocation2 + $0xf9] sm:$0xff]  ;;  %v15282_v27 = vld [vmem:[#allocation2 + $0x4c] sm:$0xff] }
 0x1cb   : > { %12058 = vmatprep.mubr.msk.f32.mxu1 %vm171_vm0, %v15261_v41  ;;  %16431 = vst [vmem:[#allocation16_spill] sm:$0xff] %v15280_v25  ;;  %16432 = vst [vmem:[#allocation17_spill] sm:$0xff] %v15282_v27  ;;  %v15284_v41 = vld [vmem:[#allocation2 + $0x109] sm:$0xff] }
 0x1cc   : > { %16433 = vst [vmem:[#allocation18_spill] sm:$0xff] %v15284_v41 }
 0x1cd   : > { %12677 = vmatmul.mubr.msk.f32.gmra.mrb[28].mxu0 %vm171_vm0, %v7230_v0  ;;  %v15291_v0 = vld [vmem:[#allocation2 + $0x54] sm:$0xff] }
 0x1ce   : > { %12059 = vmatmul.mubr.msk.f32.gmra.mrb[16].mxu1 %vm171_vm0, %v15270_v23  ;;  %12679 = vmatprep.mubr.msk.f32.mxu0 %vm171_vm0, %v7231_v36  ;;  %16434 = vst [vmem:[#allocation19_spill] sm:$0xff] %v15291_v0  ;;  %v15295_v36 = vld [vmem:[#allocation2 + $0x111] sm:$0xff]  ;;  %v15299_v23 = vld [vmem:[#allocation2 + $0x121] sm:$0xff] }
 0x1cf   : > { %12061 = vmatprep.mubr.msk.f32.mxu1 %vm171_vm0, %v15272_v40  ;;  %16435 = vst [vmem:[#allocation45_spill] sm:$0xff] %v15295_v36  ;;  %v15297_v40 = vld [vmem:[#allocation2 + $0x64] sm:$0xff]  ;;  %16437 = vst [vmem:[#allocation46_spill] sm:$0xff] %v15299_v23 }
 0x1d0   : > { %16436 = vst [vmem:[#allocation20_spill] sm:$0xff] %v15297_v40 }
 0x1d1   : > { %12680 = vmatmul.mubr.msk.f32.gmra.mrb[30].mxu0 %vm171_vm0, %v7232_v24  ;;  %v15306_v24 = vld [vmem:[%s16179_s1 + $0xa8] sm:$0xff] }
 0x1d2   : > { %12062 = vmatmul.mubr.msk.f32.gmra.mrb[18].mxu1 %vm171_vm0, %v15280_v25  ;;  %12684 = vmatprep.mubr.msk.f32.mxu0 %vm171_vm0, %v15282_v27  ;;  %v15311_v27 = vld [vmem:[#allocation2 + $0x6c] sm:$0xff]  ;;  %v15321_v25 = vld [vmem:[#allocation2 + $0x139] sm:$0xff] }
 0x1d3   : > { %12064 = vmatprep.mubr.msk.f32.mxu1 %vm171_vm0, %v15284_v41  ;;  %16438 = vst [vmem:[#allocation21_spill] sm:$0xff] %v15311_v27  ;;  %v15317_v41 = vld [vmem:[#allocation2 + $0x129] sm:$0xff]  ;;  %16441 = vst [vmem:[#allocation48_spill] sm:$0xff] %v15321_v25 }
 0x1d4   : > { %16439 = vst [vmem:[#allocation47_spill] sm:$0xff] %v15317_v41 }
 0x1d5   : > { %12685 = vmatmul.mubr.msk.f32.vlgmr.msra.gmra.mrb[0].mxu0 %vm171_vm0, %v15291_v0  ;;  %v15319_v0 = vld [vmem:[#allocation2 + $0x7c] sm:$0xff] }
 0x1d6   : > { %12733 = vmatpush3.msra.mxu0 %v15070_v54  ;;  %12065 = vmatmul.mubr.msk.f32.gmra.mrb[20].mxu1 %vm171_vm0, %v15295_v36  ;;  %16440 = vst [vmem:[#allocation22_spill] sm:$0xff] %v15319_v0  ;;  %v15330_v54 = vld [vmem:[#allocation2 + $0x84] sm:$0xff]  ;;  %v15338_v36 = vld [vmem:[#allocation2 + $0x151] sm:$0xff] }
 0x1d7   : > { %12687 = vmatprep.mubr.msk.f32.mxu0 %vm171_vm0, %v15297_v40  ;;  %12067 = vmatprep.mubr.msk.f32.mxu1 %vm171_vm0, %v15299_v23  ;;  %16442 = vst [vmem:[#allocation23_spill] sm:$0xff] %v15330_v54  ;;  %v15334_v40 = vld [vmem:[#allocation2 + $0x141] sm:$0xff]  ;;  %v15336_v23 = vld [vmem:[#allocation2 + $0x94] sm:$0xff]  ;;  %16444 = vst [vmem:[#allocation24_spill] sm:$0xff] %v15338_v36 }
 0x1d8   : > { %12782 = vmatprep.subr.mxu0 %v15306_v24  ;;  %16443 = vst [vmem:[#allocation49_spill] sm:$0xff] %v15336_v23 }
 0x1d9   : > { %12688 = vmatmul.mubr.msk.f32.gmra.mrb[2].mxu0 %vm171_vm0, %v15311_v27  ;;  %v15350_v27 = vld [vmem:[#allocation2 + $0x159] sm:$0xff] }
 0x1da   : > { %12068 = vmatmul.mubr.msk.f32.gmra.mrb[22].mxu1 %vm171_vm0, %v15317_v41  ;;  %12690 = vmatprep.mubr.msk.f32.mxu0 %vm171_vm0, %v15319_v0  ;;  %v15346_v0 = vld [vmem:[#allocation2 + $0x9c] sm:$0xff]  ;;  %v15354_v41 = vld [vmem:[#allocation2 + $0x169] sm:$0xff] }
 0x1db   : > { %12070 = vmatprep.mubr.msk.f32.mxu1 %vm171_vm0, %v15321_v25  ;;  %16445 = vst [vmem:[#allocation50_spill] sm:$0xff] %v15346_v0  ;;  %v15352_v25 = vld [vmem:[#allocation2 + $0xac] sm:$0xff]  ;;  %16447 = vst [vmem:[#allocation51_spill] sm:$0xff] %v15354_v41 }
 0x1dc   : > { %16446 = vst [vmem:[#allocation25_spill] sm:$0xff] %v15352_v25 }
 0x1dd   : > { %12691 = vmatmul.mubr.msk.f32.gmra.mrb[4].mxu0 %vm171_vm0, %v15330_v54  ;;  %v15366_v54 = vld [vmem:[#allocation2 + $0x171] sm:$0xff] }
 0x1de   : > { %12071 = vmatmul.mubr.msk.f32.gmra.mrb[24].mxu1 %vm171_vm0, %v15334_v40  ;;  %12693 = vmatprep.mubr.msk.f32.mxu0 %vm171_vm0, %v15336_v23  ;;  %v15362_v23 = vld [vmem:[#allocation2 + $0xb4] sm:$0xff]  ;;  %16449 = vst [vmem:[#allocation52_spill] sm:$0xff] %v15366_v54 }
 0x1df   : > { %12073 = vmatprep.mubr.msk.f32.mxu1 %vm171_vm0, %v15338_v36  ;;  %16448 = vst [vmem:[#allocation26_spill] sm:$0xff] %v15362_v23  ;;  %v15368_v36 = vld [vmem:[#allocation2 + $0xc4] sm:$0xff] }
 0x1e0   : > { %16450 = vst [vmem:[#allocation27_spill] sm:$0xff] %v15368_v36 }
 0x1e1   : > { %12694 = vmatmul.mubr.msk.f32.gmra.mrb[6].mxu0 %vm171_vm0, %v15346_v0  ;;  %v15376_v0 = vld [vmem:[#allocation2 + $0xcc] sm:$0xff] }
 0x1e2   : > { %12074 = vmatmul.mubr.msk.f32.gmra.mrb[26].mxu1 %vm171_vm0, %v15350_v27  ;;  %12696 = vmatprep.mubr.msk.f32.mxu0 %vm171_vm0, %v15352_v25  ;;  %16451 = vst [vmem:[#allocation53_spill] sm:$0xff] %v15376_v0  ;;  %v15380_v25 = vld [vmem:[#allocation2 + $0xdc] sm:$0xff] }
 0x1e3   : > { %12076 = vmatprep.mubr.msk.f32.mxu1 %vm171_vm0, %v15354_v41  ;;  %16452 = vst [vmem:[#allocation28_spill] sm:$0xff] %v15380_v25  ;;  %v2943_v41 = vld [vmem:[#allocation2 + $0x1a] sm:$0xff] }
 0x1e5   : > { %12697 = vmatmul.mubr.msk.f32.gmra.mrb[8].mxu0 %vm171_vm0, %v15362_v23  ;;  %v15388_v23 = vld [vmem:[#allocation2 + $0xe4] sm:$0xff] }
 0x1e6   : > { %12077 = vmatmul.mubr.msk.f32.gmra.mrb[28].mxu1 %vm171_vm0, %v15366_v54  ;;  %12699 = vmatprep.mubr.msk.f32.mxu0 %vm171_vm0, %v15368_v36  ;;  %v2944_v36 = vld [vmem:[#allocation2 + $0x22] sm:$0xff]  ;;  %v15391_v54 = vld [vmem:[#allocation2 + $0xf4] sm:$0xff] }
 0x1e7   : > { %12079 = vmatprep.mubr.msk.f32.mxu1 %vm171_vm0, %v14829_v18  ;;  %v2945_v18 = vld [vmem:[#allocation2 + $0x32] sm:$0xff] }
 0x1e9   : > { %12700 = vmatmul.mubr.msk.f32.gmra.mrb[10].mxu0 %vm171_vm0, %v15376_v0  ;;  %v15398_v0 = vld [vmem:[%s16179_s1 + $0x48] sm:$0xff] }
 0x1ea   : > { %12080 = vmatmul.mubr.msk.f32.gmra.mrb[30].mxu1 %vm171_vm0, %v14837_v51  ;;  %12702 = vmatprep.mubr.msk.f32.mxu0 %vm171_vm0, %v15380_v25  ;;  %v15403_v51 = vld [vmem:[#allocation2 + $0xfc] sm:$0xff]  ;;  %v15406_v25 = vld [vmem:[#allocation2 + $0x10c] sm:$0xff] }
 0x1eb   : > { %12084 = vmatprep.mubr.msk.f32.mxu1 %vm171_vm0, %v2943_v41  ;;  %v2946_v41 = vld [vmem:[#allocation2 + $0x3a] sm:$0xff] }
 0x1ed   : > { %12703 = vmatmul.mubr.msk.f32.gmra.mrb[12].mxu0 %vm171_vm0, %v15388_v23 }
 0x1ee   : > { %12085 = vmatmul.mubr.msk.f32.vlgmr.msra.gmra.mrb[0].mxu1 %vm171_vm0, %v2944_v36  ;;  %12705 = vmatprep.mubr.msk.f32.mxu0 %vm171_vm0, %v15391_v54  ;;  %v15415_v36 = vld [vmem:[#allocation2 + $0x114] sm:$0xff] }
 0x1ef   : > { %12087 = vmatprep.mubr.msk.f32.mxu1 %vm171_vm0, %v2945_v18  ;;  %12133 = vmatpush3.msra.mxu1 %v15162_v52  ;;  %v15419_v18 = vld [vmem:[#allocation2 + $0x124] sm:$0xff]  ;;  %v15427_v52 = vld [vmem:[#allocation2 + $0x12c] sm:$0xff] }
 0x1f0   : > { %12182 = vmatprep.subr.mxu1 %v15398_v0 }
 0x1f1   : > { %12706 = vmatmul.mubr.msk.f32.gmra.mrb[14].mxu0 %vm171_vm0, %v15403_v51 }
 0x1f2   : > { %12088 = vmatmul.mubr.msk.f32.gmra.mrb[2].mxu1 %vm171_vm0, %v2946_v41  ;;  %12708 = vmatprep.mubr.msk.f32.mxu0 %vm171_vm0, %v15406_v25  ;;  %v15431_v41 = vld [vmem:[#allocation2 + $0x13c] sm:$0xff] }
 0x1f3   : > { %12090 = vmatprep.mubr.msk.f32.mxu1 %vm171_vm0, %v14854_v48  ;;  %v15439_v48 = vld [vmem:[#allocation2 + $0x144] sm:$0xff] }
 0x1f5   : > { %12709 = vmatmul.mubr.msk.f32.gmra.mrb[16].mxu0 %vm171_vm0, %v15415_v36 }
 0x1f6   : > { %12091 = vmatmul.mubr.msk.f32.gmra.mrb[4].mxu1 %vm171_vm0, %v14861_v7  ;;  %12711 = vmatprep.mubr.msk.f32.mxu0 %vm171_vm0, %v15419_v18  ;;  %v15443_v7 = vld [vmem:[#allocation2 + $0x154] sm:$0xff] }
 0x1f7   : > { %12093 = vmatprep.mubr.msk.f32.mxu1 %vm171_vm0, %v14865_v38  ;;  %v15451_v38 = vld [vmem:[#allocation2 + $0x15c] sm:$0xff] }
 0x1f9   : > { %12712 = vmatmul.mubr.msk.f32.gmra.mrb[18].mxu0 %vm171_vm0, %v15427_v52 }
 0x1fa   : > { %12094 = vmatmul.mubr.msk.f32.gmra.mrb[6].mxu1 %vm171_vm0, %v14877_v35  ;;  %12714 = vmatprep.mubr.msk.f32.mxu0 %vm171_vm0, %v15431_v41  ;;  %v15455_v35 = vld [vmem:[#allocation2 + $0x16c] sm:$0xff] }
 0x1fb   : > { %12096 = vmatprep.mubr.msk.f32.mxu1 %vm171_vm0, %v14883_v56  ;;  %v15463_v56 = vld [vmem:[#allocation2 + $0x174] sm:$0xff] }
 0x1fd   : > { %12715 = vmatmul.mubr.msk.f32.gmra.mrb[20].mxu0 %vm171_vm0, %v15439_v48 }
 0x1fe   : > { %12097 = vmatmul.mubr.msk.f32.gmra.mrb[8].mxu1 %vm171_vm0, %v14892_v42  ;;  %12717 = vmatprep.mubr.msk.f32.mxu0 %vm171_vm0, %v15443_v7  ;;  %v15467_v42 = vld [vmem:[#allocation2 + $0x184] sm:$0xff] }
 0x1ff   : > { %12099 = vmatprep.mubr.msk.f32.mxu1 %vm171_vm0, %v14896_v29  ;;  %16453 = vst [vmem:[#allocation54_spill] sm:$0xff] %v15467_v42  ;;  %v15475_v29 = vld [vmem:[#allocation2 + $0x18c] sm:$0xff] }
 0x201   : > { %12718 = vmatmul.mubr.msk.f32.gmra.mrb[22].mxu0 %vm171_vm0, %v15451_v38 }
 0x202   : > { %12100 = vmatmul.mubr.msk.f32.gmra.mrb[10].mxu1 %vm171_vm0, %v14904_v59  ;;  %12720 = vmatprep.mubr.msk.f32.mxu0 %vm171_vm0, %v15455_v35  ;;  %v7616_v59 = vld [vmem:[#allocation2 + $0x19c] sm:$0xff] }
 0x203   : > { %12102 = vmatprep.mubr.msk.f32.mxu1 %vm171_vm0, %v14908_v16  ;;  %v7617_v16 = vld [vmem:[#allocation2 + $0x1a4] sm:$0xff] }
 0x205   : > { %12721 = vmatmul.mubr.msk.f32.gmra.mrb[24].mxu0 %vm171_vm0, %v15463_v56 }
 0x206   : > { %12103 = vmatmul.mubr.msk.f32.gmra.mrb[12].mxu1 %vm171_vm0, %v14916_v17  ;;  %12723 = vmatprep.mubr.msk.f32.mxu0 %vm171_vm0, %v15467_v42  ;;  %v7618_v17 = vld [vmem:[#allocation2 + $0x1b4] sm:$0xff] }
 0x207   : > { %12105 = vmatprep.mubr.msk.f32.mxu1 %vm171_vm0, %v14920_v30  ;;  %v15486_v42 = vld [vmem:[#allocation2 + $0xf2] sm:$0xff]  ;;  %v7619_v30 = vld [vmem:[#allocation2 + $0x1bc] sm:$0xff] }
 0x209   : > { %12724 = vmatmul.mubr.msk.f32.gmra.mrb[26].mxu0 %vm171_vm0, %v15475_v29 }
 0x20a   : > { %12106 = vmatmul.mubr.msk.f32.gmra.mrb[14].mxu1 %vm171_vm0, %v14928_v31  ;;  %12726 = vmatprep.mubr.msk.f32.mxu0 %vm171_vm0, %v7616_v59  ;;  %v15494_v31 = vld [vmem:[#allocation2 + $0xfa] sm:$0xff]  ;;  %v15496_v59 = vld [vmem:[#allocation2 + $0x10a] sm:$0xff] }
 0x20b   : > { %12108 = vmatprep.mubr.msk.f32.mxu1 %vm171_vm0, %v14932_v34  ;;  %v15505_v34 = vld [vmem:[#allocation2 + $0x112] sm:$0xff] }
 0x20d   : > { %12727 = vmatmul.mubr.msk.f32.gmra.mrb[28].mxu0 %vm171_vm0, %v7617_v16  ;;  %v15514_v16 = vld [vmem:[%s16179_s1 + $0xb0] sm:$0xff] }
 0x20e   : > { %12109 = vmatmul.mubr.msk.f32.gmra.mrb[16].mxu1 %vm171_vm0, %v14940_v39  ;;  %12729 = vmatprep.mubr.msk.f32.mxu0 %vm171_vm0, %v7618_v17  ;;  %v15507_v39 = vld [vmem:[#allocation2 + $0x122] sm:$0xff]  ;;  %v15525_v17 = vld [vmem:[#allocation2 + $0x13a] sm:$0xff] }
 0x20f   : > { %12111 = vmatprep.mubr.msk.f32.mxu1 %vm171_vm0, %v15486_v42 }
 0x211   : > { %12730 = vmatmul.mubr.msk.f32.gmra.mrb[30].mxu0 %vm171_vm0, %v7619_v30  ;;  %v16474_v30 = vld [vmem:[#allocation42_spill] sm:$0xff] }
 0x212   : > { %12112 = vmatmul.mubr.msk.f32.gmra.mrb[18].mxu1 %vm171_vm0, %v15494_v31  ;;  %12734 = vmatprep.mubr.msk.f32.mxu0 %vm171_vm0, %v14962_v43  ;;  %v15523_v43 = vld [vmem:[#allocation2 + $0x12a] sm:$0xff] }
 0x213   : > { %12114 = vmatprep.mubr.msk.f32.mxu1 %vm171_vm0, %v15496_v59 }
 0x215   : > { %12735 = vmatmul.mubr.msk.f32.vlgmr.msra.gmra.mrb[0].mxu0 %vm171_vm0, %v14971_v61  ;;  %v15536_v61 = vld [vmem:[#allocation2 + $0x142] sm:$0xff] }
 0x216   : > { %12783 = vmatpush3.msra.mxu0 %v15306_v24  ;;  %12115 = vmatmul.mubr.msk.f32.gmra.mrb[20].mxu1 %vm171_vm0, %v15505_v34  ;;  %v16473_v24 = vld [vmem:[#allocation9_spill] sm:$0xff] }
 0x217   : > { %12737 = vmatprep.mubr.msk.f32.mxu0 %vm171_vm0, %v14973_v10  ;;  %12117 = vmatprep.mubr.msk.f32.mxu1 %vm171_vm0, %v15507_v39  ;;  %v15538_v10 = vld [vmem:[#allocation2 + $0x152] sm:$0xff] }
 0x218   : > { %12832 = vmatprep.subr.mxu0 %v15514_v16 }
 0x219   : > { %12738 = vmatmul.mubr.msk.f32.gmra.mrb[2].mxu0 %vm171_vm0, %v14983_v63  ;;  %v15548_v63 = vld [vmem:[#allocation2 + $0x15a] sm:$0xff] }
 0x21a   : > { %12118 = vmatmul.mubr.msk.f32.gmra.mrb[22].mxu1 %vm171_vm0, %v15523_v43  ;;  %12740 = vmatprep.mubr.msk.f32.mxu0 %vm171_vm0, %v14985_v3  ;;  %v15550_v3 = vld [vmem:[#allocation2 + $0x16a] sm:$0xff] }
 0x21b   : > { %12120 = vmatprep.mubr.msk.f32.mxu1 %vm171_vm0, %v15525_v17 }
 0x21d   : > { %12741 = vmatmul.mubr.msk.f32.gmra.mrb[4].mxu0 %vm171_vm0, %v14995_v5  ;;  %v15560_v5 = vld [vmem:[#allocation2 + $0x172] sm:$0xff] }
 0x21e   : > { %12121 = vmatmul.mubr.msk.f32.gmra.mrb[24].mxu1 %vm171_vm0, %v15536_v61  ;;  %12743 = vmatprep.mubr.msk.f32.mxu0 %vm171_vm0, %v14997_v28  ;;  %v3330_v28 = vld [vmem:[#allocation2 + $0x1b] sm:$0xff] }
 0x21f   : > { %12123 = vmatprep.mubr.msk.f32.mxu1 %vm171_vm0, %v15538_v10 }
 0x221   : > { %12744 = vmatmul.mubr.msk.f32.gmra.mrb[6].mxu0 %vm171_vm0, %v15007_v32  ;;  %v3331_v32 = vld [vmem:[#allocation2 + $0x23] sm:$0xff] }
 0x222   : > { %12124 = vmatmul.mubr.msk.f32.gmra.mrb[26].mxu1 %vm171_vm0, %v15548_v63  ;;  %12746 = vmatprep.mubr.msk.f32.mxu0 %vm171_vm0, %v15011_v26  ;;  %v3332_v26 = vld [vmem:[#allocation2 + $0x33] sm:$0xff] }
 0x223   : > { %12126 = vmatprep.mubr.msk.f32.mxu1 %vm171_vm0, %v15550_v3 }
 0x225   : > { %12747 = vmatmul.mubr.msk.f32.gmra.mrb[8].mxu0 %vm171_vm0, %v15023_v15  ;;  %v15621_v15 = vld [vmem:[#allocation2 + $0x180] sm:$0xff] }
 0x226   : > { %12127 = vmatmul.mubr.msk.f32.gmra.mrb[28].mxu1 %vm171_vm0, %v15560_v5  ;;  %12749 = vmatprep.mubr.msk.f32.mxu0 %vm171_vm0, %v15025_v20  ;;  %v15629_v20 = vld [vmem:[#allocation2 + $0x188] sm:$0xff] }
 0x227   : > { %12129 = vmatprep.mubr.msk.f32.mxu1 %vm171_vm0, %v15009_v22  ;;  %v15582_v22 = vld [vmem:[%s16179_s1 + $0x50] sm:$0xff] }
 0x229   : > { %12750 = vmatmul.mubr.msk.f32.gmra.mrb[10].mxu0 %vm171_vm0, %v15034_v33  ;;  %v15633_v33 = vld [vmem:[#allocation2 + $0x198] sm:$0xff] }
 0x22a   : > { %12130 = vmatmul.mubr.msk.f32.gmra.mrb[30].mxu1 %vm171_vm0, %v15019_v9  ;;  %12752 = vmatprep.mubr.msk.f32.mxu0 %vm171_vm0, %v15036_v49  ;;  %v3333_v9 = vld [vmem:[#allocation2 + $0x3b] sm:$0xff] }
 0x22b   : > { %12134 = vmatprep.mubr.msk.f32.mxu1 %vm171_vm0, %v3330_v28  ;;  %v15641_v49 = vld [vmem:[#allocation2 + $0x1a0] sm:$0xff] }
 0x22c   : > { %v16476_v28 = vld [vmem:[#allocation43_spill] sm:$0xff] }
 0x22d   : > { %12753 = vmatmul.mubr.msk.f32.gmra.mrb[12].mxu0 %vm171_vm0, %v15044_v53  ;;  %v8004_v53 = vld [vmem:[#allocation2 + $0x1b0] sm:$0xff] }
 0x22e   : > { %12135 = vmatmul.mubr.msk.f32.vlgmr.msra.gmra.mrb[0].mxu1 %vm171_vm0, %v3331_v32  ;;  %12755 = vmatprep.mubr.msk.f32.mxu0 %vm171_vm0, %v15048_v8  ;;  %v8005_v8 = vld [vmem:[#allocation2 + $0x1b8] sm:$0xff]  ;;  %v16477_v32 = vld [vmem:[#allocation11_spill] sm:$0xff] }
 0x22f   : > { %12137 = vmatprep.mubr.msk.f32.mxu1 %vm171_vm0, %v3332_v26  ;;  %12183 = vmatpush3.msra.mxu1 %v15398_v0  ;;  %v16472_v0 = vld [vmem:[#allocation41_spill] sm:$0xff]  ;;  %v16478_v26 = vld [vmem:[#allocation14_spill] sm:$0xff] }
 0x230   : > { %12232 = vmatprep.subr.mxu1 %v15582_v22 }
 0x231   : > { %12756 = vmatmul.mubr.msk.f32.gmra.mrb[14].mxu0 %vm171_vm0, %v15059_v14  ;;  %v8006_v14 = vld [vmem:[#allocation2 + $0x1c8] sm:$0xff] }
 0x232   : > { %12138 = vmatmul.mubr.msk.f32.gmra.mrb[2].mxu1 %vm171_vm0, %v3333_v9  ;;  %12758 = vmatprep.mubr.msk.f32.mxu0 %vm171_vm0, %v15063_v6  ;;  %v8007_v6 = vld [vmem:[#allocation2 + $0x1d0] sm:$0xff]  ;;  %v16479_v9 = vld [vmem:[#allocation12_spill] sm:$0xff] }
 0x233   : > { %12140 = vmatprep.mubr.msk.f32.mxu1 %vm171_vm0, %v15046_v60  ;;  %v16454_v60 = vld [vmem:[#allocation29_spill] sm:$0xff] }
 0x235   : > { %12759 = vmatmul.mubr.msk.f32.gmra.mrb[16].mxu0 %vm171_vm0, %v15081_v45  ;;  %v16458_v45 = vld [vmem:[#allocation34_spill] sm:$0xff] }
 0x236   : > { %12141 = vmatmul.mubr.msk.f32.gmra.mrb[4].mxu1 %vm171_vm0, %v15055_v50  ;;  %12761 = vmatprep.mubr.msk.f32.mxu0 %vm171_vm0, %v15085_v55  ;;  %v16455_v50 = vld [vmem:[#allocation30_spill] sm:$0xff]  ;;  %v16460_v55 = vld [vmem:[#allocation35_spill] sm:$0xff] }
 0x237   : > { %12143 = vmatprep.mubr.msk.f32.mxu1 %vm171_vm0, %v15061_v57  ;;  %v16456_v57 = vld [vmem:[#allocation31_spill] sm:$0xff] }
 0x239   : > { %12762 = vmatmul.mubr.msk.f32.gmra.mrb[18].mxu0 %vm171_vm0, %v15098_v4  ;;  %v16461_v4 = vld [vmem:[#allocation33_spill] sm:$0xff] }
 0x23a   : > { %12144 = vmatmul.mubr.msk.f32.gmra.mrb[6].mxu1 %vm171_vm0, %v15075_v62  ;;  %12764 = vmatprep.mubr.msk.f32.mxu0 %vm171_vm0, %v15102_v58  ;;  %v16457_v62 = vld [vmem:[#allocation32_spill] sm:$0xff] }
 0x23b   : > { %12146 = vmatprep.mubr.msk.f32.mxu1 %vm171_vm0, %v15083_v47  ;;  %v16459_v47 = vld [vmem:[#allocation3_spill] sm:$0xff]  ;;  %v16463_v58 = vld [vmem:[#allocation4_spill] sm:$0xff] }
 0x23d   : > { %12765 = vmatmul.mubr.msk.f32.gmra.mrb[20].mxu0 %vm171_vm0, %v15114_v46  ;;  %v16465_v46 = vld [vmem:[#allocation5_spill] sm:$0xff] }
 0x23e   : > { %12147 = vmatmul.mubr.msk.f32.gmra.mrb[8].mxu1 %vm171_vm0, %v15094_v1  ;;  %12767 = vmatprep.mubr.msk.f32.mxu0 %vm171_vm0, %v15118_v12  ;;  %v15670_v1 = vld [vmem:[%s16179_s1 + $0xb8] sm:$0xff] }
 0x23f   : > { %12149 = vmatprep.mubr.msk.f32.mxu1 %vm171_vm0, %v15100_v11  ;;  %v16462_v11 = vld [vmem:[#allocation36_spill] sm:$0xff]  ;;  %v16467_v12 = vld [vmem:[#allocation6_spill] sm:$0xff] }
 0x241   : > { %12768 = vmatmul.mubr.msk.f32.gmra.mrb[22].mxu0 %vm171_vm0, %v15130_v19  ;;  %v16469_v19 = vld [vmem:[#allocation7_spill] sm:$0xff] }
 0x242   : > { %12150 = vmatmul.mubr.msk.f32.gmra.mrb[10].mxu1 %vm171_vm0, %v15110_v2  ;;  %12770 = vmatprep.mubr.msk.f32.mxu0 %vm171_vm0, %v15621_v15  ;;  %v16464_v2 = vld [vmem:[#allocation37_spill] sm:$0xff] }
 0x243   : > { %12152 = vmatprep.mubr.msk.f32.mxu1 %vm171_vm0, %v15116_v13  ;;  %v16466_v13 = vld [vmem:[#allocation38_spill] sm:$0xff] }
 0x245   : > { %12771 = vmatmul.mubr.msk.f32.gmra.mrb[24].mxu0 %vm171_vm0, %v15629_v20 }
 0x246   : > { %12153 = vmatmul.mubr.msk.f32.gmra.mrb[12].mxu1 %vm171_vm0, %v15126_v37  ;;  %12773 = vmatprep.mubr.msk.f32.mxu0 %vm171_vm0, %v15633_v33  ;;  %v16468_v37 = vld [vmem:[#allocation39_spill] sm:$0xff] }
 0x247   : > { %12155 = vmatprep.mubr.msk.f32.mxu1 %vm171_vm0, %v15132_v21  ;;  %v16470_v21 = vld [vmem:[#allocation40_spill] sm:$0xff] }
 0x249   : > { %12774 = vmatmul.mubr.msk.f32.gmra.mrb[26].mxu0 %vm171_vm0, %v15641_v49 }
 0x24a   : > { %12156 = vmatmul.mubr.msk.f32.gmra.mrb[14].mxu1 %vm171_vm0, %v16454_v60  ;;  %12776 = vmatprep.mubr.msk.f32.mxu0 %vm171_vm0, %v8004_v53  ;;  %v3717_v53 = vld [vmem:[#allocation2 + $0x1c] sm:$0xff]  ;;  %v16480_v60 = vld [vmem:[#allocation44_spill] sm:$0xff] }
 0x24b   : > { %12158 = vmatprep.mubr.msk.f32.mxu1 %vm171_vm0, %v16455_v50  ;;  %v16482_v50 = vld [vmem:[#allocation15_spill] sm:$0xff] }
 0x24d   : > { %12777 = vmatmul.mubr.msk.f32.gmra.mrb[28].mxu0 %vm171_vm0, %v8005_v8  ;;  %v16481_v8 = vld [vmem:[#allocation13_spill] sm:$0xff] }
 0x24e   : > { %12159 = vmatmul.mubr.msk.f32.gmra.mrb[16].mxu1 %vm171_vm0, %v16456_v57  ;;  %12779 = vmatprep.mubr.msk.f32.mxu0 %vm171_vm0, %v8006_v14  ;;  %v3718_v14 = vld [vmem:[#allocation2 + $0x24] sm:$0xff]  ;;  %v3719_v57 = vld [vmem:[#allocation2 + $0x34] sm:$0xff] }
 0x24f   : > { %12161 = vmatprep.mubr.msk.f32.mxu1 %vm171_vm0, %v16457_v62  ;;  %v15724_v62 = vld [vmem:[%s16179_s1 + $0x58] sm:$0xff] }
 0x251   : > { %12780 = vmatmul.mubr.msk.f32.gmra.mrb[30].mxu0 %vm171_vm0, %v8007_v6  ;;  %v16483_v6 = vld [vmem:[#allocation16_spill] sm:$0xff] }
 0x252   : > { %12162 = vmatmul.mubr.msk.f32.gmra.mrb[18].mxu1 %vm171_vm0, %v15167_v44  ;;  %12784 = vmatprep.mubr.msk.f32.mxu0 %vm171_vm0, %v16458_v45  ;;  %v16471_v44 = vld [vmem:[#allocation8_spill] sm:$0xff]  ;;  %v16484_v45 = vld [vmem:[#allocation18_spill] sm:$0xff] }
 0x253   : > { %12164 = vmatprep.mubr.msk.f32.mxu1 %vm171_vm0, %v16459_v47  ;;  %v3720_v47 = vld [vmem:[#allocation2 + $0x3c] sm:$0xff] }
 0x255   : > { %12785 = vmatmul.mubr.msk.f32.vlgmr.msra.gmra.mrb[0].mxu0 %vm171_vm0, %v16460_v55  ;;  %v16485_v55 = vld [vmem:[#allocation45_spill] sm:$0xff] }
 0x256   : > { %12833 = vmatpush3.msra.mxu0 %v15514_v16  ;;  %12165 = vmatmul.mubr.msk.f32.gmra.mrb[20].mxu1 %vm171_vm0, %v16461_v4  ;;  %v16475_v16 = vld [vmem:[#allocation10_spill] sm:$0xff] }
 0x257   : > { %12787 = vmatprep.mubr.msk.f32.mxu0 %vm171_vm0, %v16462_v11  ;;  %12167 = vmatprep.mubr.msk.f32.mxu1 %vm171_vm0, %v16463_v58  ;;  %v16486_v4 = vld [vmem:[#allocation46_spill] sm:$0xff]  ;;  %v16487_v11 = vld [vmem:[#allocation17_spill] sm:$0xff]  ;;  %v16488_v58 = vld [vmem:[#allocation47_spill] sm:$0xff] }
 0x258   : > { %12882 = vmatprep.subr.mxu0 %v15670_v1 }
 0x259   : > { %12788 = vmatmul.mubr.msk.f32.gmra.mrb[2].mxu0 %vm171_vm0, %v16464_v2  ;;  %v16489_v2 = vld [vmem:[#allocation19_spill] sm:$0xff] }
 0x25a   : > { %12168 = vmatmul.mubr.msk.f32.gmra.mrb[22].mxu1 %vm171_vm0, %v16465_v46  ;;  %12790 = vmatprep.mubr.msk.f32.mxu0 %vm171_vm0, %v16466_v13  ;;  %v16491_v46 = vld [vmem:[#allocation20_spill] sm:$0xff]  ;;  %v16492_v13 = vld [vmem:[#allocation21_spill] sm:$0xff] }
 0x25b   : > { %12170 = vmatprep.mubr.msk.f32.mxu1 %vm171_vm0, %v16467_v12  ;;  %v16493_v12 = vld [vmem:[#allocation24_spill] sm:$0xff] }
 0x25d   : > { %12791 = vmatmul.mubr.msk.f32.gmra.mrb[4].mxu0 %vm171_vm0, %v16468_v37  ;;  %v16494_v37 = vld [vmem:[#allocation22_spill] sm:$0xff] }
 0x25e   : > { %12171 = vmatmul.mubr.msk.f32.gmra.mrb[24].mxu1 %vm171_vm0, %v16469_v19  ;;  %12793 = vmatprep.mubr.msk.f32.mxu0 %vm171_vm0, %v16470_v21  ;;  %v16495_v19 = vld [vmem:[#allocation23_spill] sm:$0xff] }
 0x25f   : > { %12173 = vmatprep.mubr.msk.f32.mxu1 %vm171_vm0, %v16471_v44  ;;  %v16496_v21 = vld [vmem:[#allocation51_spill] sm:$0xff]  ;;  %v16497_v44 = vld [vmem:[#allocation49_spill] sm:$0xff] }
 0x261   : > { %12794 = vmatmul.mubr.msk.f32.gmra.mrb[6].mxu0 %vm171_vm0, %v16472_v0  ;;  %v16498_v0 = vld [vmem:[#allocation52_spill] sm:$0xff] }
 0x262   : > { %12174 = vmatmul.mubr.msk.f32.gmra.mrb[26].mxu1 %vm171_vm0, %v16473_v24  ;;  %12796 = vmatprep.mubr.msk.f32.mxu0 %vm171_vm0, %v16474_v30  ;;  %v16499_v24 = vld [vmem:[#allocation50_spill] sm:$0xff]  ;;  %v16500_v30 = vld [vmem:[#allocation25_spill] sm:$0xff] }
 0x263   : > { %12176 = vmatprep.mubr.msk.f32.mxu1 %vm171_vm0, %v16475_v16  ;;  %v15775_v16 = vld [vmem:[#allocation2 + $0x199] sm:$0xff] }
 0x265   : > { %12797 = vmatmul.mubr.msk.f32.gmra.mrb[8].mxu0 %vm171_vm0, %v16476_v28  ;;  %v16501_v28 = vld [vmem:[#allocation26_spill] sm:$0xff] }
 0x266   : > { %12177 = vmatmul.mubr.msk.f32.gmra.mrb[28].mxu1 %vm171_vm0, %v16477_v32  ;;  %12799 = vmatprep.mubr.msk.f32.mxu0 %vm171_vm0, %v16478_v26  ;;  %v15783_v32 = vld [vmem:[#allocation2 + $0x1a1] sm:$0xff] }
 0x267   : > { %12179 = vmatprep.mubr.msk.f32.mxu1 %vm171_vm0, %v16479_v9  ;;  %v16502_v26 = vld [vmem:[#allocation27_spill] sm:$0xff]  ;;  %v8391_v9 = vld [vmem:[#allocation2 + $0x1b1] sm:$0xff] }
 0x269   : > { %12800 = vmatmul.mubr.msk.f32.gmra.mrb[10].mxu0 %vm171_vm0, %v16480_v60  ;;  %v8392_v60 = vld [vmem:[#allocation2 + $0x1b9] sm:$0xff] }
 0x26a   : > { %12180 = vmatmul.mubr.msk.f32.gmra.mrb[30].mxu1 %vm171_vm0, %v16481_v8  ;;  %12802 = vmatprep.mubr.msk.f32.mxu0 %vm171_vm0, %v16482_v50  ;;  %v16504_v8 = vld [vmem:[#allocation28_spill] sm:$0xff] }
 0x26b   : > { %12184 = vmatprep.mubr.msk.f32.mxu1 %vm171_vm0, %v3717_v53  ;;  %v16503_v53 = vld [vmem:[#allocation53_spill] sm:$0xff] }
 0x26c   : > { %v8393_v50 = vld [vmem:[#allocation2 + $0x1c9] sm:$0xff] }
 0x26d   : > { %12803 = vmatmul.mubr.msk.f32.gmra.mrb[12].mxu0 %vm171_vm0, %v16483_v6  ;;  %v8751_v6 = vld [vmem:[#allocation2 + $0x6a] sm:$0xff] }
 0x26e   : > { %12185 = vmatmul.mubr.msk.f32.vlgmr.msra.gmra.mrb[0].mxu1 %vm171_vm0, %v3718_v14  ;;  %12805 = vmatprep.mubr.msk.f32.mxu0 %vm171_vm0, %v16484_v45  ;;  %v8394_v14 = vld [vmem:[#allocation2 + $0x1d1] sm:$0xff]  ;;  %v8752_v45 = vld [vmem:[#allocation2 + $0x7a] sm:$0xff] }
 0x26f   : > { %12187 = vmatprep.mubr.msk.f32.mxu1 %vm171_vm0, %v3719_v57  ;;  %12233 = vmatpush3.msra.mxu1 %v15582_v22  ;;  %v16490_v22 = vld [vmem:[#allocation48_spill] sm:$0xff] }
 0x270   : > { %12282 = vmatprep.subr.mxu1 %v15724_v62  ;;  %v8750_v57 = vld [vmem:[#allocation2 + $0x62] sm:$0xff] }
 0x271   : > { %12806 = vmatmul.mubr.msk.f32.gmra.mrb[14].mxu0 %vm171_vm0, %v16485_v55  ;;  %v4116_v55 = vld [vmem:[#allocation2 + $0xc0] sm:$0xff] }
 0x272   : > { %12188 = vmatmul.mubr.msk.f32.gmra.mrb[2].mxu1 %vm171_vm0, %v3720_v47  ;;  %12808 = vmatprep.mubr.msk.f32.mxu0 %vm171_vm0, %v16486_v4  ;;  %v4104_v47 = vld [vmem:[#allocation2 + $0x30] sm:$0xff]  ;;  %v4118_v4 = vld [vmem:[#allocation2 + $0xd8] sm:$0xff] }
 0x273   : > { %12190 = vmatprep.mubr.msk.f32.mxu1 %vm171_vm0, %v16487_v11  ;;  %v4119_v11 = vld [vmem:[#allocation2 + $0xe0] sm:$0xff] }
 0x275   : > { %12809 = vmatmul.mubr.msk.f32.gmra.mrb[16].mxu0 %vm171_vm0, %v16488_v58  ;;  %v8778_v58 = vld [vmem:[#allocation2 + $0x1b2] sm:$0xff] }
 0x276   : > { %12191 = vmatmul.mubr.msk.f32.gmra.mrb[4].mxu1 %vm171_vm0, %v16489_v2  ;;  %12811 = vmatprep.mubr.msk.f32.mxu0 %vm171_vm0, %v16490_v22  ;;  %v4120_v2 = vld [vmem:[#allocation2 + $0xf0] sm:$0xff]  ;;  %v8779_v22 = vld [vmem:[#allocation2 + $0x1ba] sm:$0xff] }
 0x277   : > { %12193 = vmatprep.mubr.msk.f32.mxu1 %vm171_vm0, %v16491_v46  ;;  %v4121_v46 = vld [vmem:[#allocation2 + $0xf8] sm:$0xff] }
 0x279   : > { %12812 = vmatmul.mubr.msk.f32.gmra.mrb[18].mxu0 %vm171_vm0, %v15334_v40  ;;  %v15763_v40 = vld [vmem:[#allocation2 + $0x181] sm:$0xff] }
 0x27a   : > { %12194 = vmatmul.mubr.msk.f32.gmra.mrb[6].mxu1 %vm171_vm0, %v16492_v13  ;;  %12814 = vmatprep.mubr.msk.f32.mxu0 %vm171_vm0, %v16493_v12  ;;  %v8780_v13 = vld [vmem:[#allocation2 + $0x1ca] sm:$0xff] }
 0x27b   : > { %12196 = vmatprep.mubr.msk.f32.mxu1 %vm171_vm0, %v16494_v37  ;;  %v4122_v12 = vld [vmem:[#allocation2 + $0x108] sm:$0xff]  ;;  %v8781_v37 = vld [vmem:[#allocation2 + $0x1d2] sm:$0xff] }
 0x27d   : > { %12815 = vmatmul.mubr.msk.f32.gmra.mrb[20].mxu0 %vm171_vm0, %v15350_v27  ;;  %v15771_v27 = vld [vmem:[#allocation2 + $0x189] sm:$0xff] }
 0x27e   : > { %12197 = vmatmul.mubr.msk.f32.gmra.mrb[8].mxu1 %vm171_vm0, %v16495_v19  ;;  %12817 = vmatprep.mubr.msk.f32.mxu0 %vm171_vm0, %v16496_v21  ;;  %v4123_v19 = vld [vmem:[#allocation2 + $0x110] sm:$0xff]  ;;  %v9137_v21 = vld [vmem:[#allocation2 + $0x63] sm:$0xff] }
 0x27f   : > { %12199 = vmatprep.mubr.msk.f32.mxu1 %vm171_vm0, %v16497_v44  ;;  %v4124_v44 = vld [vmem:[#allocation2 + $0x120] sm:$0xff] }
 0x281   : > { %12818 = vmatmul.mubr.msk.f32.gmra.mrb[22].mxu0 %vm171_vm0, %v16498_v0  ;;  %v9138_v0 = vld [vmem:[#allocation2 + $0x6b] sm:$0xff] }
 0x282   : > { %12200 = vmatmul.mubr.msk.f32.gmra.mrb[10].mxu1 %vm171_vm0, %v16499_v24  ;;  %12820 = vmatprep.mubr.msk.f32.mxu0 %vm171_vm0, %v15763_v40  ;;  %v4125_v24 = vld [vmem:[#allocation2 + $0x128] sm:$0xff] }
 0x283   : > { %12202 = vmatprep.mubr.msk.f32.mxu1 %vm171_vm0, %v16500_v30  ;;  %v9139_v30 = vld [vmem:[#allocation2 + $0x7b] sm:$0xff] }
 0x285   : > { %12821 = vmatmul.mubr.msk.f32.gmra.mrb[24].mxu0 %vm171_vm0, %v15771_v27 }
 0x286   : > { %12203 = vmatmul.mubr.msk.f32.gmra.mrb[12].mxu1 %vm171_vm0, %v16501_v28  ;;  %12823 = vmatprep.mubr.msk.f32.mxu0 %vm171_vm0, %v15775_v16  ;;  %v4126_v28 = vld [vmem:[#allocation2 + $0x138] sm:$0xff] }
 0x287   : > { %12205 = vmatprep.mubr.msk.f32.mxu1 %vm171_vm0, %v16502_v26  ;;  %v9140_v26 = vld [vmem:[#allocation2 + $0x83] sm:$0xff] }
 0x289   : > { %12824 = vmatmul.mubr.msk.f32.gmra.mrb[26].mxu0 %vm171_vm0, %v15783_v32 }
 0x28a   : > { %12206 = vmatmul.mubr.msk.f32.gmra.mrb[14].mxu1 %vm171_vm0, %v16503_v53  ;;  %12826 = vmatprep.mubr.msk.f32.mxu0 %vm171_vm0, %v8391_v9  ;;  %v4127_v9 = vld [vmem:[#allocation2 + $0x140] sm:$0xff]  ;;  %v9141_v53 = vld [vmem:[#allocation2 + $0x93] sm:$0xff] }
 0x28b   : > { %12208 = vmatprep.mubr.msk.f32.mxu1 %vm171_vm0, %v16504_v8  ;;  %v9142_v8 = vld [vmem:[#allocation2 + $0x9b] sm:$0xff] }
 0x28d   : > { %12827 = vmatmul.mubr.msk.f32.gmra.mrb[28].mxu0 %vm171_vm0, %v8392_v60  ;;  %v4128_v60 = vld [vmem:[#allocation2 + $0x150] sm:$0xff] }
 0x28e   : > { %12209 = vmatmul.mubr.msk.f32.gmra.mrb[16].mxu1 %vm171_vm0, %v15388_v23  ;;  %12829 = vmatprep.mubr.msk.f32.mxu0 %vm171_vm0, %v8393_v50  ;;  %v15810_v23 = vld [vmem:[%s16179_s1 + $0xc0] sm:$0xff]  ;;  %v4129_v50 = vld [vmem:[#allocation2 + $0x158] sm:$0xff] }
 0x28f   : > { %12211 = vmatprep.mubr.msk.f32.mxu1 %vm171_vm0, %v15391_v54  ;;  %v8753_v54 = vld [vmem:[#allocation2 + $0x82] sm:$0xff] }
 0x291   : > { %12830 = vmatmul.mubr.msk.f32.gmra.mrb[30].mxu0 %vm171_vm0, %v8394_v14  ;;  %v9143_v14 = vld [vmem:[#allocation2 + $0xab] sm:$0xff] }
 0x292   : > { %12212 = vmatmul.mubr.msk.f32.gmra.mrb[18].mxu1 %vm171_vm0, %v15403_v51  ;;  %12834 = vmatprep.mubr.msk.f32.mxu0 %vm171_vm0, %v8750_v57  ;;  %v8755_v51 = vld [vmem:[#allocation2 + $0x9a] sm:$0xff]  ;;  %v4130_v57 = vld [vmem:[#allocation2 + $0x168] sm:$0xff] }
 0x293   : > { %12214 = vmatprep.mubr.msk.f32.mxu1 %vm171_vm0, %v15406_v25  ;;  %v8754_v25 = vld [vmem:[#allocation2 + $0x92] sm:$0xff] }
 0x295   : > { %12835 = vmatmul.mubr.msk.f32.vlgmr.msra.gmra.mrb[0].mxu0 %vm171_vm0, %v8751_v6  ;;  %v9144_v6 = vld [vmem:[#allocation2 + $0xb3] sm:$0xff] }
 0x296   : > { %12883 = vmatpush3.msra.mxu0 %v15670_v1  ;;  %12215 = vmatmul.mubr.msk.f32.gmra.mrb[20].mxu1 %vm171_vm0, %v15415_v36  ;;  %v8756_v36 = vld [vmem:[#allocation2 + $0xaa] sm:$0xff]  ;;  %v8758_v1 = vld [vmem:[#allocation2 + $0xc2] sm:$0xff] }
 0x297   : > { %12837 = vmatprep.mubr.msk.f32.mxu0 %vm171_vm0, %v8752_v45  ;;  %12217 = vmatprep.mubr.msk.f32.mxu1 %vm171_vm0, %v15419_v18  ;;  %v8757_v18 = vld [vmem:[#allocation2 + $0xb2] sm:$0xff] }
 0x298   : > { %12932 = vmatprep.subr.mxu0 %v15810_v23  ;;  %v4131_v45 = vld [vmem:[#allocation2 + $0x170] sm:$0xff] }
 0x299   : > { %12838 = vmatmul.mubr.msk.f32.gmra.mrb[2].mxu0 %vm171_vm0, %v8753_v54  ;;  %v9146_v54 = vld [vmem:[#allocation2 + $0xcb] sm:$0xff] }
 0x29a   : > { %12218 = vmatmul.mubr.msk.f32.gmra.mrb[22].mxu1 %vm171_vm0, %v15427_v52  ;;  %12840 = vmatprep.mubr.msk.f32.mxu0 %vm171_vm0, %v8754_v25  ;;  %v8759_v52 = vld [vmem:[#allocation2 + $0xca] sm:$0xff]  ;;  %v9147_v25 = vld [vmem:[#allocation2 + $0xdb] sm:$0xff] }
 0x29b   : > { %12220 = vmatprep.mubr.msk.f32.mxu1 %vm171_vm0, %v15431_v41  ;;  %v8760_v41 = vld [vmem:[#allocation2 + $0xda] sm:$0xff] }
 0x29d   : > { %12841 = vmatmul.mubr.msk.f32.gmra.mrb[4].mxu0 %vm171_vm0, %v8755_v51  ;;  %v9148_v51 = vld [vmem:[#allocation2 + $0xe3] sm:$0xff] }
 0x29e   : > { %12221 = vmatmul.mubr.msk.f32.gmra.mrb[24].mxu1 %vm171_vm0, %v15439_v48  ;;  %12843 = vmatprep.mubr.msk.f32.mxu0 %vm171_vm0, %v8756_v36  ;;  %v8761_v48 = vld [vmem:[#allocation2 + $0xe2] sm:$0xff]  ;;  %v9149_v36 = vld [vmem:[#allocation2 + $0xf3] sm:$0xff] }
 0x29f   : > { %12223 = vmatprep.mubr.msk.f32.mxu1 %vm171_vm0, %v15443_v7  ;;  %v16505_v7 = vld [vmem:[#allocation54_spill] sm:$0xff] }
 0x2a1   : > { %12844 = vmatmul.mubr.msk.f32.gmra.mrb[6].mxu0 %vm171_vm0, %v8757_v18  ;;  %v4491_v18 = vld [vmem:[#allocation2 + $0x31] sm:$0xff] }
 0x2a2   : > { %12224 = vmatmul.mubr.msk.f32.gmra.mrb[26].mxu1 %vm171_vm0, %v15451_v38  ;;  %12846 = vmatprep.mubr.msk.f32.mxu0 %vm171_vm0, %v8758_v1  ;;  %v4105_v38 = vld [vmem:[#allocation2 + $0x38] sm:$0xff] }
 0x2a3   : > { %12226 = vmatprep.mubr.msk.f32.mxu1 %vm171_vm0, %v15455_v35  ;;  %v4106_v35 = vld [vmem:[#allocation2 + $0x48] sm:$0xff]  ;;  %v4492_v1 = vld [vmem:[#allocation2 + $0x39] sm:$0xff] }
 0x2a5   : > { %12847 = vmatmul.mubr.msk.f32.gmra.mrb[8].mxu0 %vm171_vm0, %v8759_v52  ;;  %v4493_v52 = vld [vmem:[#allocation2 + $0x49] sm:$0xff] }
 0x2a6   : > { %12227 = vmatmul.mubr.msk.f32.gmra.mrb[28].mxu1 %vm171_vm0, %v15463_v56  ;;  %12849 = vmatprep.mubr.msk.f32.mxu0 %vm171_vm0, %v8760_v41  ;;  %v4107_v56 = vld [vmem:[#allocation2 + $0x50] sm:$0xff] }
 0x2a7   : > { %12229 = vmatprep.mubr.msk.f32.mxu1 %vm171_vm0, %v16505_v7  ;;  %v4494_v41 = vld [vmem:[#allocation2 + $0x51] sm:$0xff] }
 0x2a8   : > { %v9154_v7 = vld [vmem:[#allocation2 + $0x12b] sm:$0xff] }
 0x2a9   : > { %12850 = vmatmul.mubr.msk.f32.gmra.mrb[10].mxu0 %vm171_vm0, %v8761_v48  ;;  %v9153_v48 = vld [vmem:[#allocation2 + $0x123] sm:$0xff] }
 0x2aa   : > { %12230 = vmatmul.mubr.msk.f32.gmra.mrb[30].mxu1 %vm171_vm0, %v15475_v29  ;;  %12852 = vmatprep.mubr.msk.f32.mxu0 %vm171_vm0, %v15486_v42  ;;  %v4108_v29 = vld [vmem:[#allocation2 + $0x60] sm:$0xff] }
 0x2ab   : > { %12234 = vmatprep.mubr.msk.f32.mxu1 %vm171_vm0, %v4104_v47  ;;  %v15859_v42 = vld [vmem:[%s16179_s1 + $0x60] sm:$0xff]  ;;  %v4496_v47 = vld [vmem:[#allocation2 + $0x69] sm:$0xff] }
 0x2ad   : > { %12853 = vmatmul.mubr.msk.f32.gmra.mrb[12].mxu0 %vm171_vm0, %v15494_v31  ;;  %v4109_v31 = vld [vmem:[#allocation2 + $0x68] sm:$0xff] }
 0x2ae   : > { %12235 = vmatmul.mubr.msk.f32.vlgmr.msra.gmra.mrb[0].mxu1 %vm171_vm0, %v4105_v38  ;;  %12855 = vmatprep.mubr.msk.f32.mxu0 %vm171_vm0, %v15496_v59  ;;  %v4110_v59 = vld [vmem:[#allocation2 + $0x78] sm:$0xff] }
 0x2af   : > { %12237 = vmatprep.mubr.msk.f32.mxu1 %vm171_vm0, %v4106_v35  ;;  %12283 = vmatpush3.msra.mxu1 %v15724_v62  ;;  %v4112_v62 = vld [vmem:[#allocation2 + $0x90] sm:$0xff]  ;;  %v9155_v38 = vld [vmem:[#allocation2 + $0x13b] sm:$0xff] }
 0x2b0   : > { %12982 = vmatprep.subr.mxu1 %v15859_v42  ;;  %v4497_v35 = vld [vmem:[#allocation2 + $0x79] sm:$0xff] }
 0x2b1   : > { %12856 = vmatmul.mubr.msk.f32.gmra.mrb[14].mxu0 %vm171_vm0, %v15505_v34  ;;  %v4111_v34 = vld [vmem:[#allocation2 + $0x80] sm:$0xff] }
 0x2b2   : > { %12238 = vmatmul.mubr.msk.f32.gmra.mrb[2].mxu1 %vm171_vm0, %v4107_v56  ;;  %12858 = vmatprep.mubr.msk.f32.mxu0 %vm171_vm0, %v15507_v39  ;;  %v4113_v39 = vld [vmem:[#allocation2 + $0x98] sm:$0xff]  ;;  %v9156_v56 = vld [vmem:[#allocation2 + $0x143] sm:$0xff] }
 0x2b3   : > { %12240 = vmatprep.mubr.msk.f32.mxu1 %vm171_vm0, %v4108_v29  ;;  %v4498_v29 = vld [vmem:[#allocation2 + $0x81] sm:$0xff] }
 0x2b5   : > { %12859 = vmatmul.mubr.msk.f32.gmra.mrb[16].mxu0 %vm171_vm0, %v15523_v43  ;;  %v4114_v43 = vld [vmem:[#allocation2 + $0xa8] sm:$0xff] }
 0x2b6   : > { %12241 = vmatmul.mubr.msk.f32.gmra.mrb[4].mxu1 %vm171_vm0, %v4109_v31  ;;  %12861 = vmatprep.mubr.msk.f32.mxu0 %vm171_vm0, %v15525_v17  ;;  %v4115_v17 = vld [vmem:[#allocation2 + $0xb0] sm:$0xff] }
 0x2b7   : > { %12243 = vmatprep.mubr.msk.f32.mxu1 %vm171_vm0, %v4110_v59  ;;  %v4499_v31 = vld [vmem:[#allocation2 + $0x91] sm:$0xff]  ;;  %v9158_v59 = vld [vmem:[#allocation2 + $0x15b] sm:$0xff] }
 0x2b9   : > { %12862 = vmatmul.mubr.msk.f32.gmra.mrb[18].mxu0 %vm171_vm0, %v15536_v61  ;;  %v15886_v61 = vld [vmem:[#allocation2 + $0x182] sm:$0xff] }
 0x2ba   : > { %12244 = vmatmul.mubr.msk.f32.gmra.mrb[6].mxu1 %vm171_vm0, %v4111_v34  ;;  %12864 = vmatprep.mubr.msk.f32.mxu0 %vm171_vm0, %v15538_v10  ;;  %v15893_v10 = vld [vmem:[#allocation2 + $0x18a] sm:$0xff]  ;;  %v4500_v34 = vld [vmem:[#allocation2 + $0x99] sm:$0xff] }
 0x2bb   : > { %12246 = vmatprep.mubr.msk.f32.mxu1 %vm171_vm0, %v4112_v62  ;;  %v9159_v62 = vld [vmem:[#allocation2 + $0x16b] sm:$0xff] }
 0x2bd   : > { %12865 = vmatmul.mubr.msk.f32.gmra.mrb[20].mxu0 %vm171_vm0, %v15548_v63  ;;  %v4117_v63 = vld [vmem:[#allocation2 + $0xc8] sm:$0xff] }
 0x2be   : > { %12247 = vmatmul.mubr.msk.f32.gmra.mrb[8].mxu1 %vm171_vm0, %v4113_v39  ;;  %12867 = vmatprep.mubr.msk.f32.mxu0 %vm171_vm0, %v15550_v3  ;;  %v15896_v3 = vld [vmem:[#allocation2 + $0x19a] sm:$0xff]  ;;  %v4501_v39 = vld [vmem:[#allocation2 + $0xa9] sm:$0xff] }
 0x2bf   : > { %12249 = vmatprep.mubr.msk.f32.mxu1 %vm171_vm0, %v4114_v43  ;;  %v9160_v43 = vld [vmem:[#allocation2 + $0x173] sm:$0xff] }
 0x2c1   : > { %12868 = vmatmul.mubr.msk.f32.gmra.mrb[22].mxu0 %vm171_vm0, %v15560_v5  ;;  %v15903_v5 = vld [vmem:[#allocation2 + $0x1a2] sm:$0xff] }
 0x2c2   : > { %12250 = vmatmul.mubr.msk.f32.gmra.mrb[10].mxu1 %vm171_vm0, %v4115_v17  ;;  %12870 = vmatprep.mubr.msk.f32.mxu0 %vm171_vm0, %v15886_v61  ;;  %v4502_v17 = vld [vmem:[#allocation2 + $0xb1] sm:$0xff] }
 0x2c3   : > { %12252 = vmatprep.mubr.msk.f32.mxu1 %vm171_vm0, %v4116_v55  ;;  %v9161_v55 = vld [vmem:[#allocation2 + $0x183] sm:$0xff] }
 0x2c5   : > { %12871 = vmatmul.mubr.msk.f32.gmra.mrb[24].mxu0 %vm171_vm0, %v15893_v10 }
 0x2c6   : > { %12253 = vmatmul.mubr.msk.f32.gmra.mrb[12].mxu1 %vm171_vm0, %v4117_v63  ;;  %12873 = vmatprep.mubr.msk.f32.mxu0 %vm171_vm0, %v15896_v3  ;;  %v4503_v63 = vld [vmem:[#allocation2 + $0xc1] sm:$0xff] }
 0x2c7   : > { %12255 = vmatprep.mubr.msk.f32.mxu1 %vm171_vm0, %v4118_v4  ;;  %v9162_v4 = vld [vmem:[#allocation2 + $0x18b] sm:$0xff] }
 0x2c9   : > { %12874 = vmatmul.mubr.msk.f32.gmra.mrb[26].mxu0 %vm171_vm0, %v15903_v5 }
 0x2ca   : > { %12256 = vmatmul.mubr.msk.f32.gmra.mrb[14].mxu1 %vm171_vm0, %v4119_v11  ;;  %12876 = vmatprep.mubr.msk.f32.mxu0 %vm171_vm0, %v8778_v58  ;;  %v4504_v11 = vld [vmem:[#allocation2 + $0xc9] sm:$0xff]  ;;  %v9163_v58 = vld [vmem:[#allocation2 + $0x19b] sm:$0xff] }
 0x2cb   : > { %12258 = vmatprep.mubr.msk.f32.mxu1 %vm171_vm0, %v4120_v2  ;;  %v4505_v2 = vld [vmem:[#allocation2 + $0xd9] sm:$0xff] }
 0x2cd   : > { %12877 = vmatmul.mubr.msk.f32.gmra.mrb[28].mxu0 %vm171_vm0, %v8779_v22  ;;  %v9164_v22 = vld [vmem:[#allocation2 + $0x1a3] sm:$0xff] }
 0x2ce   : > { %12259 = vmatmul.mubr.msk.f32.gmra.mrb[16].mxu1 %vm171_vm0, %v4121_v46  ;;  %12879 = vmatprep.mubr.msk.f32.mxu0 %vm171_vm0, %v8780_v13  ;;  %v4506_v46 = vld [vmem:[#allocation2 + $0xe1] sm:$0xff]  ;;  %v9165_v13 = vld [vmem:[#allocation2 + $0x1b3] sm:$0xff] }
 0x2cf   : > { %12261 = vmatprep.mubr.msk.f32.mxu1 %vm171_vm0, %v4122_v12  ;;  %v4507_v12 = vld [vmem:[#allocation2 + $0xf1] sm:$0xff] }
 0x2d1   : > { %12880 = vmatmul.mubr.msk.f32.gmra.mrb[30].mxu0 %vm171_vm0, %v8781_v37  ;;  %v9166_v37 = vld [vmem:[#allocation2 + $0x1bb] sm:$0xff] }
 0x2d2   : > { %12262 = vmatmul.mubr.msk.f32.gmra.mrb[18].mxu1 %vm171_vm0, %v4123_v19  ;;  %12884 = vmatprep.mubr.msk.f32.mxu0 %vm171_vm0, %v9137_v21  ;;  %v4508_v19 = vld [vmem:[#allocation2 + $0xf9] sm:$0xff]  ;;  %v9167_v21 = vld [vmem:[#allocation2 + $0x1cb] sm:$0xff] }
 0x2d3   : > { %12264 = vmatprep.mubr.msk.f32.mxu1 %vm171_vm0, %v4124_v44  ;;  %v4509_v44 = vld [vmem:[#allocation2 + $0x109] sm:$0xff] }
 0x2d5   : > { %12885 = vmatmul.mubr.msk.f32.vlgmr.msra.gmra.mrb[0].mxu0 %vm171_vm0, %v9138_v0  ;;  %v9168_v0 = vld [vmem:[#allocation2 + $0x1d3] sm:$0xff] }
 0x2d6   : > { %12933 = vmatpush3.msra.mxu0 %v15810_v23  ;;  %12265 = vmatmul.mubr.msk.f32.gmra.mrb[20].mxu1 %vm171_vm0, %v4125_v24  ;;  %v9145_v23 = vld [vmem:[#allocation2 + $0xc3] sm:$0xff]  ;;  %v4510_v24 = vld [vmem:[#allocation2 + $0x111] sm:$0xff] }
 0x2d7   : > { %12887 = vmatprep.mubr.msk.f32.mxu0 %vm171_vm0, %v9139_v30  ;;  %12267 = vmatprep.mubr.msk.f32.mxu1 %vm171_vm0, %v4126_v28  ;;  %v9524_v30 = vld [vmem:[#allocation2 + $0x64] sm:$0xff] }
 0x2d8   : > { %v4511_v28 = vld [vmem:[#allocation2 + $0x121] sm:$0xff] }
 0x2d9   : > { %12888 = vmatmul.mubr.msk.f32.gmra.mrb[2].mxu0 %vm171_vm0, %v9140_v26  ;;  %v9525_v26 = vld [vmem:[#allocation2 + $0x6c] sm:$0xff] }
 0x2da   : > { %12268 = vmatmul.mubr.msk.f32.gmra.mrb[22].mxu1 %vm171_vm0, %v4127_v9  ;;  %12890 = vmatprep.mubr.msk.f32.mxu0 %vm171_vm0, %v9141_v53  ;;  %v4512_v9 = vld [vmem:[#allocation2 + $0x129] sm:$0xff]  ;;  %v9526_v53 = vld [vmem:[#allocation2 + $0x7c] sm:$0xff] }
 0x2db   : > { %12270 = vmatprep.mubr.msk.f32.mxu1 %vm171_vm0, %v4128_v60  ;;  %v4513_v60 = vld [vmem:[#allocation2 + $0x139] sm:$0xff] }
 0x2dd   : > { %12891 = vmatmul.mubr.msk.f32.gmra.mrb[4].mxu0 %vm171_vm0, %v9142_v8  ;;  %v9527_v8 = vld [vmem:[#allocation2 + $0x84] sm:$0xff] }
 0x2de   : > { %12271 = vmatmul.mubr.msk.f32.gmra.mrb[24].mxu1 %vm171_vm0, %v4129_v50  ;;  %12893 = vmatprep.mubr.msk.f32.mxu0 %vm171_vm0, %v9143_v14  ;;  %v4514_v50 = vld [vmem:[#allocation2 + $0x141] sm:$0xff]  ;;  %v9528_v14 = vld [vmem:[#allocation2 + $0x94] sm:$0xff] }
 0x2df   : > { %12273 = vmatprep.mubr.msk.f32.mxu1 %vm171_vm0, %v4130_v57  ;;  %v4515_v57 = vld [vmem:[#allocation2 + $0x151] sm:$0xff] }
 0x2e1   : > { %12894 = vmatmul.mubr.msk.f32.gmra.mrb[6].mxu0 %vm171_vm0, %v9144_v6  ;;  %v9529_v6 = vld [vmem:[#allocation2 + $0x9c] sm:$0xff] }
 0x2e2   : > { %12274 = vmatmul.mubr.msk.f32.gmra.mrb[26].mxu1 %vm171_vm0, %v4131_v45  ;;  %12896 = vmatprep.mubr.msk.f32.mxu0 %vm171_vm0, %v9145_v23  ;;  %v4516_v45 = vld [vmem:[#allocation2 + $0x159] sm:$0xff]  ;;  %v9530_v23 = vld [vmem:[#allocation2 + $0xac] sm:$0xff] }
 0x2e3   : > { %12276 = vmatprep.mubr.msk.f32.mxu1 %vm171_vm0, %v15621_v15  ;;  %v9150_v15 = vld [vmem:[#allocation2 + $0xfb] sm:$0xff] }
 0x2e5   : > { %12897 = vmatmul.mubr.msk.f32.gmra.mrb[8].mxu0 %vm171_vm0, %v9146_v54  ;;  %v4517_v54 = vld [vmem:[#allocation2 + $0x169] sm:$0xff] }
 0x2e6   : > { %12277 = vmatmul.mubr.msk.f32.gmra.mrb[28].mxu1 %vm171_vm0, %v15629_v20  ;;  %12899 = vmatprep.mubr.msk.f32.mxu0 %vm171_vm0, %v9147_v25  ;;  %v9151_v20 = vld [vmem:[#allocation2 + $0x10b] sm:$0xff]  ;;  %v9531_v25 = vld [vmem:[#allocation2 + $0xb4] sm:$0xff] }
 0x2e7   : > { %12279 = vmatprep.mubr.msk.f32.mxu1 %vm171_vm0, %v15633_v33  ;;  %v9152_v33 = vld [vmem:[#allocation2 + $0x113] sm:$0xff] }
 0x2e9   : > { %12900 = vmatmul.mubr.msk.f32.gmra.mrb[10].mxu0 %vm171_vm0, %v9148_v51  ;;  %v4518_v51 = vld [vmem:[#allocation2 + $0x171] sm:$0xff] }
 0x2ea   : > { %12280 = vmatmul.mubr.msk.f32.gmra.mrb[30].mxu1 %vm171_vm0, %v15641_v49  ;;  %12902 = vmatprep.mubr.msk.f32.mxu0 %vm171_vm0, %v9149_v36  ;;  %v4495_v49 = vld [vmem:[#allocation2 + $0x61] sm:$0xff] }
 0x2eb   : > { %12284 = vmatprep.mubr.msk.f32.mxu1 %vm171_vm0, %v4491_v18  ;;  %v9532_v36 = vld [vmem:[#allocation2 + $0xc4] sm:$0xff]  ;;  %v9533_v18 = vld [vmem:[#allocation2 + $0xcc] sm:$0xff] }
 0x2ed   : > { %12903 = vmatmul.mubr.msk.f32.gmra.mrb[12].mxu0 %vm171_vm0, %v9150_v15  ;;  %v9534_v15 = vld [vmem:[#allocation2 + $0xdc] sm:$0xff] }
 0x2ee   : > { %12285 = vmatmul.mubr.msk.f32.vlgmr.msra.gmra.mrb[0].mxu1 %vm171_vm0, %v4492_v1  ;;  %12905 = vmatprep.mubr.msk.f32.mxu0 %vm171_vm0, %v9151_v20  ;;  %v9535_v1 = vld [vmem:[#allocation2 + $0xe4] sm:$0xff]  ;;  %v9536_v20 = vld [vmem:[#allocation2 + $0xf4] sm:$0xff] }
 0x2ef   : > { %12287 = vmatprep.mubr.msk.f32.mxu1 %vm171_vm0, %v4493_v52  ;;  %12983 = vmatpush3.msra.mxu1 %v15859_v42  ;;  %v9157_v42 = vld [vmem:[#allocation2 + $0x153] sm:$0xff] }
 0x2f0   : > { %v4894_v52 = vld [vmem:[#allocation2 + $0xf2] sm:$0xff] }
 0x2f1   : > { %12906 = vmatmul.mubr.msk.f32.gmra.mrb[14].mxu0 %vm171_vm0, %v9152_v33  ;;  %v4895_v33 = vld [vmem:[#allocation2 + $0xfa] sm:$0xff] }
 0x2f2   : > { %12288 = vmatmul.mubr.msk.f32.gmra.mrb[2].mxu1 %vm171_vm0, %v4494_v41  ;;  %12908 = vmatprep.mubr.msk.f32.mxu0 %vm171_vm0, %v9153_v48  ;;  %v4896_v41 = vld [vmem:[#allocation2 + $0x10a] sm:$0xff]  ;;  %v4897_v48 = vld [vmem:[#allocation2 + $0x112] sm:$0xff] }
 0x2f3   : > { %12290 = vmatprep.mubr.msk.f32.mxu1 %vm171_vm0, %v4495_v49  ;;  %v9540_v49 = vld [vmem:[#allocation2 + $0x124] sm:$0xff] }
 0x2f5   : > { %12909 = vmatmul.mubr.msk.f32.gmra.mrb[16].mxu0 %vm171_vm0, %v9154_v7  ;;  %v9541_v7 = vld [vmem:[#allocation2 + $0x12c] sm:$0xff] }
 0x2f6   : > { %12291 = vmatmul.mubr.msk.f32.gmra.mrb[4].mxu1 %vm171_vm0, %v4496_v47  ;;  %12911 = vmatprep.mubr.msk.f32.mxu0 %vm171_vm0, %v9155_v38  ;;  %v4899_v47 = vld [vmem:[#allocation2 + $0x12a] sm:$0xff]  ;;  %v9542_v38 = vld [vmem:[#allocation2 + $0x13c] sm:$0xff] }
 0x2f7   : > { %12293 = vmatprep.mubr.msk.f32.mxu1 %vm171_vm0, %v4497_v35  ;;  %v4900_v35 = vld [vmem:[#allocation2 + $0x13a] sm:$0xff] }
 0x2f9   : > { %12912 = vmatmul.mubr.msk.f32.gmra.mrb[18].mxu0 %vm171_vm0, %v9156_v56  ;;  %v9543_v56 = vld [vmem:[#allocation2 + $0x144] sm:$0xff] }
 0x2fa   : > { %12294 = vmatmul.mubr.msk.f32.gmra.mrb[6].mxu1 %vm171_vm0, %v4498_v29  ;;  %12914 = vmatprep.mubr.msk.f32.mxu0 %vm171_vm0, %v9157_v42  ;;  %v4901_v29 = vld [vmem:[#allocation2 + $0x142] sm:$0xff]  ;;  %v9544_v42 = vld [vmem:[#allocation2 + $0x154] sm:$0xff] }
 0x2fb   : > { %12296 = vmatprep.mubr.msk.f32.mxu1 %vm171_vm0, %v4499_v31  ;;  %v4902_v31 = vld [vmem:[#allocation2 + $0x152] sm:$0xff] }
 0x2fd   : > { %12915 = vmatmul.mubr.msk.f32.gmra.mrb[20].mxu0 %vm171_vm0, %v9158_v59  ;;  %v9545_v59 = vld [vmem:[#allocation2 + $0x15c] sm:$0xff] }
 0x2fe   : > { %12297 = vmatmul.mubr.msk.f32.gmra.mrb[8].mxu1 %vm171_vm0, %v4500_v34  ;;  %12917 = vmatprep.mubr.msk.f32.mxu0 %vm171_vm0, %v9159_v62  ;;  %v4903_v34 = vld [vmem:[#allocation2 + $0x15a] sm:$0xff]  ;;  %v9546_v62 = vld [vmem:[#allocation2 + $0x16c] sm:$0xff] }
 0x2ff   : > { %12299 = vmatprep.mubr.msk.f32.mxu1 %vm171_vm0, %v4501_v39  ;;  %v4904_v39 = vld [vmem:[#allocation2 + $0x16a] sm:$0xff] }
 0x301   : > { %12918 = vmatmul.mubr.msk.f32.gmra.mrb[22].mxu0 %vm171_vm0, %v9160_v43  ;;  %v9547_v43 = vld [vmem:[#allocation2 + $0x174] sm:$0xff] }
 0x302   : > { %12300 = vmatmul.mubr.msk.f32.gmra.mrb[10].mxu1 %vm171_vm0, %v4502_v17  ;;  %12920 = vmatprep.mubr.msk.f32.mxu0 %vm171_vm0, %v9161_v55  ;;  %v4905_v17 = vld [vmem:[#allocation2 + $0x172] sm:$0xff]  ;;  %v9548_v55 = vld [vmem:[#allocation2 + $0x184] sm:$0xff] }
 0x303   : > { %12302 = vmatprep.mubr.msk.f32.mxu1 %vm171_vm0, %v4503_v63  ;;  %v9549_v63 = vld [vmem:[#allocation2 + $0x18c] sm:$0xff] }
 0x305   : > { %12921 = vmatmul.mubr.msk.f32.gmra.mrb[24].mxu0 %vm171_vm0, %v9162_v4  ;;  %v9550_v4 = vld [vmem:[#allocation2 + $0x19c] sm:$0xff] }
 0x306   : > { %12303 = vmatmul.mubr.msk.f32.gmra.mrb[12].mxu1 %vm171_vm0, %v4504_v11  ;;  %12923 = vmatprep.mubr.msk.f32.mxu0 %vm171_vm0, %v9163_v58  ;;  %v9551_v11 = vld [vmem:[#allocation2 + $0x1a4] sm:$0xff]  ;;  %v9552_v58 = vld [vmem:[#allocation2 + $0x1b4] sm:$0xff] }
 0x307   : > { %12305 = vmatprep.mubr.msk.f32.mxu1 %vm171_vm0, %v4505_v2  ;;  %v9554_v2 = vld [vmem:[#allocation2 + $0x1cc] sm:$0xff] }
 0x309   : > { %12924 = vmatmul.mubr.msk.f32.gmra.mrb[26].mxu0 %vm171_vm0, %v9164_v22 }
 0x30a   : > { %12306 = vmatmul.mubr.msk.f32.gmra.mrb[14].mxu1 %vm171_vm0, %v4506_v46  ;;  %12926 = vmatprep.mubr.msk.f32.mxu0 %vm171_vm0, %v9165_v13 }
 0x30b   : > { %12308 = vmatprep.mubr.msk.f32.mxu1 %vm171_vm0, %v4507_v12 }
 0x30d   : > { %12927 = vmatmul.mubr.msk.f32.gmra.mrb[28].mxu0 %vm171_vm0, %v9166_v37 }
 0x30e   : > { %12309 = vmatmul.mubr.msk.f32.gmra.mrb[16].mxu1 %vm171_vm0, %v4508_v19  ;;  %12929 = vmatprep.mubr.msk.f32.mxu0 %vm171_vm0, %v9167_v21 }
 0x30f   : > { %12311 = vmatprep.mubr.msk.f32.mxu1 %vm171_vm0, %v4509_v44 }
 0x311   : > { %12930 = vmatmul.mubr.msk.f32.gmra.mrb[30].mxu0 %vm171_vm0, %v9168_v0 }
 0x312   : > { %12312 = vmatmul.mubr.msk.f32.gmra.mrb[18].mxu1 %vm171_vm0, %v4510_v24  ;;  %12934 = vmatprep.mubr.msk.f32.mxu0 %vm171_vm0, %v9524_v30 }
 0x313   : > { %12314 = vmatprep.mubr.msk.f32.mxu1 %vm171_vm0, %v4511_v28 }
 0x315   : > { %12935 = vmatmul.mubr.msk.f32.vlgmr.msra.gmra.mrb[0].mxu0 %vm171_vm0, %v9525_v26 }
 0x316   : > { %12315 = vmatmul.mubr.msk.f32.gmra.mrb[20].mxu1 %vm171_vm0, %v4512_v9  ;;  %12937 = vmatprep.mubr.msk.f32.mxu0 %vm171_vm0, %v9526_v53 }
 0x317   : > { %12317 = vmatprep.mubr.msk.f32.mxu1 %vm171_vm0, %v4513_v60  ;;  %v16066_v60 = vld [vmem:[%s16180_s2] ss:$0 sm:$0xff] }
 0x319   : > { %12938 = vmatmul.mubr.msk.f32.gmra.mrb[2].mxu0 %vm171_vm0, %v9527_v8 }
 0x31a   : > { %12318 = vmatmul.mubr.msk.f32.gmra.mrb[22].mxu1 %vm171_vm0, %v4514_v50  ;;  %12940 = vmatprep.mubr.msk.f32.mxu0 %vm171_vm0, %v9528_v14 }
 0x31b   : > { %12320 = vmatprep.mubr.msk.f32.mxu1 %vm171_vm0, %v4515_v57 }
 0x31d   : > { %12941 = vmatmul.mubr.msk.f32.gmra.mrb[4].mxu0 %vm171_vm0, %v9529_v6 }
 0x31e   : > { %12321 = vmatmul.mubr.msk.f32.gmra.mrb[24].mxu1 %vm171_vm0, %v4516_v45  ;;  %12943 = vmatprep.mubr.msk.f32.mxu0 %vm171_vm0, %v9530_v23 }
 0x31f   : > { %12323 = vmatprep.mubr.msk.f32.mxu1 %vm171_vm0, %v4517_v54 }
 0x321   : > { %12944 = vmatmul.mubr.msk.f32.gmra.mrb[6].mxu0 %vm171_vm0, %v9531_v25 }
 0x322   : > { %12324 = vmatmul.mubr.msk.f32.gmra.mrb[26].mxu1 %vm171_vm0, %v4518_v51  ;;  %12946 = vmatprep.mubr.msk.f32.mxu0 %vm171_vm0, %v9532_v36 }
 0x323   : > { %12326 = vmatprep.mubr.msk.f32.mxu1 %vm171_vm0, %v15763_v40  ;;  %v9537_v40 = vld [vmem:[#allocation2 + $0xfc] sm:$0xff] }
 0x325   : > { %12947 = vmatmul.mubr.msk.f32.gmra.mrb[8].mxu0 %vm171_vm0, %v9533_v18 }
 0x326   : > { %12327 = vmatmul.mubr.msk.f32.gmra.mrb[28].mxu1 %vm171_vm0, %v15771_v27  ;;  %12949 = vmatprep.mubr.msk.f32.mxu0 %vm171_vm0, %v9534_v15  ;;  %v9538_v27 = vld [vmem:[#allocation2 + $0x10c] sm:$0xff] }
 0x327   : > { %12329 = vmatprep.mubr.msk.f32.mxu1 %vm171_vm0, %v15775_v16  ;;  %v9539_v16 = vld [vmem:[#allocation2 + $0x114] sm:$0xff] }
 0x329   : > { %12950 = vmatmul.mubr.msk.f32.gmra.mrb[10].mxu0 %vm171_vm0, %v9535_v1 }
 0x32a   : > { %12330 = vmatmul.mubr.msk.f32.gmra.mrb[30].mxu1 %vm171_vm0, %v15783_v32  ;;  %12952 = vmatprep.mubr.msk.f32.mxu0 %vm171_vm0, %v9536_v20  ;;  %v4898_v32 = vld [vmem:[#allocation2 + $0x122] sm:$0xff] }
 0x32b   : > { %12358 = vmatprep.mubr.msk.f32.mxu1 %vm171_vm0, %v4894_v52 }
 0x32d   : > { %12953 = vmatmul.mubr.msk.f32.gmra.mrb[12].mxu0 %vm171_vm0, %v9537_v40 }
 0x32e   : > { %12359 = vmatmul.mubr.msk.f32.vlgmr.msra.gmra.mrb[16].mxu1 %vm171_vm0, %v4895_v33  ;;  %12955 = vmatprep.mubr.msk.f32.mxu0 %vm171_vm0, %v9538_v27 }
 0x32f   : > { %12361 = vmatprep.mubr.msk.f32.mxu1 %vm171_vm0, %v4896_v41 }
 0x331   : > { %12956 = vmatmul.mubr.msk.f32.gmra.mrb[14].mxu0 %vm171_vm0, %v9539_v16 }
 0x332   : > { %12362 = vmatmul.mubr.msk.f32.gmra.mrb[18].mxu1 %vm171_vm0, %v4897_v48  ;;  %12958 = vmatprep.mubr.msk.f32.mxu0 %vm171_vm0, %v9540_v49 }
 0x333   : > { %12364 = vmatprep.mubr.msk.f32.mxu1 %vm171_vm0, %v4898_v32 }
 0x335   : > { %12959 = vmatmul.mubr.msk.f32.gmra.mrb[16].mxu0 %vm171_vm0, %v9541_v7 }
 0x336   : > { %12365 = vmatmul.mubr.msk.f32.gmra.mrb[20].mxu1 %vm171_vm0, %v4899_v47  ;;  %12961 = vmatprep.mubr.msk.f32.mxu0 %vm171_vm0, %v9542_v38 }
 0x337   : > { %12367 = vmatprep.mubr.msk.f32.mxu1 %vm171_vm0, %v4900_v35 }
 0x339   : > { %12962 = vmatmul.mubr.msk.f32.gmra.mrb[18].mxu0 %vm171_vm0, %v9543_v56 }
 0x33a   : > { %12368 = vmatmul.mubr.msk.f32.gmra.mrb[22].mxu1 %vm171_vm0, %v4901_v29  ;;  %12964 = vmatprep.mubr.msk.f32.mxu0 %vm171_vm0, %v9544_v42 }
 0x33b   : > { %12370 = vmatprep.mubr.msk.f32.mxu1 %vm171_vm0, %v4902_v31 }
 0x33d   : > { %12965 = vmatmul.mubr.msk.f32.gmra.mrb[20].mxu0 %vm171_vm0, %v9545_v59 }
 0x33e   : > { %12371 = vmatmul.mubr.msk.f32.gmra.mrb[24].mxu1 %vm171_vm0, %v4903_v34  ;;  %12967 = vmatprep.mubr.msk.f32.mxu0 %vm171_vm0, %v9546_v62 }
 0x33f   : > { %12373 = vmatprep.mubr.msk.f32.mxu1 %vm171_vm0, %v4904_v39 }
 0x341   : > { %12968 = vmatmul.mubr.msk.f32.gmra.mrb[22].mxu0 %vm171_vm0, %v9547_v43 }
 0x342   : > { %12374 = vmatmul.mubr.msk.f32.gmra.mrb[26].mxu1 %vm171_vm0, %v4905_v17  ;;  %12970 = vmatprep.mubr.msk.f32.mxu0 %vm171_vm0, %v9548_v55 }
 0x343   : > { %12376 = vmatprep.mubr.msk.f32.mxu1 %vm171_vm0, %v15886_v61  ;;  %v9553_v61 = vld [vmem:[#allocation2 + $0x1bc] sm:$0xff] }
 0x345   : > { %12971 = vmatmul.mubr.msk.f32.gmra.mrb[24].mxu0 %vm171_vm0, %v9549_v63 }
 0x346   : > { %12377 = vmatmul.mubr.msk.f32.gmra.mrb[28].mxu1 %vm171_vm0, %v15893_v10  ;;  %12973 = vmatprep.mubr.msk.f32.mxu0 %vm171_vm0, %v9550_v4  ;;  %v9555_v10 = vld [vmem:[#allocation2 + $0x1d4] sm:$0xff] }
 0x347   : > { %12379 = vmatprep.mubr.msk.f32.mxu1 %vm171_vm0, %v15896_v3 }
 0x349   : > { %12974 = vmatmul.mubr.msk.f32.gmra.mrb[26].mxu0 %vm171_vm0, %v9551_v11 }
 0x34a   : > { %12380 = vmatmul.mubr.msk.f32.gmra.mrb[30].mxu1 %vm171_vm0, %v15903_v5  ;;  %12976 = vmatprep.mubr.msk.f32.mxu0 %vm171_vm0, %v9552_v58 }
 0x34d   : > { %12977 = vmatmul.mubr.msk.f32.gmra.mrb[28].mxu0 %vm171_vm0, %v9553_v61 }
 0x34e   : > { %12979 = vmatprep.mubr.msk.f32.mxu0 %vm171_vm0, %v9554_v2 }
 0x351   : > { %12980 = vmatmul.mubr.msk.f32.gmra.mrb[30].mxu0 %vm171_vm0, %v9555_v10 }
 0x3c1   : > { %v12286_v22 = vpop.f32.mrb[0].mxu1 }
 0x3c2   : > { %v4687_v46 = vpop.f32.mrb[1].mxu1 }
 0x3c5   : > { %v12289_v3 = vpop.f32.mrb[2].mxu1 }
 0x3c6   : > { %v4697_v13 = vpop.f32.mrb[3].mxu1 }
 0x3c9   : > { %v12292_v12 = vpop.f32.mrb[4].mxu1 }
 0x3ca   : > { %v4707_v37 = vpop.f32.mrb[5].mxu1 }
 0x3cd   : > { %v12295_v19 = vpop.f32.mrb[6].mxu1 }
 0x3ce   : > { %v4717_v5 = vpop.f32.mrb[7].mxu1 }
 0x3d1   : > { %v12298_v21 = vpop.f32.mrb[8].mxu1 }
 0x3d2   : > { %v4727_v44 = vpop.f32.mrb[9].mxu1 }
 0x3d5   : > { %v12301_v0 = vpop.f32.mrb[10].mxu1 }
 0x3d6   : > { %v4737_v24 = vpop.f32.mrb[11].mxu1 }
 0x3d9   : > { %v16055_v30 = vpop.f32.mrb[12].mxu1 }
 0x3da   : > { %v16057_v28 = vpop.f32.mrb[13].mxu1 }
 0x3dd   : > { %v16059_v26 = vpop.f32.mrb[14].mxu1 }
 0x3de   : > { %v16061_v9 = vpop.f32.mrb[15].mxu1 }
 0x3e8   : > { %v12936_v53 = vpop.f32.mrb[0].mxu0 }
 0x3e9   : > { %v12984_v8 = vadd.f32 %v12936_v53, %v12286_v22  ;;  %v9720_v50 = vpop.f32.mrb[1].mxu0 }
 0x3ea   : > { %v12985_v14 = vadd.f32 %v9720_v50, %v4687_v46 }
 0x3eb   : > { %v9919_v57 = vadd.f32 %v12984_v8, %v16066_v60 }
 0x3ec   : > { %v9918_v6 = vadd.f32 %v12985_v14, %v16066_v60  ;;  %v12939_v45 = vpop.f32.mrb[2].mxu0 }
 0x3ed   : > { %v9951_v23 = vmax.f32 %v9919_v57, 0.0  ;;  %v12986_v54 = vadd.f32 %v12939_v45, %v12289_v3  ;;  %v9730_v25 = vpop.f32.mrb[3].mxu0 }
 0x3ee   : > { %v9950_v51 = vmax.f32 %v9918_v6, 0.0  ;;  %v12987_v36 = vadd.f32 %v9730_v25, %v4697_v13 }
 0x3ef   : > { %9983 = vst.msk [vmem:[%s16074_s26 + $0x8] sm:$0xff] %vm171_vm0, %v9951_v23  ;;  %v9921_v18 = vadd.f32 %v12986_v54, %v16066_v60 }
 0x3f0   : > { %9982 = vst.msk [vmem:[%s16074_s26] sm:$0xff] %vm171_vm0, %v9950_v51  ;;  %v9920_v15 = vadd.f32 %v12987_v36, %v16066_v60  ;;  %v12942_v1 = vpop.f32.mrb[4].mxu0 }
 0x3f1   : > { %v9953_v20 = vmax.f32 %v9921_v18, 0.0  ;;  %v12988_v52 = vadd.f32 %v12942_v1, %v12292_v12  ;;  %v9740_v40 = vpop.f32.mrb[5].mxu0 }
 0x3f2   : > { %v9952_v33 = vmax.f32 %v9920_v15, 0.0  ;;  %v12989_v27 = vadd.f32 %v9740_v40, %v4707_v37 }
 0x3f3   : > { %9985 = vst.msk [vmem:[%s16074_s26 + $0x18] sm:$0xff] %vm171_vm0, %v9953_v20  ;;  %v9923_v41 = vadd.f32 %v12988_v52, %v16066_v60 }
 0x3f4   : > { %9984 = vst.msk [vmem:[%s16074_s26 + $0x10] sm:$0xff] %vm171_vm0, %v9952_v33  ;;  %v9922_v16 = vadd.f32 %v12989_v27, %v16066_v60  ;;  %v12945_v48 = vpop.f32.mrb[6].mxu0 }
 0x3f5   : > { %v9955_v49 = vmax.f32 %v9923_v41, 0.0  ;;  %v12990_v32 = vadd.f32 %v12945_v48, %v12295_v19  ;;  %v9750_v7 = vpop.f32.mrb[7].mxu0 }
 0x3f6   : > { %v9954_v47 = vmax.f32 %v9922_v16, 0.0  ;;  %v12991_v38 = vadd.f32 %v9750_v7, %v4717_v5 }
 0x3f7   : > { %9987 = vst.msk [vmem:[%s16074_s26 + $0x28] sm:$0xff] %vm171_vm0, %v9955_v49  ;;  %v9925_v35 = vadd.f32 %v12990_v32, %v16066_v60 }
 0x3f8   : > { %9986 = vst.msk [vmem:[%s16074_s26 + $0x20] sm:$0xff] %vm171_vm0, %v9954_v47  ;;  %v9924_v56 = vadd.f32 %v12991_v38, %v16066_v60  ;;  %v12948_v29 = vpop.f32.mrb[8].mxu0 }
 0x3f9   : > { %v9957_v42 = vmax.f32 %v9925_v35, 0.0  ;;  %v12992_v31 = vadd.f32 %v12948_v29, %v12298_v21  ;;  %v9760_v59 = vpop.f32.mrb[9].mxu0 }
 0x3fa   : > { %v9956_v34 = vmax.f32 %v9924_v56, 0.0  ;;  %v12993_v62 = vadd.f32 %v9760_v59, %v4727_v44 }
 0x3fb   : > { %9989 = vst.msk [vmem:[%s16074_s26 + $0x38] sm:$0xff] %vm171_vm0, %v9957_v42  ;;  %v9927_v39 = vadd.f32 %v12992_v31, %v16066_v60 }
 0x3fc   : > { %9988 = vst.msk [vmem:[%s16074_s26 + $0x30] sm:$0xff] %vm171_vm0, %v9956_v34  ;;  %v9926_v43 = vadd.f32 %v12993_v62, %v16066_v60  ;;  %v12951_v17 = vpop.f32.mrb[10].mxu0 }
 0x3fd   : > { %v9959_v55 = vmax.f32 %v9927_v39, 0.0  ;;  %v12994_v63 = vadd.f32 %v12951_v17, %v12301_v0  ;;  %v9770_v4 = vpop.f32.mrb[11].mxu0 }
 0x3fe   : > { %v9958_v11 = vmax.f32 %v9926_v43, 0.0  ;;  %v12995_v58 = vadd.f32 %v9770_v4, %v4737_v24 }
 0x3ff   : > { %9991 = vst.msk [vmem:[%s16074_s26 + $0x48] sm:$0xff] %vm171_vm0, %v9959_v55  ;;  %v9929_v61 = vadd.f32 %v12994_v63, %v16066_v60 }
 0x400   : > { %9990 = vst.msk [vmem:[%s16074_s26 + $0x40] sm:$0xff] %vm171_vm0, %v9958_v11  ;;  %v9928_v2 = vadd.f32 %v12995_v58, %v16066_v60  ;;  %v12954_v10 = vpop.f32.mrb[12].mxu0 }
 0x401   : > { %v9961_v22 = vmax.f32 %v9929_v61, 0.0  ;;  %v12996_v46 = vadd.f32 %v12954_v10, %v16055_v30  ;;  %v9780_v3 = vpop.f32.mrb[13].mxu0  ;;  %v12360_v13 = vpop.f32.mrb[16].mxu1 }
 0x402   : > { %v9960_v12 = vmax.f32 %v9928_v2, 0.0  ;;  %v12997_v37 = vadd.f32 %v9780_v3, %v16057_v28  ;;  %v5154_v19 = vpop.f32.mrb[17].mxu1 }
 0x403   : > { %9993 = vst.msk [vmem:[%s16074_s26 + $0x58] sm:$0xff] %vm171_vm0, %v9961_v22  ;;  %v9931_v5 = vadd.f32 %v12996_v46, %v16066_v60 }
 0x404   : > { %9992 = vst.msk [vmem:[%s16074_s26 + $0x50] sm:$0xff] %vm171_vm0, %v9960_v12  ;;  %v9930_v21 = vadd.f32 %v12997_v37, %v16066_v60  ;;  %v12957_v44 = vpop.f32.mrb[14].mxu0 }
 0x405   : > { %v9963_v0 = vmax.f32 %v9931_v5, 0.0  ;;  %v12998_v24 = vadd.f32 %v12957_v44, %v16059_v26  ;;  %v9790_v30 = vpop.f32.mrb[15].mxu0  ;;  %v12363_v53 = vpop.f32.mrb[18].mxu1 }
 0x406   : > { %v9962_v8 = vmax.f32 %v9930_v21, 0.0  ;;  %v12999_v28 = vadd.f32 %v9790_v30, %v16061_v9  ;;  %v5164_v50 = vpop.f32.mrb[19].mxu1 }
 0x407   : > { %9995 = vst.msk [vmem:[%s16074_s26 + $0x68] sm:$0xff] %vm171_vm0, %v9963_v0  ;;  %v9933_v14 = vadd.f32 %v12998_v24, %v16066_v60 }
 0x408   : > { %9994 = vst.msk [vmem:[%s16074_s26 + $0x60] sm:$0xff] %vm171_vm0, %v9962_v8  ;;  %v9932_v57 = vadd.f32 %v12999_v28, %v16066_v60  ;;  %v12960_v6 = vpop.f32.mrb[16].mxu0 }
 0x409   : > { %v9965_v45 = vmax.f32 %v9933_v14, 0.0  ;;  %v13000_v23 = vadd.f32 %v12960_v6, %v12360_v13  ;;  %v9800_v26 = vpop.f32.mrb[17].mxu0  ;;  %v12366_v54 = vpop.f32.mrb[20].mxu1 }
 0x40a   : > { %v9964_v25 = vmax.f32 %v9932_v57, 0.0  ;;  %v13001_v51 = vadd.f32 %v9800_v26, %v5154_v19  ;;  %v5174_v9 = vpop.f32.mrb[21].mxu1 }
 0x40b   : > { %9997 = vst.msk [vmem:[%s16074_s26 + $0x78] sm:$0xff] %vm171_vm0, %v9965_v45  ;;  %v9935_v36 = vadd.f32 %v13000_v23, %v16066_v60 }
 0x40c   : > { %9996 = vst.msk [vmem:[%s16074_s26 + $0x70] sm:$0xff] %vm171_vm0, %v9964_v25  ;;  %v9934_v18 = vadd.f32 %v13001_v51, %v16066_v60  ;;  %v12963_v15 = vpop.f32.mrb[18].mxu0 }
 0x40d   : > { %v9967_v1 = vmax.f32 %v9935_v36, 0.0  ;;  %v13002_v20 = vadd.f32 %v12963_v15, %v12363_v53  ;;  %v9810_v52 = vpop.f32.mrb[19].mxu0  ;;  %v12369_v40 = vpop.f32.mrb[22].mxu1 }
 0x40e   : > { %v9966_v33 = vmax.f32 %v9934_v18, 0.0  ;;  %v13003_v27 = vadd.f32 %v9810_v52, %v5164_v50  ;;  %v5184_v41 = vpop.f32.mrb[23].mxu1 }
 0x40f   : > { %9999 = vst.msk [vmem:[%s16074_s26 + $0x88] sm:$0xff] %vm171_vm0, %v9967_v1  ;;  %v9937_v16 = vadd.f32 %v13002_v20, %v16066_v60 }
 0x410   : > { %9998 = vst.msk [vmem:[%s16074_s26 + $0x80] sm:$0xff] %vm171_vm0, %v9966_v33  ;;  %v9936_v48 = vadd.f32 %v13003_v27, %v16066_v60  ;;  %v12966_v49 = vpop.f32.mrb[20].mxu0 }
 0x411   : > { %v9969_v32 = vmax.f32 %v9937_v16, 0.0  ;;  %v13004_v7 = vadd.f32 %v12966_v49, %v12366_v54  ;;  %v9820_v47 = vpop.f32.mrb[21].mxu0  ;;  %v12372_v38 = vpop.f32.mrb[24].mxu1 }
 0x412   : > { %v9968_v35 = vmax.f32 %v9936_v48, 0.0  ;;  %v13005_v56 = vadd.f32 %v9820_v47, %v5174_v9  ;;  %v5194_v29 = vpop.f32.mrb[25].mxu1 }
 0x413   : > { %10001 = vst.msk [vmem:[%s16074_s26 + $0x98] sm:$0xff] %vm171_vm0, %v9969_v32  ;;  %v9939_v42 = vadd.f32 %v13004_v7, %v16066_v60 }
 0x414   : > { %10000 = vst.msk [vmem:[%s16074_s26 + $0x90] sm:$0xff] %vm171_vm0, %v9968_v35  ;;  %v9938_v31 = vadd.f32 %v13005_v56, %v16066_v60  ;;  %v12969_v59 = vpop.f32.mrb[22].mxu0 }
 0x415   : > { %v9971_v34 = vmax.f32 %v9939_v42, 0.0  ;;  %v13006_v62 = vadd.f32 %v12969_v59, %v12369_v40  ;;  %v9830_v39 = vpop.f32.mrb[23].mxu0  ;;  %v12375_v43 = vpop.f32.mrb[26].mxu1 }
 0x416   : > { %v9970_v17 = vmax.f32 %v9938_v31, 0.0  ;;  %v13007_v55 = vadd.f32 %v9830_v39, %v5184_v41  ;;  %v5204_v63 = vpop.f32.mrb[27].mxu1 }
 0x417   : > { %10003 = vst.msk [vmem:[%s16074_s26 + $0xa8] sm:$0xff] %vm171_vm0, %v9971_v34  ;;  %v9941_v4 = vadd.f32 %v13006_v62, %v16066_v60 }
 0x418   : > { %10002 = vst.msk [vmem:[%s16074_s26 + $0xa0] sm:$0xff] %vm171_vm0, %v9970_v17  ;;  %v9940_v11 = vadd.f32 %v13007_v55, %v16066_v60  ;;  %v12972_v58 = vpop.f32.mrb[24].mxu0 }
 0x419   : > { %v9973_v61 = vmax.f32 %v9941_v4, 0.0  ;;  %v13008_v2 = vadd.f32 %v12972_v58, %v12372_v38  ;;  %v9840_v10 = vpop.f32.mrb[25].mxu0  ;;  %v12378_v22 = vpop.f32.mrb[28].mxu1 }
 0x41a   : > { %v9972_v46 = vmax.f32 %v9940_v11, 0.0  ;;  %v13009_v3 = vadd.f32 %v9840_v10, %v5194_v29  ;;  %v5214_v13 = vpop.f32.mrb[29].mxu1 }
 0x41b   : > { %10005 = vst.msk [vmem:[%s16074_s26 + $0xb8] sm:$0xff] %vm171_vm0, %v9973_v61  ;;  %v9943_v12 = vadd.f32 %v13008_v2, %v16066_v60 }
 0x41c   : > { %10004 = vst.msk [vmem:[%s16074_s26 + $0xb0] sm:$0xff] %vm171_vm0, %v9972_v46  ;;  %v9942_v37 = vadd.f32 %v13009_v3, %v16066_v60  ;;  %v12975_v19 = vpop.f32.mrb[26].mxu0 }
 0x41d   : > { %v9975_v5 = vmax.f32 %v9943_v12, 0.0  ;;  %v13010_v21 = vadd.f32 %v12975_v19, %v12375_v43  ;;  %v9850_v44 = vpop.f32.mrb[27].mxu0  ;;  %v12381_v0 = vpop.f32.mrb[30].mxu1 }
 0x41e   : > { %v9974_v24 = vmax.f32 %v9942_v37, 0.0  ;;  %v13011_v30 = vadd.f32 %v9850_v44, %v5204_v63  ;;  %v5224_v53 = vpop.f32.mrb[31].mxu1 }
 0x41f   : > { %10007 = vst.msk [vmem:[%s16074_s26 + $0xc8] sm:$0xff] %vm171_vm0, %v9975_v5  ;;  %v9945_v8 = vadd.f32 %v13010_v21, %v16066_v60 }
 0x420   : > { %10006 = vst.msk [vmem:[%s16074_s26 + $0xc0] sm:$0xff] %vm171_vm0, %v9974_v24  ;;  %v9944_v28 = vadd.f32 %v13011_v30, %v16066_v60  ;;  %v12978_v50 = vpop.f32.mrb[28].mxu0 }
 0x421   : > { %v9977_v14 = vmax.f32 %v9945_v8, 0.0  ;;  %v13012_v57 = vadd.f32 %v12978_v50, %v12378_v22  ;;  %v9860_v6 = vpop.f32.mrb[29].mxu0 }
 0x422   : > { %v9976_v45 = vmax.f32 %v9944_v28, 0.0  ;;  %v13013_v23 = vadd.f32 %v9860_v6, %v5214_v13 }
 0x423   : > { %10009 = vst.msk [vmem:[%s16074_s26 + $0xd8] sm:$0xff] %vm171_vm0, %v9977_v14  ;;  %v9947_v26 = vadd.f32 %v13012_v57, %v16066_v60 }
 0x424   : > { %10008 = vst.msk [vmem:[%s16074_s26 + $0xd0] sm:$0xff] %vm171_vm0, %v9976_v45  ;;  %v9946_v54 = vadd.f32 %v13013_v23, %v16066_v60  ;;  %v12981_v25 = vpop.f32.mrb[30].mxu0 }
 0x425   : > { %v9979_v51 = vmax.f32 %v9947_v26, 0.0  ;;  %v13014_v9 = vadd.f32 %v12981_v25, %v12381_v0  ;;  %v9870_v36 = vpop.f32.mrb[31].mxu0 }
 0x426   : > { %v9978_v18 = vmax.f32 %v9946_v54, 0.0  ;;  %v13015_v15 = vadd.f32 %v9870_v36, %v5224_v53 }
 0x427   : > { %10011 = vst.msk [vmem:[%s16074_s26 + $0xe8] sm:$0xff] %vm171_vm0, %v9979_v51  ;;  %v9949_v1 = vadd.f32 %v13014_v9, %v16066_v60 }
 0x428   : > { %10010 = vst.msk [vmem:[%s16074_s26 + $0xe0] sm:$0xff] %vm171_vm0, %v9978_v18  ;;  %v9948_v20 = vadd.f32 %v13015_v15, %v16066_v60 }
 0x429   : > { %v9981_v52 = vmax.f32 %v9949_v1, 0.0 }
 0x42a   : > { %v9980_v40 = vmax.f32 %v9948_v20, 0.0 }
 0x42b   : > { %10013 = vst.msk [vmem:[%s16074_s26 + $0xf8] sm:$0xff] %vm171_vm0, %v9981_v52 }
 0x42c   : > { %10012 = vst.msk [vmem:[%s16074_s26 + $0xf0] sm:$0xff] %vm171_vm0, %v9980_v40 }
 0x42d PF: > { %s13_s12 = sadd.s32 1, %s13768_s12  }
 0x42e   : > { %p10_p4 = scmp.ge.s32.totalorder %s13_s12, 4  }
 0x430   :  { %12 = sbr.rel (!%p10_p4) target bundleno = 1 (0x1), region = 90 }

</bundles_post_ra>
